<compile_context>
chip_gen: v5e
topology: v5e:2x2
jax: 0.10.0
libtpu: 0.0.40
codegen_flags: <defaults>
</compile_context>

<pallas_src>
import functools

import jax
import jax.numpy as jnp
from jax import lax
from jax.experimental import pallas as pl
from jax.experimental.pallas import tpu as pltpu


# --------------------------------------------------------------------------
# Kernel
# --------------------------------------------------------------------------
def _ir_kernel(x_ref, ah_ref, ah3_ref, rc_ref, rp_ref,
               w1_ref, b1_ref, w2_ref, b2_ref, out_ref, *, W):
    H = x_ref.shape[1]
    BW = x_ref.shape[2]              # Bt * W (batch stacked along lanes)
    C_MID = b1_ref.shape[0]          # 8
    OWB = rc_ref.shape[1]            # Bt * out_w

    x1 = x_ref[0].astype(jnp.float32)    # pass-through channel   (H, BW)
    x2 = x_ref[1].astype(jnp.float32)    # denoise channel
    x3 = x_ref[2].astype(jnp.float32)    # lowpass channel (pool folded into matrices)

    # ----- boundary masks, built once (iota on VPU; no extra VMEM input) -----
    ri = lax.broadcasted_iota(jnp.int32, (H, BW), 0)       # row index
    cj = lax.broadcasted_iota(jnp.int32, (H, BW), 1)       # global lane index
    if (W & (W - 1)) == 0:
        lj = cj & (W - 1)                                  # per-element column index
    else:
        lj = cj % W
    row_ok = {1: ri < (H - 1), -1: ri >= 1}
    col_ok = {1: lj < (W - 1), -1: lj >= 1}

    def shift_rows(v, dy):
        # out[i, j] = v[i+dy, j] with zero padding.
        if dy == 0:
            return v
        return jnp.where(row_ok[dy], pltpu.roll(v, shift=(-dy) % H, axis=0), 0.0)

    def shift_cols(v, dx):
        # out[i, j] = v[i, j+dx] with zero padding per batch element.
        if dx == 0:
            return v
        return jnp.where(col_ok[dx], pltpu.roll(v, shift=(-dx) % BW, axis=1), 0.0)

    # ----- conv1 (+ folded inference BatchNorm) + ReLU, tap-major -----
    acc = [None] * C_MID
    for iy, dy in enumerate((-1, 0, 1)):
        base = shift_rows(x2, dy)                  # one row roll per dy
        for ix, dx in enumerate((-1, 0, 1)):
            tap = shift_cols(base, dx)
            t = iy * 3 + ix
            for c in range(C_MID):
                contrib = w1_ref[c * 9 + t] * tap
                acc[c] = contrib if acc[c] is None else acc[c] + contrib
    fcs = [jnp.maximum(acc[c] + b1_ref[c], 0.0) for c in range(C_MID)]

    # ----- conv2, reordered by linearity: channel-mix per tap, column shifts
    #       per dy, then a single row shift per dy -----
    c2 = None
    for iy, dy in enumerate((-1, 0, 1)):
        h_dy = None
        for ix, dx in enumerate((-1, 0, 1)):
            t = iy * 3 + ix
            g = w2_ref[t] * fcs[0]
            for c in range(1, C_MID):
                g = g + w2_ref[c * 9 + t] * fcs[c]
            g = shift_cols(g, dx)
            h_dy = g if h_dy is None else h_dy + g
        h_dy = shift_rows(h_dy, dy)
        c2 = h_dy if c2 is None else c2 + h_dy
    c2 = c2 + b2_ref[0]

    # ----- bilinear resize (+ folded 15x15 avg-pool for channel 2) on the MXU -----
    ah = ah_ref[...]      # (out_h, H)
    ah3 = ah3_ref[...]    # (out_h, H)  -- includes row pool
    # Fuse the two left matmuls that share `ah` (lane-aligned concat).
    x12 = jnp.concatenate([x1, c2], axis=1)                             # (H, 2*BW)
    t12 = jnp.dot(ah, x12, preferred_element_type=jnp.float32)          # (out_h, 2*BW)
    t3 = jnp.dot(ah3, x3, preferred_element_type=jnp.float32)           # (out_h, BW)
    t1 = t12[:, :BW]
    t2 = t12[:, BW:]

    rc = rc_ref[...]      # (BW, Bt*out_w)  block-diag of awt
    rp = rp_ref[...]      # (BW, Bt*out_w)  block-diag of awt3 (includes col pool)
    out_ref[0, :, 0:OWB] = jnp.dot(
        t1, rc, preferred_element_type=jnp.float32).astype(out_ref.dtype)
    out_ref[0, :, OWB:2 * OWB] = jnp.dot(
        t2, rc, preferred_element_type=jnp.float32).astype(out_ref.dtype)
    out_ref[0, :, 2 * OWB:3 * OWB] = jnp.dot(
        t3, rp, preferred_element_type=jnp.float32).astype(out_ref.dtype)


# --------------------------------------------------------------------------
# Host-side matrix construction
# --------------------------------------------------------------------------
def bilinear_matrix(out_size, in_size):
    # torch.nn.functional.interpolate(mode='bilinear', align_corners=False)
    o = jnp.arange(out_size, dtype=jnp.float32)
    src = (o + 0.5) * (in_size / out_size) - 0.5
    src = jnp.maximum(src, 0.0)
    i0 = jnp.minimum(jnp.floor(src).astype(jnp.int32), in_size - 1)
    i1 = jnp.minimum(i0 + 1, in_size - 1)
    w1 = src - i0.astype(jnp.float32)
    w0 = 1.0 - w1
    A = jnp.zeros((out_size, in_size), dtype=jnp.float32)
    rows = jnp.arange(out_size)
    A = A.at[rows, i0].add(w0)
    A = A.at[rows, i1].add(w1)
    return A


def band_matrix(n, half):
    i = jnp.arange(n)
    return (jnp.abs(i[:, None] - i[None, :]) <= half).astype(jnp.float32)


def _tpu_caps():
    """Best-effort query of per-core VMEM and TensorCores-per-chip."""
    vmem_bytes = 64 * 1024 * 1024   # conservative default (v7x per-TC physical)
    num_tc = 1
    try:
        info = pltpu.get_tpu_info()
        vmem_bytes = int(getattr(info, "vmem_capacity_bytes", vmem_bytes))
        for name in ("num_tensorcores", "tensorcores_per_chip", "num_cores"):
            v = getattr(info, name, None)
            if isinstance(v, int) and 0 < v <= 8:
                num_tc = v
                break
    except Exception:
        pass
    return vmem_bytes, num_tc


def _pick_block_batch(B, W, out_w, H, out_h, vmem_budget, num_tc):
    """Largest batch block Bt with lane-aligned loads AND stores that fits VMEM.

    On multi-TC chips prefer a core-balanced grid count; on single-TC chips
    prefer the largest Bt (fewest grid steps)."""
    def aligned(d):
        return (d * W) % 128 == 0 and (d * out_w) % 128 == 0

    def fits(d):
        bw, owb = d * W, d * out_w
        need = (2 * 2 * bw * owb          # rc + rp (kron), double-buffered
                + 2 * 3 * H * bw          # input tile, double-buffered
                + 2 * out_h * 3 * owb     # output tile, double-buffered
                + 4 * out_h * H) * 4      # ah, ah3
        return need <= vmem_budget

    divisors = [d for d in range(1, B + 1) if B % d == 0]
    cands = [d for d in divisors if aligned(d)]
    if not cands:
        # Fallback: input-side alignment only (still correct; output stores
        # become masked partial stores).
        cands = [d for d in divisors if (d * W) % 128 == 0] or [B]
    fitting = [d for d in cands if fits(d)] or [min(cands)]
    if num_tc >= 2:
        balanced = [d for d in fitting if (B // d) % num_tc == 0]
        if balanced:
            return max(balanced)
    return max(fitting)


def ir_channel_preprocess(x, conv1_w, conv1_b, gamma, beta, running_mean,
                          running_var, eps, conv2_w, conv2_b, out_h, out_w):
    B, C, H, W = x.shape
    assert C == 3

    vmem_bytes, num_tc = _tpu_caps()
    budget = min(vmem_bytes // 4, 20 * 1024 * 1024)
    Bt = _pick_block_batch(B, W, out_w, H, out_h, budget, num_tc)
    G = B // Bt
    BW = Bt * W
    OWB = Bt * out_w

    # Fold inference-mode BatchNorm into conv1.
    bn_scale = gamma / jnp.sqrt(running_var + eps)
    bn_bias = beta - running_mean * bn_scale
    n_mid = conv1_w.shape[0]
    w1f = (conv1_w.reshape(n_mid, 9) * bn_scale[:, None]).reshape(-1).astype(jnp.float32)
    b1f = (conv1_b * bn_scale + bn_bias).astype(jnp.float32)
    w2f = conv2_w.reshape(-1).astype(jnp.float32)
    b2f = conv2_b.reshape(-1).astype(jnp.float32)

    # Resize matrices; 15x15 avg-pool (pad counted) folded into channel 2's pair.
    ah = bilinear_matrix(out_h, H)                    # (out_h, H)
    awt = bilinear_matrix(out_w, W).T                 # (W, out_w)
    ah3 = (ah @ band_matrix(H, 7)) / 15.0             # (out_h, H)
    awt3 = (band_matrix(W, 7) @ awt) / 15.0           # (W, out_w)
    eye = jnp.eye(Bt, dtype=jnp.float32)
    rc = jnp.kron(eye, awt)                           # (Bt*W, Bt*out_w)
    rp = jnp.kron(eye, awt3)

    # NCHW -> (3, H, B*W): batch stacked along the lane axis.
    x_r = jnp.transpose(x, (1, 2, 0, 3)).reshape(3, H, B * W)

    # Advisory cost estimate for XLA scheduling around the custom call.
    flops = G * (2 * 2 * 9 * n_mid * H * BW            # conv1 + conv2 (mul+add)
                 + 2 * out_h * H * 3 * BW               # left (row) matmuls
                 + 3 * 2 * out_h * BW * OWB)            # right (col) matmuls
    bytes_accessed = 4 * (3 * H * B * W + 3 * out_h * B * out_w
                          + 2 * out_h * H + 2 * BW * OWB)
    cost = pl.CostEstimate(flops=int(flops), transcendentals=0,
                           bytes_accessed=int(bytes_accessed))

    smem_spec = pl.BlockSpec(memory_space=pltpu.MemorySpace.SMEM)
    slab = pl.pallas_call(
        functools.partial(_ir_kernel, W=W),
        out_shape=jax.ShapeDtypeStruct((G, out_h, 3 * OWB), jnp.float32),
        grid=(G,),
        in_specs=[
            pl.BlockSpec((3, H, BW), lambda g: (0, 0, g)),
            pl.BlockSpec((out_h, H), lambda g: (0, 0)),
            pl.BlockSpec((out_h, H), lambda g: (0, 0)),
            pl.BlockSpec((BW, OWB), lambda g: (0, 0)),
            pl.BlockSpec((BW, OWB), lambda g: (0, 0)),
            smem_spec,  # folded conv1 weights (72,)
            smem_spec,  # folded conv1 bias    (8,)
            smem_spec,  # conv2 weights        (72,)
            smem_spec,  # conv2 bias           (1,)
        ],
        out_specs=pl.BlockSpec((1, out_h, 3 * OWB), lambda g: (g, 0, 0)),
        compiler_params=pltpu.CompilerParams(
            dimension_semantics=("parallel",),
            vmem_limit_bytes=32 * 1024 * 1024),
        cost_estimate=cost,
    )(x_r, ah, ah3, rc, rp, w1f, b1f, w2f, b2f)

    # slab[g, h, ch*Bt*out_w + b*out_w + w] -> (B, 3, out_h, out_w)
    out = slab.reshape(G, out_h, 3, Bt, out_w)
    out = jnp.transpose(out, (0, 3, 2, 1, 4)).reshape(B, 3, out_h, out_w)
    return out


# --------------------------------------------------------------------------
# Pure-JAX reference (no Pallas, no pool/resize folding) for a sanity check
# --------------------------------------------------------------------------
def _bilinear_resize_ref(img, out_h, out_w):
    B, C, H, W = img.shape

    def idx(out_size, in_size):
        o = jnp.arange(out_size, dtype=jnp.float32)
        src = (o + 0.5) * (in_size / out_size) - 0.5
        src = jnp.maximum(src, 0.0)
        i0 = jnp.minimum(jnp.floor(src).astype(jnp.int32), in_size - 1)
        i1 = jnp.minimum(i0 + 1, in_size - 1)
        w1 = src - i0.astype(jnp.float32)
        return i0, i1, w1

    h0, h1, wh = idx(out_h, H)
    w0, w1i, ww = idx(out_w, W)
    top = img[:, :, h0, :]
    bot = img[:, :, h1, :]
    rows = top * (1.0 - wh)[None, None, :, None] + bot * wh[None, None, :, None]
    left = rows[:, :, :, w0]
    right = rows[:, :, :, w1i]
    return left * (1.0 - ww)[None, None, None, :] + right * ww[None, None, None, :]


def _reference(x, conv1_w, conv1_b, gamma, beta, rmean, rvar, eps,
               conv2_w, conv2_b, out_h, out_w):
    dn = ('NCHW', 'OIHW', 'NCHW')
    hp = lax.Precision.HIGHEST
    y = lax.conv_general_dilated(x[:, 1:2], conv1_w, (1, 1), 'SAME',
                                 dimension_numbers=dn, precision=hp)
    y = y + conv1_b.reshape(1, -1, 1, 1)
    y = (y - rmean.reshape(1, -1, 1, 1)) * (gamma / jnp.sqrt(rvar + eps)).reshape(1, -1, 1, 1)
    y = y + beta.reshape(1, -1, 1, 1)
    y = jnp.maximum(y, 0.0)
    c2 = lax.conv_general_dilated(y, conv2_w, (1, 1), 'SAME',
                                  dimension_numbers=dn, precision=hp)
    c2 = c2 + conv2_b.reshape(1, -1, 1, 1)
    ones_k = jnp.full((1, 1, 15, 15), 1.0 / 225.0, jnp.float32)
    c3 = lax.conv_general_dilated(x[:, 2:3], ones_k, (1, 1), 'SAME',
                                  dimension_numbers=dn, precision=hp)
    cat = jnp.concatenate([x[:, 0:1], c2, c3], axis=1)
    return _bilinear_resize_ref(cat, out_h, out_w)


if __name__ == "__main__":
    # Small shapes: 3 input channels, 16x16 spatial, resized to 48x64.
    # B=16 gives lane-aligned blocks (Bt*W and Bt*out_w multiples of 128).
    B, H, W = 16, 16, 16
    OUT_H, OUT_W = 48, 64
    EPS = 1e-5

    key = jax.random.PRNGKey(0)
    ks = jax.random.split(key, 9)
    conv1_w = 0.2 * jax.random.normal(ks[0], (8, 1, 3, 3), jnp.float32)
    conv1_b = 0.1 * jax.random.normal(ks[1], (8,), jnp.float32)
    gamma = 1.0 + 0.1 * jax.random.normal(ks[2], (8,), jnp.float32)
    beta = 0.1 * jax.random.normal(ks[3], (8,), jnp.float32)
    running_mean = 0.05 * jax.random.normal(ks[4], (8,), jnp.float32)
    running_var = 1.0 + 0.1 * jnp.abs(jax.random.normal(ks[5], (8,), jnp.float32))
    conv2_w = 0.2 * jax.random.normal(ks[6], (1, 8, 3, 3), jnp.float32)
    conv2_b = 0.1 * jax.random.normal(ks[7], (1,), jnp.float32)
    x = jax.random.normal(ks[8], (B, 3, H, W), jnp.float32)

    out = ir_channel_preprocess(x, conv1_w, conv1_b, gamma, beta,
                                running_mean, running_var, EPS,
                                conv2_w, conv2_b, OUT_H, OUT_W)
    out = jax.block_until_ready(out)
    assert out.shape == (B, 3, OUT_H, OUT_W)
    assert bool(jnp.all(jnp.isfinite(out)))

    ref = _reference(x, conv1_w, conv1_b, gamma, beta, running_mean, running_var,
                     EPS, conv2_w, conv2_b, OUT_H, OUT_W)
    err = float(jnp.max(jnp.abs(out - ref)))
    assert err < 1e-3, f"max abs error {err}"

    print("KERNEL_OK")
</pallas_src>

<mosaic_0001>
module attributes {stable_mosaic.version = 11 : i64} {
  func.func @_ir_kernel(%arg0: i32, %arg1: memref<3x16x256xf32, #tpu.memory_space<vmem>>, %arg2: memref<48x16xf32, #tpu.memory_space<vmem>>, %arg3: memref<48x16xf32, #tpu.memory_space<vmem>>, %arg4: memref<256x1024xf32, #tpu.memory_space<vmem>>, %arg5: memref<256x1024xf32, #tpu.memory_space<vmem>>, %arg6: memref<72xf32, #tpu.memory_space<smem>>, %arg7: memref<8xf32, #tpu.memory_space<smem>>, %arg8: memref<72xf32, #tpu.memory_space<smem>>, %arg9: memref<1xf32, #tpu.memory_space<smem>>, %arg10: memref<1x48x3072xf32, #tpu.memory_space<vmem>>) attributes {dimension_semantics = [#tpu.dimension_semantics<parallel>], iteration_bounds = array<i64: 1>, scalar_prefetch = 0 : i64, scratch_operands = 0 : i64, tpu.core_type = #tpu.core_type<tc>, window_params = [{transform_indices = @transform_0, window_bounds = array<i64: 3, 16, 256>}, {pipeline_mode = #tpu.pipeline_mode<synchronous>, transform_indices = @transform_1, window_bounds = array<i64: 48, 16>}, {pipeline_mode = #tpu.pipeline_mode<synchronous>, transform_indices = @transform_2, window_bounds = array<i64: 48, 16>}, {pipeline_mode = #tpu.pipeline_mode<synchronous>, transform_indices = @transform_3, window_bounds = array<i64: 256, 1024>}, {pipeline_mode = #tpu.pipeline_mode<synchronous>, transform_indices = @transform_4, window_bounds = array<i64: 256, 1024>}, {transform_indices = @transform_5, window_bounds = array<i64: 72>}, {transform_indices = @transform_6, window_bounds = array<i64: 8>}, {transform_indices = @transform_7, window_bounds = array<i64: 72>}, {transform_indices = @transform_8, window_bounds = array<i64: 1>}, {transform_indices = @transform_9, window_bounds = array<i64: 1, 48, 3072>}]} {
    %c0 = arith.constant 0 : index
    %c0_0 = arith.constant 0 : index
    %c0_1 = arith.constant 0 : index
    %0 = vector.load %arg1[%c0, %c0_0, %c0_1] : memref<3x16x256xf32, #tpu.memory_space<vmem>>, vector<1x16x256xf32>
    %1 = vector.shape_cast %0 : vector<1x16x256xf32> to vector<16x256xf32>
    %c1 = arith.constant 1 : index
    %c0_2 = arith.constant 0 : index
    %c0_3 = arith.constant 0 : index
    %2 = vector.load %arg1[%c1, %c0_2, %c0_3] : memref<3x16x256xf32, #tpu.memory_space<vmem>>, vector<1x16x256xf32>
    %3 = vector.shape_cast %2 : vector<1x16x256xf32> to vector<16x256xf32>
    %c2 = arith.constant 2 : index
    %c0_4 = arith.constant 0 : index
    %c0_5 = arith.constant 0 : index
    %4 = vector.load %arg1[%c2, %c0_4, %c0_5] : memref<3x16x256xf32, #tpu.memory_space<vmem>>, vector<1x16x256xf32>
    %5 = vector.shape_cast %4 : vector<1x16x256xf32> to vector<16x256xf32>
    %6 = tpu.iota {dimensions = array<i32: 0>} : vector<16x256xi32>
    %7 = tpu.iota {dimensions = array<i32: 1>} : vector<16x256xi32>
    %c15_i32 = arith.constant 15 : i32
    %8 = vector.broadcast %c15_i32 : i32 to vector<16x256xi32>
    %9 = arith.andi %7, %8 : vector<16x256xi32>
    %c15_i32_6 = arith.constant 15 : i32
    %10 = vector.broadcast %c15_i32_6 : i32 to vector<16x256xi32>
    %11 = arith.cmpi slt, %6, %10 : vector<16x256xi32>
    %c1_i32 = arith.constant 1 : i32
    %12 = vector.broadcast %c1_i32 : i32 to vector<16x256xi32>
    %13 = arith.cmpi sge, %6, %12 : vector<16x256xi32>
    %c15_i32_7 = arith.constant 15 : i32
    %14 = vector.broadcast %c15_i32_7 : i32 to vector<16x256xi32>
    %15 = arith.cmpi slt, %9, %14 : vector<16x256xi32>
    %c1_i32_8 = arith.constant 1 : i32
    %16 = vector.broadcast %c1_i32_8 : i32 to vector<16x256xi32>
    %17 = arith.cmpi sge, %9, %16 : vector<16x256xi32>
    %c1_i32_9 = arith.constant 1 : i32
    %18 = tpu.dynamic_rotate %3 by %c1_i32_9 dim 0 : vector<16x256xf32>, i32 -> vector<16x256xf32>
    %cst = arith.constant 0.000000e+00 : f32
    %19 = vector.broadcast %cst : f32 to vector<16x256xf32>
    %20 = arith.select %13, %18, %19 : vector<16x256xi1>, vector<16x256xf32>
    %c1_i32_10 = arith.constant 1 : i32
    %21 = tpu.dynamic_rotate %20 by %c1_i32_10 dim 1 : vector<16x256xf32>, i32 -> vector<16x256xf32>
    %cst_11 = arith.constant 0.000000e+00 : f32
    %22 = vector.broadcast %cst_11 : f32 to vector<16x256xf32>
    %23 = arith.select %17, %21, %22 : vector<16x256xi1>, vector<16x256xf32>
    %c0_12 = arith.constant 0 : index
    %24 = memref.load %arg6[%c0_12] : memref<72xf32, #tpu.memory_space<smem>>
    %25 = vector.broadcast %24 : f32 to vector<16x256xf32>
    %26 = arith.mulf %25, %23 : vector<16x256xf32>
    %c9 = arith.constant 9 : index
    %27 = memref.load %arg6[%c9] : memref<72xf32, #tpu.memory_space<smem>>
    %28 = vector.broadcast %27 : f32 to vector<16x256xf32>
    %29 = arith.mulf %28, %23 : vector<16x256xf32>
    %c18 = arith.constant 18 : index
    %30 = memref.load %arg6[%c18] : memref<72xf32, #tpu.memory_space<smem>>
    %31 = vector.broadcast %30 : f32 to vector<16x256xf32>
    %32 = arith.mulf %31, %23 : vector<16x256xf32>
    %c27 = arith.constant 27 : index
    %33 = memref.load %arg6[%c27] : memref<72xf32, #tpu.memory_space<smem>>
    %34 = vector.broadcast %33 : f32 to vector<16x256xf32>
    %35 = arith.mulf %34, %23 : vector<16x256xf32>
    %c36 = arith.constant 36 : index
    %36 = memref.load %arg6[%c36] : memref<72xf32, #tpu.memory_space<smem>>
    %37 = vector.broadcast %36 : f32 to vector<16x256xf32>
    %38 = arith.mulf %37, %23 : vector<16x256xf32>
    %c45 = arith.constant 45 : index
    %39 = memref.load %arg6[%c45] : memref<72xf32, #tpu.memory_space<smem>>
    %40 = vector.broadcast %39 : f32 to vector<16x256xf32>
    %41 = arith.mulf %40, %23 : vector<16x256xf32>
    %c54 = arith.constant 54 : index
    %42 = memref.load %arg6[%c54] : memref<72xf32, #tpu.memory_space<smem>>
    %43 = vector.broadcast %42 : f32 to vector<16x256xf32>
    %44 = arith.mulf %43, %23 : vector<16x256xf32>
    %c63 = arith.constant 63 : index
    %45 = memref.load %arg6[%c63] : memref<72xf32, #tpu.memory_space<smem>>
    %46 = vector.broadcast %45 : f32 to vector<16x256xf32>
    %47 = arith.mulf %46, %23 : vector<16x256xf32>
    %c1_13 = arith.constant 1 : index
    %48 = memref.load %arg6[%c1_13] : memref<72xf32, #tpu.memory_space<smem>>
    %49 = vector.broadcast %48 : f32 to vector<16x256xf32>
    %50 = arith.mulf %49, %20 : vector<16x256xf32>
    %51 = arith.addf %26, %50 : vector<16x256xf32>
    %c10 = arith.constant 10 : index
    %52 = memref.load %arg6[%c10] : memref<72xf32, #tpu.memory_space<smem>>
    %53 = vector.broadcast %52 : f32 to vector<16x256xf32>
    %54 = arith.mulf %53, %20 : vector<16x256xf32>
    %55 = arith.addf %29, %54 : vector<16x256xf32>
    %c19 = arith.constant 19 : index
    %56 = memref.load %arg6[%c19] : memref<72xf32, #tpu.memory_space<smem>>
    %57 = vector.broadcast %56 : f32 to vector<16x256xf32>
    %58 = arith.mulf %57, %20 : vector<16x256xf32>
    %59 = arith.addf %32, %58 : vector<16x256xf32>
    %c28 = arith.constant 28 : index
    %60 = memref.load %arg6[%c28] : memref<72xf32, #tpu.memory_space<smem>>
    %61 = vector.broadcast %60 : f32 to vector<16x256xf32>
    %62 = arith.mulf %61, %20 : vector<16x256xf32>
    %63 = arith.addf %35, %62 : vector<16x256xf32>
    %c37 = arith.constant 37 : index
    %64 = memref.load %arg6[%c37] : memref<72xf32, #tpu.memory_space<smem>>
    %65 = vector.broadcast %64 : f32 to vector<16x256xf32>
    %66 = arith.mulf %65, %20 : vector<16x256xf32>
    %67 = arith.addf %38, %66 : vector<16x256xf32>
    %c46 = arith.constant 46 : index
    %68 = memref.load %arg6[%c46] : memref<72xf32, #tpu.memory_space<smem>>
    %69 = vector.broadcast %68 : f32 to vector<16x256xf32>
    %70 = arith.mulf %69, %20 : vector<16x256xf32>
    %71 = arith.addf %41, %70 : vector<16x256xf32>
    %c55 = arith.constant 55 : index
    %72 = memref.load %arg6[%c55] : memref<72xf32, #tpu.memory_space<smem>>
    %73 = vector.broadcast %72 : f32 to vector<16x256xf32>
    %74 = arith.mulf %73, %20 : vector<16x256xf32>
    %75 = arith.addf %44, %74 : vector<16x256xf32>
    %c64 = arith.constant 64 : index
    %76 = memref.load %arg6[%c64] : memref<72xf32, #tpu.memory_space<smem>>
    %77 = vector.broadcast %76 : f32 to vector<16x256xf32>
    %78 = arith.mulf %77, %20 : vector<16x256xf32>
    %79 = arith.addf %47, %78 : vector<16x256xf32>
    %c255_i32 = arith.constant 255 : i32
    %80 = tpu.dynamic_rotate %20 by %c255_i32 dim 1 : vector<16x256xf32>, i32 -> vector<16x256xf32>
    %cst_14 = arith.constant 0.000000e+00 : f32
    %81 = vector.broadcast %cst_14 : f32 to vector<16x256xf32>
    %82 = arith.select %15, %80, %81 : vector<16x256xi1>, vector<16x256xf32>
    %c2_15 = arith.constant 2 : index
    %83 = memref.load %arg6[%c2_15] : memref<72xf32, #tpu.memory_space<smem>>
    %84 = vector.broadcast %83 : f32 to vector<16x256xf32>
    %85 = arith.mulf %84, %82 : vector<16x256xf32>
    %86 = arith.addf %51, %85 : vector<16x256xf32>
    %c11 = arith.constant 11 : index
    %87 = memref.load %arg6[%c11] : memref<72xf32, #tpu.memory_space<smem>>
    %88 = vector.broadcast %87 : f32 to vector<16x256xf32>
    %89 = arith.mulf %88, %82 : vector<16x256xf32>
    %90 = arith.addf %55, %89 : vector<16x256xf32>
    %c20 = arith.constant 20 : index
    %91 = memref.load %arg6[%c20] : memref<72xf32, #tpu.memory_space<smem>>
    %92 = vector.broadcast %91 : f32 to vector<16x256xf32>
    %93 = arith.mulf %92, %82 : vector<16x256xf32>
    %94 = arith.addf %59, %93 : vector<16x256xf32>
    %c29 = arith.constant 29 : index
    %95 = memref.load %arg6[%c29] : memref<72xf32, #tpu.memory_space<smem>>
    %96 = vector.broadcast %95 : f32 to vector<16x256xf32>
    %97 = arith.mulf %96, %82 : vector<16x256xf32>
    %98 = arith.addf %63, %97 : vector<16x256xf32>
    %c38 = arith.constant 38 : index
    %99 = memref.load %arg6[%c38] : memref<72xf32, #tpu.memory_space<smem>>
    %100 = vector.broadcast %99 : f32 to vector<16x256xf32>
    %101 = arith.mulf %100, %82 : vector<16x256xf32>
    %102 = arith.addf %67, %101 : vector<16x256xf32>
    %c47 = arith.constant 47 : index
    %103 = memref.load %arg6[%c47] : memref<72xf32, #tpu.memory_space<smem>>
    %104 = vector.broadcast %103 : f32 to vector<16x256xf32>
    %105 = arith.mulf %104, %82 : vector<16x256xf32>
    %106 = arith.addf %71, %105 : vector<16x256xf32>
    %c56 = arith.constant 56 : index
    %107 = memref.load %arg6[%c56] : memref<72xf32, #tpu.memory_space<smem>>
    %108 = vector.broadcast %107 : f32 to vector<16x256xf32>
    %109 = arith.mulf %108, %82 : vector<16x256xf32>
    %110 = arith.addf %75, %109 : vector<16x256xf32>
    %c65 = arith.constant 65 : index
    %111 = memref.load %arg6[%c65] : memref<72xf32, #tpu.memory_space<smem>>
    %112 = vector.broadcast %111 : f32 to vector<16x256xf32>
    %113 = arith.mulf %112, %82 : vector<16x256xf32>
    %114 = arith.addf %79, %113 : vector<16x256xf32>
    %c1_i32_16 = arith.constant 1 : i32
    %115 = tpu.dynamic_rotate %3 by %c1_i32_16 dim 1 : vector<16x256xf32>, i32 -> vector<16x256xf32>
    %cst_17 = arith.constant 0.000000e+00 : f32
    %116 = vector.broadcast %cst_17 : f32 to vector<16x256xf32>
    %117 = arith.select %17, %115, %116 : vector<16x256xi1>, vector<16x256xf32>
    %c3 = arith.constant 3 : index
    %118 = memref.load %arg6[%c3] : memref<72xf32, #tpu.memory_space<smem>>
    %119 = vector.broadcast %118 : f32 to vector<16x256xf32>
    %120 = arith.mulf %119, %117 : vector<16x256xf32>
    %121 = arith.addf %86, %120 : vector<16x256xf32>
    %c12 = arith.constant 12 : index
    %122 = memref.load %arg6[%c12] : memref<72xf32, #tpu.memory_space<smem>>
    %123 = vector.broadcast %122 : f32 to vector<16x256xf32>
    %124 = arith.mulf %123, %117 : vector<16x256xf32>
    %125 = arith.addf %90, %124 : vector<16x256xf32>
    %c21 = arith.constant 21 : index
    %126 = memref.load %arg6[%c21] : memref<72xf32, #tpu.memory_space<smem>>
    %127 = vector.broadcast %126 : f32 to vector<16x256xf32>
    %128 = arith.mulf %127, %117 : vector<16x256xf32>
    %129 = arith.addf %94, %128 : vector<16x256xf32>
    %c30 = arith.constant 30 : index
    %130 = memref.load %arg6[%c30] : memref<72xf32, #tpu.memory_space<smem>>
    %131 = vector.broadcast %130 : f32 to vector<16x256xf32>
    %132 = arith.mulf %131, %117 : vector<16x256xf32>
    %133 = arith.addf %98, %132 : vector<16x256xf32>
    %c39 = arith.constant 39 : index
    %134 = memref.load %arg6[%c39] : memref<72xf32, #tpu.memory_space<smem>>
    %135 = vector.broadcast %134 : f32 to vector<16x256xf32>
    %136 = arith.mulf %135, %117 : vector<16x256xf32>
    %137 = arith.addf %102, %136 : vector<16x256xf32>
    %c48 = arith.constant 48 : index
    %138 = memref.load %arg6[%c48] : memref<72xf32, #tpu.memory_space<smem>>
    %139 = vector.broadcast %138 : f32 to vector<16x256xf32>
    %140 = arith.mulf %139, %117 : vector<16x256xf32>
    %141 = arith.addf %106, %140 : vector<16x256xf32>
    %c57 = arith.constant 57 : index
    %142 = memref.load %arg6[%c57] : memref<72xf32, #tpu.memory_space<smem>>
    %143 = vector.broadcast %142 : f32 to vector<16x256xf32>
    %144 = arith.mulf %143, %117 : vector<16x256xf32>
    %145 = arith.addf %110, %144 : vector<16x256xf32>
    %c66 = arith.constant 66 : index
    %146 = memref.load %arg6[%c66] : memref<72xf32, #tpu.memory_space<smem>>
    %147 = vector.broadcast %146 : f32 to vector<16x256xf32>
    %148 = arith.mulf %147, %117 : vector<16x256xf32>
    %149 = arith.addf %114, %148 : vector<16x256xf32>
    %c4 = arith.constant 4 : index
    %150 = memref.load %arg6[%c4] : memref<72xf32, #tpu.memory_space<smem>>
    %151 = vector.broadcast %150 : f32 to vector<16x256xf32>
    %152 = arith.mulf %151, %3 : vector<16x256xf32>
    %153 = arith.addf %121, %152 : vector<16x256xf32>
    %c13 = arith.constant 13 : index
    %154 = memref.load %arg6[%c13] : memref<72xf32, #tpu.memory_space<smem>>
    %155 = vector.broadcast %154 : f32 to vector<16x256xf32>
    %156 = arith.mulf %155, %3 : vector<16x256xf32>
    %157 = arith.addf %125, %156 : vector<16x256xf32>
    %c22 = arith.constant 22 : index
    %158 = memref.load %arg6[%c22] : memref<72xf32, #tpu.memory_space<smem>>
    %159 = vector.broadcast %158 : f32 to vector<16x256xf32>
    %160 = arith.mulf %159, %3 : vector<16x256xf32>
    %161 = arith.addf %129, %160 : vector<16x256xf32>
    %c31 = arith.constant 31 : index
    %162 = memref.load %arg6[%c31] : memref<72xf32, #tpu.memory_space<smem>>
    %163 = vector.broadcast %162 : f32 to vector<16x256xf32>
    %164 = arith.mulf %163, %3 : vector<16x256xf32>
    %165 = arith.addf %133, %164 : vector<16x256xf32>
    %c40 = arith.constant 40 : index
    %166 = memref.load %arg6[%c40] : memref<72xf32, #tpu.memory_space<smem>>
    %167 = vector.broadcast %166 : f32 to vector<16x256xf32>
    %168 = arith.mulf %167, %3 : vector<16x256xf32>
    %169 = arith.addf %137, %168 : vector<16x256xf32>
    %c49 = arith.constant 49 : index
    %170 = memref.load %arg6[%c49] : memref<72xf32, #tpu.memory_space<smem>>
    %171 = vector.broadcast %170 : f32 to vector<16x256xf32>
    %172 = arith.mulf %171, %3 : vector<16x256xf32>
    %173 = arith.addf %141, %172 : vector<16x256xf32>
    %c58 = arith.constant 58 : index
    %174 = memref.load %arg6[%c58] : memref<72xf32, #tpu.memory_space<smem>>
    %175 = vector.broadcast %174 : f32 to vector<16x256xf32>
    %176 = arith.mulf %175, %3 : vector<16x256xf32>
    %177 = arith.addf %145, %176 : vector<16x256xf32>
    %c67 = arith.constant 67 : index
    %178 = memref.load %arg6[%c67] : memref<72xf32, #tpu.memory_space<smem>>
    %179 = vector.broadcast %178 : f32 to vector<16x256xf32>
    %180 = arith.mulf %179, %3 : vector<16x256xf32>
    %181 = arith.addf %149, %180 : vector<16x256xf32>
    %c255_i32_18 = arith.constant 255 : i32
    %182 = tpu.dynamic_rotate %3 by %c255_i32_18 dim 1 : vector<16x256xf32>, i32 -> vector<16x256xf32>
    %cst_19 = arith.constant 0.000000e+00 : f32
    %183 = vector.broadcast %cst_19 : f32 to vector<16x256xf32>
    %184 = arith.select %15, %182, %183 : vector<16x256xi1>, vector<16x256xf32>
    %c5 = arith.constant 5 : index
    %185 = memref.load %arg6[%c5] : memref<72xf32, #tpu.memory_space<smem>>
    %186 = vector.broadcast %185 : f32 to vector<16x256xf32>
    %187 = arith.mulf %186, %184 : vector<16x256xf32>
    %188 = arith.addf %153, %187 : vector<16x256xf32>
    %c14 = arith.constant 14 : index
    %189 = memref.load %arg6[%c14] : memref<72xf32, #tpu.memory_space<smem>>
    %190 = vector.broadcast %189 : f32 to vector<16x256xf32>
    %191 = arith.mulf %190, %184 : vector<16x256xf32>
    %192 = arith.addf %157, %191 : vector<16x256xf32>
    %c23 = arith.constant 23 : index
    %193 = memref.load %arg6[%c23] : memref<72xf32, #tpu.memory_space<smem>>
    %194 = vector.broadcast %193 : f32 to vector<16x256xf32>
    %195 = arith.mulf %194, %184 : vector<16x256xf32>
    %196 = arith.addf %161, %195 : vector<16x256xf32>
    %c32 = arith.constant 32 : index
    %197 = memref.load %arg6[%c32] : memref<72xf32, #tpu.memory_space<smem>>
    %198 = vector.broadcast %197 : f32 to vector<16x256xf32>
    %199 = arith.mulf %198, %184 : vector<16x256xf32>
    %200 = arith.addf %165, %199 : vector<16x256xf32>
    %c41 = arith.constant 41 : index
    %201 = memref.load %arg6[%c41] : memref<72xf32, #tpu.memory_space<smem>>
    %202 = vector.broadcast %201 : f32 to vector<16x256xf32>
    %203 = arith.mulf %202, %184 : vector<16x256xf32>
    %204 = arith.addf %169, %203 : vector<16x256xf32>
    %c50 = arith.constant 50 : index
    %205 = memref.load %arg6[%c50] : memref<72xf32, #tpu.memory_space<smem>>
    %206 = vector.broadcast %205 : f32 to vector<16x256xf32>
    %207 = arith.mulf %206, %184 : vector<16x256xf32>
    %208 = arith.addf %173, %207 : vector<16x256xf32>
    %c59 = arith.constant 59 : index
    %209 = memref.load %arg6[%c59] : memref<72xf32, #tpu.memory_space<smem>>
    %210 = vector.broadcast %209 : f32 to vector<16x256xf32>
    %211 = arith.mulf %210, %184 : vector<16x256xf32>
    %212 = arith.addf %177, %211 : vector<16x256xf32>
    %c68 = arith.constant 68 : index
    %213 = memref.load %arg6[%c68] : memref<72xf32, #tpu.memory_space<smem>>
    %214 = vector.broadcast %213 : f32 to vector<16x256xf32>
    %215 = arith.mulf %214, %184 : vector<16x256xf32>
    %216 = arith.addf %181, %215 : vector<16x256xf32>
    %c15_i32_20 = arith.constant 15 : i32
    %217 = tpu.dynamic_rotate %3 by %c15_i32_20 dim 0 : vector<16x256xf32>, i32 -> vector<16x256xf32>
    %cst_21 = arith.constant 0.000000e+00 : f32
    %218 = vector.broadcast %cst_21 : f32 to vector<16x256xf32>
    %219 = arith.select %11, %217, %218 : vector<16x256xi1>, vector<16x256xf32>
    %c1_i32_22 = arith.constant 1 : i32
    %220 = tpu.dynamic_rotate %219 by %c1_i32_22 dim 1 : vector<16x256xf32>, i32 -> vector<16x256xf32>
    %cst_23 = arith.constant 0.000000e+00 : f32
    %221 = vector.broadcast %cst_23 : f32 to vector<16x256xf32>
    %222 = arith.select %17, %220, %221 : vector<16x256xi1>, vector<16x256xf32>
    %c6 = arith.constant 6 : index
    %223 = memref.load %arg6[%c6] : memref<72xf32, #tpu.memory_space<smem>>
    %224 = vector.broadcast %223 : f32 to vector<16x256xf32>
    %225 = arith.mulf %224, %222 : vector<16x256xf32>
    %226 = arith.addf %188, %225 : vector<16x256xf32>
    %c15 = arith.constant 15 : index
    %227 = memref.load %arg6[%c15] : memref<72xf32, #tpu.memory_space<smem>>
    %228 = vector.broadcast %227 : f32 to vector<16x256xf32>
    %229 = arith.mulf %228, %222 : vector<16x256xf32>
    %230 = arith.addf %192, %229 : vector<16x256xf32>
    %c24 = arith.constant 24 : index
    %231 = memref.load %arg6[%c24] : memref<72xf32, #tpu.memory_space<smem>>
    %232 = vector.broadcast %231 : f32 to vector<16x256xf32>
    %233 = arith.mulf %232, %222 : vector<16x256xf32>
    %234 = arith.addf %196, %233 : vector<16x256xf32>
    %c33 = arith.constant 33 : index
    %235 = memref.load %arg6[%c33] : memref<72xf32, #tpu.memory_space<smem>>
    %236 = vector.broadcast %235 : f32 to vector<16x256xf32>
    %237 = arith.mulf %236, %222 : vector<16x256xf32>
    %238 = arith.addf %200, %237 : vector<16x256xf32>
    %c42 = arith.constant 42 : index
    %239 = memref.load %arg6[%c42] : memref<72xf32, #tpu.memory_space<smem>>
    %240 = vector.broadcast %239 : f32 to vector<16x256xf32>
    %241 = arith.mulf %240, %222 : vector<16x256xf32>
    %242 = arith.addf %204, %241 : vector<16x256xf32>
    %c51 = arith.constant 51 : index
    %243 = memref.load %arg6[%c51] : memref<72xf32, #tpu.memory_space<smem>>
    %244 = vector.broadcast %243 : f32 to vector<16x256xf32>
    %245 = arith.mulf %244, %222 : vector<16x256xf32>
    %246 = arith.addf %208, %245 : vector<16x256xf32>
    %c60 = arith.constant 60 : index
    %247 = memref.load %arg6[%c60] : memref<72xf32, #tpu.memory_space<smem>>
    %248 = vector.broadcast %247 : f32 to vector<16x256xf32>
    %249 = arith.mulf %248, %222 : vector<16x256xf32>
    %250 = arith.addf %212, %249 : vector<16x256xf32>
    %c69 = arith.constant 69 : index
    %251 = memref.load %arg6[%c69] : memref<72xf32, #tpu.memory_space<smem>>
    %252 = vector.broadcast %251 : f32 to vector<16x256xf32>
    %253 = arith.mulf %252, %222 : vector<16x256xf32>
    %254 = arith.addf %216, %253 : vector<16x256xf32>
    %c7 = arith.constant 7 : index
    %255 = memref.load %arg6[%c7] : memref<72xf32, #tpu.memory_space<smem>>
    %256 = vector.broadcast %255 : f32 to vector<16x256xf32>
    %257 = arith.mulf %256, %219 : vector<16x256xf32>
    %258 = arith.addf %226, %257 : vector<16x256xf32>
    %c16 = arith.constant 16 : index
    %259 = memref.load %arg6[%c16] : memref<72xf32, #tpu.memory_space<smem>>
    %260 = vector.broadcast %259 : f32 to vector<16x256xf32>
    %261 = arith.mulf %260, %219 : vector<16x256xf32>
    %262 = arith.addf %230, %261 : vector<16x256xf32>
    %c25 = arith.constant 25 : index
    %263 = memref.load %arg6[%c25] : memref<72xf32, #tpu.memory_space<smem>>
    %264 = vector.broadcast %263 : f32 to vector<16x256xf32>
    %265 = arith.mulf %264, %219 : vector<16x256xf32>
    %266 = arith.addf %234, %265 : vector<16x256xf32>
    %c34 = arith.constant 34 : index
    %267 = memref.load %arg6[%c34] : memref<72xf32, #tpu.memory_space<smem>>
    %268 = vector.broadcast %267 : f32 to vector<16x256xf32>
    %269 = arith.mulf %268, %219 : vector<16x256xf32>
    %270 = arith.addf %238, %269 : vector<16x256xf32>
    %c43 = arith.constant 43 : index
    %271 = memref.load %arg6[%c43] : memref<72xf32, #tpu.memory_space<smem>>
    %272 = vector.broadcast %271 : f32 to vector<16x256xf32>
    %273 = arith.mulf %272, %219 : vector<16x256xf32>
    %274 = arith.addf %242, %273 : vector<16x256xf32>
    %c52 = arith.constant 52 : index
    %275 = memref.load %arg6[%c52] : memref<72xf32, #tpu.memory_space<smem>>
    %276 = vector.broadcast %275 : f32 to vector<16x256xf32>
    %277 = arith.mulf %276, %219 : vector<16x256xf32>
    %278 = arith.addf %246, %277 : vector<16x256xf32>
    %c61 = arith.constant 61 : index
    %279 = memref.load %arg6[%c61] : memref<72xf32, #tpu.memory_space<smem>>
    %280 = vector.broadcast %279 : f32 to vector<16x256xf32>
    %281 = arith.mulf %280, %219 : vector<16x256xf32>
    %282 = arith.addf %250, %281 : vector<16x256xf32>
    %c70 = arith.constant 70 : index
    %283 = memref.load %arg6[%c70] : memref<72xf32, #tpu.memory_space<smem>>
    %284 = vector.broadcast %283 : f32 to vector<16x256xf32>
    %285 = arith.mulf %284, %219 : vector<16x256xf32>
    %286 = arith.addf %254, %285 : vector<16x256xf32>
    %c255_i32_24 = arith.constant 255 : i32
    %287 = tpu.dynamic_rotate %219 by %c255_i32_24 dim 1 : vector<16x256xf32>, i32 -> vector<16x256xf32>
    %cst_25 = arith.constant 0.000000e+00 : f32
    %288 = vector.broadcast %cst_25 : f32 to vector<16x256xf32>
    %289 = arith.select %15, %287, %288 : vector<16x256xi1>, vector<16x256xf32>
    %c8 = arith.constant 8 : index
    %290 = memref.load %arg6[%c8] : memref<72xf32, #tpu.memory_space<smem>>
    %291 = vector.broadcast %290 : f32 to vector<16x256xf32>
    %292 = arith.mulf %291, %289 : vector<16x256xf32>
    %293 = arith.addf %258, %292 : vector<16x256xf32>
    %c17 = arith.constant 17 : index
    %294 = memref.load %arg6[%c17] : memref<72xf32, #tpu.memory_space<smem>>
    %295 = vector.broadcast %294 : f32 to vector<16x256xf32>
    %296 = arith.mulf %295, %289 : vector<16x256xf32>
    %297 = arith.addf %262, %296 : vector<16x256xf32>
    %c26 = arith.constant 26 : index
    %298 = memref.load %arg6[%c26] : memref<72xf32, #tpu.memory_space<smem>>
    %299 = vector.broadcast %298 : f32 to vector<16x256xf32>
    %300 = arith.mulf %299, %289 : vector<16x256xf32>
    %301 = arith.addf %266, %300 : vector<16x256xf32>
    %c35 = arith.constant 35 : index
    %302 = memref.load %arg6[%c35] : memref<72xf32, #tpu.memory_space<smem>>
    %303 = vector.broadcast %302 : f32 to vector<16x256xf32>
    %304 = arith.mulf %303, %289 : vector<16x256xf32>
    %305 = arith.addf %270, %304 : vector<16x256xf32>
    %c44 = arith.constant 44 : index
    %306 = memref.load %arg6[%c44] : memref<72xf32, #tpu.memory_space<smem>>
    %307 = vector.broadcast %306 : f32 to vector<16x256xf32>
    %308 = arith.mulf %307, %289 : vector<16x256xf32>
    %309 = arith.addf %274, %308 : vector<16x256xf32>
    %c53 = arith.constant 53 : index
    %310 = memref.load %arg6[%c53] : memref<72xf32, #tpu.memory_space<smem>>
    %311 = vector.broadcast %310 : f32 to vector<16x256xf32>
    %312 = arith.mulf %311, %289 : vector<16x256xf32>
    %313 = arith.addf %278, %312 : vector<16x256xf32>
    %c62 = arith.constant 62 : index
    %314 = memref.load %arg6[%c62] : memref<72xf32, #tpu.memory_space<smem>>
    %315 = vector.broadcast %314 : f32 to vector<16x256xf32>
    %316 = arith.mulf %315, %289 : vector<16x256xf32>
    %317 = arith.addf %282, %316 : vector<16x256xf32>
    %c71 = arith.constant 71 : index
    %318 = memref.load %arg6[%c71] : memref<72xf32, #tpu.memory_space<smem>>
    %319 = vector.broadcast %318 : f32 to vector<16x256xf32>
    %320 = arith.mulf %319, %289 : vector<16x256xf32>
    %321 = arith.addf %286, %320 : vector<16x256xf32>
    %c0_26 = arith.constant 0 : index
    %322 = memref.load %arg7[%c0_26] : memref<8xf32, #tpu.memory_space<smem>>
    %323 = vector.broadcast %322 : f32 to vector<16x256xf32>
    %324 = arith.addf %293, %323 : vector<16x256xf32>
    %cst_27 = arith.constant 0.000000e+00 : f32
    %325 = vector.broadcast %cst_27 : f32 to vector<16x256xf32>
    %326 = arith.maximumf %324, %325 : vector<16x256xf32>
    %c1_28 = arith.constant 1 : index
    %327 = memref.load %arg7[%c1_28] : memref<8xf32, #tpu.memory_space<smem>>
    %328 = vector.broadcast %327 : f32 to vector<16x256xf32>
    %329 = arith.addf %297, %328 : vector<16x256xf32>
    %cst_29 = arith.constant 0.000000e+00 : f32
    %330 = vector.broadcast %cst_29 : f32 to vector<16x256xf32>
    %331 = arith.maximumf %329, %330 : vector<16x256xf32>
    %c2_30 = arith.constant 2 : index
    %332 = memref.load %arg7[%c2_30] : memref<8xf32, #tpu.memory_space<smem>>
    %333 = vector.broadcast %332 : f32 to vector<16x256xf32>
    %334 = arith.addf %301, %333 : vector<16x256xf32>
    %cst_31 = arith.constant 0.000000e+00 : f32
    %335 = vector.broadcast %cst_31 : f32 to vector<16x256xf32>
    %336 = arith.maximumf %334, %335 : vector<16x256xf32>
    %c3_32 = arith.constant 3 : index
    %337 = memref.load %arg7[%c3_32] : memref<8xf32, #tpu.memory_space<smem>>
    %338 = vector.broadcast %337 : f32 to vector<16x256xf32>
    %339 = arith.addf %305, %338 : vector<16x256xf32>
    %cst_33 = arith.constant 0.000000e+00 : f32
    %340 = vector.broadcast %cst_33 : f32 to vector<16x256xf32>
    %341 = arith.maximumf %339, %340 : vector<16x256xf32>
    %c4_34 = arith.constant 4 : index
    %342 = memref.load %arg7[%c4_34] : memref<8xf32, #tpu.memory_space<smem>>
    %343 = vector.broadcast %342 : f32 to vector<16x256xf32>
    %344 = arith.addf %309, %343 : vector<16x256xf32>
    %cst_35 = arith.constant 0.000000e+00 : f32
    %345 = vector.broadcast %cst_35 : f32 to vector<16x256xf32>
    %346 = arith.maximumf %344, %345 : vector<16x256xf32>
    %c5_36 = arith.constant 5 : index
    %347 = memref.load %arg7[%c5_36] : memref<8xf32, #tpu.memory_space<smem>>
    %348 = vector.broadcast %347 : f32 to vector<16x256xf32>
    %349 = arith.addf %313, %348 : vector<16x256xf32>
    %cst_37 = arith.constant 0.000000e+00 : f32
    %350 = vector.broadcast %cst_37 : f32 to vector<16x256xf32>
    %351 = arith.maximumf %349, %350 : vector<16x256xf32>
    %c6_38 = arith.constant 6 : index
    %352 = memref.load %arg7[%c6_38] : memref<8xf32, #tpu.memory_space<smem>>
    %353 = vector.broadcast %352 : f32 to vector<16x256xf32>
    %354 = arith.addf %317, %353 : vector<16x256xf32>
    %cst_39 = arith.constant 0.000000e+00 : f32
    %355 = vector.broadcast %cst_39 : f32 to vector<16x256xf32>
    %356 = arith.maximumf %354, %355 : vector<16x256xf32>
    %c7_40 = arith.constant 7 : index
    %357 = memref.load %arg7[%c7_40] : memref<8xf32, #tpu.memory_space<smem>>
    %358 = vector.broadcast %357 : f32 to vector<16x256xf32>
    %359 = arith.addf %321, %358 : vector<16x256xf32>
    %cst_41 = arith.constant 0.000000e+00 : f32
    %360 = vector.broadcast %cst_41 : f32 to vector<16x256xf32>
    %361 = arith.maximumf %359, %360 : vector<16x256xf32>
    %c0_42 = arith.constant 0 : index
    %362 = memref.load %arg8[%c0_42] : memref<72xf32, #tpu.memory_space<smem>>
    %363 = vector.broadcast %362 : f32 to vector<16x256xf32>
    %364 = arith.mulf %363, %326 : vector<16x256xf32>
    %c9_43 = arith.constant 9 : index
    %365 = memref.load %arg8[%c9_43] : memref<72xf32, #tpu.memory_space<smem>>
    %366 = vector.broadcast %365 : f32 to vector<16x256xf32>
    %367 = arith.mulf %366, %331 : vector<16x256xf32>
    %368 = arith.addf %364, %367 : vector<16x256xf32>
    %c18_44 = arith.constant 18 : index
    %369 = memref.load %arg8[%c18_44] : memref<72xf32, #tpu.memory_space<smem>>
    %370 = vector.broadcast %369 : f32 to vector<16x256xf32>
    %371 = arith.mulf %370, %336 : vector<16x256xf32>
    %372 = arith.addf %368, %371 : vector<16x256xf32>
    %c27_45 = arith.constant 27 : index
    %373 = memref.load %arg8[%c27_45] : memref<72xf32, #tpu.memory_space<smem>>
    %374 = vector.broadcast %373 : f32 to vector<16x256xf32>
    %375 = arith.mulf %374, %341 : vector<16x256xf32>
    %376 = arith.addf %372, %375 : vector<16x256xf32>
    %c36_46 = arith.constant 36 : index
    %377 = memref.load %arg8[%c36_46] : memref<72xf32, #tpu.memory_space<smem>>
    %378 = vector.broadcast %377 : f32 to vector<16x256xf32>
    %379 = arith.mulf %378, %346 : vector<16x256xf32>
    %380 = arith.addf %376, %379 : vector<16x256xf32>
    %c45_47 = arith.constant 45 : index
    %381 = memref.load %arg8[%c45_47] : memref<72xf32, #tpu.memory_space<smem>>
    %382 = vector.broadcast %381 : f32 to vector<16x256xf32>
    %383 = arith.mulf %382, %351 : vector<16x256xf32>
    %384 = arith.addf %380, %383 : vector<16x256xf32>
    %c54_48 = arith.constant 54 : index
    %385 = memref.load %arg8[%c54_48] : memref<72xf32, #tpu.memory_space<smem>>
    %386 = vector.broadcast %385 : f32 to vector<16x256xf32>
    %387 = arith.mulf %386, %356 : vector<16x256xf32>
    %388 = arith.addf %384, %387 : vector<16x256xf32>
    %c63_49 = arith.constant 63 : index
    %389 = memref.load %arg8[%c63_49] : memref<72xf32, #tpu.memory_space<smem>>
    %390 = vector.broadcast %389 : f32 to vector<16x256xf32>
    %391 = arith.mulf %390, %361 : vector<16x256xf32>
    %392 = arith.addf %388, %391 : vector<16x256xf32>
    %c1_i32_50 = arith.constant 1 : i32
    %393 = tpu.dynamic_rotate %392 by %c1_i32_50 dim 1 : vector<16x256xf32>, i32 -> vector<16x256xf32>
    %cst_51 = arith.constant 0.000000e+00 : f32
    %394 = vector.broadcast %cst_51 : f32 to vector<16x256xf32>
    %395 = arith.select %17, %393, %394 : vector<16x256xi1>, vector<16x256xf32>
    %c1_52 = arith.constant 1 : index
    %396 = memref.load %arg8[%c1_52] : memref<72xf32, #tpu.memory_space<smem>>
    %397 = vector.broadcast %396 : f32 to vector<16x256xf32>
    %398 = arith.mulf %397, %326 : vector<16x256xf32>
    %c10_53 = arith.constant 10 : index
    %399 = memref.load %arg8[%c10_53] : memref<72xf32, #tpu.memory_space<smem>>
    %400 = vector.broadcast %399 : f32 to vector<16x256xf32>
    %401 = arith.mulf %400, %331 : vector<16x256xf32>
    %402 = arith.addf %398, %401 : vector<16x256xf32>
    %c19_54 = arith.constant 19 : index
    %403 = memref.load %arg8[%c19_54] : memref<72xf32, #tpu.memory_space<smem>>
    %404 = vector.broadcast %403 : f32 to vector<16x256xf32>
    %405 = arith.mulf %404, %336 : vector<16x256xf32>
    %406 = arith.addf %402, %405 : vector<16x256xf32>
    %c28_55 = arith.constant 28 : index
    %407 = memref.load %arg8[%c28_55] : memref<72xf32, #tpu.memory_space<smem>>
    %408 = vector.broadcast %407 : f32 to vector<16x256xf32>
    %409 = arith.mulf %408, %341 : vector<16x256xf32>
    %410 = arith.addf %406, %409 : vector<16x256xf32>
    %c37_56 = arith.constant 37 : index
    %411 = memref.load %arg8[%c37_56] : memref<72xf32, #tpu.memory_space<smem>>
    %412 = vector.broadcast %411 : f32 to vector<16x256xf32>
    %413 = arith.mulf %412, %346 : vector<16x256xf32>
    %414 = arith.addf %410, %413 : vector<16x256xf32>
    %c46_57 = arith.constant 46 : index
    %415 = memref.load %arg8[%c46_57] : memref<72xf32, #tpu.memory_space<smem>>
    %416 = vector.broadcast %415 : f32 to vector<16x256xf32>
    %417 = arith.mulf %416, %351 : vector<16x256xf32>
    %418 = arith.addf %414, %417 : vector<16x256xf32>
    %c55_58 = arith.constant 55 : index
    %419 = memref.load %arg8[%c55_58] : memref<72xf32, #tpu.memory_space<smem>>
    %420 = vector.broadcast %419 : f32 to vector<16x256xf32>
    %421 = arith.mulf %420, %356 : vector<16x256xf32>
    %422 = arith.addf %418, %421 : vector<16x256xf32>
    %c64_59 = arith.constant 64 : index
    %423 = memref.load %arg8[%c64_59] : memref<72xf32, #tpu.memory_space<smem>>
    %424 = vector.broadcast %423 : f32 to vector<16x256xf32>
    %425 = arith.mulf %424, %361 : vector<16x256xf32>
    %426 = arith.addf %422, %425 : vector<16x256xf32>
    %427 = arith.addf %395, %426 : vector<16x256xf32>
    %c2_60 = arith.constant 2 : index
    %428 = memref.load %arg8[%c2_60] : memref<72xf32, #tpu.memory_space<smem>>
    %429 = vector.broadcast %428 : f32 to vector<16x256xf32>
    %430 = arith.mulf %429, %326 : vector<16x256xf32>
    %c11_61 = arith.constant 11 : index
    %431 = memref.load %arg8[%c11_61] : memref<72xf32, #tpu.memory_space<smem>>
    %432 = vector.broadcast %431 : f32 to vector<16x256xf32>
    %433 = arith.mulf %432, %331 : vector<16x256xf32>
    %434 = arith.addf %430, %433 : vector<16x256xf32>
    %c20_62 = arith.constant 20 : index
    %435 = memref.load %arg8[%c20_62] : memref<72xf32, #tpu.memory_space<smem>>
    %436 = vector.broadcast %435 : f32 to vector<16x256xf32>
    %437 = arith.mulf %436, %336 : vector<16x256xf32>
    %438 = arith.addf %434, %437 : vector<16x256xf32>
    %c29_63 = arith.constant 29 : index
    %439 = memref.load %arg8[%c29_63] : memref<72xf32, #tpu.memory_space<smem>>
    %440 = vector.broadcast %439 : f32 to vector<16x256xf32>
    %441 = arith.mulf %440, %341 : vector<16x256xf32>
    %442 = arith.addf %438, %441 : vector<16x256xf32>
    %c38_64 = arith.constant 38 : index
    %443 = memref.load %arg8[%c38_64] : memref<72xf32, #tpu.memory_space<smem>>
    %444 = vector.broadcast %443 : f32 to vector<16x256xf32>
    %445 = arith.mulf %444, %346 : vector<16x256xf32>
    %446 = arith.addf %442, %445 : vector<16x256xf32>
    %c47_65 = arith.constant 47 : index
    %447 = memref.load %arg8[%c47_65] : memref<72xf32, #tpu.memory_space<smem>>
    %448 = vector.broadcast %447 : f32 to vector<16x256xf32>
    %449 = arith.mulf %448, %351 : vector<16x256xf32>
    %450 = arith.addf %446, %449 : vector<16x256xf32>
    %c56_66 = arith.constant 56 : index
    %451 = memref.load %arg8[%c56_66] : memref<72xf32, #tpu.memory_space<smem>>
    %452 = vector.broadcast %451 : f32 to vector<16x256xf32>
    %453 = arith.mulf %452, %356 : vector<16x256xf32>
    %454 = arith.addf %450, %453 : vector<16x256xf32>
    %c65_67 = arith.constant 65 : index
    %455 = memref.load %arg8[%c65_67] : memref<72xf32, #tpu.memory_space<smem>>
    %456 = vector.broadcast %455 : f32 to vector<16x256xf32>
    %457 = arith.mulf %456, %361 : vector<16x256xf32>
    %458 = arith.addf %454, %457 : vector<16x256xf32>
    %c255_i32_68 = arith.constant 255 : i32
    %459 = tpu.dynamic_rotate %458 by %c255_i32_68 dim 1 : vector<16x256xf32>, i32 -> vector<16x256xf32>
    %cst_69 = arith.constant 0.000000e+00 : f32
    %460 = vector.broadcast %cst_69 : f32 to vector<16x256xf32>
    %461 = arith.select %15, %459, %460 : vector<16x256xi1>, vector<16x256xf32>
    %462 = arith.addf %427, %461 : vector<16x256xf32>
    %c1_i32_70 = arith.constant 1 : i32
    %463 = tpu.dynamic_rotate %462 by %c1_i32_70 dim 0 : vector<16x256xf32>, i32 -> vector<16x256xf32>
    %cst_71 = arith.constant 0.000000e+00 : f32
    %464 = vector.broadcast %cst_71 : f32 to vector<16x256xf32>
    %465 = arith.select %13, %463, %464 : vector<16x256xi1>, vector<16x256xf32>
    %c3_72 = arith.constant 3 : index
    %466 = memref.load %arg8[%c3_72] : memref<72xf32, #tpu.memory_space<smem>>
    %467 = vector.broadcast %466 : f32 to vector<16x256xf32>
    %468 = arith.mulf %467, %326 : vector<16x256xf32>
    %c12_73 = arith.constant 12 : index
    %469 = memref.load %arg8[%c12_73] : memref<72xf32, #tpu.memory_space<smem>>
    %470 = vector.broadcast %469 : f32 to vector<16x256xf32>
    %471 = arith.mulf %470, %331 : vector<16x256xf32>
    %472 = arith.addf %468, %471 : vector<16x256xf32>
    %c21_74 = arith.constant 21 : index
    %473 = memref.load %arg8[%c21_74] : memref<72xf32, #tpu.memory_space<smem>>
    %474 = vector.broadcast %473 : f32 to vector<16x256xf32>
    %475 = arith.mulf %474, %336 : vector<16x256xf32>
    %476 = arith.addf %472, %475 : vector<16x256xf32>
    %c30_75 = arith.constant 30 : index
    %477 = memref.load %arg8[%c30_75] : memref<72xf32, #tpu.memory_space<smem>>
    %478 = vector.broadcast %477 : f32 to vector<16x256xf32>
    %479 = arith.mulf %478, %341 : vector<16x256xf32>
    %480 = arith.addf %476, %479 : vector<16x256xf32>
    %c39_76 = arith.constant 39 : index
    %481 = memref.load %arg8[%c39_76] : memref<72xf32, #tpu.memory_space<smem>>
    %482 = vector.broadcast %481 : f32 to vector<16x256xf32>
    %483 = arith.mulf %482, %346 : vector<16x256xf32>
    %484 = arith.addf %480, %483 : vector<16x256xf32>
    %c48_77 = arith.constant 48 : index
    %485 = memref.load %arg8[%c48_77] : memref<72xf32, #tpu.memory_space<smem>>
    %486 = vector.broadcast %485 : f32 to vector<16x256xf32>
    %487 = arith.mulf %486, %351 : vector<16x256xf32>
    %488 = arith.addf %484, %487 : vector<16x256xf32>
    %c57_78 = arith.constant 57 : index
    %489 = memref.load %arg8[%c57_78] : memref<72xf32, #tpu.memory_space<smem>>
    %490 = vector.broadcast %489 : f32 to vector<16x256xf32>
    %491 = arith.mulf %490, %356 : vector<16x256xf32>
    %492 = arith.addf %488, %491 : vector<16x256xf32>
    %c66_79 = arith.constant 66 : index
    %493 = memref.load %arg8[%c66_79] : memref<72xf32, #tpu.memory_space<smem>>
    %494 = vector.broadcast %493 : f32 to vector<16x256xf32>
    %495 = arith.mulf %494, %361 : vector<16x256xf32>
    %496 = arith.addf %492, %495 : vector<16x256xf32>
    %c1_i32_80 = arith.constant 1 : i32
    %497 = tpu.dynamic_rotate %496 by %c1_i32_80 dim 1 : vector<16x256xf32>, i32 -> vector<16x256xf32>
    %cst_81 = arith.constant 0.000000e+00 : f32
    %498 = vector.broadcast %cst_81 : f32 to vector<16x256xf32>
    %499 = arith.select %17, %497, %498 : vector<16x256xi1>, vector<16x256xf32>
    %c4_82 = arith.constant 4 : index
    %500 = memref.load %arg8[%c4_82] : memref<72xf32, #tpu.memory_space<smem>>
    %501 = vector.broadcast %500 : f32 to vector<16x256xf32>
    %502 = arith.mulf %501, %326 : vector<16x256xf32>
    %c13_83 = arith.constant 13 : index
    %503 = memref.load %arg8[%c13_83] : memref<72xf32, #tpu.memory_space<smem>>
    %504 = vector.broadcast %503 : f32 to vector<16x256xf32>
    %505 = arith.mulf %504, %331 : vector<16x256xf32>
    %506 = arith.addf %502, %505 : vector<16x256xf32>
    %c22_84 = arith.constant 22 : index
    %507 = memref.load %arg8[%c22_84] : memref<72xf32, #tpu.memory_space<smem>>
    %508 = vector.broadcast %507 : f32 to vector<16x256xf32>
    %509 = arith.mulf %508, %336 : vector<16x256xf32>
    %510 = arith.addf %506, %509 : vector<16x256xf32>
    %c31_85 = arith.constant 31 : index
    %511 = memref.load %arg8[%c31_85] : memref<72xf32, #tpu.memory_space<smem>>
    %512 = vector.broadcast %511 : f32 to vector<16x256xf32>
    %513 = arith.mulf %512, %341 : vector<16x256xf32>
    %514 = arith.addf %510, %513 : vector<16x256xf32>
    %c40_86 = arith.constant 40 : index
    %515 = memref.load %arg8[%c40_86] : memref<72xf32, #tpu.memory_space<smem>>
    %516 = vector.broadcast %515 : f32 to vector<16x256xf32>
    %517 = arith.mulf %516, %346 : vector<16x256xf32>
    %518 = arith.addf %514, %517 : vector<16x256xf32>
    %c49_87 = arith.constant 49 : index
    %519 = memref.load %arg8[%c49_87] : memref<72xf32, #tpu.memory_space<smem>>
    %520 = vector.broadcast %519 : f32 to vector<16x256xf32>
    %521 = arith.mulf %520, %351 : vector<16x256xf32>
    %522 = arith.addf %518, %521 : vector<16x256xf32>
    %c58_88 = arith.constant 58 : index
    %523 = memref.load %arg8[%c58_88] : memref<72xf32, #tpu.memory_space<smem>>
    %524 = vector.broadcast %523 : f32 to vector<16x256xf32>
    %525 = arith.mulf %524, %356 : vector<16x256xf32>
    %526 = arith.addf %522, %525 : vector<16x256xf32>
    %c67_89 = arith.constant 67 : index
    %527 = memref.load %arg8[%c67_89] : memref<72xf32, #tpu.memory_space<smem>>
    %528 = vector.broadcast %527 : f32 to vector<16x256xf32>
    %529 = arith.mulf %528, %361 : vector<16x256xf32>
    %530 = arith.addf %526, %529 : vector<16x256xf32>
    %531 = arith.addf %499, %530 : vector<16x256xf32>
    %c5_90 = arith.constant 5 : index
    %532 = memref.load %arg8[%c5_90] : memref<72xf32, #tpu.memory_space<smem>>
    %533 = vector.broadcast %532 : f32 to vector<16x256xf32>
    %534 = arith.mulf %533, %326 : vector<16x256xf32>
    %c14_91 = arith.constant 14 : index
    %535 = memref.load %arg8[%c14_91] : memref<72xf32, #tpu.memory_space<smem>>
    %536 = vector.broadcast %535 : f32 to vector<16x256xf32>
    %537 = arith.mulf %536, %331 : vector<16x256xf32>
    %538 = arith.addf %534, %537 : vector<16x256xf32>
    %c23_92 = arith.constant 23 : index
    %539 = memref.load %arg8[%c23_92] : memref<72xf32, #tpu.memory_space<smem>>
    %540 = vector.broadcast %539 : f32 to vector<16x256xf32>
    %541 = arith.mulf %540, %336 : vector<16x256xf32>
    %542 = arith.addf %538, %541 : vector<16x256xf32>
    %c32_93 = arith.constant 32 : index
    %543 = memref.load %arg8[%c32_93] : memref<72xf32, #tpu.memory_space<smem>>
    %544 = vector.broadcast %543 : f32 to vector<16x256xf32>
    %545 = arith.mulf %544, %341 : vector<16x256xf32>
    %546 = arith.addf %542, %545 : vector<16x256xf32>
    %c41_94 = arith.constant 41 : index
    %547 = memref.load %arg8[%c41_94] : memref<72xf32, #tpu.memory_space<smem>>
    %548 = vector.broadcast %547 : f32 to vector<16x256xf32>
    %549 = arith.mulf %548, %346 : vector<16x256xf32>
    %550 = arith.addf %546, %549 : vector<16x256xf32>
    %c50_95 = arith.constant 50 : index
    %551 = memref.load %arg8[%c50_95] : memref<72xf32, #tpu.memory_space<smem>>
    %552 = vector.broadcast %551 : f32 to vector<16x256xf32>
    %553 = arith.mulf %552, %351 : vector<16x256xf32>
    %554 = arith.addf %550, %553 : vector<16x256xf32>
    %c59_96 = arith.constant 59 : index
    %555 = memref.load %arg8[%c59_96] : memref<72xf32, #tpu.memory_space<smem>>
    %556 = vector.broadcast %555 : f32 to vector<16x256xf32>
    %557 = arith.mulf %556, %356 : vector<16x256xf32>
    %558 = arith.addf %554, %557 : vector<16x256xf32>
    %c68_97 = arith.constant 68 : index
    %559 = memref.load %arg8[%c68_97] : memref<72xf32, #tpu.memory_space<smem>>
    %560 = vector.broadcast %559 : f32 to vector<16x256xf32>
    %561 = arith.mulf %560, %361 : vector<16x256xf32>
    %562 = arith.addf %558, %561 : vector<16x256xf32>
    %c255_i32_98 = arith.constant 255 : i32
    %563 = tpu.dynamic_rotate %562 by %c255_i32_98 dim 1 : vector<16x256xf32>, i32 -> vector<16x256xf32>
    %cst_99 = arith.constant 0.000000e+00 : f32
    %564 = vector.broadcast %cst_99 : f32 to vector<16x256xf32>
    %565 = arith.select %15, %563, %564 : vector<16x256xi1>, vector<16x256xf32>
    %566 = arith.addf %531, %565 : vector<16x256xf32>
    %567 = arith.addf %465, %566 : vector<16x256xf32>
    %c6_100 = arith.constant 6 : index
    %568 = memref.load %arg8[%c6_100] : memref<72xf32, #tpu.memory_space<smem>>
    %569 = vector.broadcast %568 : f32 to vector<16x256xf32>
    %570 = arith.mulf %569, %326 : vector<16x256xf32>
    %c15_101 = arith.constant 15 : index
    %571 = memref.load %arg8[%c15_101] : memref<72xf32, #tpu.memory_space<smem>>
    %572 = vector.broadcast %571 : f32 to vector<16x256xf32>
    %573 = arith.mulf %572, %331 : vector<16x256xf32>
    %574 = arith.addf %570, %573 : vector<16x256xf32>
    %c24_102 = arith.constant 24 : index
    %575 = memref.load %arg8[%c24_102] : memref<72xf32, #tpu.memory_space<smem>>
    %576 = vector.broadcast %575 : f32 to vector<16x256xf32>
    %577 = arith.mulf %576, %336 : vector<16x256xf32>
    %578 = arith.addf %574, %577 : vector<16x256xf32>
    %c33_103 = arith.constant 33 : index
    %579 = memref.load %arg8[%c33_103] : memref<72xf32, #tpu.memory_space<smem>>
    %580 = vector.broadcast %579 : f32 to vector<16x256xf32>
    %581 = arith.mulf %580, %341 : vector<16x256xf32>
    %582 = arith.addf %578, %581 : vector<16x256xf32>
    %c42_104 = arith.constant 42 : index
    %583 = memref.load %arg8[%c42_104] : memref<72xf32, #tpu.memory_space<smem>>
    %584 = vector.broadcast %583 : f32 to vector<16x256xf32>
    %585 = arith.mulf %584, %346 : vector<16x256xf32>
    %586 = arith.addf %582, %585 : vector<16x256xf32>
    %c51_105 = arith.constant 51 : index
    %587 = memref.load %arg8[%c51_105] : memref<72xf32, #tpu.memory_space<smem>>
    %588 = vector.broadcast %587 : f32 to vector<16x256xf32>
    %589 = arith.mulf %588, %351 : vector<16x256xf32>
    %590 = arith.addf %586, %589 : vector<16x256xf32>
    %c60_106 = arith.constant 60 : index
    %591 = memref.load %arg8[%c60_106] : memref<72xf32, #tpu.memory_space<smem>>
    %592 = vector.broadcast %591 : f32 to vector<16x256xf32>
    %593 = arith.mulf %592, %356 : vector<16x256xf32>
    %594 = arith.addf %590, %593 : vector<16x256xf32>
    %c69_107 = arith.constant 69 : index
    %595 = memref.load %arg8[%c69_107] : memref<72xf32, #tpu.memory_space<smem>>
    %596 = vector.broadcast %595 : f32 to vector<16x256xf32>
    %597 = arith.mulf %596, %361 : vector<16x256xf32>
    %598 = arith.addf %594, %597 : vector<16x256xf32>
    %c1_i32_108 = arith.constant 1 : i32
    %599 = tpu.dynamic_rotate %598 by %c1_i32_108 dim 1 : vector<16x256xf32>, i32 -> vector<16x256xf32>
    %cst_109 = arith.constant 0.000000e+00 : f32
    %600 = vector.broadcast %cst_109 : f32 to vector<16x256xf32>
    %601 = arith.select %17, %599, %600 : vector<16x256xi1>, vector<16x256xf32>
    %c7_110 = arith.constant 7 : index
    %602 = memref.load %arg8[%c7_110] : memref<72xf32, #tpu.memory_space<smem>>
    %603 = vector.broadcast %602 : f32 to vector<16x256xf32>
    %604 = arith.mulf %603, %326 : vector<16x256xf32>
    %c16_111 = arith.constant 16 : index
    %605 = memref.load %arg8[%c16_111] : memref<72xf32, #tpu.memory_space<smem>>
    %606 = vector.broadcast %605 : f32 to vector<16x256xf32>
    %607 = arith.mulf %606, %331 : vector<16x256xf32>
    %608 = arith.addf %604, %607 : vector<16x256xf32>
    %c25_112 = arith.constant 25 : index
    %609 = memref.load %arg8[%c25_112] : memref<72xf32, #tpu.memory_space<smem>>
    %610 = vector.broadcast %609 : f32 to vector<16x256xf32>
    %611 = arith.mulf %610, %336 : vector<16x256xf32>
    %612 = arith.addf %608, %611 : vector<16x256xf32>
    %c34_113 = arith.constant 34 : index
    %613 = memref.load %arg8[%c34_113] : memref<72xf32, #tpu.memory_space<smem>>
    %614 = vector.broadcast %613 : f32 to vector<16x256xf32>
    %615 = arith.mulf %614, %341 : vector<16x256xf32>
    %616 = arith.addf %612, %615 : vector<16x256xf32>
    %c43_114 = arith.constant 43 : index
    %617 = memref.load %arg8[%c43_114] : memref<72xf32, #tpu.memory_space<smem>>
    %618 = vector.broadcast %617 : f32 to vector<16x256xf32>
    %619 = arith.mulf %618, %346 : vector<16x256xf32>
    %620 = arith.addf %616, %619 : vector<16x256xf32>
    %c52_115 = arith.constant 52 : index
    %621 = memref.load %arg8[%c52_115] : memref<72xf32, #tpu.memory_space<smem>>
    %622 = vector.broadcast %621 : f32 to vector<16x256xf32>
    %623 = arith.mulf %622, %351 : vector<16x256xf32>
    %624 = arith.addf %620, %623 : vector<16x256xf32>
    %c61_116 = arith.constant 61 : index
    %625 = memref.load %arg8[%c61_116] : memref<72xf32, #tpu.memory_space<smem>>
    %626 = vector.broadcast %625 : f32 to vector<16x256xf32>
    %627 = arith.mulf %626, %356 : vector<16x256xf32>
    %628 = arith.addf %624, %627 : vector<16x256xf32>
    %c70_117 = arith.constant 70 : index
    %629 = memref.load %arg8[%c70_117] : memref<72xf32, #tpu.memory_space<smem>>
    %630 = vector.broadcast %629 : f32 to vector<16x256xf32>
    %631 = arith.mulf %630, %361 : vector<16x256xf32>
    %632 = arith.addf %628, %631 : vector<16x256xf32>
    %633 = arith.addf %601, %632 : vector<16x256xf32>
    %c8_118 = arith.constant 8 : index
    %634 = memref.load %arg8[%c8_118] : memref<72xf32, #tpu.memory_space<smem>>
    %635 = vector.broadcast %634 : f32 to vector<16x256xf32>
    %636 = arith.mulf %635, %326 : vector<16x256xf32>
    %c17_119 = arith.constant 17 : index
    %637 = memref.load %arg8[%c17_119] : memref<72xf32, #tpu.memory_space<smem>>
    %638 = vector.broadcast %637 : f32 to vector<16x256xf32>
    %639 = arith.mulf %638, %331 : vector<16x256xf32>
    %640 = arith.addf %636, %639 : vector<16x256xf32>
    %c26_120 = arith.constant 26 : index
    %641 = memref.load %arg8[%c26_120] : memref<72xf32, #tpu.memory_space<smem>>
    %642 = vector.broadcast %641 : f32 to vector<16x256xf32>
    %643 = arith.mulf %642, %336 : vector<16x256xf32>
    %644 = arith.addf %640, %643 : vector<16x256xf32>
    %c35_121 = arith.constant 35 : index
    %645 = memref.load %arg8[%c35_121] : memref<72xf32, #tpu.memory_space<smem>>
    %646 = vector.broadcast %645 : f32 to vector<16x256xf32>
    %647 = arith.mulf %646, %341 : vector<16x256xf32>
    %648 = arith.addf %644, %647 : vector<16x256xf32>
    %c44_122 = arith.constant 44 : index
    %649 = memref.load %arg8[%c44_122] : memref<72xf32, #tpu.memory_space<smem>>
    %650 = vector.broadcast %649 : f32 to vector<16x256xf32>
    %651 = arith.mulf %650, %346 : vector<16x256xf32>
    %652 = arith.addf %648, %651 : vector<16x256xf32>
    %c53_123 = arith.constant 53 : index
    %653 = memref.load %arg8[%c53_123] : memref<72xf32, #tpu.memory_space<smem>>
    %654 = vector.broadcast %653 : f32 to vector<16x256xf32>
    %655 = arith.mulf %654, %351 : vector<16x256xf32>
    %656 = arith.addf %652, %655 : vector<16x256xf32>
    %c62_124 = arith.constant 62 : index
    %657 = memref.load %arg8[%c62_124] : memref<72xf32, #tpu.memory_space<smem>>
    %658 = vector.broadcast %657 : f32 to vector<16x256xf32>
    %659 = arith.mulf %658, %356 : vector<16x256xf32>
    %660 = arith.addf %656, %659 : vector<16x256xf32>
    %c71_125 = arith.constant 71 : index
    %661 = memref.load %arg8[%c71_125] : memref<72xf32, #tpu.memory_space<smem>>
    %662 = vector.broadcast %661 : f32 to vector<16x256xf32>
    %663 = arith.mulf %662, %361 : vector<16x256xf32>
    %664 = arith.addf %660, %663 : vector<16x256xf32>
    %c255_i32_126 = arith.constant 255 : i32
    %665 = tpu.dynamic_rotate %664 by %c255_i32_126 dim 1 : vector<16x256xf32>, i32 -> vector<16x256xf32>
    %cst_127 = arith.constant 0.000000e+00 : f32
    %666 = vector.broadcast %cst_127 : f32 to vector<16x256xf32>
    %667 = arith.select %15, %665, %666 : vector<16x256xi1>, vector<16x256xf32>
    %668 = arith.addf %633, %667 : vector<16x256xf32>
    %c15_i32_128 = arith.constant 15 : i32
    %669 = tpu.dynamic_rotate %668 by %c15_i32_128 dim 0 : vector<16x256xf32>, i32 -> vector<16x256xf32>
    %cst_129 = arith.constant 0.000000e+00 : f32
    %670 = vector.broadcast %cst_129 : f32 to vector<16x256xf32>
    %671 = arith.select %11, %669, %670 : vector<16x256xi1>, vector<16x256xf32>
    %672 = arith.addf %567, %671 : vector<16x256xf32>
    %c0_130 = arith.constant 0 : index
    %673 = memref.load %arg9[%c0_130] : memref<1xf32, #tpu.memory_space<smem>>
    %674 = vector.broadcast %673 : f32 to vector<16x256xf32>
    %675 = arith.addf %672, %674 : vector<16x256xf32>
    %c0_131 = arith.constant 0 : index
    %c0_132 = arith.constant 0 : index
    %676 = vector.load %arg2[%c0_131, %c0_132] : memref<48x16xf32, #tpu.memory_space<vmem>>, vector<48x16xf32>
    %c0_133 = arith.constant 0 : index
    %c0_134 = arith.constant 0 : index
    %677 = vector.load %arg3[%c0_133, %c0_134] : memref<48x16xf32, #tpu.memory_space<vmem>>, vector<48x16xf32>
    %678 = tpu.concatenate %1, %675 in 1 : vector<16x256xf32>, vector<16x256xf32> -> vector<16x512xf32>
    %cst_135 = arith.constant dense<0.000000e+00> : vector<48x512xf32>
    %679 = tpu.matmul %676, %678, %cst_135 {dimension_numbers = #tpu.dot_dimension_numbers<[1], [0], [0], [1], [0, 0, 1, 1], [], []>} : vector<48x16xf32>, vector<16x512xf32>, vector<48x512xf32> -> vector<48x512xf32>
    %cst_136 = arith.constant dense<0.000000e+00> : vector<48x256xf32>
    %680 = tpu.matmul %677, %5, %cst_136 {dimension_numbers = #tpu.dot_dimension_numbers<[1], [0], [0], [1], [0, 0, 1, 1], [], []>} : vector<48x16xf32>, vector<16x256xf32>, vector<48x256xf32> -> vector<48x256xf32>
    %681 = vector.extract_strided_slice %679 {offsets = [0, 0], sizes = [48, 256], strides = [1, 1]} : vector<48x512xf32> to vector<48x256xf32>
    %682 = vector.extract_strided_slice %679 {offsets = [0, 256], sizes = [48, 256], strides = [1, 1]} : vector<48x512xf32> to vector<48x256xf32>
    %c0_137 = arith.constant 0 : index
    %c0_138 = arith.constant 0 : index
    %683 = vector.load %arg4[%c0_137, %c0_138] : memref<256x1024xf32, #tpu.memory_space<vmem>>, vector<256x1024xf32>
    %c0_139 = arith.constant 0 : index
    %c0_140 = arith.constant 0 : index
    %684 = vector.load %arg5[%c0_139, %c0_140] : memref<256x1024xf32, #tpu.memory_space<vmem>>, vector<256x1024xf32>
    %cst_141 = arith.constant dense<0.000000e+00> : vector<48x1024xf32>
    %685 = tpu.matmul %681, %683, %cst_141 {dimension_numbers = #tpu.dot_dimension_numbers<[1], [0], [0], [1], [0, 0, 1, 1], [], []>} : vector<48x256xf32>, vector<256x1024xf32>, vector<48x1024xf32> -> vector<48x1024xf32>
    %c0_142 = arith.constant 0 : index
    %c0_143 = arith.constant 0 : index
    %c0_144 = arith.constant 0 : index
    %686 = vector.load %arg10[%c0_142, %c0_143, %c0_144] : memref<1x48x3072xf32, #tpu.memory_space<vmem>>, vector<1x48x1024xf32>
    %687 = vector.shape_cast %686 : vector<1x48x1024xf32> to vector<48x1024xf32>
    %688 = vector.shape_cast %685 : vector<48x1024xf32> to vector<1x48x1024xf32>
    tpu.vector_store %arg10[%c0_142, %c0_143, %c0_144], %688 {strides = array<i32>} : memref<1x48x3072xf32, #tpu.memory_space<vmem>>, vector<1x48x1024xf32>,
    %cst_145 = arith.constant dense<0.000000e+00> : vector<48x1024xf32>
    %689 = tpu.matmul %682, %683, %cst_145 {dimension_numbers = #tpu.dot_dimension_numbers<[1], [0], [0], [1], [0, 0, 1, 1], [], []>} : vector<48x256xf32>, vector<256x1024xf32>, vector<48x1024xf32> -> vector<48x1024xf32>
    %c0_146 = arith.constant 0 : index
    %c0_147 = arith.constant 0 : index
    %c1024 = arith.constant 1024 : index
    %690 = vector.load %arg10[%c0_146, %c0_147, %c1024] : memref<1x48x3072xf32, #tpu.memory_space<vmem>>, vector<1x48x1024xf32>
    %691 = vector.shape_cast %690 : vector<1x48x1024xf32> to vector<48x1024xf32>
    %692 = vector.shape_cast %689 : vector<48x1024xf32> to vector<1x48x1024xf32>
    tpu.vector_store %arg10[%c0_146, %c0_147, %c1024], %692 {strides = array<i32>} : memref<1x48x3072xf32, #tpu.memory_space<vmem>>, vector<1x48x1024xf32>,
    %cst_148 = arith.constant dense<0.000000e+00> : vector<48x1024xf32>
    %693 = tpu.matmul %680, %684, %cst_148 {dimension_numbers = #tpu.dot_dimension_numbers<[1], [0], [0], [1], [0, 0, 1, 1], [], []>} : vector<48x256xf32>, vector<256x1024xf32>, vector<48x1024xf32> -> vector<48x1024xf32>
    %c0_149 = arith.constant 0 : index
    %c0_150 = arith.constant 0 : index
    %c2048 = arith.constant 2048 : index
    %694 = vector.load %arg10[%c0_149, %c0_150, %c2048] : memref<1x48x3072xf32, #tpu.memory_space<vmem>>, vector<1x48x1024xf32>
    %695 = vector.shape_cast %694 : vector<1x48x1024xf32> to vector<48x1024xf32>
    %696 = vector.shape_cast %693 : vector<48x1024xf32> to vector<1x48x1024xf32>
    tpu.vector_store %arg10[%c0_149, %c0_150, %c2048], %696 {strides = array<i32>} : memref<1x48x3072xf32, #tpu.memory_space<vmem>>, vector<1x48x1024xf32>,
    return
  }
  func.func @transform_0(%arg0: i32) -> (i32, i32, i32) {
    %c0_i32 = arith.constant 0 : i32
    %c0_i32_0 = arith.constant 0 : i32
    %c0_i32_1 = arith.constant 0 : i32
    return %c0_i32, %c0_i32_0, %arg0 : i32, i32, i32
  }
  func.func @transform_1(%arg0: i32) -> (i32, i32) {
    %c0_i32 = arith.constant 0 : i32
    %c0_i32_0 = arith.constant 0 : i32
    %c0_i32_1 = arith.constant 0 : i32
    return %c0_i32, %c0_i32_0 : i32, i32
  }
  func.func @transform_2(%arg0: i32) -> (i32, i32) {
    %c0_i32 = arith.constant 0 : i32
    %c0_i32_0 = arith.constant 0 : i32
    %c0_i32_1 = arith.constant 0 : i32
    return %c0_i32, %c0_i32_0 : i32, i32
  }
  func.func @transform_3(%arg0: i32) -> (i32, i32) {
    %c0_i32 = arith.constant 0 : i32
    %c0_i32_0 = arith.constant 0 : i32
    %c0_i32_1 = arith.constant 0 : i32
    return %c0_i32, %c0_i32_0 : i32, i32
  }
  func.func @transform_4(%arg0: i32) -> (i32, i32) {
    %c0_i32 = arith.constant 0 : i32
    %c0_i32_0 = arith.constant 0 : i32
    %c0_i32_1 = arith.constant 0 : i32
    return %c0_i32, %c0_i32_0 : i32, i32
  }
  func.func @transform_5(%arg0: i32) -> i32 {
    %c0_i32 = arith.constant 0 : i32
    %c0_i32_0 = arith.constant 0 : i32
    return %c0_i32 : i32
  }
  func.func @transform_6(%arg0: i32) -> i32 {
    %c0_i32 = arith.constant 0 : i32
    %c0_i32_0 = arith.constant 0 : i32
    return %c0_i32 : i32
  }
  func.func @transform_7(%arg0: i32) -> i32 {
    %c0_i32 = arith.constant 0 : i32
    %c0_i32_0 = arith.constant 0 : i32
    return %c0_i32 : i32
  }
  func.func @transform_8(%arg0: i32) -> i32 {
    %c0_i32 = arith.constant 0 : i32
    %c0_i32_0 = arith.constant 0 : i32
    return %c0_i32 : i32
  }
  func.func @transform_9(%arg0: i32) -> (i32, i32, i32) {
    %c0_i32 = arith.constant 0 : i32
    %c0_i32_0 = arith.constant 0 : i32
    %c0_i32_1 = arith.constant 0 : i32
    return %arg0, %c0_i32, %c0_i32_0 : i32, i32, i32
  }
}

</mosaic_0001>

<bundles_post_ra>
// kernel: tpu_custom_call.1
= control target key start
LH: loop header
LB: loop body
LE: loop exit
PB: predicated region body
PF: predicated region fallthrough
CT: control target
= control target key end

     0   :  { %15 = vsyncpa [#allocation4], 0  ;;  %s8414_s0 = inlined_call_operand.vmem [shape: f32[3,16,256], index: 0, kind: input, shape index: {}]   ;;  %s8415_s1 = inlined_call_operand.vmem [shape: f32[48,16], index: 1, kind: input, shape index: {}]   ;;  %s8416_s2 = inlined_call_operand.vmem [shape: f32[48,16], index: 2, kind: input, shape index: {}]   ;;  %s8417_s3 = inlined_call_operand.hbm [shape: f32[256,1024], index: 3, kind: input, shape index: {}]   ;;  %s8418_s4 = inlined_call_operand.hbm [shape: f32[256,1024], index: 4, kind: input, shape index: {}]   ;;  %s8419_s5 = inlined_call_operand.vmem [shape: f32[72], index: 5, kind: input, shape index: {}]   ;;  %s8420_s6 = inlined_call_operand.vmem [shape: f32[8], index: 6, kind: input, shape index: {}]   ;;  %s8421_s7 = inlined_call_operand.vmem [shape: f32[72], index: 7, kind: input, shape index: {}]   ;;  %s8422_s8 = inlined_call_operand.<no memory space> [shape: f32[1], index: 8, kind: input, shape index: {}]   ;;  %s8423_s9 = inlined_call_operand.hbm [shape: f32[1,48,3072], index: 9, kind: output, shape index: {}]  }
   0x1   :  { %16 = vsyncpa [#allocation8], 0 }
   0x2   :  { %17 = vsyncpa [#allocation6], 0 }
   0x3   :  { %18 = vsyncpa [#allocation11], 0  ;;  %s66_s11 = sshll.u32 %s8420_s6, 4  ;;  %s67_s11 = int_to_ptr.vmem [resolvable:$true] %s66_s11 }
   0x4   :  { %19 = vsyncpa [#allocation5], 0  ;;  %s30_s14 = sshll.u32 %s8417_s3, 4  ;;  %s5052_s15 = smov [#allocation10]   ;;  %s31_s14 = int_to_ptr.hbm [resolvable:$true] %s30_s14 }
   0x5   :  { %69 = dma.vmem_to_smem %s67_s11, 16, %s5052_s15, [#allocation11]  }
   0x6   :  { %s5053_s16 = smov [#allocation3]   ;;  %s5054_s18 = smov 1024  }
   0x7   :  { %s32_s17 = sshll.u32 %s5053_s16, 4  ;;  %s5055_s19 = smov 64   ;;  %s33_s17 = int_to_ptr.vmem [resolvable:$true] %s32_s17 }
   0x8   :  { %38 = dma.hbm_to_vmem [thread:$0]  %s31_s14, 32768, %s33_s17, [#allocation4], %s5054_s18, %s5054_s18, %s5055_s19  }
   0x9   :  { %s43_s22 = sshll.u32 %s8418_s4, 4  ;;  %s5056_s6 = smov [#allocation7]   ;;  %s44_s22 = int_to_ptr.hbm [resolvable:$true] %s43_s22 }
   0xa   :  { %s45_s23 = sshll.u32 %s5056_s6, 4  ;;  %s57_s3 = sshll.u32 %s8419_s5, 4  ;;  %s46_s23 = int_to_ptr.vmem [resolvable:$true] %s45_s23  ;;  %s58_s3 = int_to_ptr.vmem [resolvable:$true] %s57_s3 }
   0xb   :  { %51 = dma.hbm_to_vmem [thread:$0]  %s44_s22, 32768, %s46_s23, [#allocation8], %s5054_s18, %s5054_s18, %s5055_s19  }
   0xc   :  { %s5057_s26 = smov [#allocation9]   ;;  %s75_s29 = sshll.u32 %s8421_s7, 4  ;;  %s76_s29 = int_to_ptr.vmem [resolvable:$true] %s75_s29 }
   0xd   :  { %60 = dma.vmem_to_smem %s58_s3, 16, %s5057_s26, [#allocation6]  }
   0xe   :  { %s5058_s30 = smov [#allocation12]  }
   0xf   :  { %78 = dma.vmem_to_smem %s76_s29, 16, %s5058_s30, [#allocation11]  }
  0x10   :  { %5042 = dma.done.wait [#allocation4], 32768  }
  0x11   :  { %5043 = vsyncadd [#allocation4], 4294934528 }
  0x12   :  { %5044 = dma.done.wait [#allocation8], 32768  }
  0x13   :  { %5045 = vsyncadd [#allocation8], 4294934528 }
  0x14   :  { %5046 = dma.done.wait [#allocation6], 16  }
  0x15   :  { %5047 = vsyncadd [#allocation6], 4294967280 }
  0x16   :  { %5048 = dma.done.wait [#allocation11], 32  }
  0x17   :  { %5049 = vsyncadd [#allocation11], 4294967264 }
  0x18   :  { %101 = sfence }
  0x19   :  { %v5132_v0 = vld [vmem:[%s8414_s0 + $0x28] sm:$0xff]  ;;  %v5137_v1 = vld [vmem:[%s8414_s0 + $0x38] sm:$0xff]  ;;  %v116_v2 = vlaneseq  ;;  %v5142_v3 = vld [vmem:[%s8414_s0 + $0x20] sm:$0xff]  ;;  %s5059_s15 = smov 1   ;;  %s5060_s16 = smov 127   ;;  %v8645_v38 = vmov 0 }
  0x1a   :  { %8634 = vst [vmem:[#allocation19_spill] sm:$0xff] %v5132_v0  ;;  %v133_v4 = vrot.slane %v5132_v0, 7  ;;  %v135_v5 = vrot.slane %v5137_v1, 7  ;;  %v5149_v6 = vld [vmem:[%s8414_s0 + $0x30] sm:$0xff]  ;;  %v132_v7 = vrot.slane %v5142_v3, 7  ;;  %v659_v16 = vrot.slane %v5142_v3, 1 }
  0x1b   :  { %8635 = vst [vmem:[#allocation20_spill] sm:$0xff] %v5137_v1  ;;  %v5153_v8 = vshrl.u32 %v116_v2, 7  ;;  %v134_v9 = vrot.slane %v5149_v6, 7  ;;  %v661_v17 = vrot.slane %v5149_v6, 1  ;;  %v660_v21 = vrot.slane %v5132_v0, 1  ;;  %s162_s17 = sld [smem:[#allocation9]] }
  0x1c   :  { %8636 = vst [vmem:[#allocation21_spill] sm:$0xff] %v5142_v3  ;;  %v662_v22 = vrot.slane %v5137_v1, 1  ;;  %s4491_s18 = sld [smem:[#allocation9 + $0x9]]  ;;  %v5262_v27 = vand.u32 127, %v116_v2  ;;  %v8648_v39 = vmov 0  ;;  %vm1878_vm10 = vcmask 130048  }
  0x1d   :  { %8637 = vst [vmem:[#allocation22_spill] sm:$0xff] %v5149_v6  ;;  %vm126_vm0 = vcmp.ge.s32.totalorder %v5153_v8, 1  ;;  %vm136_vm1 = vcmp.lt.s32.totalorder %v5153_v8, 1  ;;  %vm663_vm2 = vcmp.lt.s32.totalorder %v5153_v8, 7  ;;  %v5212_v18 = vadd.s32 8, %v5153_v8  ;;  %s4492_s19 = sld [smem:[#allocation9 + $0x12]] }
  0x1e   :  { %8638 = vst [vmem:[#allocation23_spill] sm:$0xff] %v5153_v8  ;;  %v140_v10 = vsel %vm136_vm1, %v135_v5, %v133_v4  ;;  %v139_v11 = vsel %vm136_vm1, %v134_v9, %v132_v7  ;;  %v5178_v14 = vsel %vm136_vm1, %v133_v4, %v135_v5  ;;  %v5182_v15 = vsel %vm136_vm1, %v132_v7, %v134_v9  ;;  %s4493_s20 = sld [smem:[#allocation9 + $0x1b]] }
  0x1f   :  { %v5164_v12 = vsel %vm126_vm0, %v140_v10, 0.0  ;;  %v5168_v13 = vsel %vm126_vm0, %v139_v11, 0.0  ;;  %8639 = vst [vmem:[#allocation24_spill] sm:$0xff] %v5212_v18  ;;  %v5216_v19 = vsel %vm663_vm2, %v659_v16, %v661_v17  ;;  %v666_v20 = vsel %vm663_vm2, %v661_v17, %v659_v16  ;;  %s5255_s21 = sld [smem:[#allocation9 + $0x24]] }
  0x20   :  { %149 = vrot.lane.b32.xlu1 %v5164_v12, %s5059_s15  ;;  %145 = vrot.lane.b32.xlu0 %v5168_v13, %s5059_s15  ;;  %8640 = vst [vmem:[#allocation25_spill] sm:$0xff] %v5216_v19  ;;  %vm125_vm3 = vcmp.lt.s32.totalorder %v5212_v18, 15  ;;  %v667_v24 = vsel %vm663_vm2, %v662_v22, %v660_v21  ;;  %v5241_v26 = vsel %vm663_vm2, %v660_v21, %v662_v22  ;;  %s5257_s22 = sld [smem:[#allocation9 + $0x2d]]  ;;  %v5265_v28 = vadd.s32 128, %v5262_v27 }
  0x21   :  { %290 = vrot.lane.b32.xlu2 %v5168_v13, %s5060_s16  ;;  %v5229_v23 = vsel %vm125_vm3, %v666_v20, 0.0  ;;  %v5237_v25 = vsel %vm125_vm3, %v667_v24, 0.0  ;;  %8643 = vst [vmem:[#allocation28_spill] sm:$0xff] %v5241_v26  ;;  %s5259_s6 = sld [smem:[#allocation9 + $0x36]]  ;;  %v8425_v29 = vand.u32 15, %v5262_v27  ;;  %v5269_v31 = vstv %s162_s17 }
  0x22   :  { %8641 = vst [vmem:[#allocation26_spill] sm:$0xff] %v5229_v23  ;;  %s4498_s23 = sld [smem:[#allocation9 + $0x1]]  ;;  %v8424_v30 = vand.u32 15, %v5265_v28  ;;  %v5271_v32 = vstv %s4491_s18  ;;  %vm153_vm4 = vcmp.lt.s32.totalorder %v5262_v27, 1  ;;  %vm298_vm7 = vcmp.lt.s32.totalorder %v5262_v27, 127 }
  0x23   :  { %8642 = vst [vmem:[#allocation27_spill] sm:$0xff] %v5237_v25  ;;  %s4499_s24 = sld [smem:[#allocation9 + $0xa]]  ;;  %v5273_v33 = vstv %s4492_s19  ;;  %vm5284_vm5 = vcmp.ge.s32.totalorder %v8425_v29, 1 }
  0x24   :  { %8644 = vst [vmem:[#allocation29_spill] sm:$0xff] %v5262_v27  ;;  %s4500_s25 = sld [smem:[#allocation9 + $0x13]]  ;;  %v5278_v34 = vstv %s4493_s20  ;;  %v8646_v38 = vsel %vm5284_vm5, 4294967295, %v8645_v38  ;;  %vm5290_vm6 = vcmp.ge.s32.totalorder %v8424_v30, 1 }
  0x25   :  { %s4501_s3 = sld [smem:[#allocation9 + $0x1c]]  ;;  %8647 = vst [vmem:[#allocation30_spill] sm:$0xff] %v8646_v38  ;;  %v8649_v39 = vsel %vm5290_vm6, 4294967295, %v8648_v39  ;;  %v5297_v44 = vstv %s5255_s21 }
  0x26   :  { %s4502_s26 = sld [smem:[#allocation9 + $0x25]]  ;;  %8650 = vst [vmem:[#allocation31_spill] sm:$0xff] %v8649_v39  ;;  %v5300_v45 = vstv %s5257_s22 }
  0x27   :  { %s4503_s27 = sld [smem:[#allocation9 + $0x2e]]  ;;  %v5303_v46 = vstv %s5259_s6 }
  0x28   :  { %151 = vrot.lane.b32.xlu1 %v5178_v14, %s5059_s15  ;;  %147 = vrot.lane.b32.xlu0 %v5182_v15, %s5059_s15  ;;  %s4504_s28 = sld [smem:[#allocation9 + $0x37]]  ;;  %v211_v35 = vstv %s4498_s23 }
  0x29   :  { %292 = vrot.lane.b32.xlu2 %v5182_v15, %s5060_s16  ;;  %s4505_s29 = sld [smem:[#allocation9 + $0x40]]  ;;  %v221_v36 = vstv %s4499_s24  ;;  %v5310_v49 = vmul.f32 %v211_v35, %v5164_v12  ;;  %v212_v57 = vmul.f32 %v211_v35, %v5168_v13  ;;  %v5362_v4 = vmul.f32 %v211_v35, %v5178_v14 }
  0x2a   :  { %s4497_s30 = sld [smem:[#allocation9 + $0x3f]]  ;;  %v231_v37 = vstv %s4500_s25  ;;  %v5313_v50 = vmul.f32 %v221_v36, %v5164_v12  ;;  %v222_v58 = vmul.f32 %v221_v36, %v5168_v13  ;;  %v5365_v5 = vmul.f32 %v221_v36, %v5178_v14 }
  0x2b   :  { %s5275_s4 = sld [smem:[#allocation9 + $0x2]]  ;;  %v241_v40 = vstv %s4501_s3  ;;  %v5316_v51 = vmul.f32 %v231_v37, %v5164_v12  ;;  %v5340_v59 = vmul.f32 %v231_v37, %v5168_v13  ;;  %v5368_v7 = vmul.f32 %v231_v37, %v5178_v14 }
  0x2c   :  { %s5280_s5 = sld [smem:[#allocation9 + $0xb]]  ;;  %v251_v41 = vstv %s4502_s26  ;;  %v5321_v52 = vmul.f32 %v241_v40, %v5164_v12  ;;  %v5345_v60 = vmul.f32 %v241_v40, %v5168_v13  ;;  %v5371_v9 = vmul.f32 %v241_v40, %v5178_v14 }
  0x2d   :  { %v261_v42 = vstv %s4503_s27  ;;  %s5294_s10 = sld [smem:[#allocation9 + $0x14]]  ;;  %v5324_v53 = vmul.f32 %v251_v41, %v5164_v12  ;;  %v5348_v61 = vmul.f32 %v251_v41, %v5168_v13  ;;  %v5374_v10 = vmul.f32 %v251_v41, %v5178_v14 }
  0x2e   :  { %v271_v43 = vstv %s4504_s28  ;;  %s5305_s11 = sld [smem:[#allocation9 + $0x1d]]  ;;  %v5327_v54 = vmul.f32 %v261_v42, %v5164_v12  ;;  %v5351_v62 = vmul.f32 %v261_v42, %v5168_v13  ;;  %v5377_v11 = vmul.f32 %v261_v42, %v5178_v14 }
  0x2f   :  { %v281_v47 = vstv %s4505_s29  ;;  %s5318_s7 = sld [smem:[#allocation9 + $0x26]]  ;;  %v5330_v55 = vmul.f32 %v271_v43, %v5164_v12  ;;  %v5354_v63 = vmul.f32 %v271_v43, %v5168_v13  ;;  %v5386_v16 = vmul.f32 %v211_v35, %v5182_v15 }
  0x30   :  { %296 = vrot.lane.b32.xlu1 %v5178_v14, %s5060_s16  ;;  %294 = vrot.lane.b32.xlu0 %v5164_v12, %s5060_s16  ;;  %v5307_v48 = vstv %s4497_s30  ;;  %s5332_s12 = sld [smem:[#allocation9 + $0x2f]]  ;;  %v5335_v56 = vmul.f32 %v281_v47, %v5164_v12  ;;  %v5359_v2 = vmul.f32 %v281_v47, %v5168_v13  ;;  %8651 = vst [vmem:[#allocation32_spill] sm:$0xff] %v5377_v11 }
  0x31   :  { %387 = vrot.lane.b32.xlu2 %v5142_v3, %s5059_s15  ;;  %s5342_s13 = sld [smem:[#allocation9 + $0x38]]  ;;  %v5380_v12 = vmul.f32 %v271_v43, %v5178_v14  ;;  %v5383_v13 = vmul.f32 %v281_v47, %v5178_v14  ;;  %v5389_v17 = vmul.f32 %v221_v36, %v5182_v15  ;;  %v5392_v20 = vmul.f32 %v231_v37, %v5182_v15 }
  0x32   :  { %s5356_s14 = sld [smem:[#allocation9 + $0x41]]  ;;  %v5395_v14 = vmul.f32 %v241_v40, %v5182_v15  ;;  %v5398_v24 = vmul.f32 %v251_v41, %v5182_v15  ;;  %v5401_v35 = vmul.f32 %v261_v42, %v5182_v15  ;;  %v5404_v36 = vmul.f32 %v271_v43, %v5182_v15 }
  0x33   :  { %8652 = vst [vmem:[#allocation33_spill] sm:$0xff] %v5380_v12  ;;  %v5411_v29 = vmul.f32 %v281_v47, %v5182_v15  ;;  %v5414_v40 = vstv %s5275_s4  ;;  %v5421_v43 = vstv %s5280_s5  ;;  %v5424_v18 = vstv %s5294_s10  ;;  %s5438_s17 = sld [smem:[#allocation9 + $0x3]] }
  0x34   :  { %8653 = vst [vmem:[#allocation34_spill] sm:$0xff] %v5383_v13  ;;  %v5427_v8 = vstv %s5305_s11  ;;  %s5446_s18 = sld [smem:[#allocation9 + $0xc]] }
  0x35   :  { %8654 = vst [vmem:[#allocation35_spill] sm:$0xff] %v5401_v35  ;;  %s5452_s19 = sld [smem:[#allocation9 + $0x15]] }
  0x36   :  { %8655 = vst [vmem:[#allocation36_spill] sm:$0xff] %v5404_v36  ;;  %s5460_s20 = sld [smem:[#allocation9 + $0x1e]] }
  0x37   :  { %8656 = vst [vmem:[#allocation37_spill] sm:$0xff] %v5411_v29  ;;  %v5436_v15 = vstv %s5342_s13  ;;  %s5635_s21 = sld [smem:[#allocation9 + $0x27]] }
  0x38   :  { %391 = vrot.lane.b32.xlu1 %v5132_v0, %s5059_s15  ;;  %389 = vrot.lane.b32.xlu0 %v5149_v6, %s5059_s15  ;;  %8657 = vst [vmem:[#allocation38_spill] sm:$0xff] %v5414_v40  ;;  %s5649_s22 = sld [smem:[#allocation9 + $0x30]] }
  0x39   :  { %393 = vrot.lane.b32.xlu2 %v5137_v1, %s5059_s15  ;;  %8658 = vst [vmem:[#allocation39_spill] sm:$0xff] %v5421_v43  ;;  %s5660_s6 = sld [smem:[#allocation9 + $0x39]] }
  0x3a   :  { %8659 = vst [vmem:[#allocation40_spill] sm:$0xff] %v5424_v18  ;;  %s5666_s23 = sld [smem:[#allocation9 + $0x42]] }
  0x3b   :  { %8660 = vst [vmem:[#allocation41_spill] sm:$0xff] %v5427_v8  ;;  %s5762_s24 = sld [smem:[#allocation9 + $0x4]] }
  0x3c   :  { %8663 = vst [vmem:[#allocation44_spill] sm:$0xff] %v5436_v15  ;;  %s5772_s25 = sld [smem:[#allocation9 + $0xd]] }
  0x3d   :  { %s5782_s3 = sld [smem:[#allocation9 + $0x16]] }
  0x3e   :  { %s5792_s26 = sld [smem:[#allocation9 + $0x1f]] }
  0x3f   :  { %s5802_s27 = sld [smem:[#allocation9 + $0x28]] }
  0x40   :  { %565 = vrot.lane.b32.xlu1 %v5149_v6, %s5060_s16  ;;  %563 = vrot.lane.b32.xlu0 %v5142_v3, %s5060_s16  ;;  %s5816_s28 = sld [smem:[#allocation9 + $0x31]] }
  0x41   :  { %567 = vrot.lane.b32.xlu2 %v5132_v0, %s5060_s16  ;;  %s5831_s29 = sld [smem:[#allocation9 + $0x3a]] }
  0x42   :  { %s5842_s30 = sld [smem:[#allocation9 + $0x43]] }
  0x43   :  { %s5856_s4 = sld [smem:[#allocation9 + $0x5]] }
  0x44   :  { %s5870_s5 = sld [smem:[#allocation9 + $0xe]] }
  0x45   :  { %s5885_s10 = sld [smem:[#allocation9 + $0x17]] }
  0x46   :  { %s5899_s11 = sld [smem:[#allocation9 + $0x20]] }
  0x47   :  { %s5927_s13 = sld [smem:[#allocation9 + $0x3b]] }
  0x48   :  { %672 = vrot.lane.b32.xlu1 %v5216_v19, %s5059_s15  ;;  %569 = vrot.lane.b32.xlu0 %v5137_v1, %s5060_s16 }
  0x49   :  { %674 = vrot.lane.b32.xlu2 %v5229_v23, %s5059_s15 }
  0x50   :  { %678 = vrot.lane.b32.xlu1 %v5237_v25, %s5059_s15  ;;  %676 = vrot.lane.b32.xlu0 %v5241_v26, %s5059_s15 }
  0x51   :  { %848 = vrot.lane.b32.xlu2 %v5216_v19, %s5060_s16 }
  0x58   :  { %852 = vrot.lane.b32.xlu1 %v5241_v26, %s5060_s16  ;;  %850 = vrot.lane.b32.xlu0 %v5229_v23, %s5060_s16  ;;  %v5430_v23 = vstv %s5318_s7  ;;  %s5909_s7 = sld [smem:[#allocation9 + $0x29]] }
  0x59   :  { %854 = vrot.lane.b32.xlu2 %v5237_v25, %s5060_s16  ;;  %8661 = vst [vmem:[#allocation42_spill] sm:$0xff] %v5430_v23 }
  0x7b   :  { %v5454_v1 = vpop.permute.xlu2 %290 }
  0x7c   :  { %8665 = vst [vmem:[#allocation46_spill] sm:$0xff] %v5454_v1 }
  0x92   :  { %v150_v21 = vpop.permute.xlu1 %149  ;;  %v146_v22 = vpop.permute.xlu0 %145 }
  0x93   :  { %v154_v37 = vsel %vm153_vm4, %v146_v22, %v150_v21  ;;  %v156_v30 = vsel %vm153_vm4, %v150_v21, %v146_v22  ;;  %v5433_v21 = vstv %s5332_s12  ;;  %s5919_s12 = sld [smem:[#allocation9 + $0x32]] }
  0x94   :  { %v158_v41 = vsel %vm5284_vm5, %v156_v30, 0.0  ;;  %v159_v42 = vsel %vm5290_vm6, %v154_v37, 0.0  ;;  %8662 = vst [vmem:[#allocation43_spill] sm:$0xff] %v5433_v21  ;;  %v5444_v37 = vstv %s5356_s14  ;;  %s5933_s14 = sld [smem:[#allocation9 + $0x44]] }
  0x95   :  { %v164_v47 = vmul.f32 %v5269_v31, %v158_v41  ;;  %v165_v30 = vmul.f32 %v5269_v31, %v159_v42  ;;  %v170_v22 = vmul.f32 %v5271_v32, %v158_v41  ;;  %8664 = vst [vmem:[#allocation45_spill] sm:$0xff] %v5444_v37  ;;  %v171_v25 = vmul.f32 %v5271_v32, %v159_v42 }
  0x96   :  { %v176_v19 = vmul.f32 %v5273_v33, %v158_v41  ;;  %v177_v26 = vmul.f32 %v5273_v33, %v159_v42  ;;  %v182_v6 = vmul.f32 %v5278_v34, %v158_v41  ;;  %v183_v0 = vmul.f32 %v5278_v34, %v159_v42 }
  0x97   :  { %v188_v3 = vmul.f32 %v5297_v44, %v158_v41  ;;  %v189_v37 = vmul.f32 %v5297_v44, %v159_v42  ;;  %v194_v15 = vmul.f32 %v5300_v45, %v158_v41  ;;  %v195_v21 = vmul.f32 %v5300_v45, %v159_v42 }
  0x98   :  { %v200_v23 = vmul.f32 %v5303_v46, %v158_v41  ;;  %v201_v13 = vmul.f32 %v5303_v46, %v159_v42  ;;  %v206_v29 = vmul.f32 %v5307_v48, %v158_v41  ;;  %v207_v12 = vmul.f32 %v5307_v48, %v159_v42 }
  0x99   :  { %v5467_v8 = vadd.f32 %v212_v57, %v164_v47  ;;  %v5470_v18 = vadd.f32 %v5310_v49, %v165_v30  ;;  %v5472_v43 = vadd.f32 %v222_v58, %v170_v22  ;;  %v5475_v11 = vadd.f32 %v5313_v50, %v171_v25 }
  0x9a   :  { %v152_v40 = vpop.permute.xlu1 %151  ;;  %v148_v36 = vpop.permute.xlu0 %147  ;;  %v5478_v1 = vadd.f32 %v5340_v59, %v176_v19  ;;  %v5481_v35 = vadd.f32 %v5316_v51, %v177_v26  ;;  %v5484_v41 = vadd.f32 %v5345_v60, %v182_v6  ;;  %v5488_v49 = vadd.f32 %v5321_v52, %v183_v0 }
  0x9b   :  { %v5491_v57 = vadd.f32 %v5348_v61, %v188_v3  ;;  %v5494_v19 = vadd.f32 %v5324_v53, %v189_v37  ;;  %v5497_v25 = vadd.f32 %v5351_v62, %v194_v15  ;;  %v5500_v6 = vadd.f32 %v5327_v54, %v195_v21 }
  0x9c   :  { %v5503_v26 = vadd.f32 %v5354_v63, %v200_v23  ;;  %v155_v0 = vsel %vm153_vm4, %v148_v36, %v152_v40  ;;  %v157_v3 = vsel %vm153_vm4, %v152_v40, %v148_v36  ;;  %v8666_v50 = vand.u32 15, %v5262_v27  ;;  %v293_v40 = vpop.permute.xlu2 %292 }
  0x9d   :  { %v8667_v51 = vmov 0  ;;  %v8670_v52 = vand.u32 15, %v5265_v28  ;;  %v8671_v53 = vmov 0  ;;  %v5522_v23 = vadd.f32 %v5330_v55, %v201_v13 }
  0x9e   :  { %vm5511_vm8 = vcmp.lt.s32.totalorder %v8666_v50, 15  ;;  %v5525_v54 = vadd.f32 %v5359_v2, %v206_v29  ;;  %v160_v58 = vsel %vm5284_vm5, %v157_v3, 0.0  ;;  %v161_v59 = vsel %vm5290_vm6, %v155_v0, 0.0 }
  0x9f   :  { %v8668_v51 = vsel %vm5511_vm8, 4294967295, %v8667_v51  ;;  %vm5517_vm9 = vcmp.lt.s32.totalorder %v8670_v52, 15  ;;  %v5532_v60 = vadd.f32 %v5335_v56, %v207_v12  ;;  %v5535_v28 = vstv %s5438_s17  ;;  %s6057_s17 = sld [smem:[#allocation9 + $0x6]] }
  0xa0   :  { %8669 = vst [vmem:[#allocation47_spill] sm:$0xff] %v8668_v51  ;;  %v8672_v53 = vsel %vm5517_vm9, 4294967295, %v8671_v53  ;;  %v5538_v61 = vstv %s5446_s18  ;;  %v5541_v62 = vstv %s5452_s19  ;;  %v166_v55 = vmul.f32 %v5269_v31, %v160_v58  ;;  %s6067_s18 = sld [smem:[#allocation9 + $0xf]] }
  0xa1   :  { %8673 = vst [vmem:[#allocation48_spill] sm:$0xff] %v8672_v53  ;;  %v167_v29 = vmul.f32 %v5269_v31, %v161_v59  ;;  %v172_v63 = vmul.f32 %v5271_v32, %v160_v58  ;;  %v5547_v2 = vstv %s5460_s20  ;;  %v173_v13 = vmul.f32 %v5271_v32, %v161_v59  ;;  %s6077_s19 = sld [smem:[#allocation9 + $0x18]] }
  0xa2   :  { %8674 = vst [vmem:[#allocation49_spill] sm:$0xff] %v5541_v62  ;;  %v178_v36 = vmul.f32 %v5273_v33, %v160_v58  ;;  %v179_v56 = vmul.f32 %v5273_v33, %v161_v59  ;;  %v184_v12 = vmul.f32 %v5278_v34, %v160_v58  ;;  %v185_v42 = vmul.f32 %v5278_v34, %v161_v59  ;;  %v297_v3 = vpop.permute.xlu1 %296  ;;  %s6086_s20 = sld [smem:[#allocation9 + $0x21]] }
  0xa3   :  { %8675 = vst [vmem:[#allocation50_spill] sm:$0xff] %v5547_v2  ;;  %v190_v21 = vmul.f32 %v5297_v44, %v160_v58  ;;  %v191_v15 = vmul.f32 %v5297_v44, %v161_v59  ;;  %v196_v31 = vmul.f32 %v5300_v45, %v160_v58  ;;  %v197_v47 = vmul.f32 %v5300_v45, %v161_v59  ;;  %v295_v44 = vpop.permute.xlu0 %294 }
  0xa4   :  { %v202_v30 = vmul.f32 %v5303_v46, %v160_v58  ;;  %v203_v32 = vmul.f32 %v5303_v46, %v161_v59  ;;  %v208_v22 = vmul.f32 %v5307_v48, %v160_v58  ;;  %v209_v33 = vmul.f32 %v5307_v48, %v161_v59  ;;  %v8676_v59 = vld [vmem:[#allocation35_spill] sm:$0xff]  ;;  %v5618_v62 = vpop.permute.xlu2 %387 }
  0xa5   :  { %v218_v37 = vadd.f32 %v5386_v16, %v166_v55  ;;  %v219_v34 = vadd.f32 %v5362_v4, %v167_v29  ;;  %v228_v0 = vadd.f32 %v5389_v17, %v172_v63  ;;  %v229_v50 = vadd.f32 %v5365_v5, %v173_v13  ;;  %v8677_v55 = vld [vmem:[#allocation46_spill] sm:$0xff] }
  0xa6   :  { %v238_v45 = vadd.f32 %v5392_v20, %v178_v36  ;;  %v239_v52 = vadd.f32 %v5368_v7, %v179_v56  ;;  %v248_v46 = vadd.f32 %v5395_v14, %v184_v12  ;;  %v249_v58 = vadd.f32 %v5371_v9, %v185_v42  ;;  %v8678_v20 = vld [vmem:[#allocation32_spill] sm:$0xff]  ;;  %v8682_v13 = vld [vmem:[#allocation38_spill] sm:$0xff]  ;;  %v8683_v12 = vld [vmem:[#allocation39_spill] sm:$0xff] }
  0xa7   :  { %v258_v48 = vadd.f32 %v5398_v24, %v190_v21  ;;  %v259_v16 = vadd.f32 %v5374_v10, %v191_v15  ;;  %v268_v4 = vadd.f32 %v8676_v59, %v196_v31  ;;  %v300_v17 = vsel %vm298_vm7, %v293_v40, %v297_v3  ;;  %v8680_v10 = vld [vmem:[#allocation36_spill] sm:$0xff] }
  0xa8   :  { %v302_v5 = vsel %vm298_vm7, %v297_v3, %v293_v40  ;;  %v299_v7 = vsel %vm298_vm7, %v8677_v55, %v295_v44  ;;  %v301_v9 = vsel %vm298_vm7, %v295_v44, %v8677_v55  ;;  %v5584_v14 = vadd.f32 %v8678_v20, %v197_v47  ;;  %v8684_v21 = vld [vmem:[#allocation40_spill] sm:$0xff]  ;;  %v8685_v47 = vld [vmem:[#allocation41_spill] sm:$0xff]  ;;  %v8688_v55 = vld [vmem:[#allocation34_spill] sm:$0xff] }
  0xa9   :  { %v5587_v24 = vadd.f32 %v8680_v10, %v202_v30  ;;  %v305_v29 = vsel %vm5511_vm8, %v300_v17, 0.0  ;;  %v306_v63 = vsel %vm5517_vm9, %v302_v5, 0.0  ;;  %v8686_v44 = vld [vmem:[#allocation33_spill] sm:$0xff]  ;;  %v5608_v20 = vadd.f32 %v8688_v55, %v209_v33  ;;  %v8690_v55 = vld [vmem:[#allocation43_spill] sm:$0xff] }
  0xaa   :  { %8679 = vst [vmem:[#allocation35_spill] sm:$0xff] %v5584_v14  ;;  %v311_v36 = vmul.f32 %v8682_v13, %v305_v29  ;;  %v312_v56 = vmul.f32 %v8682_v13, %v306_v63  ;;  %v321_v40 = vmul.f32 %v8683_v12, %v305_v29  ;;  %v322_v42 = vmul.f32 %v8683_v12, %v306_v63  ;;  %v8687_v17 = vld [vmem:[#allocation37_spill] sm:$0xff] }
  0xab   :  { %8681 = vst [vmem:[#allocation46_spill] sm:$0xff] %v5587_v24  ;;  %v331_v15 = vmul.f32 %v8684_v21, %v305_v29  ;;  %v332_v31 = vmul.f32 %v8684_v21, %v306_v63  ;;  %v341_v30 = vmul.f32 %v8685_v47, %v305_v29  ;;  %v342_v3 = vmul.f32 %v8685_v47, %v306_v63 }
  0xac   :  { %v5602_v59 = vadd.f32 %v8686_v44, %v203_v32  ;;  %v5605_v5 = vadd.f32 %v8687_v17, %v208_v22  ;;  %v303_v10 = vsel %vm5511_vm8, %v299_v7, 0.0  ;;  %v5612_v24 = vadd.f32 %v311_v36, %v218_v37  ;;  %v8689_v22 = vld [vmem:[#allocation42_spill] sm:$0xff] }
  0xad   :  { %v5614_v14 = vadd.f32 %v312_v56, %v219_v34  ;;  %v5616_v2 = vadd.f32 %v321_v40, %v228_v0  ;;  %v304_v32 = vsel %vm5517_vm9, %v301_v9, 0.0  ;;  %v5622_v44 = vadd.f32 %v322_v42, %v229_v50  ;;  %v8691_v50 = vld [vmem:[#allocation44_spill] sm:$0xff]  ;;  %v8692_v40 = vld [vmem:[#allocation45_spill] sm:$0xff] }
  0xae   :  { %v351_v17 = vmul.f32 %v8689_v22, %v305_v29  ;;  %v352_v33 = vmul.f32 %v8689_v22, %v306_v63  ;;  %v361_v51 = vmul.f32 %v8690_v55, %v305_v29  ;;  %v5627_v7 = vadd.f32 %v331_v15, %v238_v45 }
  0xaf   :  { %v5629_v37 = vadd.f32 %v332_v31, %v239_v52  ;;  %v5631_v34 = vadd.f32 %v341_v30, %v248_v46  ;;  %v5633_v0 = vadd.f32 %v342_v3, %v249_v58  ;;  %v5638_v9 = vmul.f32 %v8690_v55, %v306_v63 }
  0xb0   :  { %v5641_v36 = vmul.f32 %v8691_v50, %v305_v29  ;;  %v5644_v56 = vmul.f32 %v8691_v50, %v306_v63  ;;  %v5647_v45 = vmul.f32 %v8692_v40, %v305_v29  ;;  %v5651_v52 = vadd.f32 %v351_v17, %v258_v48 }
  0xb1   :  { %v5653_v46 = vadd.f32 %v352_v33, %v259_v16  ;;  %v5655_v58 = vadd.f32 %v361_v51, %v268_v4  ;;  %v5658_v42 = vmul.f32 %v8692_v40, %v306_v63  ;;  %v309_v15 = vmul.f32 %v8682_v13, %v303_v10 }
  0xb2   :  { %v310_v31 = vmul.f32 %v8682_v13, %v304_v32  ;;  %v319_v29 = vmul.f32 %v8683_v12, %v303_v10  ;;  %v320_v30 = vmul.f32 %v8683_v12, %v304_v32  ;;  %v329_v48 = vmul.f32 %v8684_v21, %v303_v10 }
  0xb3   :  { %8693 = vst [vmem:[#allocation32_spill] sm:$0xff] %v5655_v58  ;;  %v330_v51 = vmul.f32 %v8684_v21, %v304_v32  ;;  %v339_v16 = vmul.f32 %v8685_v47, %v303_v10  ;;  %v340_v4 = vmul.f32 %v8685_v47, %v304_v32  ;;  %v313_v63 = vadd.f32 %v309_v15, %v5467_v8 }
  0xb4   :  { %v314_v3 = vadd.f32 %v310_v31, %v5470_v18  ;;  %v323_v13 = vadd.f32 %v319_v29, %v5472_v43  ;;  %v324_v17 = vadd.f32 %v320_v30, %v5475_v11  ;;  %v333_v12 = vadd.f32 %v329_v48, %v5478_v1  ;;  %v392_v31 = vpop.permute.xlu1 %391  ;;  %v390_v29 = vpop.permute.xlu0 %389 }
  0xb5   :  { %v334_v33 = vadd.f32 %v330_v51, %v5481_v35  ;;  %v343_v53 = vadd.f32 %v339_v16, %v5484_v41  ;;  %v344_v21 = vadd.f32 %v340_v4, %v5488_v49  ;;  %v349_v58 = vmul.f32 %v8689_v22, %v303_v10  ;;  %v394_v41 = vpop.permute.xlu2 %393 }
  0xb6   :  { %v350_v47 = vmul.f32 %v8689_v22, %v304_v32  ;;  %v359_v8 = vmul.f32 %v8690_v55, %v303_v10  ;;  %v360_v18 = vmul.f32 %v8690_v55, %v304_v32  ;;  %v369_v43 = vmul.f32 %v8691_v50, %v303_v10 }
  0xb7   :  { %v370_v1 = vmul.f32 %v8691_v50, %v304_v32  ;;  %v379_v11 = vmul.f32 %v8692_v40, %v303_v10  ;;  %v380_v35 = vmul.f32 %v8692_v40, %v304_v32  ;;  %v353_v49 = vadd.f32 %v349_v58, %v5491_v57 }
  0xb8   :  { %v354_v22 = vadd.f32 %v350_v47, %v5494_v19  ;;  %v363_v15 = vadd.f32 %v359_v8, %v5497_v25  ;;  %v364_v55 = vadd.f32 %v360_v18, %v5500_v6  ;;  %v373_v30 = vadd.f32 %v369_v43, %v5503_v26  ;;  %v8694_v8 = vld [vmem:[#allocation49_spill] sm:$0xff] }
  0xb9   :  { %v374_v50 = vadd.f32 %v370_v1, %v5522_v23  ;;  %v383_v10 = vadd.f32 %v379_v11, %v5525_v54  ;;  %v384_v48 = vadd.f32 %v380_v35, %v5532_v60  ;;  %v5697_v32 = vstv %s5635_s21  ;;  %v8695_v1 = vld [vmem:[#allocation50_spill] sm:$0xff]  ;;  %s6288_s21 = sld [smem:[#allocation10]] }
  0xba   :  { %v5700_v40 = vstv %s5649_s22  ;;  %v5703_v57 = vstv %s5660_s6  ;;  %v5706_v19 = vstv %s5666_s23  ;;  %v395_v25 = vsel %vm153_vm4, %v5618_v62, %v392_v31  ;;  %s6294_s22 = sld [smem:[#allocation10 + $0x1]] }
  0xbb   :  { %v397_v6 = vsel %vm153_vm4, %v392_v31, %v5618_v62  ;;  %v396_v26 = vsel %vm153_vm4, %v390_v29, %v394_v41  ;;  %v398_v23 = vsel %vm153_vm4, %v394_v41, %v390_v29  ;;  %v400_v60 = vsel %vm5290_vm6, %v395_v25, 0.0  ;;  %s6300_s6 = sld [smem:[#allocation10 + $0x2]] }
  0xbc   :  { %v399_v54 = vsel %vm5284_vm5, %v397_v6, 0.0  ;;  %v5724_v58 = vsel %vm5284_vm5, %v398_v23, 0.0  ;;  %v5728_v51 = vsel %vm5290_vm6, %v396_v26, 0.0  ;;  %v406_v16 = vmul.f32 %v5535_v28, %v400_v60  ;;  %s6314_s23 = sld [smem:[#allocation10 + $0x3]] }
  0xbd   :  { %v405_v62 = vmul.f32 %v5535_v28, %v399_v54  ;;  %v415_v4 = vmul.f32 %v5538_v61, %v399_v54  ;;  %v416_v47 = vmul.f32 %v5538_v61, %v400_v60  ;;  %v425_v18 = vmul.f32 %v8694_v8, %v399_v54 }
  0xbe   :  { %v426_v43 = vmul.f32 %v8694_v8, %v400_v60  ;;  %v435_v11 = vmul.f32 %v8695_v1, %v399_v54  ;;  %v436_v35 = vmul.f32 %v8695_v1, %v400_v60  ;;  %v5740_v31 = vadd.f32 %v406_v16, %v314_v3 }
  0xbf   :  { %v5738_v41 = vadd.f32 %v405_v62, %v313_v63  ;;  %v5742_v29 = vadd.f32 %v415_v4, %v323_v13  ;;  %v5744_v25 = vadd.f32 %v416_v47, %v324_v17  ;;  %v5746_v6 = vadd.f32 %v425_v18, %v333_v12 }
  0xc0   :  { %v5748_v26 = vadd.f32 %v426_v43, %v334_v33  ;;  %v5750_v23 = vadd.f32 %v435_v11, %v343_v53  ;;  %v5752_v39 = vadd.f32 %v436_v35, %v344_v21  ;;  %v445_v38 = vmul.f32 %v5697_v32, %v399_v54 }
  0xc1   :  { %v446_v27 = vmul.f32 %v5697_v32, %v400_v60  ;;  %v455_v63 = vmul.f32 %v5700_v40, %v399_v54  ;;  %v456_v3 = vmul.f32 %v5700_v40, %v400_v60  ;;  %v465_v13 = vmul.f32 %v5703_v57, %v399_v54 }
  0xc2   :  { %v466_v17 = vmul.f32 %v5703_v57, %v400_v60  ;;  %v475_v12 = vmul.f32 %v5706_v19, %v399_v54  ;;  %v476_v33 = vmul.f32 %v5706_v19, %v400_v60  ;;  %v5764_v53 = vadd.f32 %v445_v38, %v353_v49 }
  0xc3   :  { %v5766_v21 = vadd.f32 %v446_v27, %v354_v22  ;;  %v5768_v62 = vadd.f32 %v455_v63, %v363_v15  ;;  %v5770_v16 = vadd.f32 %v456_v3, %v364_v55  ;;  %v5774_v4 = vadd.f32 %v465_v13, %v373_v30  ;;  %v8706_v3 = vld [vmem:[#allocation19_spill] sm:$0xff] }
  0xc4   :  { %v5776_v47 = vadd.f32 %v466_v17, %v374_v50  ;;  %v5778_v18 = vadd.f32 %v475_v12, %v383_v10  ;;  %v5780_v54 = vadd.f32 %v476_v33, %v384_v48  ;;  %v407_v27 = vmul.f32 %v5535_v28, %v5724_v58  ;;  %v8696_v50 = vld [vmem:[#allocation35_spill] sm:$0xff] }
  0xc5   :  { %v408_v38 = vmul.f32 %v5535_v28, %v5728_v51  ;;  %v417_v49 = vmul.f32 %v5538_v61, %v5724_v58  ;;  %v418_v22 = vmul.f32 %v5538_v61, %v5728_v51  ;;  %v427_v15 = vmul.f32 %v8694_v8, %v5724_v58  ;;  %v8697_v61 = vld [vmem:[#allocation46_spill] sm:$0xff] }
  0xc6   :  { %v428_v55 = vmul.f32 %v8694_v8, %v5728_v51  ;;  %v437_v30 = vmul.f32 %v8695_v1, %v5724_v58  ;;  %v438_v28 = vmul.f32 %v8695_v1, %v5728_v51  ;;  %v366_v10 = vadd.f32 %v5638_v9, %v8696_v50 }
  0xc7   :  { %v375_v48 = vadd.f32 %v5641_v36, %v8697_v61  ;;  %v5810_v60 = vadd.f32 %v5644_v56, %v5602_v59  ;;  %v5814_v8 = vadd.f32 %v5647_v45, %v5605_v5  ;;  %v5820_v43 = vadd.f32 %v5658_v42, %v5608_v20 }
  0xc8   :  { %v5823_v1 = vadd.f32 %v407_v27, %v5612_v24  ;;  %v5826_v9 = vadd.f32 %v408_v38, %v5614_v14  ;;  %v5829_v36 = vadd.f32 %v417_v49, %v5616_v2  ;;  %v5834_v59 = vadd.f32 %v418_v22, %v5622_v44 }
  0xc9   :  { %v447_v5 = vmul.f32 %v5697_v32, %v5724_v58  ;;  %v448_v20 = vmul.f32 %v5697_v32, %v5728_v51  ;;  %v457_v24 = vmul.f32 %v5700_v40, %v5724_v58  ;;  %v5845_v2 = vadd.f32 %v427_v15, %v5627_v7  ;;  %v8703_v32 = vld [vmem:[#allocation32_spill] sm:$0xff] }
  0xca   :  { %8698 = vst [vmem:[#allocation36_spill] sm:$0xff] %v5823_v1  ;;  %v5848_v14 = vadd.f32 %v428_v55, %v5629_v37  ;;  %v5851_v44 = vadd.f32 %v437_v30, %v5631_v34  ;;  %v5854_v56 = vadd.f32 %v438_v28, %v5633_v0  ;;  %v458_v45 = vmul.f32 %v5700_v40, %v5728_v51 }
  0xcb   :  { %8699 = vst [vmem:[#allocation38_spill] sm:$0xff] %v5829_v36  ;;  %v467_v7 = vmul.f32 %v5703_v57, %v5724_v58  ;;  %v5864_v37 = vmul.f32 %v5703_v57, %v5728_v51  ;;  %v5868_v34 = vmul.f32 %v5706_v19, %v5724_v58  ;;  %v5873_v0 = vadd.f32 %v447_v5, %v5651_v52 }
  0xcc   :  { %8700 = vst [vmem:[#allocation39_spill] sm:$0xff] %v5845_v2  ;;  %v5876_v42 = vadd.f32 %v448_v20, %v5653_v46  ;;  %v5879_v40 = vadd.f32 %v457_v24, %v8703_v32  ;;  %v5883_v11 = vmul.f32 %v5706_v19, %v5728_v51  ;;  %v5888_v57 = vstv %s5762_s24  ;;  %v8705_v46 = vld [vmem:[#allocation21_spill] sm:$0xff]  ;;  %s6141_s24 = sld [smem:[#allocation9 + $0x2a]] }
  0xcd   :  { %8701 = vst [vmem:[#allocation40_spill] sm:$0xff] %v5851_v44  ;;  %v5891_v58 = vstv %s5772_s25  ;;  %v5894_v35 = vstv %s5782_s3  ;;  %v5897_v52 = vstv %s5792_s26  ;;  %v485_v63 = vmul.f32 %v8705_v46, %v5888_v57  ;;  %s6147_s25 = sld [smem:[#allocation9 + $0x33]] }
  0xce   :  { %8702 = vst [vmem:[#allocation41_spill] sm:$0xff] %v5873_v0  ;;  %v486_v13 = vmul.f32 %v8706_v3, %v5888_v57  ;;  %v495_v19 = vmul.f32 %v8705_v46, %v5891_v58  ;;  %v496_v51 = vmul.f32 %v8706_v3, %v5891_v58  ;;  %v5911_v17 = vadd.f32 %v458_v45, %v366_v10  ;;  %s6150_s3 = sld [smem:[#allocation9 + $0x3c]] }
  0xcf   :  { %8704 = vst [vmem:[#allocation33_spill] sm:$0xff] %v5879_v40  ;;  %v5913_v12 = vadd.f32 %v467_v7, %v375_v48  ;;  %v505_v33 = vmul.f32 %v8705_v46, %v5894_v35  ;;  %v506_v27 = vmul.f32 %v8706_v3, %v5894_v35  ;;  %v489_v38 = vadd.f32 %v485_v63, %v5738_v41  ;;  %s6156_s26 = sld [smem:[#allocation9 + $0x45]] }
  0xd0   :  { %v490_v49 = vadd.f32 %v486_v13, %v5740_v31  ;;  %v515_v22 = vmul.f32 %v8705_v46, %v5897_v52  ;;  %v516_v15 = vmul.f32 %v8706_v3, %v5897_v52  ;;  %v499_v55 = vadd.f32 %v495_v19, %v5742_v29  ;;  %v568_v13 = vpop.permute.xlu2 %567 }
  0xd1   :  { %8707 = vst [vmem:[#allocation37_spill] sm:$0xff] %v5913_v12  ;;  %v500_v30 = vadd.f32 %v496_v51, %v5744_v25  ;;  %v509_v28 = vadd.f32 %v505_v33, %v5746_v6  ;;  %v510_v50 = vadd.f32 %v506_v27, %v5748_v26  ;;  %v5936_v41 = vstv %s5802_s27  ;;  %s6162_s27 = sld [smem:[#allocation9 + $0x7]] }
  0xd2   :  { %v5939_v31 = vstv %s5816_s28  ;;  %v5942_v10 = vstv %s5831_s29  ;;  %v5945_v61 = vstv %s5842_s30  ;;  %v525_v48 = vmul.f32 %v8705_v46, %v5936_v41  ;;  %s6164_s28 = sld [smem:[#allocation9 + $0x10]] }
  0xd3   :  { %v526_v29 = vmul.f32 %v8706_v3, %v5936_v41  ;;  %v535_v25 = vmul.f32 %v8705_v46, %v5939_v31  ;;  %v536_v6 = vmul.f32 %v8706_v3, %v5939_v31  ;;  %v545_v26 = vmul.f32 %v8705_v46, %v5942_v10  ;;  %s6166_s29 = sld [smem:[#allocation9 + $0x19]] }
  0xd4   :  { %v546_v5 = vmul.f32 %v8706_v3, %v5942_v10  ;;  %v555_v20 = vmul.f32 %v8705_v46, %v5945_v61  ;;  %v556_v24 = vmul.f32 %v8706_v3, %v5945_v61  ;;  %v519_v45 = vadd.f32 %v515_v22, %v5750_v23  ;;  %v564_v23 = vpop.permute.xlu0 %563  ;;  %s6177_s30 = sld [smem:[#allocation9 + $0x22]] }
  0xd5   :  { %v520_v7 = vadd.f32 %v516_v15, %v5752_v39  ;;  %v529_v32 = vadd.f32 %v525_v48, %v5764_v53  ;;  %v530_v63 = vadd.f32 %v526_v29, %v5766_v21  ;;  %v539_v46 = vadd.f32 %v535_v25, %v5768_v62 }
  0xd6   :  { %v540_v19 = vadd.f32 %v536_v6, %v5770_v16  ;;  %v549_v3 = vadd.f32 %v545_v26, %v5774_v4  ;;  %v550_v51 = vadd.f32 %v546_v5, %v5776_v47  ;;  %v559_v33 = vadd.f32 %v555_v20, %v5778_v18  ;;  %v8714_v26 = vld [vmem:[#allocation20_spill] sm:$0xff] }
  0xd7   :  { %v560_v39 = vadd.f32 %v556_v24, %v5780_v54  ;;  %v5974_v27 = vstv %s5856_s4  ;;  %v5977_v53 = vstv %s5870_s5  ;;  %v5980_v21 = vstv %s5885_s10  ;;  %s6189_s4 = sld [smem:[#allocation9 + $0x2b]] }
  0xd8   :  { %8708 = vst [vmem:[#allocation34_spill] sm:$0xff] %v5974_v27  ;;  %v5983_v22 = vstv %s5899_s11  ;;  %v5986_v62 = vstv %s5909_s7  ;;  %v5989_v16 = vstv %s5919_s12  ;;  %v5992_v4 = vstv %s5927_s13  ;;  %s6197_s5 = sld [smem:[#allocation9 + $0x34]] }
  0xd9   :  { %8709 = vst [vmem:[#allocation42_spill] sm:$0xff] %v5977_v53  ;;  %v5995_v47 = vstv %s5933_s14  ;;  %v571_v18 = vsel %vm298_vm7, %v564_v23, %v568_v13  ;;  %v573_v54 = vsel %vm298_vm7, %v568_v13, %v564_v23  ;;  %v488_v5 = vmul.f32 %v8714_v26, %v5888_v57  ;;  %s6206_s10 = sld [smem:[#allocation9 + $0x3d]] }
  0xda   :  { %8710 = vst [vmem:[#allocation43_spill] sm:$0xff] %v5980_v21  ;;  %v575_v29 = vsel %vm5511_vm8, %v571_v18, 0.0  ;;  %v576_v6 = vsel %vm5517_vm9, %v573_v54, 0.0  ;;  %v498_v20 = vmul.f32 %v8714_v26, %v5891_v58  ;;  %s6212_s11 = sld [smem:[#allocation9 + $0x46]] }
  0xdb   :  { %v581_v24 = vmul.f32 %v5974_v27, %v575_v29  ;;  %v582_v12 = vmul.f32 %v5974_v27, %v576_v6  ;;  %v591_v40 = vmul.f32 %v5977_v53, %v575_v29  ;;  %v592_v13 = vmul.f32 %v5977_v53, %v576_v6  ;;  %v566_v27 = vpop.permute.xlu1 %565  ;;  %s6222_s7 = sld [smem:[#allocation9 + $0x8]] }
  0xdc   :  { %v601_v23 = vmul.f32 %v5980_v21, %v575_v29  ;;  %v602_v18 = vmul.f32 %v5980_v21, %v576_v6  ;;  %v611_v54 = vmul.f32 %v5983_v22, %v575_v29  ;;  %v612_v25 = vmul.f32 %v5983_v22, %v576_v6  ;;  %s6228_s12 = sld [smem:[#allocation9 + $0x11]] }
  0xdd   :  { %v6017_v48 = vadd.f32 %v581_v24, %v489_v38  ;;  %v6019_v15 = vadd.f32 %v582_v12, %v490_v49  ;;  %v6021_v0 = vadd.f32 %v591_v40, %v499_v55  ;;  %v6023_v44 = vadd.f32 %v592_v13, %v500_v30  ;;  %s6233_s13 = sld [smem:[#allocation9 + $0x1a]] }
  0xde   :  { %v6025_v2 = vadd.f32 %v601_v23, %v509_v28  ;;  %v6027_v53 = vadd.f32 %v602_v18, %v510_v50  ;;  %v6029_v36 = vadd.f32 %v611_v54, %v519_v45  ;;  %v6031_v21 = vadd.f32 %v612_v25, %v520_v7  ;;  %v8719_v54 = vld [vmem:[#allocation38_spill] sm:$0xff]  ;;  %s6243_s14 = sld [smem:[#allocation9 + $0x23]] }
  0xdf   :  { %v621_v1 = vmul.f32 %v5986_v62, %v575_v29  ;;  %v622_v38 = vmul.f32 %v5986_v62, %v576_v6  ;;  %v631_v12 = vmul.f32 %v5989_v16, %v575_v29  ;;  %v632_v40 = vmul.f32 %v5989_v16, %v576_v6 }
  0xe0   :  { %v641_v49 = vmul.f32 %v5992_v4, %v575_v29  ;;  %v642_v55 = vmul.f32 %v5992_v4, %v576_v6  ;;  %v651_v30 = vmul.f32 %v5995_v47, %v575_v29  ;;  %v652_v28 = vmul.f32 %v5995_v47, %v576_v6  ;;  %v570_v29 = vpop.permute.xlu0 %569 }
  0xe1   :  { %v6041_v50 = vadd.f32 %v621_v1, %v529_v32  ;;  %v6043_v45 = vadd.f32 %v622_v38, %v530_v63  ;;  %v6045_v7 = vadd.f32 %v631_v12, %v539_v46  ;;  %v6047_v25 = vadd.f32 %v632_v40, %v540_v19  ;;  %v8717_v19 = vld [vmem:[#allocation22_spill] sm:$0xff]  ;;  %v8720_v12 = vld [vmem:[#allocation39_spill] sm:$0xff] }
  0xe2   :  { %v6049_v24 = vadd.f32 %v641_v49, %v549_v3  ;;  %v6051_v13 = vadd.f32 %v642_v55, %v550_v51  ;;  %v6053_v23 = vadd.f32 %v651_v30, %v559_v33  ;;  %v6055_v18 = vadd.f32 %v652_v28, %v560_v39  ;;  %v8721_v49 = vld [vmem:[#allocation40_spill] sm:$0xff]  ;;  %v8722_v55 = vld [vmem:[#allocation41_spill] sm:$0xff] }
  0xe3   :  { %v472_v1 = vadd.f32 %v5864_v37, %v5810_v60  ;;  %v481_v32 = vadd.f32 %v5868_v34, %v5814_v8  ;;  %v482_v63 = vadd.f32 %v5883_v11, %v5820_v43  ;;  %v508_v46 = vmul.f32 %v8714_v26, %v5894_v35  ;;  %v6103_v6 = vpop.permute.xlu1 %672 }
  0xe4   :  { %8715 = vst [vmem:[#allocation44_spill] sm:$0xff] %v6053_v23  ;;  %v487_v3 = vmul.f32 %v8717_v19, %v5888_v57  ;;  %v497_v51 = vmul.f32 %v8717_v19, %v5891_v58  ;;  %v518_v60 = vmul.f32 %v8714_v26, %v5897_v52  ;;  %v528_v8 = vmul.f32 %v8714_v26, %v5936_v41 }
  0xe5   :  { %8716 = vst [vmem:[#allocation45_spill] sm:$0xff] %v6055_v18  ;;  %v492_v43 = vadd.f32 %v488_v5, %v5826_v9  ;;  %v507_v37 = vmul.f32 %v8717_v19, %v5894_v35  ;;  %v517_v34 = vmul.f32 %v8717_v19, %v5897_v52  ;;  %v538_v11 = vmul.f32 %v8714_v26, %v5939_v31 }
  0xe6   :  { %v502_v57 = vadd.f32 %v498_v20, %v5834_v59  ;;  %v512_v58 = vadd.f32 %v508_v46, %v5848_v14  ;;  %v527_v33 = vmul.f32 %v8717_v19, %v5936_v41  ;;  %v548_v9 = vmul.f32 %v8714_v26, %v5942_v10  ;;  %v4692_v59 = vld [vmem:[%s8414_s0 + $0x38] sm:$0xff] }
  0xe7   :  { %v522_v35 = vadd.f32 %v518_v60, %v5854_v56  ;;  %v537_v52 = vmul.f32 %v8717_v19, %v5939_v31  ;;  %v547_v39 = vmul.f32 %v8717_v19, %v5942_v10  ;;  %v558_v14 = vmul.f32 %v4692_v59, %v5945_v61  ;;  %v4693_v56 = vld [vmem:[%s8414_s0 + $0x30] sm:$0xff]  ;;  %v8718_v10 = vld [vmem:[#allocation36_spill] sm:$0xff]  ;;  %v8729_v59 = vld [vmem:[#allocation42_spill] sm:$0xff] }
  0xe8   :  { %v532_v41 = vadd.f32 %v528_v8, %v5876_v42  ;;  %v542_v26 = vadd.f32 %v538_v11, %v5911_v17  ;;  %v557_v31 = vmul.f32 %v4693_v56, %v5945_v61  ;;  %v491_v5 = vadd.f32 %v487_v3, %v8718_v10  ;;  %v8725_v3 = vld [vmem:[#allocation37_spill] sm:$0xff]  ;;  %v8730_v10 = vld [vmem:[#allocation43_spill] sm:$0xff] }
  0xe9   :  { %v552_v20 = vadd.f32 %v548_v9, %v472_v1  ;;  %v501_v38 = vadd.f32 %v497_v51, %v8719_v54  ;;  %v511_v40 = vadd.f32 %v507_v37, %v8720_v12  ;;  %v521_v42 = vadd.f32 %v517_v34, %v8721_v49  ;;  %v8724_v1 = vld [vmem:[#allocation33_spill] sm:$0xff] }
  0xea   :  { %v562_v17 = vadd.f32 %v558_v14, %v482_v63  ;;  %v531_v30 = vadd.f32 %v527_v33, %v8722_v55  ;;  %v572_v46 = vsel %vm298_vm7, %v566_v27, %v570_v29  ;;  %v574_v61 = vsel %vm298_vm7, %v570_v29, %v566_v27  ;;  %v8728_v63 = vld [vmem:[#allocation34_spill] sm:$0xff] }
  0xeb   :  { %v541_v19 = vadd.f32 %v537_v52, %v8724_v1  ;;  %v551_v51 = vadd.f32 %v547_v39, %v8725_v3  ;;  %v577_v8 = vsel %vm5511_vm8, %v572_v46, 0.0  ;;  %v578_v34 = vsel %vm5517_vm9, %v574_v61, 0.0 }
  0xec   :  { %v561_v11 = vadd.f32 %v557_v31, %v481_v32  ;;  %v583_v9 = vmul.f32 %v8728_v63, %v577_v8  ;;  %v584_v33 = vmul.f32 %v8728_v63, %v578_v34  ;;  %v593_v14 = vmul.f32 %v8729_v59, %v577_v8 }
  0xed   :  { %v6130_v56 = vstv %s6057_s17  ;;  %v6133_v27 = vstv %s6067_s18  ;;  %v6136_v52 = vstv %s6077_s19  ;;  %v6139_v39 = vstv %s6086_s20  ;;  %s6252_s17 = sld [smem:[#allocation9 + $0x2c]] }
  0xee   :  { %v594_v29 = vmul.f32 %v8729_v59, %v578_v34  ;;  %v603_v32 = vmul.f32 %v8730_v10, %v577_v8  ;;  %v604_v31 = vmul.f32 %v8730_v10, %v578_v34  ;;  %v613_v54 = vmul.f32 %v5983_v22, %v577_v8  ;;  %v679_v10 = vpop.permute.xlu1 %678  ;;  %s6259_s18 = sld [smem:[#allocation9 + $0x35]] }
  0xef   :  { %v587_v12 = vadd.f32 %v583_v9, %v491_v5  ;;  %v588_v49 = vadd.f32 %v584_v33, %v492_v43  ;;  %v597_v55 = vadd.f32 %v593_v14, %v501_v38  ;;  %v614_v46 = vmul.f32 %v5983_v22, %v578_v34  ;;  %s6268_s19 = sld [smem:[#allocation9 + $0x3e]] }
  0xf0   :  { %v623_v61 = vmul.f32 %v5986_v62, %v577_v8  ;;  %v624_v1 = vmul.f32 %v5986_v62, %v578_v34  ;;  %v633_v3 = vmul.f32 %v5989_v16, %v577_v8  ;;  %v634_v63 = vmul.f32 %v5989_v16, %v578_v34  ;;  %v677_v62 = vpop.permute.xlu0 %676  ;;  %s6274_s20 = sld [smem:[#allocation9 + $0x47]] }
  0xf1   :  { %v643_v59 = vmul.f32 %v5992_v4, %v577_v8  ;;  %v644_v5 = vmul.f32 %v5992_v4, %v578_v34  ;;  %v653_v43 = vmul.f32 %v5995_v47, %v577_v8  ;;  %v654_v22 = vmul.f32 %v5995_v47, %v578_v34  ;;  %v675_v4 = vpop.permute.xlu2 %674 }
  0xf2   :  { %v598_v38 = vadd.f32 %v594_v29, %v502_v57  ;;  %v607_v9 = vadd.f32 %v603_v32, %v511_v40  ;;  %v608_v33 = vadd.f32 %v604_v31, %v512_v58  ;;  %v617_v14 = vadd.f32 %v613_v54, %v521_v42 }
  0xf3   :  { %v618_v37 = vadd.f32 %v614_v46, %v522_v35  ;;  %v627_v16 = vadd.f32 %v623_v61, %v531_v30  ;;  %v628_v60 = vadd.f32 %v624_v1, %v532_v41  ;;  %v637_v18 = vadd.f32 %v633_v3, %v541_v19  ;;  %v8758_v30 = vld [vmem:[#allocation25_spill] sm:$0xff] }
  0xf4   :  { %v638_v8 = vadd.f32 %v634_v63, %v542_v26  ;;  %v647_v23 = vadd.f32 %v643_v59, %v551_v51  ;;  %v648_v47 = vadd.f32 %v644_v5, %v552_v20  ;;  %v657_v57 = vadd.f32 %v653_v43, %v561_v11 }
  0xf5   :  { %v6168_v58 = vadd.f32 %v654_v22, %v562_v17  ;;  %v681_v35 = vsel %vm153_vm4, %v675_v4, %v679_v10  ;;  %v683_v41 = vsel %vm153_vm4, %v679_v10, %v675_v4  ;;  %v682_v40 = vsel %vm153_vm4, %v677_v62, %v6103_v6 }
  0xf6   :  { %v6180_v26 = vstv %s6141_s24  ;;  %v6183_v20 = vstv %s6147_s25  ;;  %v686_v17 = vsel %vm5284_vm5, %v683_v41, 0.0  ;;  %v687_v19 = vsel %vm5290_vm6, %v681_v35, 0.0  ;;  %s6326_s24 = sld [smem:[#allocation10 + $0x4]] }
  0xf7   :  { %v692_v51 = vmul.f32 %v6130_v56, %v686_v17  ;;  %v693_v34 = vmul.f32 %v6130_v56, %v687_v19  ;;  %v702_v11 = vmul.f32 %v6133_v27, %v686_v17  ;;  %v680_v29 = vsel %vm153_vm4, %v6103_v6, %v677_v62  ;;  %s6340_s25 = sld [smem:[#allocation10 + $0x5]] }
  0xf8   :  { %v749_v32 = vstv %s6150_s3  ;;  %v6201_v31 = vstv %s6156_s26  ;;  %v703_v54 = vmul.f32 %v6133_v27, %v687_v19  ;;  %v684_v46 = vsel %vm5284_vm5, %v682_v40, 0.0  ;;  %s6354_s3 = sld [smem:[#allocation10 + $0x6]] }
  0xf9   :  { %v712_v61 = vmul.f32 %v6136_v52, %v686_v17  ;;  %v713_v1 = vmul.f32 %v6136_v52, %v687_v19  ;;  %v722_v3 = vmul.f32 %v6139_v39, %v686_v17  ;;  %v723_v6 = vmul.f32 %v6139_v39, %v687_v19  ;;  %s6670_s26 = sld [smem:[#allocation12 + $0xf]] }
  0xfa   :  { %v6214_v63 = vadd.f32 %v692_v51, %v587_v12  ;;  %v6216_v59 = vadd.f32 %v693_v34, %v588_v49  ;;  %v6218_v5 = vadd.f32 %v702_v11, %v597_v55  ;;  %v685_v43 = vsel %vm5290_vm6, %v680_v29, 0.0 }
  0xfb   :  { %v732_v22 = vmul.f32 %v6180_v26, %v686_v17  ;;  %v733_v10 = vmul.f32 %v6180_v26, %v687_v19  ;;  %v742_v62 = vmul.f32 %v6183_v20, %v686_v17  ;;  %v743_v4 = vmul.f32 %v6183_v20, %v687_v19 }
  0xfc   :  { %8733 = vst [vmem:[#allocation49_spill] sm:$0xff] %v6214_v63  ;;  %v6230_v12 = vadd.f32 %v703_v54, %v598_v38  ;;  %v752_v49 = vmul.f32 %v749_v32, %v686_v17  ;;  %v753_v55 = vmul.f32 %v749_v32, %v687_v19  ;;  %v762_v35 = vmul.f32 %v6201_v31, %v686_v17 }
  0xfd   :  { %8734 = vst [vmem:[#allocation50_spill] sm:$0xff] %v6216_v59  ;;  %v6235_v41 = vadd.f32 %v712_v61, %v607_v9  ;;  %v6237_v40 = vadd.f32 %v713_v1, %v608_v33  ;;  %v6239_v51 = vadd.f32 %v722_v3, %v617_v14  ;;  %v6241_v34 = vadd.f32 %v723_v6, %v618_v37 }
  0xfe   :  { %8735 = vst [vmem:[#allocation35_spill] sm:$0xff] %v6218_v5  ;;  %v6245_v11 = vadd.f32 %v732_v22, %v627_v16  ;;  %v6247_v38 = vadd.f32 %v733_v10, %v628_v60  ;;  %v6249_v29 = vadd.f32 %v742_v62, %v637_v18  ;;  %v763_v17 = vmul.f32 %v6201_v31, %v687_v19  ;;  %v105_v62 = vld [vmem:[%s8414_s0 + $0x18] sm:$0xff] }
  0xff   :  { %8736 = vst [vmem:[#allocation46_spill] sm:$0xff] %v6230_v12  ;;  %v6254_v9 = vadd.f32 %v743_v4, %v638_v8  ;;  %v690_v33 = vmul.f32 %v6130_v56, %v684_v46  ;;  %v691_v14 = vmul.f32 %v6130_v56, %v685_v43  ;;  %v700_v37 = vmul.f32 %v6133_v27, %v684_v46 }
 0x100   :  { %8737 = vst [vmem:[#allocation32_spill] sm:$0xff] %v6235_v41  ;;  %v6261_v16 = vadd.f32 %v752_v49, %v647_v23  ;;  %v6263_v60 = vadd.f32 %v753_v55, %v648_v47  ;;  %v6265_v18 = vadd.f32 %v762_v35, %v657_v57  ;;  %v701_v19 = vmul.f32 %v6133_v27, %v685_v43  ;;  %v8751_v55 = vld [vmem:[#allocation45_spill] sm:$0xff]  ;;  %v853_v41 = vpop.permute.xlu1 %852 }
 0x101   :  { %8738 = vst [vmem:[#allocation21_spill] sm:$0xff] %v6237_v40  ;;  %v710_v8 = vmul.f32 %v6136_v52, %v684_v46  ;;  %v711_v54 = vmul.f32 %v6136_v52, %v685_v43  ;;  %v720_v56 = vmul.f32 %v6139_v39, %v684_v46  ;;  %v721_v61 = vmul.f32 %v6139_v39, %v685_v43  ;;  %v849_v40 = vpop.permute.xlu2 %848 }
 0x102   :  { %8739 = vst [vmem:[#allocation19_spill] sm:$0xff] %v6239_v51  ;;  %v6277_v23 = vadd.f32 %v763_v17, %v6168_v58  ;;  %v6280_v47 = vadd.f32 %v690_v33, %v6017_v48  ;;  %v6283_v27 = vadd.f32 %v691_v14, %v6019_v15  ;;  %v6286_v57 = vadd.f32 %v700_v37, %v6021_v0  ;;  %v8752_v17 = vld [vmem:[#allocation28_spill] sm:$0xff] }
 0x103   :  { %8740 = vst [vmem:[#allocation20_spill] sm:$0xff] %v6241_v34  ;;  %v730_v52 = vmul.f32 %v6180_v26, %v684_v46  ;;  %v731_v39 = vmul.f32 %v6180_v26, %v685_v43  ;;  %v740_v1 = vmul.f32 %v6183_v20, %v684_v46  ;;  %v741_v58 = vmul.f32 %v6183_v20, %v685_v43 }
 0x104   :  { %8741 = vst [vmem:[#allocation22_spill] sm:$0xff] %v6245_v11  ;;  %v6297_v48 = vadd.f32 %v701_v19, %v6023_v44  ;;  %v750_v15 = vmul.f32 %v749_v32, %v684_v46  ;;  %v751_v0 = vmul.f32 %v749_v32, %v685_v43  ;;  %v760_v3 = vmul.f32 %v6201_v31, %v684_v46  ;;  %v102_v19 = vld [vmem:[%s8414_s0] sm:$0xff] }
 0x105   :  { %8742 = vst [vmem:[#allocation36_spill] sm:$0xff] %v6247_v38  ;;  %v6303_v26 = vadd.f32 %v710_v8, %v6025_v2  ;;  %v6306_v6 = vadd.f32 %v711_v54, %v6027_v53  ;;  %v6309_v20 = vadd.f32 %v720_v56, %v6029_v36  ;;  %v6312_v44 = vadd.f32 %v721_v61, %v6031_v21  ;;  %v103_v8 = vld [vmem:[%s8414_s0 + $0x8] sm:$0xff] }
 0x106   :  { %8743 = vst [vmem:[#allocation38_spill] sm:$0xff] %v6249_v29  ;;  %v6317_v32 = vadd.f32 %v730_v52, %v6041_v50  ;;  %v6320_v46 = vadd.f32 %v731_v39, %v6043_v45  ;;  %v6323_v2 = vadd.f32 %v740_v1, %v6045_v7  ;;  %v761_v36 = vmul.f32 %v6201_v31, %v685_v43  ;;  %v8749_v43 = vld [vmem:[#allocation44_spill] sm:$0xff] }
 0x107   :  { %8744 = vst [vmem:[#allocation39_spill] sm:$0xff] %v6254_v9  ;;  %v6329_v53 = vadd.f32 %v741_v58, %v6047_v25  ;;  %v6332_v21 = vstv %s6162_s27  ;;  %v6335_v50 = vstv %s6164_s28  ;;  %v6338_v45 = vstv %s6166_s29  ;;  %v104_v25 = vld [vmem:[%s8414_s0 + $0x10] sm:$0xff]  ;;  %1946 = vmatpush.msra.mxu1 %v105_v62  ;;  %4678 = vmatpush.msra.mxu3 %v105_v62  ;;  %s6673_s27 = sld [smem:[#allocation12 + $0x18]] }
 0x108   :  { %8745 = vst [vmem:[#allocation40_spill] sm:$0xff] %v6261_v16  ;;  %v6343_v7 = vadd.f32 %v750_v15, %v6049_v24  ;;  %v6346_v31 = vadd.f32 %v751_v0, %v6051_v13  ;;  %v6349_v22 = vadd.f32 %v760_v3, %v8749_v43  ;;  %v6352_v10 = vstv %s6177_s30  ;;  %s6374_s30 = sld [smem:[#allocation10 + $0x7]]  ;;  %1911 = vmatpush.msra.mxu0 %v104_v25 }
 0x109   :  { %8746 = vst [vmem:[#allocation41_spill] sm:$0xff] %v6263_v60  ;;  %v6363_v24 = vstv %s6189_s4  ;;  %v6366_v4 = vstv %s6197_s5  ;;  %v6369_v13 = vstv %s6206_s10  ;;  %v6372_v49 = vstv %s6212_s11  ;;  %4676 = vmatpush.msra.mxu2 %v104_v25  ;;  %1947 = vmatpush.msra.mxu1 %v103_v8  ;;  %s6679_s28 = sld [smem:[#allocation12 + $0x21]] }
 0x10a   :  { %8747 = vst [vmem:[#allocation33_spill] sm:$0xff] %v6265_v18  ;;  %v765_v35 = vadd.f32 %v761_v36, %v8751_v55  ;;  %v771_v33 = vmul.f32 %v6332_v21, %v8752_v17  ;;  %v781_v14 = vmul.f32 %v6335_v50, %v8752_v17  ;;  %v791_v37 = vmul.f32 %v6338_v45, %v8752_v17  ;;  %s6699_s10 = sld [smem:[#allocation12 + $0x2a]] }
 0x10b   :  { %8748 = vst [vmem:[#allocation37_spill] sm:$0xff] %v6277_v23  ;;  %v801_v54 = vmul.f32 %v6352_v10, %v8752_v17  ;;  %v811_v56 = vmul.f32 %v6363_v24, %v8752_v17  ;;  %v821_v61 = vmul.f32 %v6366_v4, %v8752_v17  ;;  %1912 = vmatpush.msra.mxu0 %v102_v19  ;;  %v6400_v1 = vstv %s6222_s7  ;;  %s6558_s7 = sld [smem:[#allocation12]] }
 0x10c   :  { %8750 = vst [vmem:[#allocation34_spill] sm:$0xff] %v6352_v10  ;;  %v831_v52 = vmul.f32 %v6369_v13, %v8752_v17  ;;  %v841_v39 = vmul.f32 %v6372_v49, %v8752_v17  ;;  %v6403_v58 = vstv %s6228_s12  ;;  %4677 = vmatpush.msra.mxu2 %v102_v19  ;;  %v6406_v15 = vstv %s6233_s13  ;;  %4679 = vmatpush.msra.mxu3 %v103_v8  ;;  %s6568_s12 = sld [smem:[#allocation12 + $0x9]] }
 0x10d   :  { %8753 = vst [vmem:[#allocation42_spill] sm:$0xff] %v6403_v58  ;;  %v6409_v0 = vstv %s6243_s14  ;;  %v6412_v3 = vstv %s6252_s17  ;;  %v6415_v36 = vstv %s6259_s18  ;;  %v6418_v43 = vstv %s6268_s19  ;;  %s6577_s13 = sld [smem:[#allocation12 + $0x12]] }
 0x10e   :  { %8754 = vst [vmem:[#allocation43_spill] sm:$0xff] %v6406_v15  ;;  %v6421_v25 = vstv %s6274_s20  ;;  %v6424_v55 = vstv %s6288_s21  ;;  %v6427_v17 = vstv %s6294_s22  ;;  %v6430_v62 = vstv %s6300_s6  ;;  %s6641_s20 = sld [smem:[#allocation12 + $0x1b]] }
 0x10f   :  { %8755 = vst [vmem:[#allocation44_spill] sm:$0xff] %v6409_v0  ;;  %v6433_v19 = vstv %s6314_s23  ;;  %v770_v42 = vmul.f32 %v6332_v21, %v8758_v30  ;;  %v780_v18 = vmul.f32 %v6335_v50, %v8758_v30  ;;  %v6440_v16 = vstv %s6326_s24  ;;  %s6643_s21 = sld [smem:[#allocation12 + $0x24]] }
 0x110   :  { %8756 = vst [vmem:[#allocation45_spill] sm:$0xff] %v6412_v3  ;;  %v6443_v29 = vstv %s6340_s25  ;;  %v790_v23 = vmul.f32 %v6338_v45, %v8758_v30  ;;  %v800_v8 = vmul.f32 %v6352_v10, %v8758_v30  ;;  %v6450_v11 = vstv %s6354_s3  ;;  %s6652_s23 = sld [smem:[#allocation12 + $0x2d]] }
 0x111   :  { %8757 = vst [vmem:[#allocation28_spill] sm:$0xff] %v6415_v36  ;;  %v6453_v51 = vstv %s6374_s30  ;;  %v775_v60 = vadd.f32 %v771_v33, %v6283_v27  ;;  %v785_v5 = vadd.f32 %v781_v14, %v6297_v48  ;;  %v774_v63 = vadd.f32 %v770_v42, %v6280_v47  ;;  %s6658_s24 = sld [smem:[#allocation12 + $0x36]] }
 0x112   :  { %v795_v9 = vadd.f32 %v791_v37, %v6306_v6  ;;  %v805_v38 = vadd.f32 %v801_v54, %v6312_v44  ;;  %v810_v34 = vmul.f32 %v6363_v24, %v8758_v30  ;;  %v784_v12 = vadd.f32 %v780_v18, %v6286_v57  ;;  %s6660_s25 = sld [smem:[#allocation12 + $0x3f]] }
 0x113   :  { %v794_v59 = vadd.f32 %v790_v23, %v6303_v26  ;;  %v815_v10 = vadd.f32 %v811_v56, %v6320_v46  ;;  %v820_v27 = vmul.f32 %v6366_v4, %v8758_v30  ;;  %v804_v48 = vadd.f32 %v800_v8, %v6309_v20  ;;  %s6663_s3 = sld [smem:[#allocation12 + $0x6]] }
 0x114   :  { %v825_v42 = vadd.f32 %v821_v61, %v6329_v53  ;;  %v856_v47 = vsel %vm298_vm7, %v849_v40, %v853_v41  ;;  %v858_v6 = vsel %vm298_vm7, %v853_v41, %v849_v40  ;;  %v830_v18 = vmul.f32 %v6369_v13, %v8758_v30  ;;  %s6706_s11 = sld [smem:[#allocation12 + $0x33]] }
 0x115   :  { %v840_v23 = vmul.f32 %v6372_v49, %v8758_v30  ;;  %v860_v26 = vsel %vm5511_vm8, %v856_v47, 0.0  ;;  %v861_v20 = vsel %vm5517_vm9, %v858_v6, 0.0  ;;  %v814_v46 = vadd.f32 %v810_v34, %v6317_v32  ;;  %s6770_s14 = sld [smem:[#allocation12 + $0xb]] }
 0x116   :  { %v835_v53 = vadd.f32 %v831_v52, %v6346_v31  ;;  %v866_v33 = vmul.f32 %v6400_v1, %v860_v26  ;;  %v867_v41 = vmul.f32 %v6400_v1, %v861_v20  ;;  %v824_v40 = vadd.f32 %v820_v27, %v6323_v2  ;;  %s6778_s17 = sld [smem:[#allocation12 + $0x14]] }
 0x117   :  { %v845_v14 = vadd.f32 %v841_v39, %v765_v35  ;;  %v876_v37 = vmul.f32 %v6403_v58, %v860_v26  ;;  %v877_v30 = vmul.f32 %v6403_v58, %v861_v20  ;;  %v886_v54 = vmul.f32 %v6406_v15, %v860_v26  ;;  %v8788_v57 = vld [vmem:[#allocation45_spill] sm:$0xff]  ;;  %s6790_s18 = sld [smem:[#allocation12 + $0x1d]] }
 0x118   :  { %v887_v56 = vmul.f32 %v6406_v15, %v861_v20  ;;  %v896_v61 = vmul.f32 %v6409_v0, %v860_v26  ;;  %v897_v34 = vmul.f32 %v6409_v0, %v861_v20  ;;  %v834_v32 = vadd.f32 %v830_v18, %v6343_v7  ;;  %s6798_s19 = sld [smem:[#allocation12 + $0x26]] }
 0x119   :  { %v844_v31 = vadd.f32 %v840_v23, %v6349_v22  ;;  %v870_v52 = vadd.f32 %v866_v33, %v774_v63  ;;  %v871_v8 = vadd.f32 %v867_v41, %v775_v60  ;;  %v906_v2 = vmul.f32 %v6412_v3, %v860_v26  ;;  %s6826_s22 = sld [smem:[#allocation12 + $0x41]] }
 0x11a   :  { %v907_v35 = vmul.f32 %v6412_v3, %v861_v20  ;;  %v916_v39 = vmul.f32 %v6415_v36, %v860_v26  ;;  %v917_v27 = vmul.f32 %v6415_v36, %v861_v20  ;;  %v880_v47 = vadd.f32 %v876_v37, %v784_v12  ;;  %s6854_s6 = sld [smem:[#allocation12 + $0x8]] }
 0x11b   :  { %v881_v6 = vadd.f32 %v877_v30, %v785_v5  ;;  %v926_v15 = vmul.f32 %v6418_v43, %v860_v26  ;;  %v927_v0 = vmul.f32 %v6418_v43, %v861_v20  ;;  %v890_v58 = vadd.f32 %v886_v54, %v794_v59  ;;  %s6905_s29 = sld [smem:[#allocation12 + $0x3e]] }
 0x11c   :  { %v891_v7 = vadd.f32 %v887_v56, %v795_v9  ;;  %v900_v18 = vadd.f32 %v896_v61, %v804_v48  ;;  %v901_v22 = vadd.f32 %v897_v34, %v805_v38  ;;  %v910_v63 = vadd.f32 %v906_v2, %v814_v46  ;;  %s6913_s30 = sld [smem:[#allocation12 + $0x47]] }
 0x11d   :  { %v911_v60 = vadd.f32 %v907_v35, %v815_v10  ;;  %v936_v23 = vmul.f32 %v6421_v25, %v860_v26  ;;  %v937_v33 = vmul.f32 %v6421_v25, %v861_v20  ;;  %v920_v41 = vadd.f32 %v916_v39, %v824_v40  ;;  %v8764_v39 = vld [vmem:[#allocation27_spill] sm:$0xff]  ;;  %s6920_s4 = sld [smem:[#allocation12 + $0x3]] }
 0x11e   :  { %v921_v3 = vadd.f32 %v917_v27, %v825_v42  ;;  %v946_v36 = vadd.f32 %v6424_v55, %v870_v52  ;;  %v947_v5 = vadd.f32 %v6424_v55, %v871_v8  ;;  %v930_v12 = vadd.f32 %v926_v15, %v834_v32  ;;  %s6927_s5 = sld [smem:[#allocation12 + $0xc]] }
 0x11f   :  { %v931_v37 = vadd.f32 %v927_v0, %v835_v53  ;;  %v956_v30 = vadd.f32 %v6427_v17, %v880_v47  ;;  %v957_v59 = vadd.f32 %v6427_v17, %v881_v6  ;;  %v966_v38 = vadd.f32 %v6430_v62, %v890_v58 }
 0x120   :  { %v967_v9 = vadd.f32 %v6430_v62, %v891_v7  ;;  %v976_v10 = vadd.f32 %v6433_v19, %v900_v18  ;;  %v977_v48 = vadd.f32 %v6433_v19, %v901_v22  ;;  %v940_v26 = vadd.f32 %v936_v23, %v844_v31  ;;  %v8767_v22 = vld [vmem:[#allocation34_spill] sm:$0xff] }
 0x121   :  { %v941_v42 = vadd.f32 %v937_v33, %v845_v14  ;;  %v6510_v20 = vmax.f32 %v946_v36, 0.0  ;;  %v6512_v46 = vmax.f32 %v947_v5, 0.0  ;;  %v986_v15 = vadd.f32 %v6440_v16, %v910_v63 }
 0x122   :  { %v987_v0 = vadd.f32 %v6440_v16, %v911_v60  ;;  %v996_v53 = vadd.f32 %v6443_v29, %v920_v41  ;;  %v997_v58 = vadd.f32 %v6443_v29, %v921_v3  ;;  %v6518_v40 = vmax.f32 %v956_v30, 0.0  ;;  %v8768_v60 = vld [vmem:[#allocation26_spill] sm:$0xff] }
 0x123   :  { %v6520_v54 = vmax.f32 %v957_v59, 0.0  ;;  %v1006_v56 = vadd.f32 %v6450_v11, %v930_v12  ;;  %v1007_v14 = vadd.f32 %v6450_v11, %v931_v37  ;;  %v6524_v36 = vmax.f32 %v966_v38, 0.0  ;;  %v8769_v12 = vld [vmem:[#allocation50_spill] sm:$0xff]  ;;  %v8771_v38 = vld [vmem:[#allocation21_spill] sm:$0xff] }
 0x124   :  { %v6526_v61 = vmax.f32 %v967_v9, 0.0  ;;  %v6528_v34 = vmax.f32 %v976_v10, 0.0  ;;  %v6530_v32 = vmax.f32 %v977_v48, 0.0  ;;  %v6532_v31 = vmax.f32 %v986_v15, 0.0  ;;  %v8772_v10 = vld [vmem:[#allocation20_spill] sm:$0xff] }
 0x125   :  { %v6534_v52 = vmax.f32 %v987_v0, 0.0  ;;  %v6537_v3 = vadd.f32 %v6453_v51, %v940_v26  ;;  %v6540_v8 = vadd.f32 %v6453_v51, %v941_v42  ;;  %v6542_v2 = vmax.f32 %v996_v53, 0.0  ;;  %v855_v42 = vpop.permute.xlu2 %854  ;;  %v8773_v15 = vld [vmem:[#allocation36_spill] sm:$0xff] }
 0x126   :  { %8761 = vst [vmem:[#allocation25_spill] sm:$0xff] %v6530_v32  ;;  %v6544_v35 = vmax.f32 %v997_v58, 0.0  ;;  %v773_v27 = vmul.f32 %v6332_v21, %v8764_v39  ;;  %v783_v47 = vmul.f32 %v6335_v50, %v8764_v39  ;;  %v6550_v6 = vmax.f32 %v1006_v56, 0.0  ;;  %v851_v56 = vpop.permute.xlu0 %850 }
 0x127   :  { %8762 = vst [vmem:[#allocation51_spill] sm:$0xff] %v6534_v52  ;;  %v6552_v7 = vmax.f32 %v1007_v14, 0.0  ;;  %v793_v18 = vmul.f32 %v6338_v45, %v8764_v39  ;;  %v803_v63 = vmul.f32 %v8767_v22, %v8764_v39  ;;  %v772_v23 = vmul.f32 %v6332_v21, %v8768_v60  ;;  %v8774_v14 = vld [vmem:[#allocation39_spill] sm:$0xff] }
 0x128   :  { %8763 = vst [vmem:[#allocation52_spill] sm:$0xff] %v6544_v35  ;;  %v782_v33 = vmul.f32 %v6335_v50, %v8768_v60  ;;  %v792_v41 = vmul.f32 %v6338_v45, %v8768_v60  ;;  %v813_v5 = vmul.f32 %v6363_v24, %v8764_v39  ;;  %v777_v37 = vadd.f32 %v773_v27, %v8769_v12  ;;  %v8770_v50 = vld [vmem:[#allocation46_spill] sm:$0xff] }
 0x129   :  { %8765 = vst [vmem:[#allocation27_spill] sm:$0xff] %v6550_v6  ;;  %v802_v30 = vmul.f32 %v8767_v22, %v8768_v60  ;;  %v812_v59 = vmul.f32 %v6363_v24, %v8768_v60  ;;  %v823_v21 = vmul.f32 %v6366_v4, %v8764_v39  ;;  %v787_v45 = vadd.f32 %v783_v47, %v8770_v50 }
 0x12a   :  { %8766 = vst [vmem:[#allocation53_spill] sm:$0xff] %v6552_v7  ;;  %v797_v9 = vadd.f32 %v793_v18, %v8771_v38  ;;  %v807_v48 = vadd.f32 %v803_v63, %v8772_v10  ;;  %v833_v26 = vmul.f32 %v6369_v13, %v8764_v39  ;;  %v817_v0 = vadd.f32 %v813_v5, %v8773_v15  ;;  %v8775_v18 = vld [vmem:[#allocation49_spill] sm:$0xff]  ;;  %v8776_v63 = vld [vmem:[#allocation35_spill] sm:$0xff]  ;;  %v8780_v15 = vld [vmem:[#allocation22_spill] sm:$0xff] }
 0x12b   :  { %v822_v24 = vmul.f32 %v6366_v4, %v8768_v60  ;;  %v832_v53 = vmul.f32 %v6369_v13, %v8768_v60  ;;  %v843_v58 = vmul.f32 %v6372_v49, %v8764_v39  ;;  %v827_v27 = vadd.f32 %v823_v21, %v8774_v14  ;;  %v1866_v4 = vld [vmem:[%s8415_s1] sm:$0xff]  ;;  %v8777_v5 = vld [vmem:[#allocation41_spill] sm:$0xff]  ;;  %v8778_v13 = vld [vmem:[#allocation32_spill] sm:$0xff] }
 0x12c   :  { %v842_v47 = vmul.f32 %v6372_v49, %v8768_v60  ;;  %v776_v22 = vadd.f32 %v772_v23, %v8775_v18  ;;  %v786_v12 = vadd.f32 %v782_v33, %v8776_v63  ;;  %v6600_v50 = vadd.f32 %v833_v26, %v8777_v5  ;;  %v8779_v39 = vld [vmem:[#allocation19_spill] sm:$0xff]  ;;  %v1869_v49 = vld [vmem:[%s8415_s1 + $0x18] sm:$0xff]  ;;  %v8781_v60 = vld [vmem:[#allocation37_spill] sm:$0xff]  ;;  %4640 = vmatmul.msk.f32.vlgmr.msra.gmra.mxu0 %vm1878_vm10, %v1866_v4 }
 0x12d   :  { %v796_v38 = vadd.f32 %v792_v41, %v8778_v13  ;;  %v806_v10 = vadd.f32 %v802_v30, %v8779_v39  ;;  %v816_v21 = vadd.f32 %v812_v59, %v8780_v15  ;;  %v847_v23 = vadd.f32 %v843_v58, %v8781_v60  ;;  %v8782_v41 = vld [vmem:[#allocation38_spill] sm:$0xff]  ;;  %v8783_v14 = vld [vmem:[#allocation40_spill] sm:$0xff]  ;;  %4646 = vmatmul.msk.f32.vlgmr.msra.gmra.mxu1 %vm1878_vm10, %v1866_v4  ;;  %v8786_v4 = vld [vmem:[#allocation43_spill] sm:$0xff] }
 0x12e   :  { %v857_v33 = vsel %vm298_vm7, %v851_v56, %v855_v42  ;;  %v859_v26 = vsel %vm298_vm7, %v855_v42, %v851_v56  ;;  %v826_v30 = vadd.f32 %v822_v24, %v8782_v41  ;;  %v836_v59 = vadd.f32 %v832_v53, %v8783_v14  ;;  %v8784_v56 = vld [vmem:[#allocation42_spill] sm:$0xff]  ;;  %4643 = vmatmul.msk.f32.vlgmr.msra.gmra.mxu2 %vm1878_vm10, %v1869_v49  ;;  %v8785_v53 = vld [vmem:[#allocation33_spill] sm:$0xff]  ;;  %v8789_v7 = vld [vmem:[#allocation28_spill] sm:$0xff] }
 0x12f   :  { %v862_v18 = vsel %vm5511_vm8, %v857_v33, 0.0  ;;  %v863_v58 = vsel %vm5517_vm9, %v859_v26, 0.0  ;;  %v846_v13 = vadd.f32 %v842_v47, %v8785_v53  ;;  %v6628_v39 = vstv %s6558_s7  ;;  %4649 = vmatmul.msk.f32.vlgmr.msra.gmra.mxu3 %vm1878_vm10, %v1869_v49  ;;  %v8787_v26 = vld [vmem:[#allocation44_spill] sm:$0xff]  ;;  %s6717_s7 = sld [smem:[#allocation12 + $0x3c]] }
 0x130   :  { %v868_v63 = vmul.f32 %v6400_v1, %v862_v18  ;;  %v869_v42 = vmul.f32 %v6400_v1, %v863_v58  ;;  %v878_v5 = vmul.f32 %v8784_v56, %v862_v18  ;;  %v879_v24 = vmul.f32 %v8784_v56, %v863_v58 }
 0x131   :  { %v6631_v15 = vstv %s6568_s12  ;;  %v6634_v60 = vstv %s6577_s13  ;;  %v888_v33 = vmul.f32 %v8786_v4, %v862_v18  ;;  %v889_v1 = vmul.f32 %v8786_v4, %v863_v58  ;;  %s6728_s12 = sld [smem:[#allocation12 + $0x45]] }
 0x132   :  { %v898_v41 = vmul.f32 %v8787_v26, %v862_v18  ;;  %v899_v14 = vmul.f32 %v8787_v26, %v863_v58  ;;  %v872_v56 = vadd.f32 %v868_v63, %v776_v22  ;;  %v873_v47 = vadd.f32 %v869_v42, %v777_v37  ;;  %v1867_v26 = vld [vmem:[%s8415_s1 + $0x8] sm:$0xff]  ;;  %s6756_s13 = sld [smem:[#allocation12 + $0x2]] }
 0x133   :  { %v882_v53 = vadd.f32 %v878_v5, %v786_v12  ;;  %v883_v44 = vadd.f32 %v879_v24, %v787_v45  ;;  %v908_v28 = vmul.f32 %v8788_v57, %v862_v18  ;;  %v909_v49 = vmul.f32 %v8788_v57, %v863_v58 }
 0x134   :  { %v918_v35 = vmul.f32 %v8789_v7, %v862_v18  ;;  %v919_v4 = vmul.f32 %v8789_v7, %v863_v58  ;;  %v928_v37 = vmul.f32 %v6418_v43, %v862_v18  ;;  %v929_v45 = vmul.f32 %v6418_v43, %v863_v58  ;;  %4641 = vmatmul.msk.f32.gmra.mxu0 %vm1878_vm10, %v1867_v26 }
 0x135   :  { %v938_v22 = vmul.f32 %v6421_v25, %v862_v18  ;;  %v939_v12 = vmul.f32 %v6421_v25, %v863_v58  ;;  %v892_v57 = vadd.f32 %v888_v33, %v796_v38  ;;  %v893_v63 = vadd.f32 %v889_v1, %v797_v9  ;;  %4647 = vmatmul.msk.f32.gmra.mxu1 %vm1878_vm10, %v1867_v26  ;;  %v1868_v58 = vld [vmem:[%s8415_s1 + $0x10] sm:$0xff] }
 0x136   :  { %v902_v42 = vadd.f32 %v898_v41, %v806_v10  ;;  %v903_v7 = vadd.f32 %v899_v14, %v807_v48  ;;  %v912_v5 = vadd.f32 %v908_v28, %v816_v21  ;;  %v913_v24 = vadd.f32 %v909_v49, %v817_v0 }
 0x137   :  { %v922_v52 = vadd.f32 %v918_v35, %v826_v30  ;;  %v923_v32 = vadd.f32 %v919_v4, %v827_v27  ;;  %v948_v43 = vadd.f32 %v6424_v55, %v872_v56  ;;  %v949_v25 = vadd.f32 %v6424_v55, %v873_v47 }
 0x138   :  { %v958_v18 = vadd.f32 %v6427_v17, %v882_v53  ;;  %v959_v9 = vadd.f32 %v6427_v17, %v883_v44  ;;  %v932_v28 = vadd.f32 %v928_v37, %v836_v59  ;;  %v933_v35 = vadd.f32 %v929_v45, %v6600_v50 }
 0x139   :  { %v942_v48 = vadd.f32 %v938_v22, %v846_v13  ;;  %v943_v0 = vadd.f32 %v939_v12, %v847_v23  ;;  %v968_v27 = vadd.f32 %v6430_v62, %v892_v57  ;;  %v969_v38 = vadd.f32 %v6430_v62, %v893_v63  ;;  %v1870_v23 = vld [vmem:[%s8415_s1 + $0x20] sm:$0xff] }
 0x13a   :  { %v978_v55 = vadd.f32 %v6433_v19, %v902_v42  ;;  %v979_v10 = vadd.f32 %v6433_v19, %v903_v7  ;;  %v6681_v17 = vmax.f32 %v948_v43, 0.0  ;;  %v6683_v44 = vmax.f32 %v949_v25, 0.0  ;;  %4644 = vmatmul.msk.f32.gmra.mxu2 %vm1878_vm10, %v1870_v23  ;;  %4650 = vmatmul.msk.f32.gmra.mxu3 %vm1878_vm10, %v1870_v23 }
 0x13b   :  { %v6685_v21 = vmax.f32 %v958_v18, 0.0  ;;  %v6687_v50 = vmax.f32 %v959_v9, 0.0  ;;  %v988_v62 = vadd.f32 %v6440_v16, %v912_v5  ;;  %v989_v30 = vadd.f32 %v6440_v16, %v913_v24 }
 0x13c   :  { %8790 = vst [vmem:[#allocation34_spill] sm:$0xff] %v6681_v17  ;;  %v998_v19 = vadd.f32 %v6443_v29, %v922_v52  ;;  %v999_v59 = vadd.f32 %v6443_v29, %v923_v32  ;;  %v1008_v13 = vadd.f32 %v6450_v11, %v932_v28  ;;  %v1009_v33 = vadd.f32 %v6450_v11, %v933_v35 }
 0x13d   :  { %8791 = vst [vmem:[#allocation26_spill] sm:$0xff] %v6683_v44  ;;  %v1018_v1 = vadd.f32 %v6453_v51, %v942_v48  ;;  %v1019_v16 = vadd.f32 %v6453_v51, %v943_v0  ;;  %v6709_v29 = vmax.f32 %v968_v27, 0.0  ;;  %v6711_v32 = vmax.f32 %v969_v38, 0.0  ;;  %4642 = vmatmul.msk.f32.gmra.mxu0 %vm1878_vm10, %v1868_v58  ;;  %4648 = vmatmul.msk.f32.gmra.mxu1 %vm1878_vm10, %v1868_v58 }
 0x13e   :  { %8792 = vst [vmem:[#allocation50_spill] sm:$0xff] %v6685_v21  ;;  %v6713_v52 = vmax.f32 %v978_v55, 0.0  ;;  %v6715_v41 = vmax.f32 %v979_v10, 0.0  ;;  %v6719_v11 = vmax.f32 %v988_v62, 0.0  ;;  %v6721_v14 = vmax.f32 %v989_v30, 0.0 }
 0x13f   :  { %8793 = vst [vmem:[#allocation46_spill] sm:$0xff] %v6687_v50  ;;  %v6723_v51 = vmax.f32 %v998_v19, 0.0  ;;  %v6725_v56 = vmax.f32 %v999_v59, 0.0  ;;  %v6730_v47 = vmax.f32 %v1008_v13, 0.0  ;;  %v1029_v53 = vmul.f32 %v6628_v39, %v6683_v44 }
 0x140   :  { %8794 = vst [vmem:[#allocation21_spill] sm:$0xff] %v6709_v29  ;;  %v1035_v49 = vmul.f32 %v6631_v15, %v6687_v50  ;;  %v6738_v4 = vstv %s6641_s20  ;;  %v6740_v26 = vmax.f32 %v1009_v33, 0.0  ;;  %v6742_v37 = vmax.f32 %v1018_v1, 0.0  ;;  %s6810_s20 = sld [smem:[#allocation12 + $0x2f]] }
 0x141   :  { %8795 = vst [vmem:[#allocation20_spill] sm:$0xff] %v6711_v32  ;;  %v6744_v45 = vmax.f32 %v1019_v16, 0.0  ;;  %v6747_v22 = vstv %s6643_s21  ;;  %v1045_v57 = vmul.f32 %v6634_v60, %v6711_v32  ;;  %v1055_v63 = vmul.f32 %v6738_v4, %v6715_v41  ;;  %s6816_s21 = sld [smem:[#allocation12 + $0x38]] }
 0x142   :  { %8796 = vst [vmem:[#allocation36_spill] sm:$0xff] %v6713_v52  ;;  %v1039_v12 = vadd.f32 %v1035_v49, %v1029_v53  ;;  %v6754_v42 = vstv %s6652_s23  ;;  %v6759_v7 = vstv %s6658_s24  ;;  %v6762_v5 = vstv %s6663_s3  ;;  %s6863_s23 = sld [smem:[#allocation12 + $0x11]] }
 0x143   :  { %8797 = vst [vmem:[#allocation39_spill] sm:$0xff] %v6715_v41  ;;  %v6765_v24 = vstv %s6670_s26  ;;  %v6768_v43 = vstv %s6673_s27  ;;  %v1065_v18 = vmul.f32 %v6747_v22, %v6721_v14  ;;  %v1580_v9 = vmul.f32 %v6762_v5, %v6681_v17  ;;  %s6872_s24 = sld [smem:[#allocation12 + $0x1a]] }
 0x144   :  { %8798 = vst [vmem:[#allocation49_spill] sm:$0xff] %v6719_v11  ;;  %v1049_v25 = vadd.f32 %v1045_v57, %v1039_v12  ;;  %v1586_v28 = vmul.f32 %v6765_v24, %v6685_v21  ;;  %v1075_v35 = vmul.f32 %v6754_v42, %v6725_v56  ;;  %v6783_v48 = vstv %s6660_s25  ;;  %s6881_s25 = sld [smem:[#allocation12 + $0x23]] }
 0x145   :  { %8799 = vst [vmem:[#allocation35_spill] sm:$0xff] %v6721_v14  ;;  %v1596_v0 = vmul.f32 %v6768_v43, %v6709_v29  ;;  %v6788_v27 = vstv %s6679_s28  ;;  %v6793_v10 = vstv %s6699_s10  ;;  %v6796_v23 = vstv %s6706_s11  ;;  %s6887_s3 = sld [smem:[#allocation12 + $0x2c]] }
 0x146   :  { %8800 = vst [vmem:[#allocation41_spill] sm:$0xff] %v6723_v51  ;;  %v1059_v38 = vadd.f32 %v1055_v63, %v1049_v25  ;;  %v1590_v55 = vadd.f32 %v1586_v28, %v1580_v9  ;;  %v1085_v62 = vmul.f32 %v6759_v7, %v6740_v26  ;;  %v6803_v30 = vstv %s6717_s7  ;;  %s6895_s26 = sld [smem:[#allocation12 + $0x35]] }
 0x147   :  { %8801 = vst [vmem:[#allocation32_spill] sm:$0xff] %v6725_v56  ;;  %v6806_v19 = vstv %s6728_s12  ;;  %v1028_v59 = vmul.f32 %v6628_v39, %v6681_v17  ;;  %v1095_v13 = vmul.f32 %v6783_v48, %v6744_v45  ;;  %v1606_v1 = vmul.f32 %v6788_v27, %v6713_v52  ;;  %s6933_s10 = sld [smem:[#allocation12 + $0x15]] }
 0x148   :  { %8802 = vst [vmem:[#allocation19_spill] sm:$0xff] %v6730_v47  ;;  %v1069_v58 = vadd.f32 %v1065_v18, %v1059_v38  ;;  %v1600_v33 = vadd.f32 %v1596_v0, %v1590_v55  ;;  %v1616_v16 = vmul.f32 %v6793_v10, %v6719_v11  ;;  %v1626_v53 = vmul.f32 %v6796_v23, %v6723_v51  ;;  %s6945_s11 = sld [smem:[#allocation12 + $0x1e]] }
 0x149   :  { %8803 = vst [vmem:[#allocation22_spill] sm:$0xff] %v6738_v4  ;;  %v1636_v49 = vmul.f32 %v6803_v30, %v6730_v47  ;;  %v1034_v12 = vmul.f32 %v6631_v15, %v6685_v21  ;;  %v1646_v25 = vmul.f32 %v6806_v19, %v6742_v37  ;;  %v1044_v18 = vmul.f32 %v6634_v60, %v6709_v29  ;;  %s6959_s7 = sld [smem:[#allocation12 + $0x27]] }
 0x14a   :  { %8804 = vst [vmem:[#allocation37_spill] sm:$0xff] %v6740_v26  ;;  %v1079_v57 = vadd.f32 %v1075_v35, %v1069_v58  ;;  %v1610_v63 = vadd.f32 %v1606_v1, %v1600_v33  ;;  %v1054_v28 = vmul.f32 %v6738_v4, %v6713_v52  ;;  %v6835_v0 = vstv %s6756_s13  ;;  %s6966_s12 = sld [smem:[#allocation12 + $0x30]] }
 0x14b   :  { %8805 = vst [vmem:[#allocation38_spill] sm:$0xff] %v6742_v37  ;;  %v1038_v9 = vadd.f32 %v1034_v12, %v1028_v59  ;;  %v6838_v38 = vstv %s6770_s14  ;;  %v1201_v35 = vmul.f32 %v6835_v0, %v6683_v44  ;;  %v1064_v59 = vmul.f32 %v6747_v22, %v6719_v11  ;;  %s6974_s13 = sld [smem:[#allocation12 + $0x39]] }
 0x14c   :  { %8806 = vst [vmem:[#allocation40_spill] sm:$0xff] %v6744_v45  ;;  %v1089_v55 = vadd.f32 %v1085_v62, %v1079_v57  ;;  %v1620_v6 = vadd.f32 %v1616_v16, %v1610_v63  ;;  %v1207_v58 = vmul.f32 %v6838_v38, %v6687_v50  ;;  %v6847_v1 = vstv %s6778_s17  ;;  %s6981_s14 = sld [smem:[#allocation12 + $0x42]] }
 0x14d   :  { %8807 = vst [vmem:[#allocation42_spill] sm:$0xff] %v6747_v22  ;;  %v1048_v33 = vadd.f32 %v1044_v18, %v1038_v9  ;;  %v6850_v12 = vstv %s6790_s18  ;;  %v1217_v16 = vmul.f32 %v6847_v1, %v6711_v32  ;;  %v1074_v18 = vmul.f32 %v6754_v42, %v6723_v51  ;;  %s6992_s17 = sld [smem:[#allocation12 + $0x5]] }
 0x14e   :  { %8808 = vst [vmem:[#allocation33_spill] sm:$0xff] %v6754_v42  ;;  %v1099_v4 = vadd.f32 %v1095_v13, %v1089_v55  ;;  %v1630_v62 = vadd.f32 %v1626_v53, %v1620_v6  ;;  %v1211_v57 = vadd.f32 %v1207_v58, %v1201_v35  ;;  %v1227_v9 = vmul.f32 %v6850_v12, %v6715_v41  ;;  %s6998_s18 = sld [smem:[#allocation12 + $0xe]] }
 0x14f   :  { %8809 = vst [vmem:[#allocation43_spill] sm:$0xff] %v6759_v7  ;;  %v1058_v63 = vadd.f32 %v1054_v28, %v1048_v33  ;;  %v6861_v22 = vstv %s6798_s19  ;;  %v6867_v53 = vstv %s6810_s20  ;;  %v6870_v55 = vstv %s6816_s21  ;;  %s7009_s19 = sld [smem:[#allocation12 + $0x17]] }
 0x150   :  { %8810 = vst [vmem:[#allocation44_spill] sm:$0xff] %v6783_v48  ;;  %1106 = vrot.lane.b32.xlu0 %v1099_v4, %s5059_s15  ;;  %v1640_v6 = vadd.f32 %v1636_v49, %v1630_v62  ;;  %v1221_v13 = vadd.f32 %v1217_v16, %v1211_v57  ;;  %v1084_v35 = vmul.f32 %v6759_v7, %v6730_v47  ;;  %v6877_v58 = vstv %s6826_s22  ;;  %s7016_s20 = sld [smem:[#allocation12 + $0x20]] }
 0x151   :  { %8811 = vst [vmem:[#allocation45_spill] sm:$0xff] %v6806_v19  ;;  %v1068_v28 = vadd.f32 %v1064_v59, %v1058_v63  ;;  %v1200_v33 = vmul.f32 %v6835_v0, %v6681_v17  ;;  %v1237_v62 = vmul.f32 %v6861_v22, %v6721_v14  ;;  %v1206_v57 = vmul.f32 %v6838_v38, %v6685_v21  ;;  %s7026_s21 = sld [smem:[#allocation12 + $0x29]] }
 0x152   :  { %8812 = vst [vmem:[#allocation28_spill] sm:$0xff] %v6835_v0  ;;  %v1650_v4 = vadd.f32 %v1646_v25, %v1640_v6  ;;  %v1231_v49 = vadd.f32 %v1227_v9, %v1221_v13  ;;  %v1094_v16 = vmul.f32 %v6783_v48, %v6742_v37  ;;  %v1247_v63 = vmul.f32 %v6867_v53, %v6725_v56  ;;  %v1871_v25 = vld [vmem:[%s8415_s1 + $0x28] sm:$0xff]  ;;  %s7033_s22 = sld [smem:[#allocation12 + $0x32]] }
 0x153   :  { %8813 = vst [vmem:[#allocation54_spill] sm:$0xff] %v6838_v38  ;;  %v1078_v59 = vadd.f32 %v1074_v18, %v1068_v28  ;;  %v1257_v0 = vmul.f32 %v6870_v55, %v6740_v26  ;;  %v1267_v18 = vmul.f32 %v6877_v58, %v6744_v45  ;;  %v1210_v6 = vadd.f32 %v1206_v57, %v1200_v33  ;;  %s7473_s27 = sld [smem:[#allocation12 + $0x40]] }
 0x154   :  { %8814 = vst [vmem:[#allocation55_spill] sm:$0xff] %v6847_v1  ;;  %1654 = vrot.lane.b32.xlu2 %v1650_v4, %s5059_s15  ;;  %v1241_v9 = vadd.f32 %v1237_v62, %v1231_v49  ;;  %v1216_v13 = vmul.f32 %v6847_v1, %v6709_v29  ;;  %v1226_v48 = vmul.f32 %v6850_v12, %v6713_v52  ;;  %v7004_v1 = vstv %s6933_s10  ;;  %s7483_s28 = sld [smem:[#allocation12 + $0x22]] }
 0x155   :  { %8815 = vst [vmem:[#allocation56_spill] sm:$0xff] %v6850_v12  ;;  %v1088_v28 = vadd.f32 %v1084_v35, %v1078_v59  ;;  %v1581_v38 = vmul.f32 %v6762_v5, %v6683_v44  ;;  %v1587_v4 = vmul.f32 %v6765_v24, %v6687_v50  ;;  %4645 = vmatmul.msk.f32.gmra.mxu2 %vm1878_vm10, %v1871_v25  ;;  %v7007_v7 = vstv %s6945_s11  ;;  %s7561_s10 = sld [smem:[#allocation12 + $0x46]] }
 0x156   :  { %8816 = vst [vmem:[#allocation57_spill] sm:$0xff] %v6861_v22  ;;  %v1251_v33 = vadd.f32 %v1247_v63, %v1241_v9  ;;  %v1220_v49 = vadd.f32 %v1216_v13, %v1210_v6  ;;  %v1236_v62 = vmul.f32 %v6861_v22, %v6719_v11  ;;  %v1246_v35 = vmul.f32 %v6867_v53, %v6723_v51  ;;  %s7571_s11 = sld [smem:[#allocation12 + $0x28]] }
 0x157   :  { %8817 = vst [vmem:[#allocation58_spill] sm:$0xff] %v6867_v53  ;;  %4651 = vmatmul.msk.f32.gmra.mxu3 %vm1878_vm10, %v1871_v25  ;;  %v1098_v57 = vadd.f32 %v1094_v16, %v1088_v28  ;;  %v1256_v59 = vmul.f32 %v6870_v55, %v6730_v47  ;;  %v1591_v12 = vadd.f32 %v1587_v4, %v1581_v38  ;;  %v6937_v16 = vstv %s6854_s6  ;;  %s7045_s6 = sld [smem:[#allocation12 + $0x3b]] }
 0x158   :  { %8818 = vst [vmem:[#allocation59_spill] sm:$0xff] %v6870_v55  ;;  %v1597_v63 = vmul.f32 %v6768_v43, %v6711_v32  ;;  %v1261_v9 = vadd.f32 %v1257_v0, %v1251_v33  ;;  %v1230_v6 = vadd.f32 %v1226_v48, %v1220_v49  ;;  %v1266_v13 = vmul.f32 %v6877_v58, %v6742_v37 }
 0x159   :  { %8819 = vst [vmem:[#allocation60_spill] sm:$0xff] %v6877_v58  ;;  %v1607_v25 = vmul.f32 %v6788_v27, %v6715_v41  ;;  %1102 = vrot.lane.b32.xlu1 %v1098_v57, %s5059_s15  ;;  %v6940_v28 = vstv %s6863_s23  ;;  %v6943_v4 = vstv %s6872_s24  ;;  %v1753_v33 = vmul.f32 %v6937_v16, %v6683_v44  ;;  %s7059_s23 = sld [smem:[#allocation12 + $0x44]] }
 0x15a   :  { %v1601_v38 = vadd.f32 %v1597_v63, %v1591_v12  ;;  %v1271_v48 = vadd.f32 %v1267_v18, %v1261_v9  ;;  %v1240_v0 = vadd.f32 %v1236_v62, %v1230_v6  ;;  %v1759_v49 = vmul.f32 %v6940_v28, %v6687_v50  ;;  %8822 = vst [vmem:[#allocation63_spill] sm:$0xff] %v7007_v7  ;;  %s7443_s24 = sld [smem:[#allocation12 + $0x37]] }
 0x15b   :  { %v1617_v12 = vmul.f32 %v6793_v10, %v6721_v14  ;;  %v6954_v57 = vstv %s6881_s25  ;;  %v6957_v63 = vstv %s6887_s3  ;;  %v1627_v62 = vmul.f32 %v6796_v23, %v6725_v56  ;;  %s7450_s25 = sld [smem:[#allocation12 + $0x19]] }
 0x15c   :  { %v1611_v58 = vadd.f32 %v1607_v25, %v1601_v38  ;;  %1278 = vrot.lane.b32.xlu2 %v1271_v48, %s5060_s16  ;;  %v1250_v18 = vadd.f32 %v1246_v35, %v1240_v0  ;;  %v1763_v9 = vadd.f32 %v1759_v49, %v1753_v33  ;;  %v1769_v6 = vmul.f32 %v6943_v4, %v6711_v32  ;;  %s7460_s3 = sld [smem:[#allocation12 + $0x4]] }
 0x15d   :  { %v1637_v38 = vmul.f32 %v6803_v30, %v6740_v26  ;;  %v1647_v48 = vmul.f32 %v6806_v19, %v6744_v45  ;;  %v1779_v35 = vmul.f32 %v6954_v57, %v6715_v41  ;;  %v1789_v49 = vmul.f32 %v6957_v63, %v6721_v14 }
 0x15e   :  { %v1621_v25 = vadd.f32 %v1617_v12, %v1611_v58  ;;  %v1260_v0 = vadd.f32 %v1256_v59, %v1250_v18  ;;  %v1773_v33 = vadd.f32 %v1769_v6, %v1763_v9  ;;  %v6979_v58 = vstv %s6895_s26  ;;  %s7466_s26 = sld [smem:[#allocation12 + $0xd]] }
 0x15f   :  { %v6984_v55 = vstv %s6905_s29  ;;  %v6987_v53 = vstv %s6920_s4  ;;  %v6990_v22 = vstv %s6927_s5  ;;  %v7024_v19 = vstv %s6959_s7  ;;  %s7489_s29 = sld [smem:[#allocation12 + $0x2b]] }
 0x160   :  { %v1631_v12 = vadd.f32 %v1627_v62, %v1621_v25  ;;  %8820 = vst [vmem:[#allocation61_spill] sm:$0xff] %v6987_v53  ;;  %v1270_v59 = vadd.f32 %v1266_v13, %v1260_v0  ;;  %v1783_v18 = vadd.f32 %v1779_v35, %v1773_v33  ;;  %v1308_v9 = vmul.f32 %v6987_v53, %v6681_v17  ;;  %s7532_s4 = sld [smem:[#allocation12 + $0x1f]] }
 0x161   :  { %8821 = vst [vmem:[#allocation62_spill] sm:$0xff] %v6990_v22  ;;  %v1314_v6 = vmul.f32 %v6990_v22, %v6685_v21  ;;  %v7001_v25 = vstv %s6913_s30  ;;  %v1799_v35 = vmul.f32 %v6979_v58, %v6725_v56  ;;  %v1324_v33 = vmul.f32 %v7004_v1, %v6709_v29  ;;  %s7500_s30 = sld [smem:[#allocation12 + $0x16]] }
 0x162   :  { %v1641_v62 = vadd.f32 %v1637_v38, %v1631_v12  ;;  %1274 = vrot.lane.b32.xlu0 %v1270_v59, %s5060_s16  ;;  %v1793_v13 = vadd.f32 %v1789_v49, %v1783_v18  ;;  %v7019_v38 = vmax.f32 %v6537_v3, 0.0  ;;  %v1809_v42 = vmul.f32 %v6984_v55, %v6740_v26  ;;  %8824 = vst [vmem:[#allocation65_spill] sm:$0xff] %v7024_v19  ;;  %s7538_s5 = sld [smem:[#allocation12 + $0x3d]] }
 0x163   :  { %v1318_v0 = vadd.f32 %v1314_v6, %v1308_v9  ;;  %v1334_v18 = vmul.f32 %v7007_v7, %v6713_v52  ;;  %v7031_v9 = vstv %s6966_s12  ;;  %v7036_v3 = vmax.f32 %v6540_v8, 0.0  ;;  %s7606_s7 = sld [smem:[#allocation12 + $0x31]] }
 0x164   :  { %8823 = vst [vmem:[#allocation64_spill] sm:$0xff] %v7019_v38  ;;  %v1651_v12 = vadd.f32 %v1647_v48, %v1641_v62  ;;  %v1803_v49 = vadd.f32 %v1799_v35, %v1793_v13  ;;  %v1819_v48 = vmul.f32 %v7001_v25, %v6744_v45  ;;  %v1309_v6 = vmul.f32 %v6987_v53, %v6683_v44  ;;  %s7638_s12 = sld [smem:[#allocation12 + $0x43]] }
 0x165   :  { %v1328_v59 = vadd.f32 %v1324_v33, %v1318_v0  ;;  %8825 = vst [vmem:[#allocation66_spill] sm:$0xff] %v7031_v9  ;;  %v1315_v62 = vmul.f32 %v6990_v22, %v6687_v50  ;;  %v1344_v8 = vmul.f32 %v7024_v19, %v6719_v11  ;;  %v7050_v0 = vstv %s6974_s13 }
 0x166   :  { %8826 = vst [vmem:[#allocation67_spill] sm:$0xff] %v7036_v3  ;;  %1658 = vrot.lane.b32.xlu1 %v1651_v12, %s5059_s15  ;;  %v1813_v13 = vadd.f32 %v1809_v42, %v1803_v49  ;;  %v1354_v33 = vmul.f32 %v7031_v9, %v6723_v51  ;;  %v7055_v12 = vstv %s6981_s14  ;;  %v1325_v50 = vmul.f32 %v7004_v1, %v6711_v32 }
 0x167   :  { %v1338_v35 = vadd.f32 %v1334_v18, %v1328_v59  ;;  %8827 = vst [vmem:[#allocation68_spill] sm:$0xff] %v7050_v0  ;;  %v1319_v44 = vadd.f32 %v1315_v62, %v1309_v6  ;;  %v1335_v49 = vmul.f32 %v7007_v7, %v6715_v41  ;;  %v7064_v59 = vstv %s6992_s17 }
 0x168   :  { %8828 = vst [vmem:[#allocation69_spill] sm:$0xff] %v7055_v12  ;;  %v1823_v22 = vadd.f32 %v1819_v48, %v1813_v13  ;;  %v1480_v53 = vmul.f32 %v7064_v59, %v6681_v17  ;;  %v7069_v3 = vstv %s6998_s18  ;;  %v7072_v6 = vstv %s7009_s19  ;;  %s4576_s18 = sld [smem:[#allocation12 + $0x1]] }
 0x169   :  { %v1348_v42 = vadd.f32 %v1344_v8, %v1338_v35  ;;  %8829 = vst [vmem:[#allocation70_spill] sm:$0xff] %v7064_v59  ;;  %v1329_v18 = vadd.f32 %v1325_v50, %v1319_v44  ;;  %v1364_v62 = vmul.f32 %v7050_v0, %v6730_v47  ;;  %v1374_v13 = vmul.f32 %v7055_v12, %v6742_v37  ;;  %s4577_s19 = sld [smem:[#allocation12 + $0xa]] }
 0x16a   :  { %8830 = vst [vmem:[#allocation71_spill] sm:$0xff] %v7069_v3  ;;  %1830 = vrot.lane.b32.xlu2 %v1823_v22, %s5060_s16  ;;  %v1486_v44 = vmul.f32 %v7069_v3, %v6685_v21  ;;  %v1345_v35 = vmul.f32 %v7024_v19, %v6721_v14  ;;  %v1355_v8 = vmul.f32 %v7031_v9, %v6725_v56  ;;  %v7086_v41 = vstv %s7016_s20  ;;  %s4579_s20 = sld [smem:[#allocation12 + $0x1c]] }
 0x16b   :  { %8831 = vst [vmem:[#allocation72_spill] sm:$0xff] %v7072_v6  ;;  %v1358_v48 = vadd.f32 %v1354_v33, %v1348_v42  ;;  %v1339_v50 = vadd.f32 %v1335_v49, %v1329_v18  ;;  %v1496_v42 = vmul.f32 %v7072_v6, %v6709_v29  ;;  %v7091_v32 = vstv %s7026_s21  ;;  %s7425_s21 = sld [smem:[#allocation12 + $0x25]] }
 0x16c   :  { %8832 = vst [vmem:[#allocation73_spill] sm:$0xff] %v7086_v41  ;;  %v1490_v33 = vadd.f32 %v1486_v44, %v1480_v53  ;;  %v7094_v7 = vstv %s7033_s22  ;;  %v7097_v49 = vstv %s7045_s6  ;;  %v1752_v18 = vmul.f32 %v6937_v16, %v6681_v17  ;;  %s7427_s22 = sld [smem:[#allocation12 + $0x7]] }
 0x16d   :  { %v1368_v22 = vadd.f32 %v1364_v62, %v1358_v48  ;;  %8833 = vst [vmem:[#allocation74_spill] sm:$0xff] %v7091_v32  ;;  %v1349_v59 = vadd.f32 %v1345_v35, %v1339_v50  ;;  %v1365_v56 = vmul.f32 %v7050_v0, %v6740_v26  ;;  %v1506_v53 = vmul.f32 %v7086_v41, %v6713_v52  ;;  %v8848_v41 = vld [vmem:[#allocation54_spill] sm:$0xff]  ;;  %s7431_s6 = sld [smem:[#allocation12 + $0x10]] }
 0x16e   :  { %8834 = vst [vmem:[#allocation75_spill] sm:$0xff] %v7094_v7  ;;  %v1500_v3 = vadd.f32 %v1496_v42, %v1490_v33  ;;  %v1375_v62 = vmul.f32 %v7055_v12, %v6744_v45  ;;  %v7108_v44 = vstv %s7059_s23  ;;  %v1758_v50 = vmul.f32 %v6940_v28, %v6685_v21  ;;  %s7437_s23 = sld [smem:[#allocation12 + $0x2e]] }
 0x16f   :  { %8835 = vst [vmem:[#allocation76_spill] sm:$0xff] %v7097_v49  ;;  %v1378_v14 = vadd.f32 %v1374_v13, %v1368_v22  ;;  %v1359_v48 = vadd.f32 %v1355_v8, %v1349_v59  ;;  %v1516_v13 = vmul.f32 %v7091_v32, %v6719_v11  ;;  %v1526_v22 = vmul.f32 %v7094_v7, %v6723_v51  ;;  %v8846_v32 = vld [vmem:[#allocation43_spill] sm:$0xff] }
 0x170   :  { %8836 = vst [vmem:[#allocation77_spill] sm:$0xff] %v7108_v44  ;;  %v1510_v35 = vadd.f32 %v1506_v53, %v1500_v3  ;;  %v1536_v59 = vmul.f32 %v7097_v49, %v6730_v47  ;;  %v1762_v33 = vadd.f32 %v1758_v50, %v1752_v18  ;;  %v1768_v42 = vmul.f32 %v6943_v4, %v6709_v29  ;;  %v8839_v29 = vld [vmem:[#allocation22_spill] sm:$0xff]  ;;  %v8844_v49 = vld [vmem:[#allocation33_spill] sm:$0xff] }
 0x171   :  { %1382 = vrot.lane.b32.xlu0 %v1378_v14, %s5059_s15  ;;  %v1369_v8 = vadd.f32 %v1365_v56, %v1359_v48  ;;  %v1578_v21 = vmul.f32 %v6762_v5, %v6510_v20  ;;  %v1546_v14 = vmul.f32 %v7108_v44, %v6742_v37  ;;  %v1778_v3 = vmul.f32 %v6954_v57, %v6713_v52  ;;  %v8843_v44 = vld [vmem:[#allocation52_spill] sm:$0xff] }
 0x172   :  { %v1520_v17 = vadd.f32 %v1516_v13, %v1510_v35  ;;  %v1584_v53 = vmul.f32 %v6765_v24, %v6518_v40  ;;  %v1772_v26 = vadd.f32 %v1768_v42, %v1762_v33  ;;  %v1788_v56 = vmul.f32 %v6957_v63, %v6719_v11  ;;  %v8838_v11 = vld [vmem:[#allocation25_spill] sm:$0xff] }
 0x173   :  { %v1379_v45 = vadd.f32 %v1375_v62, %v1369_v8  ;;  %v1798_v18 = vmul.f32 %v6979_v58, %v6723_v51  ;;  %v1808_v50 = vmul.f32 %v6984_v55, %v6730_v47  ;;  %v1594_v13 = vmul.f32 %v6768_v43, %v6524_v36  ;;  %v8837_v51 = vld [vmem:[#allocation27_spill] sm:$0xff] }
 0x174   :  { %v1530_v48 = vadd.f32 %v1526_v22, %v1520_v17  ;;  %v1588_v35 = vadd.f32 %v1584_v53, %v1578_v21  ;;  %v1782_v52 = vadd.f32 %v1778_v3, %v1772_v26  ;;  %v1818_v62 = vmul.f32 %v7001_v25, %v6742_v37 }
 0x175   :  { %1386 = vrot.lane.b32.xlu1 %v1379_v45, %s5059_s15  ;;  %v1027_v8 = vmul.f32 %v6628_v39, %v6512_v46  ;;  %v1033_v33 = vmul.f32 %v6631_v15, %v6520_v54  ;;  %v1604_v21 = vmul.f32 %v6788_v27, %v6528_v34  ;;  %v1614_v42 = vmul.f32 %v6793_v10, %v6532_v31 }
 0x176   :  { %v1540_v17 = vadd.f32 %v1536_v59, %v1530_v48  ;;  %v1598_v22 = vadd.f32 %v1594_v13, %v1588_v35  ;;  %v1792_v53 = vadd.f32 %v1788_v56, %v1782_v52  ;;  %v1624_v26 = vmul.f32 %v6796_v23, %v6542_v2 }
 0x177   :  { %v1037_v45 = vadd.f32 %v1033_v33, %v1027_v8  ;;  %v1043_v3 = vmul.f32 %v6634_v60, %v6526_v61  ;;  %v1634_v59 = vmul.f32 %v6803_v30, %v8837_v51  ;;  %v1026_v48 = vmul.f32 %v6628_v39, %v6510_v20 }
 0x178   :  { %v1550_v37 = vadd.f32 %v1546_v14, %v1540_v17  ;;  %v1608_v47 = vadd.f32 %v1604_v21, %v1598_v22  ;;  %v1802_v35 = vadd.f32 %v1798_v18, %v1792_v53  ;;  %v1053_v52 = vmul.f32 %v8839_v29, %v8838_v11  ;;  %v8840_v14 = vld [vmem:[#allocation45_spill] sm:$0xff]  ;;  %v8841_v17 = vld [vmem:[#allocation51_spill] sm:$0xff]  ;;  %v8842_v22 = vld [vmem:[#allocation42_spill] sm:$0xff] }
 0x179   :  { %v1047_v13 = vadd.f32 %v1043_v3, %v1037_v45  ;;  %v1032_v56 = vmul.f32 %v6631_v15, %v6518_v40  ;;  %v1644_v33 = vmul.f32 %v8840_v14, %v7019_v38  ;;  %v1063_v21 = vmul.f32 %v8842_v22, %v8841_v17  ;;  %v8845_v15 = vld [vmem:[#allocation53_spill] sm:$0xff] }
 0x17a   :  { %1554 = vrot.lane.b32.xlu2 %v1550_v37, %s5060_s16  ;;  %v1618_v8 = vadd.f32 %v1614_v42, %v1608_v47  ;;  %v1073_v39 = vmul.f32 %v8844_v49, %v8843_v44  ;;  %v1812_v18 = vadd.f32 %v1808_v50, %v1802_v35  ;;  %v1042_v3 = vmul.f32 %v6634_v60, %v6524_v36  ;;  %v8847_v47 = vld [vmem:[#allocation28_spill] sm:$0xff]  ;;  %v8849_v35 = vld [vmem:[#allocation67_spill] sm:$0xff] }
 0x17b   :  { %v1057_v53 = vadd.f32 %v1053_v52, %v1047_v13  ;;  %v1036_v45 = vadd.f32 %v1032_v56, %v1026_v48  ;;  %v1083_v37 = vmul.f32 %v8846_v32, %v8845_v15  ;;  %v1199_v42 = vmul.f32 %v8847_v47, %v6512_v46  ;;  %v8850_v13 = vld [vmem:[#allocation44_spill] sm:$0xff]  ;;  %v8851_v52 = vld [vmem:[#allocation55_spill] sm:$0xff] }
 0x17c   :  { %v1628_v7 = vadd.f32 %v1624_v26, %v1618_v8  ;;  %v1205_v6 = vmul.f32 %v8848_v41, %v6520_v54  ;;  %v1822_v12 = vadd.f32 %v1818_v62, %v1812_v18  ;;  %v1052_v50 = vmul.f32 %v8839_v29, %v6528_v34 }
 0x17d   :  { %v1067_v0 = vadd.f32 %v1063_v21, %v1057_v53  ;;  %v1046_v9 = vadd.f32 %v1042_v3, %v1036_v45  ;;  %v1093_v60 = vmul.f32 %v8850_v13, %v8849_v35  ;;  %v1215_v56 = vmul.f32 %v8851_v52, %v6526_v61 }
 0x17e   :  { %v1638_v48 = vadd.f32 %v1634_v59, %v1628_v7  ;;  %v1209_v26 = vadd.f32 %v1205_v6, %v1199_v42  ;;  %1826 = vrot.lane.b32.xlu0 %v1822_v12, %s5060_s16  ;;  %v1062_v62 = vmul.f32 %v8842_v22, %v6532_v31  ;;  %v1072_v21 = vmul.f32 %v8844_v49, %v6542_v2  ;;  %v8852_v7 = vld [vmem:[#allocation56_spill] sm:$0xff] }
 0x17f   :  { %v1077_v8 = vadd.f32 %v1073_v39, %v1067_v0  ;;  %v1056_v19 = vadd.f32 %v1052_v50, %v1046_v9  ;;  %v1225_v59 = vmul.f32 %v8852_v7, %v8838_v11  ;;  %v1198_v6 = vmul.f32 %v8847_v47, %v6510_v20  ;;  %v8854_v39 = vld [vmem:[#allocation58_spill] sm:$0xff] }
 0x180   :  { %v1648_v18 = vadd.f32 %v1644_v33, %v1638_v48  ;;  %v1219_v29 = vadd.f32 %v1215_v56, %v1209_v26  ;;  %v1082_v0 = vmul.f32 %v8846_v32, %v8837_v51  ;;  %v1204_v9 = vmul.f32 %v8848_v41, %v6518_v40  ;;  %v8853_v33 = vld [vmem:[#allocation57_spill] sm:$0xff]  ;;  %v8855_v41 = vld [vmem:[#allocation59_spill] sm:$0xff] }
 0x181   :  { %v1087_v53 = vadd.f32 %v1083_v37, %v1077_v8  ;;  %v1066_v45 = vadd.f32 %v1062_v62, %v1056_v19  ;;  %v1092_v12 = vmul.f32 %v8850_v13, %v7019_v38  ;;  %v1235_v22 = vmul.f32 %v8853_v33, %v8841_v17 }
 0x182   :  { %1652 = vrot.lane.b32.xlu1 %v1648_v18, %s5059_s15  ;;  %v1229_v49 = vadd.f32 %v1225_v59, %v1219_v29  ;;  %v1245_v3 = vmul.f32 %v8854_v39, %v8843_v44  ;;  %v1208_v47 = vadd.f32 %v1204_v9, %v1198_v6  ;;  %v1214_v32 = vmul.f32 %v8851_v52, %v6524_v36 }
 0x183   :  { %v1097_v37 = vadd.f32 %v1093_v60, %v1087_v53  ;;  %v1076_v19 = vadd.f32 %v1072_v21, %v1066_v45  ;;  %v1255_v50 = vmul.f32 %v8855_v41, %v8845_v15  ;;  %v1579_v48 = vmul.f32 %v6762_v5, %v6512_v46  ;;  %v8856_v60 = vld [vmem:[#allocation60_spill] sm:$0xff] }
 0x184   :  { %v1239_v42 = vadd.f32 %v1235_v22, %v1229_v49  ;;  %v1585_v13 = vmul.f32 %v6765_v24, %v6520_v54  ;;  %v1265_v56 = vmul.f32 %v8856_v60, %v8849_v35  ;;  %v1218_v8 = vadd.f32 %v1214_v32, %v1208_v47 }
 0x185   :  { %1104 = vrot.lane.b32.xlu2 %v1097_v37, %s5059_s15  ;;  %v1086_v26 = vadd.f32 %v1082_v0, %v1076_v19  ;;  %v1224_v52 = vmul.f32 %v8852_v7, %v6528_v34  ;;  %v1234_v21 = vmul.f32 %v8853_v33, %v6532_v31  ;;  %v1595_v5 = vmul.f32 %v6768_v43, %v6526_v61 }
 0x186   :  { %v1249_v62 = vadd.f32 %v1245_v3, %v1239_v42  ;;  %v1589_v18 = vadd.f32 %v1585_v13, %v1579_v48  ;;  %v1244_v59 = vmul.f32 %v8854_v39, %v6542_v2  ;;  %v1605_v6 = vmul.f32 %v6788_v27, %v8838_v11 }
 0x187   :  { %v1096_v29 = vadd.f32 %v1092_v12, %v1086_v26  ;;  %v1228_v24 = vadd.f32 %v1224_v52, %v1218_v8  ;;  %v1751_v7 = vmul.f32 %v6937_v16, %v6512_v46  ;;  %v1757_v0 = vmul.f32 %v6940_v28, %v6520_v54  ;;  %v8857_v52 = vld [vmem:[#allocation61_spill] sm:$0xff] }
 0x188   :  { %v1259_v53 = vadd.f32 %v1255_v50, %v1249_v62  ;;  %v1599_v45 = vadd.f32 %v1595_v5, %v1589_v18  ;;  %v1254_v43 = vmul.f32 %v8855_v41, %v8837_v51  ;;  %v1264_v12 = vmul.f32 %v8856_v60, %v7019_v38 }
 0x189   :  { %1100 = vrot.lane.b32.xlu0 %v1096_v29, %s5059_s15  ;;  %v1238_v9 = vadd.f32 %v1234_v21, %v1228_v24  ;;  %v1615_v27 = vmul.f32 %v6793_v10, %v8841_v17  ;;  %v1761_v22 = vadd.f32 %v1757_v0, %v1751_v7  ;;  %v1767_v39 = vmul.f32 %v6943_v4, %v6526_v61  ;;  %v8858_v21 = vld [vmem:[#allocation62_spill] sm:$0xff] }
 0x18a   :  { %v1269_v49 = vadd.f32 %v1265_v56, %v1259_v53  ;;  %v1609_v33 = vadd.f32 %v1605_v6, %v1599_v45  ;;  %v1625_v37 = vmul.f32 %v6796_v23, %v8843_v44  ;;  %v1635_v19 = vmul.f32 %v6803_v30, %v8845_v15  ;;  %v4488_v6 = vld [vmem:[%s8414_s0 + $0x48] sm:$0xff] }
 0x18b   :  { %v1248_v3 = vadd.f32 %v1244_v59, %v1238_v9  ;;  %v1750_v47 = vmul.f32 %v6937_v16, %v6510_v20  ;;  %v1771_v10 = vadd.f32 %v1767_v39, %v1761_v22  ;;  %v1777_v42 = vmul.f32 %v6954_v57, %v8838_v11 }
 0x18c   :  { %1276 = vrot.lane.b32.xlu1 %v1269_v49, %s5060_s16  ;;  %v1619_v32 = vadd.f32 %v1615_v27, %v1609_v33  ;;  %v1756_v41 = vmul.f32 %v6940_v28, %v6518_v40  ;;  %v1645_v23 = vmul.f32 %v8840_v14, %v8849_v35  ;;  %v1787_v30 = vmul.f32 %v6957_v63, %v8841_v17  ;;  %v4489_v28 = vld [vmem:[%s8414_s0 + $0x50] sm:$0xff]  ;;  %v4490_v14 = vld [vmem:[%s8414_s0 + $0x58] sm:$0xff]  ;;  %v1872_v27 = vld [vmem:[%s8416_s2] sm:$0xff] }
 0x18d   :  { %v1258_v50 = vadd.f32 %v1254_v43, %v1248_v3  ;;  %v1797_v16 = vmul.f32 %v6979_v58, %v8843_v44  ;;  %v1781_v13 = vadd.f32 %v1777_v42, %v1771_v10  ;;  %v1766_v60 = vmul.f32 %v6943_v4, %v6524_v36  ;;  %2069 = vmatpush.msrb.mxu0 %v4489_v28  ;;  %v4487_v4 = vld [vmem:[%s8414_s0 + $0x40] sm:$0xff]  ;;  %v8860_v10 = vld [vmem:[#allocation65_spill] sm:$0xff]  ;;  %s7513_s0 = sld [smem:[#allocation12 + $0x34]] }
 0x18e   :  { %v1629_v48 = vadd.f32 %v1625_v37, %v1619_v32  ;;  %v1760_v26 = vadd.f32 %v1756_v41, %v1750_v47  ;;  %v1807_v8 = vmul.f32 %v6984_v55, %v8845_v15  ;;  %v1306_v62 = vmul.f32 %v8857_v52, %v6510_v20  ;;  %2104 = vmatpush.msrb.mxu1 %v4490_v14  ;;  %v8859_v33 = vld [vmem:[#allocation63_spill] sm:$0xff]  ;;  %v2246_v47 = vld [vmem:[#allocation3 + $0x3c8] sm:$0xff] }
 0x18f   :  { %v1268_v56 = vadd.f32 %v1264_v12, %v1258_v50  ;;  %v1312_v18 = vmul.f32 %v8858_v21, %v6518_v40  ;;  %v1791_v29 = vadd.f32 %v1787_v30, %v1781_v13  ;;  %v1776_v59 = vmul.f32 %v6954_v57, %v6528_v34  ;;  %2070 = vmatpush.msrb.mxu0 %v4487_v4 }
 0x190   :  { %v1639_v5 = vadd.f32 %v1635_v19, %v1629_v48  ;;  %v1770_v24 = vadd.f32 %v1766_v60, %v1760_v26  ;;  %v1817_v53 = vmul.f32 %v7001_v25, %v8849_v35  ;;  %v1786_v45 = vmul.f32 %v6957_v63, %v6532_v31  ;;  %2105 = vmatpush.msrb.mxu1 %v4488_v6  ;;  %v8862_v60 = vld [vmem:[#allocation70_spill] sm:$0xff]  ;;  %v8866_v6 = vld [vmem:[#allocation72_spill] sm:$0xff] }
 0x191   :  { %1272 = vrot.lane.b32.xlu2 %v1268_v56, %s5060_s16  ;;  %v1316_v7 = vadd.f32 %v1312_v18, %v1306_v62  ;;  %v1322_v0 = vmul.f32 %v7004_v1, %v6524_v36  ;;  %v1801_v43 = vadd.f32 %v1797_v16, %v1791_v29  ;;  %v1796_v12 = vmul.f32 %v6979_v58, %v6542_v2  ;;  %v8861_v16 = vld [vmem:[#allocation66_spill] sm:$0xff]  ;;  %v2238_v56 = vld [vmem:[#allocation3 + $0x388] sm:$0xff] }
 0x192   :  { %v1649_v9 = vadd.f32 %v1645_v23, %v1639_v5  ;;  %v1780_v57 = vadd.f32 %v1776_v59, %v1770_v24  ;;  %v1332_v22 = vmul.f32 %v8859_v33, %v6528_v34  ;;  %v1307_v63 = vmul.f32 %v8857_v52, %v6512_v46  ;;  %4664 = vmatmul.msk.f32.vlgmr.msrb.gmra.mxu0 %vm1878_vm10, %v1872_v27  ;;  %v8864_v52 = vld [vmem:[#allocation68_spill] sm:$0xff] }
 0x193   :  { %v1326_v49 = vadd.f32 %v1322_v0, %v1316_v7  ;;  %v1313_v39 = vmul.f32 %v8858_v21, %v6520_v54  ;;  %v1811_v3 = vadd.f32 %v1807_v8, %v1801_v43  ;;  %v1806_v37 = vmul.f32 %v6984_v55, %v8837_v51  ;;  %4670 = vmatmul.msk.f32.vlgmr.msrb.gmra.mxu1 %vm1878_vm10, %v1872_v27  ;;  %v8865_v21 = vld [vmem:[#allocation69_spill] sm:$0xff]  ;;  %v2366_v5 = vld [vmem:[#allocation3 + $0x788] sm:$0xff]  ;;  %v8868_v43 = vld [vmem:[#allocation26_spill] sm:$0xff] }
 0x194   :  { %1656 = vrot.lane.b32.xlu0 %v1649_v9, %s5059_s15  ;;  %v1790_v58 = vadd.f32 %v1786_v45, %v1780_v57  ;;  %v1816_v19 = vmul.f32 %v7001_v25, %v7019_v38  ;;  %v1342_v42 = vmul.f32 %v8860_v10, %v6532_v31  ;;  %v1323_v50 = vmul.f32 %v7004_v1, %v6526_v61  ;;  %v2374_v25 = vld [vmem:[#allocation3 + $0x7c8] sm:$0xff]  ;;  %v8863_v1 = vld [vmem:[#allocation71_spill] sm:$0xff]  ;;  %v8867_v0 = vld [vmem:[#allocation73_spill] sm:$0xff] }
 0x195   :  { %v1336_v32 = vadd.f32 %v1332_v22, %v1326_v49  ;;  %v1317_v41 = vadd.f32 %v1313_v39, %v1307_v63  ;;  %v1821_v23 = vadd.f32 %v1817_v53, %v1811_v3  ;;  %v1352_v48 = vmul.f32 %v8861_v16, %v6542_v2  ;;  %2707 = vmatpush.msra.mxu0 %v2246_v47  ;;  %v8869_v22 = vld [vmem:[#allocation46_spill] sm:$0xff] }
 0x196   :  { %v1800_v30 = vadd.f32 %v1796_v12, %v1790_v58  ;;  %v1333_v55 = vmul.f32 %v8859_v33, %v8838_v11  ;;  %v1479_v28 = vmul.f32 %v8862_v60, %v6512_v46  ;;  %v1485_v14 = vmul.f32 %v8863_v1, %v6520_v54  ;;  %2742 = vmatpush.msra.mxu1 %v2374_v25  ;;  %v1873_v12 = vld [vmem:[%s8416_s2 + $0x8] sm:$0xff]  ;;  %v8870_v3 = vld [vmem:[#allocation74_spill] sm:$0xff] }
 0x197   :  { %v1346_v13 = vadd.f32 %v1342_v42, %v1336_v32  ;;  %v1327_v26 = vadd.f32 %v1323_v50, %v1317_v41  ;;  %1828 = vrot.lane.b32.xlu1 %v1821_v23, %s5060_s16  ;;  %v1362_v62 = vmul.f32 %v8864_v52, %v8837_v51  ;;  %v1372_v18 = vmul.f32 %v8865_v21, %v7019_v38  ;;  %v2230_v41 = vld [vmem:[#allocation3 + $0x348] sm:$0xff]  ;;  %v8872_v23 = vld [vmem:[#allocation75_spill] sm:$0xff] }
 0x198   :  { %v1810_v8 = vadd.f32 %v1806_v37, %v1800_v30  ;;  %v1343_v4 = vmul.f32 %v8860_v10, %v8841_v17  ;;  %v1489_v59 = vadd.f32 %v1485_v14, %v1479_v28  ;;  %v1495_v53 = vmul.f32 %v8866_v6, %v6526_v61  ;;  %2708 = vmatpush.msra.mxu0 %v2238_v56  ;;  %v8871_v37 = vld [vmem:[#allocation20_spill] sm:$0xff]  ;;  %v8873_v28 = vld [vmem:[#allocation39_spill] sm:$0xff] }
 0x199   :  { %v1356_v29 = vadd.f32 %v1352_v48, %v1346_v13  ;;  %v1337_v24 = vadd.f32 %v1333_v55, %v1327_v26  ;;  %v1353_v7 = vmul.f32 %v8861_v16, %v8843_v44  ;;  %v1505_v9 = vmul.f32 %v8867_v0, %v8838_v11  ;;  %2743 = vmatpush.msra.mxu1 %v2366_v5  ;;  %v2358_v55 = vld [vmem:[#allocation3 + $0x748] sm:$0xff]  ;;  %v8875_v5 = vld [vmem:[#allocation35_spill] sm:$0xff] }
 0x19a   :  { %v1820_v45 = vadd.f32 %v1816_v19, %v1810_v8  ;;  %v1481_v57 = vmul.f32 %v8862_v60, %v8868_v43  ;;  %v1499_v33 = vadd.f32 %v1495_v53, %v1489_v59  ;;  %v1487_v63 = vmul.f32 %v8863_v1, %v8869_v22  ;;  %4665 = vmatmul.msk.f32.gmra.mxu0 %vm1878_vm10, %v1873_v12  ;;  %v2222_v56 = vld [vmem:[#allocation3 + $0x308] sm:$0xff]  ;;  %v8876_v59 = vld [vmem:[#allocation77_spill] sm:$0xff] }
 0x19b   :  { %v1366_v27 = vadd.f32 %v1362_v62, %v1356_v29  ;;  %v1347_v49 = vadd.f32 %v1343_v4, %v1337_v24  ;;  %v1363_v39 = vmul.f32 %v8864_v52, %v8845_v15  ;;  %v1515_v58 = vmul.f32 %v8870_v3, %v8841_v17  ;;  %4671 = vmatmul.msk.f32.gmra.mxu1 %vm1878_vm10, %v1873_v12  ;;  %v8874_v8 = vld [vmem:[#allocation76_spill] sm:$0xff] }
 0x19c   :  { %1824 = vrot.lane.b32.xlu2 %v1820_v45, %s5060_s16  ;;  %v1497_v19 = vmul.f32 %v8866_v6, %v8871_v37  ;;  %v1509_v10 = vadd.f32 %v1505_v9, %v1499_v33  ;;  %v1491_v42 = vadd.f32 %v1487_v63, %v1481_v57  ;;  %v1373_v50 = vmul.f32 %v8865_v21, %v8849_v35  ;;  %v2214_v24 = vld [vmem:[#allocation3 + $0x2c8] sm:$0xff] }
 0x19d   :  { %v1376_v47 = vadd.f32 %v1372_v18, %v1366_v27  ;;  %v1357_v32 = vadd.f32 %v1353_v7, %v1347_v49  ;;  %v1525_v30 = vmul.f32 %v8872_v23, %v8843_v44  ;;  %v1478_v16 = vmul.f32 %v8862_v60, %v6510_v20  ;;  %2709 = vmatpush.msra.mxu0 %v2230_v41  ;;  %v2342_v9 = vld [vmem:[#allocation3 + $0x6c8] sm:$0xff] }
 0x19e   :  { %v1484_v48 = vmul.f32 %v8863_v1, %v6518_v40  ;;  %v1519_v13 = vadd.f32 %v1515_v58, %v1509_v10  ;;  %v1501_v26 = vadd.f32 %v1497_v19, %v1491_v42  ;;  %v1507_v14 = vmul.f32 %v8867_v0, %v8873_v28  ;;  %v2350_v1 = vld [vmem:[#allocation3 + $0x708] sm:$0xff]  ;;  %2744 = vmatpush.msra.mxu1 %v2358_v55 }
 0x19f   :  { %1380 = vrot.lane.b32.xlu0 %v1376_v47, %s5059_s15  ;;  %v1367_v25 = vadd.f32 %v1363_v39, %v1357_v32  ;;  %v1535_v52 = vmul.f32 %v8874_v8, %v8845_v15  ;;  %v1494_v60 = vmul.f32 %v8866_v6, %v6524_v36  ;;  %v1517_v29 = vmul.f32 %v8870_v3, %v8875_v5  ;;  %v1874_v6 = vld [vmem:[%s8416_s2 + $0x10] sm:$0xff]  ;;  %v8877_v27 = vld [vmem:[#allocation32_spill] sm:$0xff] }
 0x1a0   :  { %v1488_v62 = vadd.f32 %v1484_v48, %v1478_v16  ;;  %v1529_v18 = vadd.f32 %v1525_v30, %v1519_v13  ;;  %v1511_v4 = vadd.f32 %v1507_v14, %v1501_v26  ;;  %v1545_v53 = vmul.f32 %v8876_v59, %v8849_v35  ;;  %2710 = vmatpush.msra.mxu0 %v2222_v56  ;;  %v2206_v33 = vld [vmem:[#allocation3 + $0x288] sm:$0xff]  ;;  %v8878_v47 = vld [vmem:[#allocation37_spill] sm:$0xff] }
 0x1a1   :  { %v1377_v21 = vadd.f32 %v1373_v50, %v1367_v25  ;;  %v1504_v7 = vmul.f32 %v8867_v0, %v6528_v34  ;;  %v1527_v49 = vmul.f32 %v8872_v23, %v8877_v27  ;;  %2745 = vmatpush.msra.mxu1 %v2350_v1  ;;  %v1514_v39 = vmul.f32 %v8870_v3, %v6532_v31  ;;  %v2334_v0 = vld [vmem:[#allocation3 + $0x688] sm:$0xff] }
 0x1a2   :  { %v1498_v45 = vadd.f32 %v1494_v60, %v1488_v62  ;;  %v1539_v57 = vadd.f32 %v1535_v52, %v1529_v18  ;;  %v1521_v12 = vadd.f32 %v1517_v29, %v1511_v4  ;;  %2711 = vmatpush.msra.mxu0 %v2214_v24  ;;  %v1537_v32 = vmul.f32 %v8874_v8, %v8878_v47  ;;  %v2198_v10 = vld [vmem:[#allocation3 + $0x248] sm:$0xff]  ;;  %v1875_v52 = vld [vmem:[%s8416_s2 + $0x18] sm:$0xff]  ;;  %v1876_v24 = vld [vmem:[%s8416_s2 + $0x20] sm:$0xff] }
 0x1a3   :  { %1384 = vrot.lane.b32.xlu1 %v1377_v21, %s5059_s15  ;;  %4666 = vmatmul.msk.f32.gmra.mxu0 %vm1878_vm10, %v1874_v6  ;;  %v1524_v41 = vmul.f32 %v8872_v23, %v6542_v2  ;;  %v2326_v50 = vld [vmem:[#allocation3 + $0x648] sm:$0xff]  ;;  %v1534_v25 = vmul.f32 %v8874_v8, %v8837_v51  ;;  %v1544_v56 = vmul.f32 %v8876_v59, %v7019_v38  ;;  %v7547_v15 = vstv %s7483_s28  ;;  %s7628_s15 = sld [smem:[#allocation12 + $0x3a]]  ;;  %s5062_s28 = smov 3072  }
 0x1a4   :  { %v1508_v63 = vadd.f32 %v1504_v7, %v1498_v45  ;;  %v1549_v58 = vadd.f32 %v1545_v53, %v1539_v57  ;;  %v1531_v19 = vadd.f32 %v1527_v49, %v1521_v12  ;;  %2746 = vmatpush.msra.mxu1 %v2342_v9  ;;  %2712 = vmatpush.msra.mxu0 %v2206_v33  ;;  %v8879_v30 = vld [vmem:[#allocation40_spill] sm:$0xff]  ;;  %v7550_v51 = vstv %s7489_s29  ;;  %s5063_s29 = smov 192  }
 0x1a5   :  { %4672 = vmatmul.msk.f32.gmra.mxu1 %vm1878_vm10, %v1874_v6  ;;  %v1547_v16 = vmul.f32 %v8876_v59, %v8879_v30  ;;  %v2190_v48 = vld [vmem:[#allocation3 + $0x208] sm:$0xff] }
 0x1a6   :  { %v1518_v42 = vadd.f32 %v1514_v39, %v1508_v63  ;;  %1556 = vrot.lane.b32.xlu2 %v1549_v58, %s5060_s16  ;;  %v1541_v3 = vadd.f32 %v1537_v32, %v1531_v19  ;;  %2747 = vmatpush.msra.mxu1 %v2334_v0  ;;  %v2318_v13 = vld [vmem:[#allocation3 + $0x608] sm:$0xff]  ;;  %v2248_v39 = vld [vmem:[#allocation3 + $0x3d8] sm:$0xff] }
 0x1a7   :  { %2713 = vmatpush.msra.mxu0 %v2198_v10  ;;  %v2182_v23 = vld [vmem:[#allocation3 + $0x1c8] sm:$0xff]  ;;  %v2376_v0 = vld [vmem:[#allocation3 + $0x7d8] sm:$0xff]  ;;  %v7407_v10 = vstv %s4576_s18 }
 0x1a8   :  { %v1528_v55 = vadd.f32 %v1524_v41, %v1518_v42  ;;  %v1551_v26 = vadd.f32 %v1547_v16, %v1541_v3  ;;  %2748 = vmatpush.msra.mxu1 %v2326_v50  ;;  %v2310_v62 = vld [vmem:[#allocation3 + $0x5c8] sm:$0xff]  ;;  %v2240_v58 = vld [vmem:[#allocation3 + $0x398] sm:$0xff]  ;;  %v7409_v42 = vstv %s4577_s19 }
 0x1a9   :  { %2714 = vmatpush.msra.mxu0 %v2190_v48  ;;  %v2174_v8 = vld [vmem:[#allocation3 + $0x188] sm:$0xff]  ;;  %v7399_v33 = vpop.f32.mrf.mxu0  ;;  %v2368_v19 = vld [vmem:[#allocation3 + $0x798] sm:$0xff] }
 0x1aa   :  { %v1538_v14 = vadd.f32 %v1534_v25, %v1528_v55  ;;  %1558 = vrot.lane.b32.xlu0 %v1551_v26, %s5060_s16  ;;  %2749 = vmatpush.msra.mxu1 %v2318_v13  ;;  %v2302_v1 = vld [vmem:[#allocation3 + $0x588] sm:$0xff]  ;;  %v7401_v63 = vpop.f32.mrf.mxu1  ;;  %v2232_v50 = vld [vmem:[#allocation3 + $0x358] sm:$0xff] }
 0x1ab   :  { %2715 = vmatpush.msra.mxu0 %v2182_v23  ;;  %v2166_v21 = vld [vmem:[#allocation3 + $0x148] sm:$0xff]  ;;  %8880 = vst [vmem:[#allocation25_spill] sm:$0xff] %v7401_v63  ;;  %v2360_v3 = vld [vmem:[#allocation3 + $0x758] sm:$0xff] }
 0x1ac   :  { %v1548_v60 = vadd.f32 %v1544_v56, %v1538_v14  ;;  %4667 = vmatmul.msk.f32.gmra.mxu0 %vm1878_vm10, %v1875_v52  ;;  %2750 = vmatpush.msra.mxu1 %v2310_v62  ;;  %v2294_v18 = vld [vmem:[#allocation3 + $0x548] sm:$0xff]  ;;  %v2224_v16 = vld [vmem:[#allocation3 + $0x318] sm:$0xff]  ;;  %v1121_v14 = vmul.f32 %v7407_v10, %v8868_v43  ;;  %v1127_v56 = vmul.f32 %v7409_v42, %v8869_v22 }
 0x1ad   :  { %4673 = vmatmul.msk.f32.gmra.mxu1 %vm1878_vm10, %v1875_v52  ;;  %2716 = vmatpush.msra.mxu0 %v2174_v8  ;;  %v2158_v4 = vld [vmem:[#allocation3 + $0x108] sm:$0xff]  ;;  %v8883_v48 = vld [vmem:[#allocation34_spill] sm:$0xff] }
 0x1ae   :  { %1552 = vrot.lane.b32.xlu1 %v1548_v60, %s5060_s16  ;;  %2751 = vmatpush.msra.mxu1 %v2302_v1  ;;  %v2286_v29 = vld [vmem:[#allocation3 + $0x508] sm:$0xff]  ;;  %v1120_v55 = vmul.f32 %v7407_v10, %v8883_v48  ;;  %v8884_v25 = vld [vmem:[#allocation50_spill] sm:$0xff] }
 0x1af   :  { %2717 = vmatpush.msra.mxu0 %v2166_v21  ;;  %v2278_v59 = vld [vmem:[#allocation3 + $0x4c8] sm:$0xff]  ;;  %v1126_v13 = vmul.f32 %v7409_v42, %v8884_v25  ;;  %v2352_v26 = vld [vmem:[#allocation3 + $0x718] sm:$0xff]  ;;  %v1131_v21 = vadd.f32 %v1127_v56, %v1121_v14  ;;  %v8893_v56 = vld [vmem:[#allocation49_spill] sm:$0xff] }
 0x1b0   :  { %2752 = vmatpush.msra.mxu1 %v2294_v18  ;;  %v2150_v53 = vld [vmem:[#allocation3 + $0xc8] sm:$0xff]  ;;  %v2216_v23 = vld [vmem:[#allocation3 + $0x2d8] sm:$0xff]  ;;  %v8885_v18 = vld [vmem:[#allocation21_spill] sm:$0xff] }
 0x1b1   :  { %2718 = vmatpush.msra.mxu0 %v2158_v4  ;;  %v2270_v45 = vld [vmem:[#allocation3 + $0x488] sm:$0xff]  ;;  %v7405_v32 = vpop.f32.mrf.mxu0  ;;  %v2344_v52 = vld [vmem:[#allocation3 + $0x6d8] sm:$0xff]  ;;  %v1130_v8 = vadd.f32 %v1126_v13, %v1120_v55 }
 0x1b2   :  { %2753 = vmatpush.msra.mxu1 %v2286_v29  ;;  %v2142_v7 = vld [vmem:[#allocation3 + $0x88] sm:$0xff]  ;;  %8881 = vst [vmem:[#allocation22_spill] sm:$0xff] %v7405_v32  ;;  %v7411_v41 = vpop.f32.mrf.mxu1  ;;  %v2208_v60 = vld [vmem:[#allocation3 + $0x298] sm:$0xff] }
 0x1b3   :  { %2719 = vmatpush.msra.mxu0 %v2150_v53  ;;  %v2262_v6 = vld [vmem:[#allocation3 + $0x448] sm:$0xff]  ;;  %8882 = vst [vmem:[#allocation45_spill] sm:$0xff] %v7411_v41  ;;  %v2336_v1 = vld [vmem:[#allocation3 + $0x698] sm:$0xff] }
 0x1b4   :  { %4668 = vmatmul.msk.f32.gmra.mxu0 %vm1878_vm10, %v1876_v24  ;;  %2754 = vmatpush.msra.mxu1 %v2278_v59  ;;  %v2134_v9 = vld [vmem:[#allocation3 + $0x48] sm:$0xff]  ;;  %v2184_v13 = vld [vmem:[#allocation3 + $0x1d8] sm:$0xff] }
 0x1b5   :  { %4674 = vmatmul.msk.f32.gmra.mxu1 %vm1878_vm10, %v1876_v24  ;;  %2720 = vmatpush.msra.mxu0 %v2142_v7  ;;  %v2254_v57 = vld [vmem:[#allocation3 + $0x408] sm:$0xff]  ;;  %v7435_v24 = vstv %s4579_s20  ;;  %v7446_v7 = vpop.permute.xlu2 %1654 }
 0x1b6   :  { %2755 = vmatpush.msra.mxu1 %v2270_v45  ;;  %v2126_v12 = vld [vmem:[#allocation3 + $0x8] sm:$0xff]  ;;  %8888 = vst [vmem:[#allocation33_spill] sm:$0xff] %v7446_v7 }
 0x1b7   :  { %v1877_v49 = vld [vmem:[%s8416_s2 + $0x28] sm:$0xff]  ;;  %2721 = vmatpush.msra.mxu0 %v2134_v9  ;;  %s4578_s2 = sld [smem:[#allocation12 + $0x13]] }
 0x1b8   :  { %2756 = vmatpush.msra.mxu1 %v2262_v6  ;;  %v8889_v9 = vld [vmem:[#allocation36_spill] sm:$0xff] }
 0x1b9   :  { %2722 = vmatpush.msra.mxu0 %v2126_v12  ;;  %v7453_v12 = vpop.f32.mrf.mxu2 }
 0x1ba   :  { %2757 = vmatpush.msra.mxu1 %v2254_v57  ;;  %v7433_v29 = vpop.f32.mrf.mxu0  ;;  %v7439_v59 = vpop.f32.mrf.mxu1  ;;  %v1146_v57 = vmul.f32 %v7435_v24, %v8889_v9  ;;  %8890 = vst [vmem:[#allocation43_spill] sm:$0xff] %v7453_v12 }
 0x1bb   :  { %2847 = vmatpush.msrb.mxu0 %v2248_v39  ;;  %8886 = vst [vmem:[#allocation51_spill] sm:$0xff] %v7433_v29  ;;  %v2328_v39 = vld [vmem:[#allocation3 + $0x658] sm:$0xff] }
 0x1bc   :  { %4669 = vmatmul.msk.f32.gmra.mxu0 %vm1878_vm10, %v1877_v49  ;;  %2882 = vmatpush.msrb.mxu1 %v2376_v0  ;;  %8887 = vst [vmem:[#allocation42_spill] sm:$0xff] %v7439_v59  ;;  %v2192_v0 = vld [vmem:[#allocation3 + $0x218] sm:$0xff] }
 0x1bd   :  { %4675 = vmatmul.msk.f32.gmra.mxu1 %vm1878_vm10, %v1877_v49  ;;  %2848 = vmatpush.msrb.mxu0 %v2240_v58  ;;  %v7423_v62 = vstv %s4578_s2  ;;  %v2200_v49 = vld [vmem:[#allocation3 + $0x258] sm:$0xff] }
 0x1be   :  { %2883 = vmatpush.msrb.mxu1 %v2368_v19  ;;  %v1136_v4 = vmul.f32 %v7423_v62, %v8885_v18  ;;  %v1137_v53 = vmul.f32 %v7423_v62, %v8871_v37  ;;  %v7458_v19 = vstv %s7425_s21 }
 0x1bf   :  { %2849 = vmatpush.msrb.mxu0 %v2232_v50  ;;  %v7462_v50 = vpop.f32.mrf.mxu3 }
 0x1c0   :  { %2884 = vmatpush.msrb.mxu1 %v2360_v3  ;;  %v1140_v45 = vadd.f32 %v1136_v4, %v1130_v8  ;;  %v1141_v6 = vadd.f32 %v1137_v53, %v1131_v21  ;;  %8892 = vst [vmem:[#allocation54_spill] sm:$0xff] %v7462_v50  ;;  %v2320_v3 = vld [vmem:[#allocation3 + $0x618] sm:$0xff]  ;;  %v7478_v8 = vstv %s7431_s6  ;;  %v7481_v21 = vstv %s7437_s23 }
 0x1c1   :  { %2850 = vmatpush.msrb.mxu0 %v2224_v16  ;;  %v1147_v16 = vmul.f32 %v7435_v24, %v8873_v28  ;;  %v2176_v4 = vld [vmem:[#allocation3 + $0x198] sm:$0xff]  ;;  %v1157_v53 = vmul.f32 %v7458_v19, %v8875_v5 }
 0x1c2   :  { %2885 = vmatpush.msrb.mxu1 %v2352_v26  ;;  %v7455_v58 = vpop.permute.xlu0 %1106  ;;  %v1150_v55 = vadd.f32 %v1146_v57, %v1140_v45  ;;  %v2312_v26 = vld [vmem:[#allocation3 + $0x5d8] sm:$0xff] }
 0x1c3   :  { %2851 = vmatpush.msrb.mxu0 %v2216_v23  ;;  %8891 = vst [vmem:[#allocation28_spill] sm:$0xff] %v7455_v58  ;;  %v7469_v23 = vstv %s7427_s22  ;;  %v1151_v14 = vadd.f32 %v1147_v16, %v1141_v6 }
 0x1c4   :  { %2723 = vmatmul.f32.vlgmr.msra.gmra.mxu0 %v7399_v33  ;;  %2886 = vmatpush.msrb.mxu1 %v2344_v52  ;;  %v1156_v52 = vmul.f32 %v7458_v19, %v8893_v56  ;;  %v1672_v6 = vmul.f32 %v7469_v23, %v8883_v48  ;;  %v1673_v57 = vmul.f32 %v7469_v23, %v8868_v43 }
 0x1c5   :  { %2758 = vmatmul.f32.vlgmr.msra.gmra.mxu1 %v7401_v63  ;;  %2852 = vmatpush.msrb.mxu0 %v2208_v60 }
 0x1c6   :  { %2887 = vmatpush.msrb.mxu1 %v2336_v1  ;;  %v2304_v1 = vld [vmem:[#allocation3 + $0x598] sm:$0xff]  ;;  %v1160_v45 = vadd.f32 %v1156_v52, %v1150_v55  ;;  %v1167_v55 = vmul.f32 %v7481_v21, %v8877_v27 }
 0x1c7   :  { %2853 = vmatpush.msrb.mxu0 %v2200_v49  ;;  %v1678_v49 = vmul.f32 %v7478_v8, %v8884_v25 }
 0x1c8   :  { %2888 = vmatpush.msrb.mxu1 %v2328_v39  ;;  %v1679_v39 = vmul.f32 %v7478_v8, %v8869_v22 }
 0x1c9   :  { %2854 = vmatpush.msrb.mxu0 %v2192_v0  ;;  %v1161_v0 = vadd.f32 %v1157_v53, %v1151_v14  ;;  %v7516_v14 = vstv %s7460_s3  ;;  %v7521_v53 = vpop.f32.mrf.mxu2 }
 0x1ca   :  { %2889 = vmatpush.msrb.mxu1 %v2320_v3  ;;  %v8895_v3 = vld [vmem:[#allocation41_spill] sm:$0xff]  ;;  %8898 = vst [vmem:[#allocation57_spill] sm:$0xff] %v7521_v53  ;;  %v1683_v7 = vadd.f32 %v1679_v39, %v1673_v57  ;;  %v2296_v39 = vld [vmem:[#allocation3 + $0x558] sm:$0xff] }
 0x1cb   :  { %v7475_v60 = vpop.permute.xlu1 %1102  ;;  %2855 = vmatpush.msrb.mxu0 %v2184_v13  ;;  %v1166_v16 = vmul.f32 %v7481_v21, %v8895_v3  ;;  %v7506_v13 = vstv %s7443_s24 }
 0x1cc   :  { %2726 = vmatmul.f32.gmra.mxu0 %v7405_v32  ;;  %8894 = vst [vmem:[#allocation44_spill] sm:$0xff] %v7475_v60  ;;  %2890 = vmatpush.msrb.mxu1 %v2312_v26  ;;  %v7508_v26 = vpop.permute.xlu2 %1278 }
 0x1cd   :  { %2761 = vmatmul.f32.gmra.mxu1 %v7411_v41  ;;  %2856 = vmatpush.msrb.mxu0 %v2176_v4  ;;  %8896 = vst [vmem:[#allocation55_spill] sm:$0xff] %v7506_v13  ;;  %v1170_v52 = vadd.f32 %v1166_v16, %v1160_v45  ;;  %v8901_v45 = vld [vmem:[#allocation19_spill] sm:$0xff] }
 0x1ce   :  { %2891 = vmatpush.msrb.mxu1 %v2304_v1  ;;  %8897 = vst [vmem:[#allocation56_spill] sm:$0xff] %v7508_v26  ;;  %v7519_v1 = vstv %s7466_s26  ;;  %v1171_v26 = vadd.f32 %v1167_v55, %v1161_v0  ;;  %v1176_v16 = vmul.f32 %v7506_v13, %v8901_v45  ;;  %v2160_v0 = vld [vmem:[#allocation3 + $0x118] sm:$0xff]  ;;  %v1177_v55 = vmul.f32 %v7506_v13, %v8878_v47 }
 0x1cf   :  { %v1406_v57 = vmul.f32 %v7519_v1, %v8884_v25  ;;  %v1401_v25 = vmul.f32 %v7516_v14, %v8868_v43  ;;  %v1407_v60 = vmul.f32 %v7519_v1, %v8869_v22  ;;  %v1698_v43 = vmul.f32 %v7547_v15, %v8889_v9 }
 0x1d0   :  { %v1180_v38 = vadd.f32 %v1176_v16, %v1170_v52  ;;  %2892 = vmatpush.msrb.mxu1 %v2296_v39  ;;  %v2152_v52 = vld [vmem:[#allocation3 + $0xd8] sm:$0xff]  ;;  %v1699_v22 = vmul.f32 %v7547_v15, %v8873_v28 }
 0x1d1   :  { %v8903_v16 = vld [vmem:[#allocation38_spill] sm:$0xff] }
 0x1d4   :  { %2729 = vmatmul.f32.gmra.mxu0 %v7433_v29  ;;  %v7523_v4 = vpop.permute.xlu0 %1274  ;;  %v7530_v29 = vstv %s7473_s27  ;;  %s4467_s27 = sshll.u32 %s8423_s9, 4  ;;  %s4468_s27 = int_to_ptr.hbm [resolvable:$true] %s4467_s27 }
 0x1d5   :  { %2764 = vmatmul.f32.gmra.mxu1 %v7439_v59  ;;  %8899 = vst [vmem:[#allocation58_spill] sm:$0xff] %v7523_v4  ;;  %v7525_v59 = vpop.f32.mrf.mxu3  ;;  %v1186_v13 = vmul.f32 %v7530_v29, %v8903_v16  ;;  %v1187_v39 = vmul.f32 %v7530_v29, %v8879_v30 }
 0x1d6   :  { %8900 = vst [vmem:[#allocation59_spill] sm:$0xff] %v7525_v59 }
 0x1d8   :  { %v7552_v41 = vpop.permute.xlu1 %1658 }
 0x1d9   :  { %8902 = vst [vmem:[#allocation60_spill] sm:$0xff] %v7552_v41  ;;  %v7584_v41 = vpop.permute.xlu2 %1830 }
 0x1da   :  { %8905 = vst [vmem:[#allocation62_spill] sm:$0xff] %v7584_v41 }
 0x1dc   :  { %2732 = vmatmul.f32.gmra.mxu0 %v7453_v12  ;;  %v7511_v12 = vstv %s7450_s25 }
 0x1dd   :  { %2767 = vmatmul.f32.gmra.mxu1 %v7462_v50  ;;  %v1682_v50 = vadd.f32 %v1678_v49, %v1672_v6  ;;  %v1688_v35 = vmul.f32 %v7511_v12, %v8885_v18  ;;  %v1689_v4 = vmul.f32 %v7511_v12, %v8871_v37  ;;  %v1400_v6 = vmul.f32 %v7516_v14, %v8883_v48  ;;  %v2168_v49 = vld [vmem:[#allocation3 + $0x158] sm:$0xff] }
 0x1de   :  { %2857 = vmatpush.msrb.mxu0 %v2168_v49  ;;  %v2288_v48 = vld [vmem:[#allocation3 + $0x518] sm:$0xff]  ;;  %v7564_v49 = vstv %s7500_s30 }
 0x1df   :  { %v1692_v44 = vadd.f32 %v1688_v35, %v1682_v50  ;;  %v1693_v58 = vadd.f32 %v1689_v4, %v1683_v7  ;;  %v2280_v35 = vld [vmem:[#allocation3 + $0x4d8] sm:$0xff]  ;;  %v1181_v7 = vadd.f32 %v1177_v55, %v1171_v26  ;;  %v1410_v50 = vadd.f32 %v1406_v57, %v1400_v6  ;;  %2893 = vmatpush.msrb.mxu1 %v2288_v48 }
 0x1e0   :  { %2858 = vmatpush.msrb.mxu0 %v2160_v0  ;;  %v2144_v4 = vld [vmem:[#allocation3 + $0x98] sm:$0xff]  ;;  %v1708_v26 = vmul.f32 %v7550_v51, %v8893_v56  ;;  %v7580_v0 = vstv %s7513_s0  ;;  %v1411_v57 = vadd.f32 %v1407_v60, %v1401_v25  ;;  %v1416_v48 = vmul.f32 %v7564_v49, %v8885_v18 }
 0x1e1   :  { %v2272_v55 = vld [vmem:[#allocation3 + $0x498] sm:$0xff]  ;;  %v1703_v6 = vadd.f32 %v1699_v22, %v1693_v58  ;;  %2894 = vmatpush.msrb.mxu1 %v2280_v35  ;;  %v7597_v58 = vadd.f32 %v1187_v39, %v1181_v7  ;;  %v7600_v18 = vstv %s7538_s5  ;;  %v1417_v25 = vmul.f32 %v7564_v49, %v8871_v37 }
 0x1e2   :  { %2859 = vmatpush.msrb.mxu0 %v2152_v52  ;;  %v1124_v52 = vmul.f32 %v7409_v42, %v6518_v40  ;;  %v1420_v35 = vadd.f32 %v1416_v48, %v1410_v50  ;;  %v1718_v22 = vmul.f32 %v7580_v0, %v8895_v3  ;;  %v1719_v7 = vmul.f32 %v7580_v0, %v8877_v27 }
 0x1e3   :  { %8908 = vst [vmem:[#allocation66_spill] sm:$0xff] %v7597_v58  ;;  %v7602_v60 = vpop.permute.xlu0 %1382  ;;  %2895 = vmatpush.msrb.mxu1 %v2272_v55  ;;  %v1125_v37 = vmul.f32 %v7409_v42, %v6520_v54  ;;  %v1421_v48 = vadd.f32 %v1417_v25, %v1411_v57  ;;  %v1728_v55 = vmul.f32 %v7600_v18, %v8901_v45  ;;  %v7626_v58 = vstv %s7561_s10  ;;  %v2136_v57 = vld [vmem:[#allocation3 + $0x58] sm:$0xff] }
 0x1e4   :  { %2735 = vmatmul.f32.gmra.mxu0 %v7521_v53  ;;  %v7575_v53 = vadd.f32 %v1186_v13, %v1180_v38  ;;  %v1709_v38 = vmul.f32 %v7550_v51, %v8875_v5  ;;  %v7589_v13 = vstv %s7532_s4  ;;  %8909 = vst [vmem:[#allocation70_spill] sm:$0xff] %v7602_v60  ;;  %v1729_v41 = vmul.f32 %v7600_v18, %v8878_v47  ;;  %v2128_v25 = vld [vmem:[#allocation3 + $0x18] sm:$0xff] }
 0x1e5   :  { %2770 = vmatmul.f32.gmra.mxu1 %v7525_v59  ;;  %v1702_v59 = vadd.f32 %v1698_v43, %v1692_v44  ;;  %8906 = vst [vmem:[#allocation63_spill] sm:$0xff] %v7589_v13  ;;  %v7595_v44 = vpop.f32.mrf.mxu2  ;;  %2860 = vmatpush.msrb.mxu0 %v2144_v4  ;;  %v7608_v43 = vpop.f32.mrf.mxu3  ;;  %v1119_v4 = vmul.f32 %v7407_v10, %v6512_v46 }
 0x1e6   :  { %8904 = vst [vmem:[#allocation61_spill] sm:$0xff] %v7575_v53  ;;  %v1118_v53 = vmul.f32 %v7407_v10, %v6510_v20  ;;  %v1713_v50 = vadd.f32 %v1709_v38, %v1703_v6  ;;  %v1426_v60 = vmul.f32 %v7589_v13, %v8889_v9  ;;  %v1134_v6 = vmul.f32 %v7423_v62, %v6524_v36  ;;  %v2264_v38 = vld [vmem:[#allocation3 + $0x458] sm:$0xff] }
 0x1e7   :  { %8907 = vst [vmem:[#allocation65_spill] sm:$0xff] %v7595_v44  ;;  %v1712_v39 = vadd.f32 %v1708_v26, %v1702_v59  ;;  %v7630_v10 = vpop.permute.xlu1 %1386  ;;  %v1427_v59 = vmul.f32 %v7589_v13, %v8873_v28  ;;  %v7636_v26 = vstv %s7571_s11  ;;  %2861 = vmatpush.msrb.mxu0 %v2136_v57  ;;  %2896 = vmatpush.msrb.mxu1 %v2264_v38  ;;  %v2256_v28 = vld [vmem:[#allocation3 + $0x418] sm:$0xff]  ;;  %v7655_v38 = vstv %s7606_s7 }
 0x1e8   :  { %8910 = vst [vmem:[#allocation71_spill] sm:$0xff] %v7608_v43  ;;  %v1128_v42 = vadd.f32 %v1124_v52, %v1118_v53  ;;  %v1430_v9 = vadd.f32 %v1426_v60, %v1420_v35  ;;  %v1670_v53 = vmul.f32 %v7469_v23, %v6510_v20  ;;  %v1676_v52 = vmul.f32 %v7478_v8, %v6518_v40 }
 0x1e9   :  { %8911 = vst [vmem:[#allocation68_spill] sm:$0xff] %v7630_v10  ;;  %v1722_v60 = vadd.f32 %v1718_v22, %v1712_v39  ;;  %v1723_v35 = vadd.f32 %v1719_v7, %v1713_v50  ;;  %v1431_v10 = vadd.f32 %v1427_v59, %v1421_v48  ;;  %v1436_v13 = vmul.f32 %v7636_v26, %v8893_v56  ;;  %v7661_v39 = vpop.permute.xlu2 %1554 }
 0x1ea   :  { %2862 = vmatpush.msrb.mxu0 %v2128_v25  ;;  %2897 = vmatpush.msrb.mxu1 %v2256_v28  ;;  %v1437_v57 = vmul.f32 %v7636_v26, %v8875_v5  ;;  %v1671_v22 = vmul.f32 %v7469_v23, %v6512_v46  ;;  %v1677_v7 = vmul.f32 %v7478_v8, %v6520_v54 }
 0x1eb   :  { %v1440_v56 = vadd.f32 %v1436_v13, %v1430_v9  ;;  %v1680_v48 = vadd.f32 %v1676_v52, %v1670_v53  ;;  %v1733_v5 = vadd.f32 %v1729_v41, %v1723_v35  ;;  %v1739_v59 = vmul.f32 %v7626_v58, %v8879_v30 }
 0x1ec   :  { %2738 = vmatmul.f32.gmra.mxu0 %v7595_v44  ;;  %v1129_v44 = vadd.f32 %v1125_v37, %v1119_v4  ;;  %v1135_v4 = vmul.f32 %v7423_v62, %v6526_v61  ;;  %v1138_v37 = vadd.f32 %v1134_v6, %v1128_v42  ;;  %v1144_v62 = vmul.f32 %v7435_v24, %v6528_v34 }
 0x1ed   :  { %2773 = vmatmul.f32.gmra.mxu1 %v7608_v43  ;;  %v1738_v43 = vmul.f32 %v7626_v58, %v8903_v16  ;;  %v1732_v42 = vadd.f32 %v1728_v55, %v1722_v60  ;;  %v1441_v6 = vadd.f32 %v1437_v57, %v1431_v10  ;;  %v1446_v8 = vmul.f32 %v7655_v38, %v8895_v3 }
 0x1ee   :  { %v1139_v50 = vadd.f32 %v1135_v4, %v1129_v44  ;;  %v1145_v13 = vmul.f32 %v7435_v24, %v8838_v11  ;;  %v1148_v44 = vadd.f32 %v1144_v62, %v1138_v37  ;;  %v1686_v9 = vmul.f32 %v7511_v12, %v6524_v36 }
 0x1ef   :  { %v1447_v41 = vmul.f32 %v7655_v38, %v8877_v27  ;;  %v7680_v55 = vstv %s7628_s15  ;;  %v7683_v10 = vstv %s7638_s12  ;;  %v1681_v25 = vadd.f32 %v1677_v7, %v1671_v22 }
 0x1f0   :  { %v7667_v23 = vpop.permute.xlu0 %1826  ;;  %v1450_v53 = vadd.f32 %v1446_v8, %v1440_v56  ;;  %v1149_v3 = vadd.f32 %v1145_v13, %v1139_v50  ;;  %v1154_v24 = vmul.f32 %v7458_v19, %v6532_v31  ;;  %v1690_v28 = vadd.f32 %v1686_v9, %v1680_v48 }
 0x1f1   :  { %v7689_v60 = vadd.f32 %v1738_v43, %v1732_v42  ;;  %v7691_v35 = vadd.f32 %v1739_v59, %v1733_v5  ;;  %v1451_v4 = vadd.f32 %v1447_v41, %v1441_v6  ;;  %v1687_v27 = vmul.f32 %v7511_v12, %v6526_v61  ;;  %v8913_v59 = vld [vmem:[#allocation28_spill] sm:$0xff]  ;;  %v7724_v13 = vpop.permute.xlu2 %1104 }
 0x1f2   :  { %v1456_v37 = vmul.f32 %v7680_v55, %v8901_v45  ;;  %v1155_v57 = vmul.f32 %v7458_v19, %v8841_v17  ;;  %v1158_v22 = vadd.f32 %v1154_v24, %v1148_v44  ;;  %v1696_v7 = vmul.f32 %v7547_v15, %v6528_v34  ;;  %v8915_v44 = vld [vmem:[#allocation52_spill] sm:$0xff] }
 0x1f3   :  { %v1457_v43 = vmul.f32 %v7680_v55, %v8878_v47  ;;  %v1466_v56 = vmul.f32 %v7683_v10, %v8903_v16  ;;  %v7707_v50 = vmul.f32 %v7683_v10, %v8879_v30  ;;  %v1691_v12 = vadd.f32 %v1687_v27, %v1681_v25  ;;  %v8912_v30 = vld [vmem:[#allocation44_spill] sm:$0xff]  ;;  %v8918_v27 = vld [vmem:[#allocation55_spill] sm:$0xff] }
 0x1f4   :  { %2863 = vmatmul.f32.vlgmr.msrb.gmra.mxu0 %v7399_v33  ;;  %v7685_v52 = vpop.permute.xlu1 %1652  ;;  %v1460_v62 = vadd.f32 %v1456_v37, %v1450_v53  ;;  %v1159_v45 = vadd.f32 %v1155_v57, %v1149_v3  ;;  %v1164_v19 = vmul.f32 %v7481_v21, %v6542_v2  ;;  %v1700_v48 = vadd.f32 %v1696_v7, %v1690_v28 }
 0x1f5   :  { %2898 = vmatmul.f32.vlgmr.msrb.gmra.mxu1 %v7401_v63  ;;  %v7711_v42 = vadd.f32 %v1457_v43, %v1451_v4  ;;  %v1697_v5 = vmul.f32 %v7547_v15, %v8838_v11  ;;  %v1398_v47 = vmul.f32 %v7516_v14, %v6510_v20  ;;  %v1404_v16 = vmul.f32 %v7519_v1, %v6518_v40  ;;  %v8916_v20 = vld [vmem:[#allocation45_spill] sm:$0xff]  ;;  %v8917_v4 = vld [vmem:[#allocation27_spill] sm:$0xff]  ;;  %v8928_v63 = vld [vmem:[#allocation58_spill] sm:$0xff] }
 0x1f6   :  { %v1111_v8 = vsel %vm153_vm4, %v8913_v59, %v8912_v30  ;;  %v1165_v9 = vmul.f32 %v7481_v21, %v8915_v44  ;;  %v1168_v41 = vadd.f32 %v1164_v19, %v1158_v22  ;;  %v1706_v15 = vmul.f32 %v7550_v51, %v6532_v31  ;;  %v8920_v43 = vld [vmem:[#allocation53_spill] sm:$0xff] }
 0x1f7   :  { %v1109_v40 = vsel %vm153_vm4, %v8912_v30, %v8913_v59  ;;  %v1701_v53 = vadd.f32 %v1697_v5, %v1691_v12  ;;  %v1399_v3 = vmul.f32 %v7516_v14, %v6512_v46  ;;  %v1405_v21 = vmul.f32 %v7519_v1, %v6520_v54  ;;  %v8923_v5 = vld [vmem:[#allocation67_spill] sm:$0xff] }
 0x1f8   :  { %v7741_v24 = vadd.f32 %v1466_v56, %v1460_v62  ;;  %v1169_v28 = vadd.f32 %v1165_v9, %v1159_v45  ;;  %v1174_v37 = vmul.f32 %v8918_v27, %v8917_v4  ;;  %v1710_v57 = vadd.f32 %v1706_v15, %v1700_v48  ;;  %v8922_v56 = vld [vmem:[#allocation64_spill] sm:$0xff] }
 0x1f9   :  { %v1114_v7 = vsel %vm5284_vm5, %v1111_v8, 0.0  ;;  %v1175_v19 = vmul.f32 %v8918_v27, %v8920_v43  ;;  %v1707_v12 = vmul.f32 %v7550_v51, %v8841_v17  ;;  %v1408_v46 = vadd.f32 %v1404_v16, %v1398_v47  ;;  %v2250_v47 = vld [vmem:[#allocation3 + $0x3e8] sm:$0xff] }
 0x1fa   :  { %v1115_v54 = vsel %vm5290_vm6, %v1109_v40, 0.0  ;;  %v1178_v1 = vadd.f32 %v1174_v37, %v1168_v41  ;;  %v1184_v62 = vmul.f32 %v7530_v29, %v8922_v56  ;;  %v1716_v48 = vmul.f32 %v7580_v0, %v6542_v2  ;;  %v2378_v16 = vld [vmem:[#allocation3 + $0x7e8] sm:$0xff]  ;;  %v8924_v41 = vld [vmem:[#allocation61_spill] sm:$0xff]  ;;  %2987 = vmatpush.msra.mxu0 %v2250_v47 }
 0x1fb   :  { %v7735_v25 = vpop.permute.xlu0 %1100  ;;  %v1185_v30 = vmul.f32 %v7530_v29, %v8923_v5  ;;  %v1711_v59 = vadd.f32 %v1707_v12, %v1701_v53  ;;  %v1409_v8 = vadd.f32 %v1405_v21, %v1399_v3  ;;  %v1414_v51 = vmul.f32 %v7564_v49, %v6524_v36  ;;  %v2242_v9 = vld [vmem:[#allocation3 + $0x3a8] sm:$0xff]  ;;  %3022 = vmatpush.msra.mxu1 %v2378_v16  ;;  %v8926_v36 = vld [vmem:[#allocation51_spill] sm:$0xff] }
 0x1fc   :  { %2866 = vmatmul.f32.gmra.mxu0 %v7405_v32  ;;  %v1194_v15 = vadd.f32 %v8924_v41, %v1114_v7  ;;  %v1179_v40 = vadd.f32 %v1175_v19, %v1169_v28  ;;  %v1720_v27 = vadd.f32 %v1716_v48, %v1710_v57  ;;  %v2370_v37 = vld [vmem:[#allocation3 + $0x7a8] sm:$0xff]  ;;  %v1717_v29 = vmul.f32 %v7580_v0, %v8915_v44  ;;  %v8929_v7 = vld [vmem:[#allocation42_spill] sm:$0xff] }
 0x1fd   :  { %2901 = vmatmul.f32.gmra.mxu1 %v8916_v20  ;;  %v8925_v20 = vld [vmem:[#allocation66_spill] sm:$0xff]  ;;  %v1415_v53 = vmul.f32 %v7564_v49, %v6526_v61  ;;  %v1418_v3 = vadd.f32 %v1414_v51, %v1408_v46  ;;  %v2234_v21 = vld [vmem:[#allocation3 + $0x368] sm:$0xff]  ;;  %v7774_v57 = vadd.f32 %v1184_v62, %v1178_v1  ;;  %2988 = vmatpush.msra.mxu0 %v2242_v9  ;;  %v8930_v46 = vld [vmem:[#allocation63_spill] sm:$0xff]  ;;  %v1273_v62 = vpop.permute.xlu2 %1272 }
 0x1fe   :  { %v7755_v45 = vpop.permute.xlu1 %1276  ;;  %v1195_v32 = vadd.f32 %v8925_v20, %v1115_v54  ;;  %v8927_v12 = vld [vmem:[#allocation56_spill] sm:$0xff]  ;;  %v1726_v20 = vmul.f32 %v7600_v18, %v8917_v4  ;;  %v1721_v49 = vadd.f32 %v1717_v29, %v1711_v59  ;;  %v1424_v54 = vmul.f32 %v8930_v46, %v6528_v34  ;;  %3023 = vmatpush.msra.mxu1 %v2370_v37 }
 0x1ff   :  { %v1281_v28 = vsel %vm298_vm7, %v8928_v63, %v8927_v12  ;;  %v2362_v0 = vld [vmem:[#allocation3 + $0x768] sm:$0xff]  ;;  %v1283_v61 = vsel %vm298_vm7, %v8927_v12, %v8928_v63  ;;  %v1419_v19 = vadd.f32 %v1415_v53, %v1409_v8  ;;  %v1189_v48 = vadd.f32 %v1185_v30, %v1179_v40  ;;  %2989 = vmatpush.msra.mxu0 %v2234_v21  ;;  %v8933_v8 = vld [vmem:[#allocation33_spill] sm:$0xff] }
 0x200   :  { %v2226_v1 = vld [vmem:[#allocation3 + $0x328] sm:$0xff]  ;;  %v1727_v51 = vmul.f32 %v7600_v18, %v8920_v43  ;;  %v1730_v47 = vadd.f32 %v1726_v20, %v1720_v27  ;;  %v1425_v16 = vmul.f32 %v8930_v46, %v8838_v11  ;;  %v1286_v63 = vsel %vm5511_vm8, %v1281_v28, 0.0  ;;  %3024 = vmatpush.msra.mxu1 %v2362_v0 }
 0x201   :  { %v2354_v9 = vld [vmem:[#allocation3 + $0x728] sm:$0xff]  ;;  %v1428_v40 = vadd.f32 %v1424_v54, %v1418_v3  ;;  %v1287_v37 = vsel %vm5517_vm9, %v1283_v61, 0.0  ;;  %v1736_v29 = vmul.f32 %v7626_v58, %v8922_v56  ;;  %v1737_v53 = vmul.f32 %v7626_v58, %v8923_v5  ;;  %2990 = vmatpush.msra.mxu0 %v2226_v1 }
 0x202   :  { %v8932_v59 = vld [vmem:[#allocation60_spill] sm:$0xff]  ;;  %v1434_v21 = vmul.f32 %v7636_v26, %v6532_v31  ;;  %v1108_v3 = vsel %vm153_vm4, %v7735_v25, %v7724_v13  ;;  %v1110_v28 = vsel %vm153_vm4, %v7724_v13, %v7735_v25  ;;  %v1731_v20 = vadd.f32 %v1727_v51, %v1721_v49  ;;  %3025 = vmatpush.msra.mxu1 %v2354_v9  ;;  %v8935_v49 = vld [vmem:[#allocation43_spill] sm:$0xff] }
 0x203   :  { %v1661_v34 = vsel %vm153_vm4, %v8933_v8, %v8932_v59  ;;  %v1663_v30 = vsel %vm153_vm4, %v8932_v59, %v8933_v8  ;;  %v2218_v27 = vld [vmem:[#allocation3 + $0x2e8] sm:$0xff]  ;;  %v1429_v0 = vadd.f32 %v1425_v16, %v1419_v19  ;;  %v7815_v61 = vadd.f32 %v1286_v63, %v1194_v15 }
 0x204   :  { %2869 = vmatmul.f32.gmra.mxu0 %v8926_v36  ;;  %v2346_v12 = vld [vmem:[#allocation3 + $0x6e8] sm:$0xff]  ;;  %v1666_v31 = vsel %vm5284_vm5, %v1663_v30, 0.0  ;;  %v1667_v58 = vsel %vm5290_vm6, %v1661_v34, 0.0  ;;  %v1435_v54 = vmul.f32 %v7636_v26, %v8841_v17  ;;  %v7823_v8 = vadd.f32 %v1287_v37, %v1195_v32  ;;  %v8936_v26 = vld [vmem:[#allocation54_spill] sm:$0xff] }
 0x205   :  { %2904 = vmatmul.f32.gmra.mxu1 %v8929_v7  ;;  %2991 = vmatpush.msra.mxu0 %v2218_v27  ;;  %v2210_v1 = vld [vmem:[#allocation3 + $0x2a8] sm:$0xff]  ;;  %v1740_v13 = vadd.f32 %v1736_v29, %v1730_v47  ;;  %v1438_v25 = vadd.f32 %v1434_v21, %v1428_v40  ;;  %v1112_v19 = vsel %vm5284_vm5, %v1110_v28, 0.0  ;;  %v1113_v51 = vsel %vm5290_vm6, %v1108_v3, 0.0 }
 0x206   :  { %v1657_v18 = vpop.permute.xlu0 %1656  ;;  %v2338_v59 = vld [vmem:[#allocation3 + $0x6a8] sm:$0xff]  ;;  %3026 = vmatpush.msra.mxu1 %v2346_v12  ;;  %v1746_v16 = vadd.f32 %v7689_v60, %v1666_v31  ;;  %v7839_v9 = vadd.f32 %v7691_v35, %v1667_v58  ;;  %v1741_v63 = vadd.f32 %v1737_v53, %v1731_v20  ;;  %v1439_v34 = vadd.f32 %v1435_v54, %v1429_v0 }
 0x207   :  { %v2202_v15 = vld [vmem:[#allocation3 + $0x268] sm:$0xff]  ;;  %v1660_v17 = vsel %vm153_vm4, %v7685_v52, %v1657_v18  ;;  %v1662_v32 = vsel %vm153_vm4, %v1657_v18, %v7685_v52  ;;  %2992 = vmatpush.msra.mxu0 %v2210_v1  ;;  %v1280_v40 = vsel %vm298_vm7, %v1273_v62, %v7755_v45  ;;  %v1282_v52 = vsel %vm298_vm7, %v7755_v45, %v1273_v62  ;;  %v1825_v45 = vpop.permute.xlu2 %1824  ;;  %v8937_v62 = vld [vmem:[#allocation62_spill] sm:$0xff] }
 0x208   :  { %v2330_v47 = vld [vmem:[#allocation3 + $0x668] sm:$0xff]  ;;  %3027 = vmatpush.msra.mxu1 %v2338_v59  ;;  %v1444_v18 = vmul.f32 %v7655_v38, %v6542_v2  ;;  %v1445_v60 = vmul.f32 %v7655_v38, %v8915_v44  ;;  %v1192_v27 = vadd.f32 %v7774_v57, %v1112_v19  ;;  %v1193_v37 = vadd.f32 %v1189_v48, %v1113_v51  ;;  %v8938_v59 = vld [vmem:[#allocation70_spill] sm:$0xff] }
 0x209   :  { %v1829_v46 = vpop.permute.xlu1 %1828  ;;  %v2194_v30 = vld [vmem:[#allocation3 + $0x228] sm:$0xff]  ;;  %2993 = vmatpush.msra.mxu0 %v2202_v15  ;;  %v1664_v29 = vsel %vm5284_vm5, %v1662_v32, 0.0  ;;  %v1665_v53 = vsel %vm5290_vm6, %v1660_v17, 0.0  ;;  %v1833_v2 = vsel %vm298_vm7, %v7667_v23, %v8937_v62  ;;  %v1454_v44 = vmul.f32 %v7680_v55, %v8917_v4  ;;  %v8940_v17 = vld [vmem:[#allocation57_spill] sm:$0xff] }
 0x20a   :  { %v2322_v35 = vld [vmem:[#allocation3 + $0x628] sm:$0xff]  ;;  %3028 = vmatpush.msra.mxu1 %v2330_v47  ;;  %v1448_v38 = vadd.f32 %v1444_v18, %v1438_v25  ;;  %v1455_v57 = vmul.f32 %v7680_v55, %v8920_v43  ;;  %v1835_v3 = vsel %vm298_vm7, %v8937_v62, %v7667_v23  ;;  %v1284_v28 = vsel %vm5511_vm8, %v1280_v40, 0.0  ;;  %v8941_v40 = vld [vmem:[#allocation59_spill] sm:$0xff] }
 0x20b   :  { %v2186_v21 = vld [vmem:[#allocation3 + $0x1e8] sm:$0xff]  ;;  %2994 = vmatpush.msra.mxu0 %v2194_v30  ;;  %v1285_v20 = vsel %vm5517_vm9, %v1282_v52, 0.0  ;;  %v1449_v4 = vadd.f32 %v1445_v60, %v1439_v34  ;;  %v1744_v55 = vadd.f32 %v1740_v13, %v1664_v29  ;;  %v1745_v43 = vadd.f32 %v1741_v63, %v1665_v53 }
 0x20c   :  { %2872 = vmatmul.f32.gmra.mxu0 %v8935_v49  ;;  %v2314_v12 = vld [vmem:[#allocation3 + $0x5e8] sm:$0xff]  ;;  %3029 = vmatpush.msra.mxu1 %v2322_v35  ;;  %v1832_v58 = vsel %vm298_vm7, %v1825_v45, %v1829_v46  ;;  %v1834_v54 = vsel %vm298_vm7, %v1829_v46, %v1825_v45  ;;  %v1838_v19 = vsel %vm5511_vm8, %v1833_v2, 0.0  ;;  %v7886_v51 = vadd.f32 %v1284_v28, %v1192_v27 }
 0x20d   :  { %2907 = vmatmul.f32.gmra.mxu1 %v8936_v26  ;;  %2995 = vmatpush.msra.mxu0 %v2186_v21  ;;  %v2178_v23 = vld [vmem:[#allocation3 + $0x1a8] sm:$0xff]  ;;  %v7888_v13 = vadd.f32 %v1285_v20, %v1193_v37  ;;  %v1839_v47 = vsel %vm5517_vm9, %v1835_v3, 0.0  ;;  %v1458_v63 = vadd.f32 %v1454_v44, %v1448_v38  ;;  %v1464_v34 = vmul.f32 %v7683_v10, %v8922_v56 }
 0x20e   :  { %v2306_v1 = vld [vmem:[#allocation3 + $0x5a8] sm:$0xff]  ;;  %3030 = vmatpush.msra.mxu1 %v2314_v12  ;;  %v1836_v18 = vsel %vm5511_vm8, %v1832_v58, 0.0  ;;  %v1837_v60 = vsel %vm5517_vm9, %v1834_v54, 0.0  ;;  %v1459_v35 = vadd.f32 %v1455_v57, %v1449_v4  ;;  %v1465_v27 = vmul.f32 %v7683_v10, %v8923_v5 }
 0x20f   :  { %v7864_v48 = vpop.f32.mrf.mxu0  ;;  %v8939_v25 = vld [vmem:[#allocation68_spill] sm:$0xff]  ;;  %2996 = vmatpush.msra.mxu0 %v2178_v23  ;;  %v7908_v29 = vadd.f32 %v1838_v19, %v1746_v16  ;;  %v7910_v53 = vadd.f32 %v1836_v18, %v1744_v55  ;;  %v7912_v21 = vadd.f32 %v1837_v60, %v1745_v43  ;;  %v7917_v2 = vadd.f32 %v1839_v47, %v7839_v9  ;;  %v8944_v47 = vld [vmem:[#allocation71_spill] sm:$0xff]  ;;  %v1557_v18 = vpop.permute.xlu2 %1556 }
 0x210   :  { %v7874_v31 = vpop.f32.mrf.mxu1  ;;  %v1391_v15 = vsel %vm153_vm4, %v8939_v25, %v8938_v59  ;;  %v2170_v32 = vld [vmem:[#allocation3 + $0x168] sm:$0xff]  ;;  %v1389_v46 = vsel %vm153_vm4, %v8938_v59, %v8939_v25  ;;  %3031 = vmatpush.msra.mxu1 %v2306_v1  ;;  %v1292_v10 = vrot.slane %v7886_v51, 7  ;;  %v1293_v5 = vrot.slane %v7888_v13, 7  ;;  %v2357_v1 = vld [vmem:[#allocation3 + $0x740] sm:$0xff] }
 0x211   :  { %v1381_v0 = vpop.permute.xlu0 %1380  ;;  %v2298_v52 = vld [vmem:[#allocation3 + $0x568] sm:$0xff]  ;;  %v1394_v56 = vsel %vm5284_vm5, %v1391_v15, 0.0  ;;  %2997 = vmatpush.msra.mxu0 %v2170_v32  ;;  %v1395_v62 = vsel %vm5290_vm6, %v1389_v46, 0.0  ;;  %v1294_v16 = vrot.slane %v7815_v61, 7  ;;  %v1295_v44 = vrot.slane %v7823_v8, 7  ;;  %v8943_v15 = vld [vmem:[#allocation65_spill] sm:$0xff] }
 0x212   :  { %v2162_v37 = vld [vmem:[#allocation3 + $0x128] sm:$0xff]  ;;  %3032 = vmatpush.msra.mxu1 %v2298_v52  ;;  %v1471_v57 = vadd.f32 %v7707_v50, %v7711_v42  ;;  %v1468_v12 = vadd.f32 %v1464_v34, %v1458_v63  ;;  %v1474_v9 = vadd.f32 %v7741_v24, %v1394_v56  ;;  %v1469_v20 = vadd.f32 %v1465_v27, %v1459_v35 }
 0x213   :  { %v2290_v45 = vld [vmem:[#allocation3 + $0x528] sm:$0xff]  ;;  %2998 = vmatpush.msra.mxu0 %v2162_v37  ;;  %v1846_v50 = vrot.slane %v7908_v29, 1  ;;  %v1844_v42 = vrot.slane %v7910_v53, 1  ;;  %v1845_v43 = vrot.slane %v7912_v21, 1  ;;  %v1847_v54 = vrot.slane %v7917_v2, 1 }
 0x214   :  { %2875 = vmatmul.f32.gmra.mxu0 %v8940_v17  ;;  %v2154_v38 = vld [vmem:[#allocation3 + $0xe8] sm:$0xff]  ;;  %3033 = vmatpush.msra.mxu1 %v2290_v45  ;;  %v1475_v8 = vadd.f32 %v1471_v57, %v1395_v62  ;;  %v1296_v59 = vsel %vm136_vm1, %v1292_v10, %v1294_v16  ;;  %v1297_v25 = vsel %vm136_vm1, %v1293_v5, %v1295_v44  ;;  %v2309_v57 = vld [vmem:[#allocation3 + $0x5c0] sm:$0xff] }
 0x215   :  { %v1385_v30 = vpop.permute.xlu1 %1384  ;;  %2910 = vmatmul.f32.gmra.mxu1 %v8941_v40  ;;  %v2282_v28 = vld [vmem:[#allocation3 + $0x4e8] sm:$0xff]  ;;  %2999 = vmatpush.msra.mxu0 %v2154_v38  ;;  %v1298_v14 = vsel %vm136_vm1, %v1294_v16, %v1292_v10  ;;  %v1850_v27 = vsel %vm663_vm2, %v1846_v50, %v1844_v42  ;;  %v1851_v37 = vsel %vm663_vm2, %v1847_v54, %v1845_v43 }
 0x216   :  { %v1388_v4 = vsel %vm153_vm4, %v1381_v0, %v1385_v30  ;;  %v1390_v55 = vsel %vm153_vm4, %v1385_v30, %v1381_v0  ;;  %v2146_v58 = vld [vmem:[#allocation3 + $0xa8] sm:$0xff]  ;;  %v1861_v0 = vstv %s8422_s8  ;;  %3034 = vmatpush.msra.mxu1 %v2282_v28  ;;  %v1299_v30 = vsel %vm136_vm1, %v1295_v44, %v1293_v5 }
 0x217   :  { %v7925_v3 = vpop.f32.mrf.mxu0  ;;  %v2274_v24 = vld [vmem:[#allocation3 + $0x4a8] sm:$0xff]  ;;  %v1392_v51 = vsel %vm5284_vm5, %v1390_v55, 0.0  ;;  %v1393_v13 = vsel %vm5290_vm6, %v1388_v4, 0.0  ;;  %3000 = vmatpush.msra.mxu0 %v2146_v58  ;;  %v1855_v6 = vsel %vm125_vm3, %v1851_v37, 0.0  ;;  %v1300_v11 = vsel %vm126_vm0, %v1298_v14, 0.0  ;;  %v2252_v14 = vld [vmem:[#allocation3 + $0x3f8] sm:$0xff] }
 0x218   :  { %v7932_v61 = vpop.f32.mrf.mxu1  ;;  %v2138_v19 = vld [vmem:[#allocation3 + $0x68] sm:$0xff]  ;;  %3035 = vmatpush.msra.mxu1 %v2274_v24  ;;  %v1472_v29 = vadd.f32 %v1468_v12, %v1392_v51  ;;  %v1473_v53 = vadd.f32 %v1469_v20, %v1393_v13  ;;  %v1854_v12 = vsel %vm125_vm3, %v1850_v27, 0.0  ;;  %v1301_v20 = vsel %vm126_vm0, %v1299_v30, 0.0  ;;  %v2380_v30 = vld [vmem:[#allocation3 + $0x7f8] sm:$0xff] }
 0x219   :  { %v2266_v63 = vld [vmem:[#allocation3 + $0x468] sm:$0xff]  ;;  %3001 = vmatpush.msra.mxu0 %v2138_v19  ;;  %v1848_v24 = vsel %vm663_vm2, %v1844_v42, %v1846_v50  ;;  %v4694_v50 = vld [vmem:[%s8415_s1] sm:$0xff] }
 0x21a   :  { %v2130_v52 = vld [vmem:[#allocation3 + $0x28] sm:$0xff]  ;;  %3036 = vmatpush.msra.mxu1 %v2266_v63  ;;  %v2237_v42 = vld [vmem:[#allocation3 + $0x380] sm:$0xff] }
 0x21b   :  { %v2258_v56 = vld [vmem:[#allocation3 + $0x428] sm:$0xff]  ;;  %3002 = vmatpush.msra.mxu0 %v2130_v52  ;;  %v2221_v52 = vld [vmem:[#allocation3 + $0x300] sm:$0xff] }
 0x21c   :  { %v1559_v23 = vpop.permute.xlu0 %1558  ;;  %2878 = vmatmul.f32.gmra.mxu0 %v8943_v15  ;;  %3037 = vmatpush.msra.mxu1 %v2258_v56  ;;  %v4695_v37 = vld [vmem:[%s8415_s1 + $0x8] sm:$0xff]  ;;  %v2205_v56 = vld [vmem:[#allocation3 + $0x280] sm:$0xff] }
 0x21d   :  { %v1561_v32 = vsel %vm298_vm7, %v7661_v39, %v1559_v23  ;;  %v1563_v46 = vsel %vm298_vm7, %v1559_v23, %v7661_v39  ;;  %2913 = vmatmul.f32.gmra.mxu1 %v8944_v47  ;;  %v1849_v23 = vsel %vm663_vm2, %v1845_v43, %v1847_v54  ;;  %v2365_v43 = vld [vmem:[#allocation3 + $0x780] sm:$0xff]  ;;  %3127 = vmatpush.msrb.mxu0 %v2252_v14  ;;  %v2204_v14 = vld [vmem:[#allocation3 + $0x278] sm:$0xff] }
 0x21e   :  { %v1566_v34 = vsel %vm5511_vm8, %v1561_v32, 0.0  ;;  %v1567_v22 = vsel %vm5517_vm9, %v1563_v46, 0.0  ;;  %v2245_v32 = vld [vmem:[#allocation3 + $0x3c0] sm:$0xff]  ;;  %3162 = vmatpush.msrb.mxu1 %v2380_v30  ;;  %v2332_v30 = vld [vmem:[#allocation3 + $0x678] sm:$0xff] }
 0x21f   :  { %v1570_v39 = vadd.f32 %v1566_v34, %v1474_v9  ;;  %v1571_v60 = vadd.f32 %v1567_v22, %v1475_v8  ;;  %v2373_v46 = vld [vmem:[#allocation3 + $0x7c0] sm:$0xff]  ;;  %v8950_v22 = vld [vmem:[#allocation45_spill] sm:$0xff] }
 0x220   :  { %v1553_v35 = vpop.permute.xlu1 %1552  ;;  %v7977_v38 = vpop.f32.mrf.mxu0  ;;  %v2229_v54 = vld [vmem:[#allocation3 + $0x340] sm:$0xff] }
 0x221   :  { %v1560_v21 = vsel %vm298_vm7, %v1553_v35, %v1557_v18  ;;  %v1562_v45 = vsel %vm298_vm7, %v1557_v18, %v1553_v35  ;;  %v1574_v10 = vadd.f32 %v1570_v39, %v1296_v59  ;;  %v1575_v5 = vadd.f32 %v1571_v60, %v1297_v25  ;;  %v8946_v59 = vld [vmem:[#allocation25_spill] sm:$0xff]  ;;  %v2349_v18 = vld [vmem:[#allocation3 + $0x700] sm:$0xff] }
 0x222   :  { %v1564_v62 = vsel %vm5511_vm8, %v1560_v21, 0.0  ;;  %v1565_v2 = vsel %vm5517_vm9, %v1562_v45, 0.0  ;;  %v7983_v28 = vpop.f32.mrf.mxu1  ;;  %v2213_v39 = vld [vmem:[#allocation3 + $0x2c0] sm:$0xff]  ;;  %v2372_v21 = vld [vmem:[#allocation3 + $0x7b8] sm:$0xff] }
 0x223   :  { %v1568_v16 = vadd.f32 %v1564_v62, %v1472_v29  ;;  %v1569_v44 = vadd.f32 %v1565_v2, %v1473_v53  ;;  %v1858_v41 = vadd.f32 %v1854_v12, %v1574_v10  ;;  %v1859_v9 = vadd.f32 %v1855_v6, %v1575_v5  ;;  %v2341_v60 = vld [vmem:[#allocation3 + $0x6c0] sm:$0xff]  ;;  %v2244_v53 = vld [vmem:[#allocation3 + $0x3b8] sm:$0xff]  ;;  %3163 = vmatpush.msrb.mxu1 %v2372_v21 }
 0x224   :  { %3003 = vmatmul.f32.vlgmr.msra.gmra.mxu0 %v7399_v33  ;;  %v2333_v29 = vld [vmem:[#allocation3 + $0x680] sm:$0xff]  ;;  %v2236_v2 = vld [vmem:[#allocation3 + $0x378] sm:$0xff] }
 0x225   :  { %v1572_v4 = vadd.f32 %v1568_v16, %v1300_v11  ;;  %v1573_v55 = vadd.f32 %v1569_v44, %v1301_v20  ;;  %v1864_v8 = vadd.f32 %v1861_v0, %v1858_v41  ;;  %v1865_v58 = vadd.f32 %v1861_v0, %v1859_v9  ;;  %3038 = vmatmul.f32.vlgmr.msra.gmra.mxu1 %v8946_v59  ;;  %v2197_v45 = vld [vmem:[#allocation3 + $0x240] sm:$0xff]  ;;  %v2364_v10 = vld [vmem:[#allocation3 + $0x778] sm:$0xff]  ;;  %v4696_v11 = vld [vmem:[%s8415_s1 + $0x10] sm:$0xff] }
 0x226   :  { %v2325_v62 = vld [vmem:[#allocation3 + $0x640] sm:$0xff]  ;;  %3128 = vmatpush.msrb.mxu0 %v2244_v53  ;;  %3164 = vmatpush.msrb.mxu1 %v2364_v10  ;;  %v2228_v41 = vld [vmem:[#allocation3 + $0x338] sm:$0xff]  ;;  %v2247_v10 = vld [vmem:[#allocation3 + $0x3d0] sm:$0xff] }
 0x227   :  { %v1856_v25 = vadd.f32 %v1848_v24, %v1572_v4  ;;  %v1857_v19 = vadd.f32 %v1849_v23, %v1573_v55  ;;  %1981 = vmatpush.msrb.mxu2 %v1864_v8  ;;  %2016 = vmatpush.msrb.mxu3 %v1865_v58  ;;  %v2189_v5 = vld [vmem:[#allocation3 + $0x200] sm:$0xff]  ;;  %v2356_v9 = vld [vmem:[#allocation3 + $0x738] sm:$0xff] }
 0x228   :  { %v2317_v16 = vld [vmem:[#allocation3 + $0x600] sm:$0xff]  ;;  %3129 = vmatpush.msrb.mxu0 %v2236_v2  ;;  %3165 = vmatpush.msrb.mxu1 %v2356_v9  ;;  %v2220_v58 = vld [vmem:[#allocation3 + $0x2f8] sm:$0xff] }
 0x229   :  { %v1862_v51 = vadd.f32 %v1861_v0, %v1856_v25  ;;  %v1863_v13 = vadd.f32 %v1861_v0, %v1857_v19  ;;  %v7995_v63 = vpop.f32.mrf.mxu0  ;;  %v8949_v0 = vld [vmem:[#allocation22_spill] sm:$0xff]  ;;  %v2181_v44 = vld [vmem:[#allocation3 + $0x1c0] sm:$0xff] }
 0x22a   :  { %8947 = vst [vmem:[#allocation69_spill] sm:$0xff] %v7995_v63  ;;  %v7997_v34 = vpop.f32.mrf.mxu1  ;;  %v2173_v20 = vld [vmem:[#allocation3 + $0x180] sm:$0xff]  ;;  %3130 = vmatpush.msrb.mxu0 %v2228_v41  ;;  %v2348_v24 = vld [vmem:[#allocation3 + $0x6f8] sm:$0xff]  ;;  %v2367_v41 = vld [vmem:[#allocation3 + $0x790] sm:$0xff] }
 0x22b   :  { %1982 = vmatpush.msrb.mxu2 %v1862_v51  ;;  %2017 = vmatpush.msrb.mxu3 %v1863_v13  ;;  %8948 = vst [vmem:[#allocation72_spill] sm:$0xff] %v7997_v34  ;;  %v2301_v4 = vld [vmem:[#allocation3 + $0x580] sm:$0xff]  ;;  %v2188_v53 = vld [vmem:[#allocation3 + $0x1f8] sm:$0xff]  ;;  %v4794_v63 = vld [vmem:[#allocation3 + $0x168] sm:$0xff] }
 0x22c   :  { %4652 = vmatmul.msk.f32.vlgmr.msrb.gmra.mxu2 %vm1878_vm10, %v4694_v50  ;;  %4658 = vmatmul.msk.f32.vlgmr.msrb.gmra.mxu3 %vm1878_vm10, %v4694_v50  ;;  %v2165_v55 = vld [vmem:[#allocation3 + $0x140] sm:$0xff]  ;;  %v2316_v21 = vld [vmem:[#allocation3 + $0x5f8] sm:$0xff] }
 0x22d   :  { %2637 = vmatpush.msra.mxu2 %v2245_v32  ;;  %2672 = vmatpush.msra.mxu3 %v2373_v46  ;;  %v2293_v8 = vld [vmem:[#allocation3 + $0x540] sm:$0xff]  ;;  %v2212_v32 = vld [vmem:[#allocation3 + $0x2b8] sm:$0xff] }
 0x22e   :  { %3006 = vmatmul.f32.gmra.mxu0 %v8949_v0  ;;  %3041 = vmatmul.f32.gmra.mxu1 %v8950_v22  ;;  %v2157_v23 = vld [vmem:[#allocation3 + $0x100] sm:$0xff]  ;;  %v2340_v46 = vld [vmem:[#allocation3 + $0x6b8] sm:$0xff] }
 0x22f   :  { %2638 = vmatpush.msra.mxu2 %v2237_v42  ;;  %2673 = vmatpush.msra.mxu3 %v2365_v43  ;;  %v2285_v25 = vld [vmem:[#allocation3 + $0x500] sm:$0xff]  ;;  %v4697_v42 = vld [vmem:[%s8415_s1 + $0x18] sm:$0xff] }
 0x230   :  { %v2149_v19 = vld [vmem:[#allocation3 + $0xc0] sm:$0xff]  ;;  %3131 = vmatpush.msrb.mxu0 %v2220_v58  ;;  %3166 = vmatpush.msrb.mxu1 %v2348_v24  ;;  %v2172_v9 = vld [vmem:[#allocation3 + $0x178] sm:$0xff] }
 0x231   :  { %2639 = vmatpush.msra.mxu2 %v2229_v54  ;;  %2674 = vmatpush.msra.mxu3 %v2357_v1  ;;  %v8006_v35 = vpop.f32.mrf.mxu0  ;;  %v2277_v51 = vld [vmem:[#allocation3 + $0x4c0] sm:$0xff] }
 0x232   :  { %8951 = vst [vmem:[#allocation73_spill] sm:$0xff] %v8006_v35  ;;  %v8008_v27 = vpop.f32.mrf.mxu1  ;;  %v2141_v43 = vld [vmem:[#allocation3 + $0x80] sm:$0xff]  ;;  %3132 = vmatpush.msrb.mxu0 %v2212_v32  ;;  %3167 = vmatpush.msrb.mxu1 %v2340_v46  ;;  %v2351_v32 = vld [vmem:[#allocation3 + $0x710] sm:$0xff]  ;;  %v2148_v46 = vld [vmem:[#allocation3 + $0xb8] sm:$0xff] }
 0x233   :  { %2640 = vmatpush.msra.mxu2 %v2221_v52  ;;  %2675 = vmatpush.msra.mxu3 %v2349_v18  ;;  %8952 = vst [vmem:[#allocation26_spill] sm:$0xff] %v8008_v27  ;;  %v2269_v54 = vld [vmem:[#allocation3 + $0x480] sm:$0xff]  ;;  %v4771_v27 = vld [vmem:[#allocation3 + $0x728] sm:$0xff] }
 0x234   :  { %4653 = vmatmul.msk.f32.gmra.mxu2 %vm1878_vm10, %v4695_v37  ;;  %4659 = vmatmul.msk.f32.gmra.mxu3 %vm1878_vm10, %v4695_v37  ;;  %v2133_v52 = vld [vmem:[#allocation3 + $0x40] sm:$0xff] }
 0x235   :  { %2641 = vmatpush.msra.mxu2 %v2213_v39  ;;  %2676 = vmatpush.msra.mxu3 %v2341_v60  ;;  %v2261_v18 = vld [vmem:[#allocation3 + $0x440] sm:$0xff]  ;;  %v2196_v39 = vld [vmem:[#allocation3 + $0x238] sm:$0xff] }
 0x236   :  { %3009 = vmatmul.f32.gmra.mxu0 %v8926_v36  ;;  %3044 = vmatmul.f32.gmra.mxu1 %v8929_v7  ;;  %v2324_v60 = vld [vmem:[#allocation3 + $0x638] sm:$0xff]  ;;  %v2125_v37 = vld [vmem:[#allocation3] sm:$0xff] }
 0x237   :  { %2642 = vmatpush.msra.mxu2 %v2205_v56  ;;  %2677 = vmatpush.msra.mxu3 %v2333_v29  ;;  %v2253_v56 = vld [vmem:[#allocation3 + $0x400] sm:$0xff] }
 0x238   :  { %3133 = vmatpush.msrb.mxu0 %v2204_v14  ;;  %3168 = vmatpush.msrb.mxu1 %v2332_v30  ;;  %v2132_v14 = vld [vmem:[#allocation3 + $0x38] sm:$0xff]  ;;  %v4789_v35 = vld [vmem:[#allocation3 + $0x700] sm:$0xff] }
 0x239   :  { %2643 = vmatpush.msra.mxu2 %v2197_v45  ;;  %2678 = vmatpush.msra.mxu3 %v2325_v62  ;;  %v8017_v12 = vpop.f32.mrf.mxu0  ;;  %v4698_v62 = vld [vmem:[%s8415_s1 + $0x20] sm:$0xff]  ;;  %v2260_v30 = vld [vmem:[#allocation3 + $0x438] sm:$0xff] }
 0x23a   :  { %8953 = vst [vmem:[#allocation46_spill] sm:$0xff] %v8017_v12  ;;  %v8019_v6 = vpop.f32.mrf.mxu1  ;;  %3134 = vmatpush.msrb.mxu0 %v2196_v39  ;;  %3169 = vmatpush.msrb.mxu1 %v2324_v60  ;;  %v2207_v60 = vld [vmem:[#allocation3 + $0x290] sm:$0xff] }
 0x23b   :  { %2644 = vmatpush.msra.mxu2 %v2189_v5  ;;  %2679 = vmatpush.msra.mxu3 %v2317_v16  ;;  %8954 = vst [vmem:[#allocation74_spill] sm:$0xff] %v8019_v6  ;;  %v2180_v5 = vld [vmem:[#allocation3 + $0x1b8] sm:$0xff]  ;;  %v2139_v6 = vld [vmem:[#allocation3 + $0x70] sm:$0xff] }
 0x23c   :  { %4654 = vmatmul.msk.f32.gmra.mxu2 %vm1878_vm10, %v4696_v11  ;;  %4660 = vmatmul.msk.f32.gmra.mxu3 %vm1878_vm10, %v4696_v11  ;;  %v2308_v16 = vld [vmem:[#allocation3 + $0x5b8] sm:$0xff] }
 0x23d   :  { %2645 = vmatpush.msra.mxu2 %v2181_v44  ;;  %2680 = vmatpush.msra.mxu3 %v2309_v57  ;;  %v2375_v44 = vld [vmem:[#allocation3 + $0x7d0] sm:$0xff]  ;;  %v2300_v11 = vld [vmem:[#allocation3 + $0x578] sm:$0xff] }
 0x23e   :  { %3012 = vmatmul.f32.gmra.mxu0 %v8935_v49  ;;  %3047 = vmatmul.f32.gmra.mxu1 %v8936_v26  ;;  %v2239_v57 = vld [vmem:[#allocation3 + $0x390] sm:$0xff] }
 0x23f   :  { %2646 = vmatpush.msra.mxu2 %v2173_v20  ;;  %2681 = vmatpush.msra.mxu3 %v2301_v4  ;;  %v2231_v20 = vld [vmem:[#allocation3 + $0x350] sm:$0xff] }
 0x240   :  { %3135 = vmatpush.msrb.mxu0 %v2188_v53  ;;  %3170 = vmatpush.msrb.mxu1 %v2316_v21  ;;  %v2359_v4 = vld [vmem:[#allocation3 + $0x750] sm:$0xff] }
 0x241   :  { %2647 = vmatpush.msra.mxu2 %v2165_v55  ;;  %2682 = vmatpush.msra.mxu3 %v2293_v8  ;;  %v2724_v13 = vpop.f32.mrf.mxu0  ;;  %v2164_v55 = vld [vmem:[#allocation3 + $0x138] sm:$0xff]  ;;  %v2191_v53 = vld [vmem:[#allocation3 + $0x210] sm:$0xff] }
 0x242   :  { %v2759_v50 = vpop.f32.mrf.mxu1  ;;  %3136 = vmatpush.msrb.mxu0 %v2180_v5  ;;  %3171 = vmatpush.msrb.mxu1 %v2308_v16  ;;  %v2292_v8 = vld [vmem:[#allocation3 + $0x538] sm:$0xff]  ;;  %v2319_v21 = vld [vmem:[#allocation3 + $0x610] sm:$0xff]  ;;  %v4702_v16 = vld [vmem:[#allocation3 + $0x388] sm:$0xff] }
 0x243   :  { %2648 = vmatpush.msra.mxu2 %v2157_v23  ;;  %2683 = vmatpush.msra.mxu3 %v2285_v25  ;;  %v2760_v1 = vadd.f32 %v2759_v50, %v2724_v13  ;;  %v4699_v23 = vld [vmem:[%s8415_s1 + $0x28] sm:$0xff]  ;;  %v2156_v25 = vld [vmem:[#allocation3 + $0xf8] sm:$0xff]  ;;  %v2223_v13 = vld [vmem:[#allocation3 + $0x310] sm:$0xff]  ;;  %s5061_s1 = smov [#allocation13]  }
 0x244   :  { %4655 = vmatmul.msk.f32.gmra.mxu2 %vm1878_vm10, %v4697_v42  ;;  %4661 = vmatmul.msk.f32.gmra.mxu3 %vm1878_vm10, %v4697_v42  ;;  %v2276_v50 = vld [vmem:[#allocation3 + $0x4b8] sm:$0xff]  ;;  %v2215_v42 = vld [vmem:[#allocation3 + $0x2d0] sm:$0xff]  ;;  %s4465_s25 = sshll.u32 %s5061_s1, 4  ;;  %s4466_s25 = int_to_ptr.vmem [resolvable:$true] %s4465_s25 }
 0x245   :  { %2649 = vmatpush.msra.mxu2 %v2149_v19  ;;  %2684 = vmatpush.msra.mxu3 %v2277_v51  ;;  %3198 = vst [vmem:[#allocation13 + $0x8] sm:$0xff] %v2760_v1  ;;  %v2284_v19 = vld [vmem:[#allocation3 + $0x4f8] sm:$0xff] }
 0x246   :  { %3015 = vmatmul.f32.gmra.mxu0 %v8940_v17  ;;  %3050 = vmatmul.f32.gmra.mxu1 %v8941_v40  ;;  %v2268_v1 = vld [vmem:[#allocation3 + $0x478] sm:$0xff] }
 0x247   :  { %2650 = vmatpush.msra.mxu2 %v2141_v43  ;;  %2685 = vmatpush.msra.mxu3 %v2269_v54  ;;  %v2343_v43 = vld [vmem:[#allocation3 + $0x6d0] sm:$0xff]  ;;  %v2140_v54 = vld [vmem:[#allocation3 + $0x78] sm:$0xff] }
 0x248   :  { %3137 = vmatpush.msrb.mxu0 %v2172_v9  ;;  %3172 = vmatpush.msrb.mxu1 %v2300_v11  ;;  %v2175_v9 = vld [vmem:[#allocation3 + $0x190] sm:$0xff] }
 0x249   :  { %2651 = vmatpush.msra.mxu2 %v2133_v52  ;;  %2686 = vmatpush.msra.mxu3 %v2261_v18  ;;  %v2727_v29 = vpop.f32.mrf.mxu0  ;;  %v2303_v11 = vld [vmem:[#allocation3 + $0x590] sm:$0xff] }
 0x24a   :  { %v2762_v45 = vpop.f32.mrf.mxu1  ;;  %3138 = vmatpush.msrb.mxu0 %v2164_v55  ;;  %3173 = vmatpush.msrb.mxu1 %v2292_v8  ;;  %v2159_v55 = vld [vmem:[#allocation3 + $0x110] sm:$0xff] }
 0x24b   :  { %2652 = vmatpush.msra.mxu2 %v2125_v37  ;;  %2687 = vmatpush.msra.mxu3 %v2253_v56  ;;  %v2763_v2 = vadd.f32 %v2762_v45, %v2727_v29  ;;  %v2335_v37 = vld [vmem:[#allocation3 + $0x690] sm:$0xff]  ;;  %v4700_v45 = vld [vmem:[#allocation3 + $0x3c8] sm:$0xff] }
 0x24c   :  { %4656 = vmatmul.msk.f32.gmra.mxu2 %vm1878_vm10, %v4698_v62  ;;  %4662 = vmatmul.msk.f32.gmra.mxu3 %vm1878_vm10, %v4698_v62  ;;  %v2199_v56 = vld [vmem:[#allocation3 + $0x250] sm:$0xff]  ;;  %v4701_v62 = vld [vmem:[#allocation3 + $0x7c8] sm:$0xff] }
 0x24d   :  { %3206 = vst [vmem:[#allocation13 + $0xc8] sm:$0xff] %v2763_v2  ;;  %2777 = vmatpush.msrb.mxu2 %v2247_v10  ;;  %2812 = vmatpush.msrb.mxu3 %v2375_v44  ;;  %v2327_v29 = vld [vmem:[#allocation3 + $0x650] sm:$0xff]  ;;  %v4703_v44 = vld [vmem:[#allocation3 + $0x788] sm:$0xff] }
 0x24e   :  { %3018 = vmatmul.f32.gmra.mxu0 %v8943_v15  ;;  %3053 = vmatmul.f32.gmra.mxu1 %v8944_v47  ;;  %v2183_v2 = vld [vmem:[#allocation3 + $0x1d0] sm:$0xff] }
 0x24f   :  { %2778 = vmatpush.msrb.mxu2 %v2239_v57  ;;  %2813 = vmatpush.msrb.mxu3 %v2367_v41  ;;  %v2311_v10 = vld [vmem:[#allocation3 + $0x5d0] sm:$0xff] }
 0x250   :  { %3139 = vmatpush.msrb.mxu0 %v2156_v25  ;;  %3174 = vmatpush.msrb.mxu1 %v2284_v19  ;;  %v2287_v8 = vld [vmem:[#allocation3 + $0x510] sm:$0xff] }
 0x251   :  { %v2730_v58 = vpop.f32.mrf.mxu0  ;;  %2779 = vmatpush.msrb.mxu2 %v2231_v20  ;;  %2814 = vmatpush.msrb.mxu3 %v2359_v4  ;;  %v2167_v20 = vld [vmem:[#allocation3 + $0x150] sm:$0xff] }
 0x252   :  { %v2765_v24 = vpop.f32.mrf.mxu1  ;;  %3140 = vmatpush.msrb.mxu0 %v2148_v46  ;;  %3175 = vmatpush.msrb.mxu1 %v2276_v50  ;;  %v2295_v4 = vld [vmem:[#allocation3 + $0x550] sm:$0xff] }
 0x253   :  { %v2766_v51 = vadd.f32 %v2765_v24, %v2730_v58  ;;  %2780 = vmatpush.msrb.mxu2 %v2223_v13  ;;  %2815 = vmatpush.msrb.mxu3 %v2351_v32  ;;  %v4704_v58 = vld [vmem:[#allocation3 + $0x348] sm:$0xff]  ;;  %v2279_v25 = vld [vmem:[#allocation3 + $0x4d0] sm:$0xff] }
 0x254   :  { %4657 = vmatmul.msk.f32.gmra.mxu2 %vm1878_vm10, %v4699_v23  ;;  %4663 = vmatmul.msk.f32.gmra.mxu3 %vm1878_vm10, %v4699_v23  ;;  %v4705_v24 = vld [vmem:[#allocation3 + $0x748] sm:$0xff]  ;;  %v2151_v23 = vld [vmem:[#allocation3 + $0xd0] sm:$0xff] }
 0x255   :  { %3214 = vst [vmem:[#allocation13 + $0x188] sm:$0xff] %v2766_v51  ;;  %2781 = vmatpush.msrb.mxu2 %v2215_v42  ;;  %2816 = vmatpush.msrb.mxu3 %v2343_v43  ;;  %v4706_v51 = vld [vmem:[#allocation3 + $0x308] sm:$0xff]  ;;  %v2143_v50 = vld [vmem:[#allocation3 + $0x90] sm:$0xff] }
 0x256   :  { %3141 = vmatpush.msrb.mxu0 %v2140_v54  ;;  %3176 = vmatpush.msrb.mxu1 %v2268_v1  ;;  %v4707_v13 = vld [vmem:[#allocation3 + $0x708] sm:$0xff]  ;;  %v2271_v42 = vld [vmem:[#allocation3 + $0x490] sm:$0xff] }
 0x257   :  { %2782 = vmatpush.msrb.mxu2 %v2207_v60  ;;  %2817 = vmatpush.msrb.mxu3 %v2335_v37  ;;  %v2135_v43 = vld [vmem:[#allocation3 + $0x50] sm:$0xff]  ;;  %v4711_v60 = vld [vmem:[#allocation3 + $0x688] sm:$0xff] }
 0x258   :  { %3142 = vmatpush.msrb.mxu0 %v2132_v14  ;;  %3177 = vmatpush.msrb.mxu1 %v2260_v30  ;;  %v2263_v54 = vld [vmem:[#allocation3 + $0x450] sm:$0xff]  ;;  %v4708_v30 = vld [vmem:[#allocation3 + $0x2c8] sm:$0xff] }
 0x259   :  { %v2733_v52 = vpop.f32.mrf.mxu0  ;;  %3143 = vmatmul.f32.vlgmr.msrb.gmra.mxu0 %v7399_v33  ;;  %3178 = vmatmul.f32.vlgmr.msrb.gmra.mxu1 %v8946_v59  ;;  %v2127_v1 = vld [vmem:[#allocation3 + $0x10] sm:$0xff] }
 0x25a   :  { %v2768_v18 = vpop.f32.mrf.mxu1  ;;  %3315 = vmatpush.msra.mxu0 %v4700_v45  ;;  %3350 = vmatpush.msra.mxu1 %v4701_v62  ;;  %v2255_v14 = vld [vmem:[#allocation3 + $0x410] sm:$0xff]  ;;  %v4715_v45 = vld [vmem:[#allocation3 + $0x608] sm:$0xff] }
 0x25b   :  { %v2769_v39 = vadd.f32 %v2768_v18, %v2733_v52  ;;  %2783 = vmatpush.msrb.mxu2 %v2199_v56  ;;  %2818 = vmatpush.msrb.mxu3 %v2327_v29  ;;  %v4709_v52 = vld [vmem:[#allocation3 + $0x6c8] sm:$0xff] }
 0x25c   :  { %2653 = vmatmul.f32.vlgmr.msra.gmra.mxu2 %v7399_v33  ;;  %2688 = vmatmul.f32.vlgmr.msra.gmra.mxu3 %v8946_v59  ;;  %v4712_v29 = vld [vmem:[#allocation3 + $0x248] sm:$0xff] }
 0x25d   :  { %3222 = vst [vmem:[#allocation13 + $0x248] sm:$0xff] %v2769_v39  ;;  %3316 = vmatpush.msra.mxu0 %v4702_v16  ;;  %3351 = vmatpush.msra.mxu1 %v4703_v44  ;;  %v4710_v39 = vld [vmem:[#allocation3 + $0x288] sm:$0xff] }
 0x25e   :  { %2784 = vmatpush.msrb.mxu2 %v2191_v53  ;;  %2819 = vmatpush.msrb.mxu3 %v2319_v21  ;;  %v4713_v53 = vld [vmem:[#allocation3 + $0x648] sm:$0xff] }
 0x25f   :  { %3317 = vmatpush.msra.mxu0 %v4704_v58  ;;  %3352 = vmatpush.msra.mxu1 %v4705_v24  ;;  %v4714_v21 = vld [vmem:[#allocation3 + $0x208] sm:$0xff]  ;;  %v8085_v58 = vld [vmem:[#allocation3 + $0x720] sm:$0xff] }
 0x260   :  { %2785 = vmatpush.msrb.mxu2 %v2183_v2  ;;  %2820 = vmatpush.msrb.mxu3 %v2311_v10  ;;  %v4716_v62 = vld [vmem:[#allocation3 + $0x1c8] sm:$0xff] }
 0x261   :  { %v2736_v5 = vpop.f32.mrf.mxu0  ;;  %3146 = vmatmul.f32.gmra.mxu0 %v8949_v0  ;;  %3181 = vmatmul.f32.gmra.mxu1 %v8950_v22  ;;  %v4717_v2 = vld [vmem:[#allocation3 + $0x5c8] sm:$0xff] }
 0x262   :  { %v2771_v57 = vpop.f32.mrf.mxu1  ;;  %2786 = vmatpush.msrb.mxu2 %v2175_v9  ;;  %2821 = vmatpush.msrb.mxu3 %v2303_v11  ;;  %v4718_v16 = vld [vmem:[#allocation3 + $0x188] sm:$0xff]  ;;  %v8067_v9 = vld [vmem:[#allocation3 + $0x7e0] sm:$0xff] }
 0x263   :  { %v2772_v41 = vadd.f32 %v2771_v57, %v2736_v5  ;;  %3318 = vmatpush.msra.mxu0 %v4706_v51  ;;  %3353 = vmatpush.msra.mxu1 %v4707_v13  ;;  %v4719_v44 = vld [vmem:[#allocation3 + $0x588] sm:$0xff]  ;;  %v8069_v11 = vld [vmem:[#allocation3 + $0x3a0] sm:$0xff] }
 0x264   :  { %2656 = vmatmul.f32.gmra.mxu2 %v8949_v0  ;;  %2691 = vmatmul.f32.gmra.mxu3 %v8950_v22  ;;  %v4720_v24 = vld [vmem:[#allocation3 + $0x148] sm:$0xff] }
 0x265   :  { %3230 = vst [vmem:[#allocation13 + $0x308] sm:$0xff] %v2772_v41  ;;  %2787 = vmatpush.msrb.mxu2 %v2167_v20  ;;  %2822 = vmatpush.msrb.mxu3 %v2295_v4  ;;  %v8065_v41 = vld [vmem:[#allocation3 + $0x3e0] sm:$0xff]  ;;  %v4723_v51 = vld [vmem:[#allocation3 + $0x508] sm:$0xff] }
 0x266   :  { %3319 = vmatpush.msra.mxu0 %v4708_v30  ;;  %3354 = vmatpush.msra.mxu1 %v4709_v52  ;;  %v8073_v20 = vld [vmem:[#allocation3 + $0x7a0] sm:$0xff]  ;;  %v4725_v30 = vld [vmem:[#allocation3 + $0x4c8] sm:$0xff] }
 0x267   :  { %2788 = vmatpush.msrb.mxu2 %v2159_v55  ;;  %2823 = vmatpush.msrb.mxu3 %v2287_v8  ;;  %v8077_v4 = vld [vmem:[#allocation3 + $0x360] sm:$0xff] }
 0x268   :  { %3320 = vmatpush.msra.mxu0 %v4710_v39  ;;  %3355 = vmatpush.msra.mxu1 %v4711_v60  ;;  %v8079_v55 = vld [vmem:[#allocation3 + $0x760] sm:$0xff]  ;;  %v4726_v60 = vld [vmem:[#allocation3 + $0x88] sm:$0xff] }
 0x269   :  { %v2739_v19 = vpop.f32.mrf.mxu0  ;;  %2789 = vmatpush.msrb.mxu2 %v2151_v23  ;;  %2824 = vmatpush.msrb.mxu3 %v2279_v25  ;;  %v8083_v8 = vld [vmem:[#allocation3 + $0x320] sm:$0xff]  ;;  %v4721_v23 = vld [vmem:[#allocation3 + $0x548] sm:$0xff] }
 0x26a   :  { %v2774_v32 = vpop.f32.mrf.mxu1  ;;  %3149 = vmatmul.f32.gmra.mxu0 %v8926_v36  ;;  %3184 = vmatmul.f32.gmra.mxu1 %v8929_v7  ;;  %v8111_v52 = vld [vmem:[#allocation3 + $0x220] sm:$0xff] }
 0x26b   :  { %v2775_v46 = vadd.f32 %v2774_v32, %v2739_v19  ;;  %2790 = vmatpush.msrb.mxu2 %v2143_v50  ;;  %2825 = vmatpush.msrb.mxu3 %v2271_v42  ;;  %v4722_v19 = vld [vmem:[#allocation3 + $0x108] sm:$0xff]  ;;  %v8095_v50 = vld [vmem:[#allocation3 + $0x6e0] sm:$0xff] }
 0x26c   :  { %2659 = vmatmul.f32.gmra.mxu2 %v8926_v36  ;;  %2694 = vmatmul.f32.gmra.mxu3 %v8929_v7  ;;  %v8097_v42 = vld [vmem:[#allocation3 + $0x2a0] sm:$0xff] }
 0x26d   :  { %3238 = vst [vmem:[#allocation13 + $0x3c8] sm:$0xff] %v2775_v46  ;;  %2791 = vmatpush.msrb.mxu2 %v2135_v43  ;;  %2826 = vmatpush.msrb.mxu3 %v2263_v54  ;;  %v8093_v46 = vld [vmem:[#allocation3 + $0x2e0] sm:$0xff] }
 0x26e   :  { %3321 = vmatpush.msra.mxu0 %v4712_v29  ;;  %3356 = vmatpush.msra.mxu1 %v4713_v53  ;;  %v8101_v43 = vld [vmem:[#allocation3 + $0x6a0] sm:$0xff] }
 0x26f   :  { %2792 = vmatpush.msrb.mxu2 %v2127_v1  ;;  %2827 = vmatpush.msrb.mxu3 %v2255_v14  ;;  %v8105_v54 = vld [vmem:[#allocation3 + $0x260] sm:$0xff]  ;;  %v4724_v14 = vld [vmem:[#allocation3 + $0xc8] sm:$0xff] }
 0x270   :  { %3322 = vmatpush.msra.mxu0 %v4714_v21  ;;  %3357 = vmatpush.msra.mxu1 %v4715_v45  ;;  %v8107_v1 = vld [vmem:[#allocation3 + $0x660] sm:$0xff]  ;;  %v4728_v45 = vld [vmem:[#allocation3 + $0x48] sm:$0xff] }
 0x271   :  { %v2864_v18 = vpop.f32.mrf.mxu0  ;;  %2917 = vmatpush.msra.mxu2 %v8065_v41  ;;  %2952 = vmatpush.msra.mxu3 %v8067_v9  ;;  %v8121_v53 = vld [vmem:[#allocation3 + $0x1e0] sm:$0xff] }
 0x272   :  { %v2899_v37 = vpop.f32.mrf.mxu1  ;;  %3152 = vmatmul.f32.gmra.mxu0 %v8935_v49  ;;  %3187 = vmatmul.f32.gmra.mxu1 %v8936_v26  ;;  %v8123_v21 = vld [vmem:[#allocation3 + $0x5e0] sm:$0xff] }
 0x273   :  { %v2900_v56 = vadd.f32 %v2899_v37, %v2864_v18  ;;  %3323 = vmatpush.msra.mxu0 %v4716_v62  ;;  %3358 = vmatpush.msra.mxu1 %v4717_v2  ;;  %v8113_v18 = vld [vmem:[#allocation3 + $0x620] sm:$0xff]  ;;  %v4727_v37 = vld [vmem:[#allocation3 + $0x488] sm:$0xff] }
 0x274   :  { %2662 = vmatmul.f32.gmra.mxu2 %v8935_v49  ;;  %2697 = vmatmul.f32.gmra.mxu3 %v8936_v26  ;;  %v4729_v62 = vld [vmem:[#allocation3 + $0x448] sm:$0xff]  ;;  %v8127_v2 = vld [vmem:[#allocation3 + $0x1a0] sm:$0xff] }
 0x275   :  { %3200 = vst [vmem:[#allocation13 + $0x18] sm:$0xff] %v2900_v56  ;;  %3324 = vmatpush.msra.mxu0 %v4718_v16  ;;  %3359 = vmatpush.msra.mxu1 %v4719_v44  ;;  %v2297_v16 = vld [vmem:[#allocation3 + $0x560] sm:$0xff]  ;;  %v4730_v44 = vld [vmem:[#allocation3 + $0x8] sm:$0xff] }
 0x276   :  { %2918 = vmatpush.msra.mxu2 %v8069_v11  ;;  %2953 = vmatpush.msra.mxu3 %v8073_v20 }
 0x277   :  { %3325 = vmatpush.msra.mxu0 %v4720_v24  ;;  %3360 = vmatpush.msra.mxu1 %v4721_v23  ;;  %v2161_v23 = vld [vmem:[#allocation3 + $0x120] sm:$0xff] }
 0x278   :  { %2919 = vmatpush.msra.mxu2 %v8077_v4  ;;  %2954 = vmatpush.msra.mxu3 %v8079_v55 }
 0x279   :  { %v2867_v10 = vpop.f32.mrf.mxu0  ;;  %3326 = vmatpush.msra.mxu0 %v4722_v19  ;;  %3361 = vmatpush.msra.mxu1 %v4723_v51  ;;  %v4732_v51 = vld [vmem:[#allocation3 + $0x3d8] sm:$0xff] }
 0x27a   :  { %v2902_v5 = vpop.f32.mrf.mxu1  ;;  %3155 = vmatmul.f32.gmra.mxu0 %v8940_v17  ;;  %3190 = vmatmul.f32.gmra.mxu1 %v8941_v40 }
 0x27b   :  { %v2903_v57 = vadd.f32 %v2902_v5, %v2867_v10  ;;  %2920 = vmatpush.msra.mxu2 %v8083_v8  ;;  %2955 = vmatpush.msra.mxu3 %v8085_v58  ;;  %v8129_v10 = vld [vmem:[#allocation3 + $0x5a0] sm:$0xff] }
 0x27c   :  { %2665 = vmatmul.f32.gmra.mxu2 %v8940_v17  ;;  %2700 = vmatmul.f32.gmra.mxu3 %v8941_v40  ;;  %v2169_v5 = vld [vmem:[#allocation3 + $0x160] sm:$0xff] }
 0x27d   :  { %3208 = vst [vmem:[#allocation13 + $0xd8] sm:$0xff] %v2903_v57  ;;  %2921 = vmatpush.msra.mxu2 %v8093_v46  ;;  %2956 = vmatpush.msra.mxu3 %v8095_v50  ;;  %v4731_v57 = vld [vmem:[#allocation3 + $0x408] sm:$0xff] }
 0x27e   :  { %3327 = vmatpush.msra.mxu0 %v4724_v14  ;;  %3362 = vmatpush.msra.mxu1 %v4725_v30  ;;  %v2153_v14 = vld [vmem:[#allocation3 + $0xe0] sm:$0xff] }
 0x27f   :  { %2922 = vmatpush.msra.mxu2 %v8097_v42  ;;  %2957 = vmatpush.msra.mxu3 %v8101_v43  ;;  %v2281_v30 = vld [vmem:[#allocation3 + $0x4e0] sm:$0xff] }
 0x280   :  { %3328 = vmatpush.msra.mxu0 %v4726_v60  ;;  %3363 = vmatpush.msra.mxu1 %v4727_v37  ;;  %v4735_v60 = vld [vmem:[#allocation3 + $0x798] sm:$0xff]  ;;  %v2145_v37 = vld [vmem:[#allocation3 + $0xa0] sm:$0xff] }
 0x281   :  { %v2870_v25 = vpop.f32.mrf.mxu0  ;;  %2923 = vmatpush.msra.mxu2 %v8105_v54  ;;  %2958 = vmatpush.msra.mxu3 %v8107_v1 }
 0x282   :  { %v2905_v13 = vpop.f32.mrf.mxu1  ;;  %3158 = vmatmul.f32.gmra.mxu0 %v8943_v15  ;;  %3193 = vmatmul.f32.gmra.mxu1 %v8944_v47 }
 0x283   :  { %v2906_v32 = vadd.f32 %v2905_v13, %v2870_v25  ;;  %2924 = vmatpush.msra.mxu2 %v8111_v52  ;;  %2959 = vmatpush.msra.mxu3 %v8113_v18  ;;  %v2289_v25 = vld [vmem:[#allocation3 + $0x520] sm:$0xff]  ;;  %v4733_v13 = vld [vmem:[#allocation3 + $0x7d8] sm:$0xff] }
 0x284   :  { %2668 = vmatmul.f32.gmra.mxu2 %v8943_v15  ;;  %2703 = vmatmul.f32.gmra.mxu3 %v8944_v47 }
 0x285   :  { %3216 = vst [vmem:[#allocation13 + $0x198] sm:$0xff] %v2906_v32  ;;  %2925 = vmatpush.msra.mxu2 %v8121_v53  ;;  %2960 = vmatpush.msra.mxu3 %v8123_v21 }
 0x286   :  { %3329 = vmatpush.msra.mxu0 %v4728_v45  ;;  %3364 = vmatpush.msra.mxu1 %v4729_v62  ;;  %v2265_v45 = vld [vmem:[#allocation3 + $0x460] sm:$0xff]  ;;  %v4736_v62 = vld [vmem:[#allocation3 + $0x358] sm:$0xff] }
 0x287   :  { %2926 = vmatpush.msra.mxu2 %v8127_v2  ;;  %2961 = vmatpush.msra.mxu3 %v8129_v10 }
 0x288   :  { %3330 = vmatpush.msra.mxu0 %v4730_v44  ;;  %3365 = vmatpush.msra.mxu1 %v4731_v57  ;;  %v2129_v44 = vld [vmem:[#allocation3 + $0x20] sm:$0xff] }
 0x289   :  { %v2873_v39 = vpop.f32.mrf.mxu0  ;;  %2927 = vmatpush.msra.mxu2 %v2169_v5  ;;  %2962 = vmatpush.msra.mxu3 %v2297_v16  ;;  %v4737_v5 = vld [vmem:[#allocation3 + $0x758] sm:$0xff]  ;;  %v2257_v57 = vld [vmem:[#allocation3 + $0x420] sm:$0xff] }
 0x28a   :  { %v2908_v56 = vpop.f32.mrf.mxu1  ;;  %3455 = vmatpush.msrb.mxu0 %v4732_v51  ;;  %3490 = vmatpush.msrb.mxu1 %v4733_v13  ;;  %v4740_v51 = vld [vmem:[#allocation3 + $0x2d8] sm:$0xff] }
 0x28b   :  { %v2909_v29 = vadd.f32 %v2908_v56, %v2873_v39  ;;  %2928 = vmatpush.msra.mxu2 %v2161_v23  ;;  %2963 = vmatpush.msra.mxu3 %v2289_v25  ;;  %v4734_v39 = vld [vmem:[#allocation3 + $0x398] sm:$0xff]  ;;  %v2273_v56 = vld [vmem:[#allocation3 + $0x4a0] sm:$0xff] }
 0x28c   :  { %2793 = vmatmul.f32.vlgmr.msrb.gmra.mxu2 %v7399_v33  ;;  %2828 = vmatmul.f32.vlgmr.msrb.gmra.mxu3 %v8946_v59  ;;  %v4739_v23 = vld [vmem:[#allocation3 + $0x718] sm:$0xff] }
 0x28d   :  { %3224 = vst [vmem:[#allocation13 + $0x258] sm:$0xff] %v2909_v29  ;;  %3456 = vmatpush.msrb.mxu0 %v4734_v39  ;;  %3491 = vmatpush.msrb.mxu1 %v4735_v60  ;;  %v2137_v29 = vld [vmem:[#allocation3 + $0x60] sm:$0xff]  ;;  %v4741_v13 = vld [vmem:[#allocation3 + $0x6d8] sm:$0xff] }
 0x28e   :  { %2929 = vmatpush.msra.mxu2 %v2153_v14  ;;  %2964 = vmatpush.msra.mxu3 %v2281_v30  ;;  %v4743_v14 = vld [vmem:[#allocation3 + $0x698] sm:$0xff] }
 0x28f   :  { %3457 = vmatpush.msrb.mxu0 %v4736_v62  ;;  %3492 = vmatpush.msrb.mxu1 %v4737_v5  ;;  %v4744_v39 = vld [vmem:[#allocation3 + $0x258] sm:$0xff] }
 0x290   :  { %2930 = vmatpush.msra.mxu2 %v2145_v37  ;;  %2965 = vmatpush.msra.mxu3 %v2273_v56  ;;  %v4745_v60 = vld [vmem:[#allocation3 + $0x658] sm:$0xff] }
 0x291   :  { %v2876_v24 = vpop.f32.mrf.mxu0  ;;  %3493 = vmatpush.msrb.mxu1 %v4739_v23  ;;  %v4748_v62 = vld [vmem:[#allocation3 + $0x1d8] sm:$0xff] }
 0x292   :  { %v2911_v19 = vpop.f32.mrf.mxu1  ;;  %2931 = vmatpush.msra.mxu2 %v2137_v29  ;;  %2966 = vmatpush.msra.mxu3 %v2265_v45  ;;  %v4746_v29 = vld [vmem:[#allocation3 + $0x218] sm:$0xff] }
 0x293   :  { %v2912_v32 = vadd.f32 %v2911_v19, %v2876_v24  ;;  %v4738_v24 = vld [vmem:[#allocation3 + $0x318] sm:$0xff]  ;;  %3494 = vmatpush.msrb.mxu1 %v4741_v13  ;;  %v2379_v13 = vld [vmem:[#allocation3 + $0x7f0] sm:$0xff] }
 0x294   :  { %2796 = vmatmul.f32.gmra.mxu2 %v8949_v0  ;;  %2831 = vmatmul.f32.gmra.mxu3 %v8950_v22  ;;  %v4747_v45 = vld [vmem:[#allocation3 + $0x618] sm:$0xff] }
 0x295   :  { %3232 = vst [vmem:[#allocation13 + $0x318] sm:$0xff] %v2912_v32  ;;  %3458 = vmatpush.msrb.mxu0 %v4738_v24  ;;  %2932 = vmatpush.msra.mxu2 %v2129_v44  ;;  %v4742_v32 = vld [vmem:[#allocation3 + $0x298] sm:$0xff] }
 0x296   :  { %2967 = vmatpush.msra.mxu3 %v2257_v57  ;;  %3495 = vmatpush.msrb.mxu1 %v4743_v14  ;;  %v4749_v5 = vld [vmem:[#allocation3 + $0x5d8] sm:$0xff] }
 0x297   :  { %3459 = vmatpush.msrb.mxu0 %v4740_v51  ;;  %v4751_v44 = vld [vmem:[#allocation3 + $0x598] sm:$0xff]  ;;  %v2251_v51 = vld [vmem:[#allocation3 + $0x3f0] sm:$0xff] }
 0x298   :  { %3496 = vmatpush.msrb.mxu1 %v4745_v60  ;;  %v4752_v23 = vld [vmem:[#allocation3 + $0x158] sm:$0xff]  ;;  %3057 = vmatpush.msrb.mxu2 %v2251_v51  ;;  %v2243_v60 = vld [vmem:[#allocation3 + $0x3b0] sm:$0xff] }
 0x299   :  { %v2879_v16 = vpop.f32.mrf.mxu0  ;;  %3460 = vmatpush.msrb.mxu0 %v4742_v32  ;;  %3092 = vmatpush.msrb.mxu3 %v2379_v13  ;;  %v4754_v32 = vld [vmem:[#allocation3 + $0x118] sm:$0xff] }
 0x29a   :  { %v2914_v25 = vpop.f32.mrf.mxu1  ;;  %3497 = vmatpush.msrb.mxu1 %v4747_v45  ;;  %v4755_v14 = vld [vmem:[#allocation3 + $0x518] sm:$0xff]  ;;  %3058 = vmatpush.msrb.mxu2 %v2243_v60  ;;  %v2227_v45 = vld [vmem:[#allocation3 + $0x330] sm:$0xff] }
 0x29b   :  { %v2915_v19 = vadd.f32 %v2914_v25, %v2879_v16  ;;  %3461 = vmatpush.msrb.mxu0 %v4744_v39  ;;  %v4750_v16 = vld [vmem:[#allocation3 + $0x198] sm:$0xff]  ;;  %v8155_v60 = vld [vmem:[#allocation3 + $0x6b0] sm:$0xff] }
 0x29c   :  { %2799 = vmatmul.f32.gmra.mxu2 %v8926_v36  ;;  %2834 = vmatmul.f32.gmra.mxu3 %v8929_v7  ;;  %v4753_v25 = vld [vmem:[#allocation3 + $0x558] sm:$0xff] }
 0x29d   :  { %3240 = vst [vmem:[#allocation13 + $0x3d8] sm:$0xff] %v2915_v19  ;;  %3462 = vmatpush.msrb.mxu0 %v4746_v29  ;;  %3498 = vmatpush.msrb.mxu1 %v4749_v5  ;;  %v2363_v29 = vld [vmem:[#allocation3 + $0x770] sm:$0xff]  ;;  %v4756_v5 = vld [vmem:[#allocation3 + $0xd8] sm:$0xff] }
 0x29e   :  { %v4759_v51 = vld [vmem:[#allocation3 + $0x498] sm:$0xff] }
 0x29f   :  { %3463 = vmatpush.msrb.mxu0 %v4748_v62  ;;  %3499 = vmatpush.msrb.mxu1 %v4751_v44  ;;  %v2355_v62 = vld [vmem:[#allocation3 + $0x730] sm:$0xff] }
 0x2a1   :  { %v3004_v30 = vpop.f32.mrf.mxu0  ;;  %3464 = vmatpush.msrb.mxu0 %v4750_v16  ;;  %3500 = vmatpush.msrb.mxu1 %v4753_v25  ;;  %v4757_v16 = vld [vmem:[#allocation3 + $0x4d8] sm:$0xff]  ;;  %v2347_v25 = vld [vmem:[#allocation3 + $0x6f0] sm:$0xff] }
 0x2a2   :  { %v3039_v37 = vpop.f32.mrf.mxu1 }
 0x2a3   :  { %v3040_v56 = vadd.f32 %v3039_v37, %v3004_v30  ;;  %3465 = vmatpush.msrb.mxu0 %v4752_v23  ;;  %3501 = vmatpush.msrb.mxu1 %v4755_v14  ;;  %v2371_v37 = vld [vmem:[#allocation3 + $0x7b0] sm:$0xff] }
 0x2a4   :  { %2802 = vmatmul.f32.gmra.mxu2 %v8935_v49  ;;  %2837 = vmatmul.f32.gmra.mxu3 %v8936_v26  ;;  %v2219_v23 = vld [vmem:[#allocation3 + $0x2f0] sm:$0xff] }
 0x2a5   :  { %3202 = vst [vmem:[#allocation13 + $0x28] sm:$0xff] %v3040_v56  ;;  %3466 = vmatpush.msrb.mxu0 %v4754_v32  ;;  %v2235_v56 = vld [vmem:[#allocation3 + $0x370] sm:$0xff]  ;;  %3093 = vmatpush.msrb.mxu3 %v2371_v37 }
 0x2a6   :  { %3502 = vmatpush.msrb.mxu1 %v4757_v16  ;;  %3059 = vmatpush.msrb.mxu2 %v2235_v56  ;;  %v8153_v14 = vld [vmem:[#allocation3 + $0x2b0] sm:$0xff] }
 0x2a7   :  { %3467 = vmatpush.msrb.mxu0 %v4756_v5  ;;  %3094 = vmatpush.msrb.mxu3 %v2363_v29  ;;  %v2203_v37 = vld [vmem:[#allocation3 + $0x270] sm:$0xff]  ;;  %v4761_v5 = vld [vmem:[#allocation3 + $0x458] sm:$0xff] }
 0x2a8   :  { %3060 = vmatpush.msrb.mxu2 %v2227_v45  ;;  %3503 = vmatpush.msrb.mxu1 %v4759_v51  ;;  %v2331_v56 = vld [vmem:[#allocation3 + $0x670] sm:$0xff] }
 0x2a9   :  { %3095 = vmatpush.msrb.mxu3 %v2355_v62  ;;  %v2195_v29 = vld [vmem:[#allocation3 + $0x230] sm:$0xff]  ;;  %v4760_v62 = vld [vmem:[#allocation3 + $0x58] sm:$0xff] }
 0x2aa   :  { %3061 = vmatpush.msrb.mxu2 %v2219_v23  ;;  %v2323_v45 = vld [vmem:[#allocation3 + $0x630] sm:$0xff]  ;;  %3504 = vmatpush.msrb.mxu1 %v4761_v5 }
 0x2ab   :  { %v3007_v57 = vpop.f32.mrf.mxu0  ;;  %v3042_v24 = vpop.f32.mrf.mxu1  ;;  %3096 = vmatpush.msrb.mxu3 %v2347_v25  ;;  %v2187_v16 = vld [vmem:[#allocation3 + $0x1f0] sm:$0xff]  ;;  %v4762_v25 = vld [vmem:[#allocation3 + $0x18] sm:$0xff] }
 0x2ac   :  { %2805 = vmatmul.f32.gmra.mxu2 %v8940_v17  ;;  %2840 = vmatmul.f32.gmra.mxu3 %v8941_v40  ;;  %v3043_v19 = vadd.f32 %v3042_v24, %v3007_v57  ;;  %v2171_v5 = vld [vmem:[#allocation3 + $0x170] sm:$0xff] }
 0x2ad   :  { %3062 = vmatpush.msrb.mxu2 %v8153_v14  ;;  %3097 = vmatpush.msrb.mxu3 %v8155_v60 }
 0x2ae   :  { %3210 = vst [vmem:[#allocation13 + $0xe8] sm:$0xff] %v3043_v19  ;;  %v4758_v19 = vld [vmem:[#allocation3 + $0x98] sm:$0xff] }
 0x2af   :  { %v8141_v30 = vpop.f32.mrf.mxu2  ;;  %v8143_v39 = vpop.f32.mrf.mxu3  ;;  %3468 = vmatpush.msrb.mxu0 %v4758_v19  ;;  %3063 = vmatpush.msrb.mxu2 %v2203_v37  ;;  %v4763_v19 = vld [vmem:[#allocation3 + $0x418] sm:$0xff]  ;;  %v4764_v37 = vld [vmem:[#allocation3 + $0x3e8] sm:$0xff] }
 0x2b0   :  { %3331 = vmatmul.f32.vlgmr.msra.gmra.mxu0 %v8141_v30  ;;  %3366 = vmatmul.f32.vlgmr.msra.gmra.mxu1 %v8143_v39 }
 0x2b1   :  { %3469 = vmatpush.msrb.mxu0 %v4760_v62  ;;  %3098 = vmatpush.msrb.mxu3 %v2331_v56  ;;  %v4765_v56 = vld [vmem:[#allocation3 + $0x7e8] sm:$0xff] }
 0x2b2   :  { %3064 = vmatpush.msrb.mxu2 %v2195_v29  ;;  %3505 = vmatpush.msrb.mxu1 %v4763_v19  ;;  %v2179_v29 = vld [vmem:[#allocation3 + $0x1b0] sm:$0xff]  ;;  %v4767_v19 = vld [vmem:[#allocation3 + $0x7a8] sm:$0xff] }
 0x2b3   :  { %v3010_v44 = vpop.f32.mrf.mxu0  ;;  %v3045_v57 = vpop.f32.mrf.mxu1  ;;  %3099 = vmatpush.msrb.mxu3 %v2323_v45  ;;  %3470 = vmatpush.msrb.mxu0 %v4762_v25  ;;  %v2307_v45 = vld [vmem:[#allocation3 + $0x5b0] sm:$0xff]  ;;  %v4766_v25 = vld [vmem:[#allocation3 + $0x3a8] sm:$0xff] }
 0x2b4   :  { %2808 = vmatmul.f32.gmra.mxu2 %v8943_v15  ;;  %2843 = vmatmul.f32.gmra.mxu3 %v8944_v47  ;;  %v3046_v24 = vadd.f32 %v3045_v57, %v3010_v44  ;;  %v2315_v44 = vld [vmem:[#allocation3 + $0x5f0] sm:$0xff] }
 0x2b5   :  { %3065 = vmatpush.msrb.mxu2 %v2187_v16  ;;  %3100 = vmatpush.msrb.mxu3 %v2315_v44  ;;  %v2163_v16 = vld [vmem:[#allocation3 + $0x130] sm:$0xff] }
 0x2b6   :  { %3218 = vst [vmem:[#allocation13 + $0x1a8] sm:$0xff] %v3046_v24  ;;  %3595 = vmatpush.msra.mxu0 %v4764_v37  ;;  %3630 = vmatpush.msra.mxu1 %v4765_v56  ;;  %v2291_v44 = vld [vmem:[#allocation3 + $0x530] sm:$0xff] }
 0x2b7   :  { %v8149_v13 = vpop.f32.mrf.mxu2  ;;  %v8151_v32 = vpop.f32.mrf.mxu3  ;;  %3066 = vmatpush.msrb.mxu2 %v2179_v29  ;;  %3101 = vmatpush.msrb.mxu3 %v2307_v45 }
 0x2b8   :  { %3334 = vmatmul.f32.gmra.mxu0 %v8149_v13  ;;  %3369 = vmatmul.f32.gmra.mxu1 %v8151_v32 }
 0x2b9   :  { %3067 = vmatpush.msrb.mxu2 %v2171_v5  ;;  %3596 = vmatpush.msra.mxu0 %v4766_v25  ;;  %v2147_v5 = vld [vmem:[#allocation3 + $0xb0] sm:$0xff]  ;;  %v4768_v25 = vld [vmem:[#allocation3 + $0x368] sm:$0xff] }
 0x2ba   :  { %3631 = vmatpush.msra.mxu1 %v4767_v19  ;;  %v4769_v19 = vld [vmem:[#allocation3 + $0x768] sm:$0xff] }
 0x2bb   :  { %v3013_v57 = vpop.f32.mrf.mxu0  ;;  %v3048_v24 = vpop.f32.mrf.mxu1  ;;  %3068 = vmatpush.msrb.mxu2 %v2163_v16  ;;  %3597 = vmatpush.msra.mxu0 %v4768_v25  ;;  %v2267_v16 = vld [vmem:[#allocation3 + $0x470] sm:$0xff] }
 0x2bc   :  { %2933 = vmatmul.f32.vlgmr.msra.gmra.mxu2 %v7399_v33  ;;  %2968 = vmatmul.f32.vlgmr.msra.gmra.mxu3 %v8946_v59  ;;  %v3049_v23 = vadd.f32 %v3048_v24, %v3013_v57  ;;  %v2299_v57 = vld [vmem:[#allocation3 + $0x570] sm:$0xff] }
 0x2bd   :  { %3102 = vmatpush.msrb.mxu3 %v2299_v57  ;;  %v2155_v24 = vld [vmem:[#allocation3 + $0xf0] sm:$0xff]  ;;  %3632 = vmatpush.msra.mxu1 %v4769_v19 }
 0x2be   :  { %3226 = vst [vmem:[#allocation13 + $0x268] sm:$0xff] %v3049_v23  ;;  %v2283_v23 = vld [vmem:[#allocation3 + $0x4f0] sm:$0xff]  ;;  %3069 = vmatpush.msrb.mxu2 %v2155_v24 }
 0x2bf   :  { %v8163_v51 = vpop.f32.mrf.mxu2  ;;  %v8165_v62 = vpop.f32.mrf.mxu3  ;;  %3103 = vmatpush.msrb.mxu3 %v2291_v44  ;;  %v2275_v57 = vld [vmem:[#allocation3 + $0x4b0] sm:$0xff]  ;;  %3633 = vmatpush.msra.mxu1 %v4771_v27 }
 0x2c0   :  { %3337 = vmatmul.f32.gmra.mxu0 %v8163_v51  ;;  %3372 = vmatmul.f32.gmra.mxu1 %v8165_v62  ;;  %v2131_v44 = vld [vmem:[#allocation3 + $0x30] sm:$0xff] }
 0x2c1   :  { %3104 = vmatpush.msrb.mxu3 %v2283_v23  ;;  %3070 = vmatpush.msrb.mxu2 %v2147_v5  ;;  %v2259_v24 = vld [vmem:[#allocation3 + $0x430] sm:$0xff]  ;;  %v4770_v23 = vld [vmem:[#allocation3 + $0x328] sm:$0xff] }
 0x2c2   :  { %3598 = vmatpush.msra.mxu0 %v4770_v23  ;;  %v4779_v23 = vld [vmem:[#allocation3 + $0x668] sm:$0xff] }
 0x2c3   :  { %v3016_v29 = vpop.f32.mrf.mxu0  ;;  %v3051_v45 = vpop.f32.mrf.mxu1  ;;  %3105 = vmatpush.msrb.mxu3 %v2275_v57  ;;  %3071 = vmatpush.msrb.mxu2 %v2139_v6  ;;  %v4775_v6 = vld [vmem:[#allocation3 + $0x7c0] sm:$0xff]  ;;  %v4776_v57 = vld [vmem:[#allocation3 + $0x2a8] sm:$0xff] }
 0x2c4   :  { %2936 = vmatmul.f32.gmra.mxu2 %v8949_v0  ;;  %2971 = vmatmul.f32.gmra.mxu3 %v8950_v22  ;;  %v3052_v12 = vadd.f32 %v3051_v45, %v3016_v29  ;;  %v4772_v29 = vld [vmem:[#allocation3 + $0x2e8] sm:$0xff] }
 0x2c5   :  { %3106 = vmatpush.msrb.mxu3 %v2267_v16  ;;  %3072 = vmatpush.msrb.mxu2 %v2131_v44  ;;  %v4773_v45 = vld [vmem:[#allocation3 + $0x6e8] sm:$0xff] }
 0x2c6   :  { %3234 = vst [vmem:[#allocation13 + $0x328] sm:$0xff] %v3052_v12  ;;  %3599 = vmatpush.msra.mxu0 %v4772_v29  ;;  %3634 = vmatpush.msra.mxu1 %v4773_v45  ;;  %v4774_v12 = vld [vmem:[#allocation3 + $0x3c0] sm:$0xff]  ;;  %v4777_v16 = vld [vmem:[#allocation3 + $0x6a8] sm:$0xff] }
 0x2c7   :  { %v8171_v37 = vpop.f32.mrf.mxu2  ;;  %v8173_v56 = vpop.f32.mrf.mxu3  ;;  %3107 = vmatpush.msrb.mxu3 %v2259_v24  ;;  %3245 = vmatpush.msra.mxu2 %v4774_v12  ;;  %v4778_v24 = vld [vmem:[#allocation3 + $0x268] sm:$0xff]  ;;  %v4780_v29 = vld [vmem:[#allocation3 + $0x380] sm:$0xff] }
 0x2c8   :  { %3340 = vmatmul.f32.gmra.mxu0 %v8171_v37  ;;  %3375 = vmatmul.f32.gmra.mxu1 %v8173_v56  ;;  %v4781_v45 = vld [vmem:[#allocation3 + $0x780] sm:$0xff] }
 0x2c9   :  { %3280 = vmatpush.msra.mxu3 %v4775_v6  ;;  %3600 = vmatpush.msra.mxu0 %v4776_v57  ;;  %v4782_v57 = vld [vmem:[#allocation3 + $0x228] sm:$0xff] }
 0x2ca   :  { %3635 = vmatpush.msra.mxu1 %v4777_v16  ;;  %3246 = vmatpush.msra.mxu2 %v4780_v29  ;;  %v4783_v16 = vld [vmem:[#allocation3 + $0x628] sm:$0xff] }
 0x2cb   :  { %v3019_v5 = vpop.f32.mrf.mxu0  ;;  %v3054_v27 = vpop.f32.mrf.mxu1  ;;  %3601 = vmatpush.msra.mxu0 %v4778_v24  ;;  %3281 = vmatpush.msra.mxu3 %v4781_v45  ;;  %v4787_v24 = vld [vmem:[#allocation3 + $0x5e8] sm:$0xff]  ;;  %v4788_v45 = vld [vmem:[#allocation3 + $0x300] sm:$0xff] }
 0x2cc   :  { %2939 = vmatmul.f32.gmra.mxu2 %v8926_v36  ;;  %2974 = vmatmul.f32.gmra.mxu3 %v8929_v7  ;;  %v3055_v44 = vadd.f32 %v3054_v27, %v3019_v5  ;;  %v4784_v5 = vld [vmem:[#allocation3 + $0x340] sm:$0xff] }
 0x2cd   :  { %3636 = vmatpush.msra.mxu1 %v4779_v23  ;;  %3602 = vmatpush.msra.mxu0 %v4782_v57  ;;  %v4785_v27 = vld [vmem:[#allocation3 + $0x740] sm:$0xff] }
 0x2ce   :  { %3242 = vst [vmem:[#allocation13 + $0x3e8] sm:$0xff] %v3055_v44  ;;  %3247 = vmatpush.msra.mxu2 %v4784_v5  ;;  %3282 = vmatpush.msra.mxu3 %v4785_v27  ;;  %v4786_v44 = vld [vmem:[#allocation3 + $0x1e8] sm:$0xff]  ;;  %v4792_v27 = vld [vmem:[#allocation3 + $0x2c0] sm:$0xff] }
 0x2cf   :  { %v8179_v25 = vpop.f32.mrf.mxu2  ;;  %v8181_v19 = vpop.f32.mrf.mxu3  ;;  %3637 = vmatpush.msra.mxu1 %v4783_v16  ;;  %3603 = vmatpush.msra.mxu0 %v4786_v44  ;;  %v4790_v16 = vld [vmem:[#allocation3 + $0x1a8] sm:$0xff]  ;;  %v4793_v44 = vld [vmem:[#allocation3 + $0x6c0] sm:$0xff] }
 0x2d0   :  { %3343 = vmatmul.f32.gmra.mxu0 %v8179_v25  ;;  %3378 = vmatmul.f32.gmra.mxu1 %v8181_v19  ;;  %v4791_v5 = vld [vmem:[#allocation3 + $0x5a8] sm:$0xff] }
 0x2d1   :  { %3638 = vmatpush.msra.mxu1 %v4787_v24  ;;  %3248 = vmatpush.msra.mxu2 %v4788_v45  ;;  %v4795_v45 = vld [vmem:[#allocation3 + $0x568] sm:$0xff] }
 0x2d2   :  { %3283 = vmatpush.msra.mxu3 %v4789_v35  ;;  %3604 = vmatpush.msra.mxu0 %v4790_v16  ;;  %v4799_v16 = vld [vmem:[#allocation3 + $0x528] sm:$0xff] }
 0x2d3   :  { %3639 = vmatpush.msra.mxu1 %v4791_v5  ;;  %3249 = vmatpush.msra.mxu2 %v4792_v27 }
 0x2d4   :  { %2942 = vmatmul.f32.gmra.mxu2 %v8935_v49  ;;  %2977 = vmatmul.f32.gmra.mxu3 %v8936_v26 }
 0x2d5   :  { %3284 = vmatpush.msra.mxu3 %v4793_v44  ;;  %3605 = vmatpush.msra.mxu0 %v4794_v63  ;;  %v4800_v44 = vld [vmem:[#allocation3 + $0x240] sm:$0xff] }
 0x2d6   :  { %v3144_v23 = vpop.f32.mrf.mxu0  ;;  %v3179_v29 = vpop.f32.mrf.mxu1  ;;  %3640 = vmatpush.msra.mxu1 %v4795_v45  ;;  %v4801_v63 = vld [vmem:[#allocation3 + $0x640] sm:$0xff]  ;;  %v4803_v45 = vld [vmem:[#allocation3 + $0x4e8] sm:$0xff] }
 0x2d7   :  { %v8187_v12 = vpop.f32.mrf.mxu2  ;;  %v8189_v6 = vpop.f32.mrf.mxu3  ;;  %v3180_v57 = vadd.f32 %v3179_v29, %v3144_v23  ;;  %v4796_v23 = vld [vmem:[#allocation3 + $0x280] sm:$0xff] }
 0x2d8   :  { %3346 = vmatmul.f32.gmra.mxu0 %v8187_v12  ;;  %3381 = vmatmul.f32.gmra.mxu1 %v8189_v6  ;;  %v4797_v29 = vld [vmem:[#allocation3 + $0x680] sm:$0xff] }
 0x2d9   :  { %3204 = vst [vmem:[#allocation13 + $0x38] sm:$0xff] %v3180_v57  ;;  %3250 = vmatpush.msra.mxu2 %v4796_v23  ;;  %3285 = vmatpush.msra.mxu3 %v4797_v29  ;;  %v4798_v57 = vld [vmem:[#allocation3 + $0x128] sm:$0xff]  ;;  %v4805_v23 = vld [vmem:[#allocation3 + $0x600] sm:$0xff] }
 0x2da   :  { %3606 = vmatpush.msra.mxu0 %v4798_v57  ;;  %3641 = vmatpush.msra.mxu1 %v4799_v16  ;;  %v4806_v16 = vld [vmem:[#allocation3 + $0xa8] sm:$0xff] }
 0x2db   :  { %3251 = vmatpush.msra.mxu2 %v4800_v44  ;;  %3286 = vmatpush.msra.mxu3 %v4801_v63  ;;  %v4807_v44 = vld [vmem:[#allocation3 + $0x4a8] sm:$0xff] }
 0x2dc   :  { %2945 = vmatmul.f32.gmra.mxu2 %v8940_v17  ;;  %2980 = vmatmul.f32.gmra.mxu3 %v8941_v40 }
 0x2dd   :  { %3642 = vmatpush.msra.mxu1 %v4803_v45  ;;  %3287 = vmatpush.msra.mxu3 %v4805_v23  ;;  %v4812_v23 = vld [vmem:[#allocation3 + $0x180] sm:$0xff] }
 0x2de   :  { %v3147_v5 = vpop.f32.mrf.mxu0  ;;  %v3182_v27 = vpop.f32.mrf.mxu1 }
 0x2df   :  { %v2654_v24 = vpop.f32.mrf.mxu2  ;;  %v2689_v34 = vpop.f32.mrf.mxu3  ;;  %3643 = vmatpush.msra.mxu1 %v4807_v44  ;;  %v4815_v44 = vld [vmem:[#allocation3 + $0x428] sm:$0xff] }
 0x2e0   :  { %v2690_v35 = vadd.f32 %v2689_v34, %v2654_v24  ;;  %3471 = vmatmul.f32.vlgmr.msrb.gmra.mxu0 %v8141_v30  ;;  %3506 = vmatmul.f32.vlgmr.msrb.gmra.mxu1 %v8143_v39  ;;  %v3183_v34 = vadd.f32 %v3182_v27, %v3147_v5  ;;  %v4802_v24 = vld [vmem:[#allocation3 + $0xe8] sm:$0xff]  ;;  %v4808_v5 = vld [vmem:[#allocation3 + $0x1c0] sm:$0xff] }
 0x2e1   :  { %3607 = vmatpush.msra.mxu0 %v4802_v24  ;;  %v4809_v27 = vld [vmem:[#allocation3 + $0x5c0] sm:$0xff]  ;;  %v4811_v24 = vld [vmem:[#allocation3 + $0x468] sm:$0xff] }
 0x2e2   :  { %3197 = vst [vmem:[#allocation13] sm:$0xff] %v2690_v35  ;;  %v4804_v35 = vld [vmem:[#allocation3 + $0x200] sm:$0xff]  ;;  %3288 = vmatpush.msra.mxu3 %v4809_v27  ;;  %3644 = vmatpush.msra.mxu1 %v4811_v24  ;;  %v4818_v24 = vld [vmem:[#allocation3 + $0x3f8] sm:$0xff] }
 0x2e3   :  { %3212 = vst [vmem:[#allocation13 + $0xf8] sm:$0xff] %v3183_v34  ;;  %3252 = vmatpush.msra.mxu2 %v4804_v35  ;;  %3608 = vmatpush.msra.mxu0 %v4806_v16  ;;  %v4810_v34 = vld [vmem:[#allocation3 + $0x68] sm:$0xff]  ;;  %v4813_v16 = vld [vmem:[#allocation3 + $0x580] sm:$0xff] }
 0x2e4   :  { %2948 = vmatmul.f32.gmra.mxu2 %v8943_v15  ;;  %2983 = vmatmul.f32.gmra.mxu3 %v8944_v47 }
 0x2e5   :  { %3253 = vmatpush.msra.mxu2 %v4808_v5  ;;  %3609 = vmatpush.msra.mxu0 %v4810_v34  ;;  %v4817_v5 = vld [vmem:[#allocation3 + $0x540] sm:$0xff] }
 0x2e6   :  { %3289 = vmatpush.msra.mxu3 %v4813_v16  ;;  %3645 = vmatpush.msra.mxu1 %v4815_v44  ;;  %v4824_v44 = vld [vmem:[#allocation3 + $0xc0] sm:$0xff] }
 0x2e7   :  { %v2657_v29 = vpop.f32.mrf.mxu2  ;;  %v2692_v57 = vpop.f32.mrf.mxu3  ;;  %3254 = vmatpush.msra.mxu2 %v4812_v23  ;;  %v4819_v23 = vld [vmem:[#allocation3 + $0x7f8] sm:$0xff] }
 0x2e8   :  { %v2693_v63 = vadd.f32 %v2692_v57, %v2657_v29  ;;  %3474 = vmatmul.f32.gmra.mxu0 %v8149_v13  ;;  %3509 = vmatmul.f32.gmra.mxu1 %v8151_v32  ;;  %v3150_v45 = vpop.f32.mrf.mxu0  ;;  %v3185_v35 = vpop.f32.mrf.mxu1  ;;  %v4814_v57 = vld [vmem:[#allocation3 + $0x28] sm:$0xff] }
 0x2e9   :  { %v3186_v29 = vadd.f32 %v3185_v35, %v3150_v45  ;;  %3610 = vmatpush.msra.mxu0 %v4814_v57  ;;  %3290 = vmatpush.msra.mxu3 %v4817_v5  ;;  %v4822_v45 = vld [vmem:[#allocation3 + $0x3b8] sm:$0xff] }
 0x2ea   :  { %3205 = vst [vmem:[#allocation13 + $0xc0] sm:$0xff] %v2693_v63  ;;  %v4816_v63 = vld [vmem:[#allocation3 + $0x140] sm:$0xff]  ;;  %3770 = vmatpush.msrb.mxu1 %v4819_v23  ;;  %v4823_v35 = vld [vmem:[#allocation3 + $0x7b8] sm:$0xff] }
 0x2eb   :  { %3220 = vst [vmem:[#allocation13 + $0x1b8] sm:$0xff] %v3186_v29  ;;  %3255 = vmatpush.msra.mxu2 %v4816_v63  ;;  %3735 = vmatpush.msrb.mxu0 %v4818_v24  ;;  %v4825_v63 = vld [vmem:[#allocation3 + $0x4c0] sm:$0xff]  ;;  %v4828_v24 = vld [vmem:[#allocation3 + $0x378] sm:$0xff] }
 0x2ec   :  { %3073 = vmatmul.f32.vlgmr.msrb.gmra.mxu2 %v7399_v33  ;;  %3108 = vmatmul.f32.vlgmr.msrb.gmra.mxu3 %v8946_v59  ;;  %v4820_v33 = vld [vmem:[#allocation3 + $0x100] sm:$0xff]  ;;  %v4829_v23 = vld [vmem:[#allocation3 + $0x778] sm:$0xff] }
 0x2ed   :  { %3256 = vmatpush.msra.mxu2 %v4820_v33  ;;  %v4821_v59 = vld [vmem:[#allocation3 + $0x500] sm:$0xff]  ;;  %3736 = vmatpush.msrb.mxu0 %v4822_v45 }
 0x2ee   :  { %3291 = vmatpush.msra.mxu3 %v4821_v59  ;;  %3771 = vmatpush.msrb.mxu1 %v4823_v35  ;;  %v4830_v59 = vld [vmem:[#allocation3 + $0x40] sm:$0xff] }
 0x2ef   :  { %v2660_v27 = vpop.f32.mrf.mxu2  ;;  %v2695_v34 = vpop.f32.mrf.mxu3  ;;  %3257 = vmatpush.msra.mxu2 %v4824_v44  ;;  %3737 = vmatpush.msrb.mxu0 %v4828_v24  ;;  %v4831_v45 = vld [vmem:[#allocation3 + $0x440] sm:$0xff]  ;;  %v4838_v24 = vld [vmem:[#allocation3 + $0x2f8] sm:$0xff] }
 0x2f0   :  { %v2696_v16 = vadd.f32 %v2695_v34, %v2660_v27  ;;  %3477 = vmatmul.f32.gmra.mxu0 %v8163_v51  ;;  %3512 = vmatmul.f32.gmra.mxu1 %v8165_v62  ;;  %v3153_v29 = vpop.f32.mrf.mxu0  ;;  %v3188_v57 = vpop.f32.mrf.mxu1  ;;  %v4826_v27 = vld [vmem:[#allocation3 + $0x80] sm:$0xff] }
 0x2f1   :  { %3292 = vmatpush.msra.mxu3 %v4825_v63  ;;  %v3189_v5 = vadd.f32 %v3188_v57, %v3153_v29  ;;  %3258 = vmatpush.msra.mxu2 %v4826_v27  ;;  %v4827_v34 = vld [vmem:[#allocation3 + $0x480] sm:$0xff]  ;;  %v4834_v29 = vld [vmem:[#allocation3 + $0x338] sm:$0xff]  ;;  %v4837_v27 = vld [vmem:[#allocation3 + $0x7d0] sm:$0xff] }
 0x2f2   :  { %3213 = vst [vmem:[#allocation13 + $0x180] sm:$0xff] %v2696_v16  ;;  %3772 = vmatpush.msrb.mxu1 %v4829_v23  ;;  %3738 = vmatpush.msrb.mxu0 %v4834_v29  ;;  %v4835_v57 = vld [vmem:[#allocation3 + $0x738] sm:$0xff]  ;;  %v4846_v29 = vld [vmem:[#allocation3 + $0x350] sm:$0xff] }
 0x2f3   :  { %3293 = vmatpush.msra.mxu3 %v4827_v34  ;;  %3228 = vst [vmem:[#allocation13 + $0x278] sm:$0xff] %v3189_v5  ;;  %3259 = vmatpush.msra.mxu2 %v4830_v59  ;;  %v4836_v5 = vld [vmem:[#allocation3 + $0x3d0] sm:$0xff]  ;;  %v4839_v23 = vld [vmem:[#allocation3 + $0x6f8] sm:$0xff] }
 0x2f4   :  { %3076 = vmatmul.f32.gmra.mxu2 %v8949_v0  ;;  %3111 = vmatmul.f32.gmra.mxu3 %v8950_v22  ;;  %v4832_v0 = vld [vmem:[#allocation3] sm:$0xff] }
 0x2f5   :  { %3294 = vmatpush.msra.mxu3 %v4831_v45  ;;  %3260 = vmatpush.msra.mxu2 %v4832_v0  ;;  %v4833_v22 = vld [vmem:[#allocation3 + $0x400] sm:$0xff]  ;;  %v4843_v0 = vld [vmem:[#allocation3 + $0x6b8] sm:$0xff] }
 0x2f6   :  { %3773 = vmatpush.msrb.mxu1 %v4835_v57  ;;  %3739 = vmatpush.msrb.mxu0 %v4838_v24  ;;  %v4847_v57 = vld [vmem:[#allocation3 + $0x750] sm:$0xff]  ;;  %v4850_v24 = vld [vmem:[#allocation3 + $0x1f8] sm:$0xff] }
 0x2f7   :  { %v2663_v16 = vpop.f32.mrf.mxu2  ;;  %v2698_v33 = vpop.f32.mrf.mxu3  ;;  %3295 = vmatpush.msra.mxu3 %v4833_v22  ;;  %3385 = vmatpush.msrb.mxu2 %v4836_v5  ;;  %v4848_v5 = vld [vmem:[#allocation3 + $0x238] sm:$0xff] }
 0x2f8   :  { %v2699_v35 = vadd.f32 %v2698_v33, %v2663_v16  ;;  %3480 = vmatmul.f32.gmra.mxu0 %v8171_v37  ;;  %3515 = vmatmul.f32.gmra.mxu1 %v8173_v56  ;;  %v3156_v44 = vpop.f32.mrf.mxu0  ;;  %v3191_v63 = vpop.f32.mrf.mxu1  ;;  %v4840_v16 = vld [vmem:[#allocation3 + $0x390] sm:$0xff] }
 0x2f9   :  { %3420 = vmatpush.msrb.mxu3 %v4837_v27  ;;  %v3192_v34 = vadd.f32 %v3191_v63, %v3156_v44  ;;  %3774 = vmatpush.msrb.mxu1 %v4839_v23  ;;  %v4841_v33 = vld [vmem:[#allocation3 + $0x790] sm:$0xff]  ;;  %v4849_v27 = vld [vmem:[#allocation3 + $0x638] sm:$0xff] }
 0x2fa   :  { %3221 = vst [vmem:[#allocation13 + $0x240] sm:$0xff] %v2699_v35  ;;  %3386 = vmatpush.msrb.mxu2 %v4840_v16  ;;  %v4842_v35 = vld [vmem:[#allocation3 + $0x2b8] sm:$0xff]  ;;  %v4852_v16 = vld [vmem:[#allocation3 + $0x310] sm:$0xff] }
 0x2fb   :  { %3236 = vst [vmem:[#allocation13 + $0x338] sm:$0xff] %v3192_v34  ;;  %3421 = vmatpush.msrb.mxu3 %v4841_v33  ;;  %3740 = vmatpush.msrb.mxu0 %v4842_v35  ;;  %v4851_v23 = vld [vmem:[#allocation3 + $0x5f8] sm:$0xff]  ;;  %v4853_v33 = vld [vmem:[#allocation3 + $0x710] sm:$0xff] }
 0x2fc   :  { %3079 = vmatmul.f32.gmra.mxu2 %v8926_v36  ;;  %3114 = vmatmul.f32.gmra.mxu3 %v8929_v7  ;;  %v4844_v36 = vld [vmem:[#allocation3 + $0x278] sm:$0xff] }
 0x2fd   :  { %3775 = vmatpush.msrb.mxu1 %v4843_v0  ;;  %3741 = vmatpush.msrb.mxu0 %v4844_v36  ;;  %v4845_v7 = vld [vmem:[#allocation3 + $0x678] sm:$0xff] }
 0x2fe   :  { %3387 = vmatpush.msrb.mxu2 %v4846_v29  ;;  %3422 = vmatpush.msrb.mxu3 %v4847_v57  ;;  %v4854_v35 = vld [vmem:[#allocation3 + $0x1b8] sm:$0xff]  ;;  %v4860_v29 = vld [vmem:[#allocation3 + $0x290] sm:$0xff] }
 0x2ff   :  { %v2666_v59 = vpop.f32.mrf.mxu2  ;;  %v2701_v45 = vpop.f32.mrf.mxu3  ;;  %3776 = vmatpush.msrb.mxu1 %v4845_v7  ;;  %3742 = vmatpush.msrb.mxu0 %v4848_v5  ;;  %v4855_v0 = vld [vmem:[#allocation3 + $0x5b8] sm:$0xff]  ;;  %v4861_v57 = vld [vmem:[#allocation3 + $0x690] sm:$0xff] }
 0x300   :  { %v2702_v22 = vadd.f32 %v2701_v45, %v2666_v59  ;;  %3483 = vmatmul.f32.gmra.mxu0 %v8179_v25  ;;  %3518 = vmatmul.f32.gmra.mxu1 %v8181_v19  ;;  %v3159_v44 = vpop.f32.mrf.mxu0  ;;  %v3194_v63 = vpop.f32.mrf.mxu1  ;;  %v4858_v36 = vld [vmem:[#allocation3 + $0x178] sm:$0xff]  ;;  %v4864_v5 = vld [vmem:[#allocation3 + $0x250] sm:$0xff] }
 0x301   :  { %3777 = vmatpush.msrb.mxu1 %v4849_v27  ;;  %v3195_v34 = vadd.f32 %v3194_v63, %v3159_v44  ;;  %3743 = vmatpush.msrb.mxu0 %v4850_v24  ;;  %v4859_v7 = vld [vmem:[#allocation3 + $0x578] sm:$0xff]  ;;  %v4865_v27 = vld [vmem:[#allocation3 + $0x650] sm:$0xff] }
 0x302   :  { %3229 = vst [vmem:[#allocation13 + $0x300] sm:$0xff] %v2702_v22  ;;  %3388 = vmatpush.msrb.mxu2 %v4852_v16  ;;  %3423 = vmatpush.msrb.mxu3 %v4853_v33  ;;  %v4862_v44 = vld [vmem:[#allocation3 + $0x138] sm:$0xff] }
 0x303   :  { %3778 = vmatpush.msrb.mxu1 %v4851_v23  ;;  %3244 = vst [vmem:[#allocation13 + $0x3f8] sm:$0xff] %v3195_v34  ;;  %3744 = vmatpush.msrb.mxu0 %v4854_v35  ;;  %v4863_v63 = vld [vmem:[#allocation3 + $0x538] sm:$0xff]  ;;  %v4872_v35 = vld [vmem:[#allocation3 + $0x1d0] sm:$0xff] }
 0x304   :  { %3082 = vmatmul.f32.gmra.mxu2 %v8935_v49  ;;  %3117 = vmatmul.f32.gmra.mxu3 %v8936_v26  ;;  %v4856_v49 = vld [vmem:[#allocation3 + $0x2d0] sm:$0xff]  ;;  %v4866_v23 = vld [vmem:[#allocation3 + $0xf8] sm:$0xff] }
 0x305   :  { %3779 = vmatpush.msrb.mxu1 %v4855_v0  ;;  %3389 = vmatpush.msrb.mxu2 %v4856_v49  ;;  %v4857_v26 = vld [vmem:[#allocation3 + $0x6d0] sm:$0xff]  ;;  %v4867_v16 = vld [vmem:[#allocation3 + $0x4f8] sm:$0xff] }
 0x306   :  { %3424 = vmatpush.msrb.mxu3 %v4857_v26  ;;  %3745 = vmatpush.msrb.mxu0 %v4858_v36  ;;  %v4873_v0 = vld [vmem:[#allocation3 + $0x5d0] sm:$0xff]  ;;  %v4875_v49 = vld [vmem:[#allocation3 + $0x478] sm:$0xff] }
 0x307   :  { %v2669_v59 = vpop.f32.mrf.mxu2  ;;  %v2704_v45 = vpop.f32.mrf.mxu3  ;;  %3780 = vmatpush.msrb.mxu1 %v4859_v7  ;;  %3390 = vmatpush.msrb.mxu2 %v4860_v29  ;;  %v4876_v26 = vld [vmem:[#allocation3 + $0x190] sm:$0xff] }
 0x308   :  { %v2705_v22 = vadd.f32 %v2704_v45, %v2669_v59  ;;  %3486 = vmatmul.f32.gmra.mxu0 %v8187_v12  ;;  %3521 = vmatmul.f32.gmra.mxu1 %v8189_v6  ;;  %v4870_v59 = vld [vmem:[#allocation3 + $0xb8] sm:$0xff]  ;;  %v4877_v36 = vld [vmem:[#allocation3 + $0x590] sm:$0xff] }
 0x309   :  { %3425 = vmatpush.msrb.mxu3 %v4861_v57  ;;  %3746 = vmatpush.msrb.mxu0 %v4862_v44  ;;  %v4871_v45 = vld [vmem:[#allocation3 + $0x4b8] sm:$0xff] }
 0x30a   :  { %3237 = vst [vmem:[#allocation13 + $0x3c0] sm:$0xff] %v2705_v22  ;;  %3781 = vmatpush.msrb.mxu1 %v4863_v63  ;;  %3391 = vmatpush.msrb.mxu2 %v4864_v5  ;;  %v4874_v22 = vld [vmem:[#allocation3 + $0x78] sm:$0xff]  ;;  %v4882_v5 = vld [vmem:[#allocation3 + $0x110] sm:$0xff] }
 0x30b   :  { %3426 = vmatpush.msrb.mxu3 %v4865_v27  ;;  %3747 = vmatpush.msrb.mxu0 %v4866_v23  ;;  %v4878_v57 = vld [vmem:[#allocation3 + $0x38] sm:$0xff]  ;;  %v4883_v27 = vld [vmem:[#allocation3 + $0x510] sm:$0xff] }
 0x30c   :  { %3085 = vmatmul.f32.gmra.mxu2 %v8940_v17  ;;  %3120 = vmatmul.f32.gmra.mxu3 %v8941_v40  ;;  %v4868_v17 = vld [vmem:[#allocation3 + $0x210] sm:$0xff]  ;;  %v4879_v44 = vld [vmem:[#allocation3 + $0x438] sm:$0xff] }
 0x30d   :  { %3782 = vmatpush.msrb.mxu1 %v4867_v16  ;;  %3392 = vmatpush.msrb.mxu2 %v4868_v17  ;;  %v4869_v40 = vld [vmem:[#allocation3 + $0x610] sm:$0xff] }
 0x30e   :  { %3427 = vmatpush.msrb.mxu3 %v4869_v40  ;;  %3748 = vmatpush.msrb.mxu0 %v4870_v59  ;;  %v4887_v17 = vld [vmem:[#allocation3 + $0x490] sm:$0xff] }
 0x30f   :  { %v2794_v34 = vpop.f32.mrf.mxu2  ;;  %v2829_v24 = vpop.f32.mrf.mxu3  ;;  %3783 = vmatpush.msrb.mxu1 %v4871_v45  ;;  %3393 = vmatpush.msrb.mxu2 %v4872_v35  ;;  %v4888_v59 = vld [vmem:[#allocation3 + $0x50] sm:$0xff] }
 0x310   :  { %v2830_v33 = vadd.f32 %v2829_v24, %v2794_v34  ;;  %3611 = vmatmul.f32.vlgmr.msra.gmra.mxu0 %v8141_v30  ;;  %3646 = vmatmul.f32.vlgmr.msra.gmra.mxu1 %v8143_v39  ;;  %v4884_v34 = vld [vmem:[#allocation3 + $0xd0] sm:$0xff] }
 0x311   :  { %3428 = vmatpush.msrb.mxu3 %v4873_v0  ;;  %3749 = vmatpush.msrb.mxu0 %v4874_v22  ;;  %v4885_v24 = vld [vmem:[#allocation3 + $0x4d0] sm:$0xff] }
 0x312   :  { %3199 = vst [vmem:[#allocation13 + $0x10] sm:$0xff] %v2830_v33  ;;  %3784 = vmatpush.msrb.mxu1 %v4875_v49  ;;  %3394 = vmatpush.msrb.mxu2 %v4876_v26  ;;  %v4886_v33 = vld [vmem:[#allocation3 + $0x90] sm:$0xff] }
 0x313   :  { %3429 = vmatpush.msrb.mxu3 %v4877_v36  ;;  %3750 = vmatpush.msrb.mxu0 %v4878_v57  ;;  %v4889_v45 = vld [vmem:[#allocation3 + $0x450] sm:$0xff]  ;;  %v2614_v57 = vld [vmem:[#allocation7 + $0x748] sm:$0xff] }
 0x314   :  { %3088 = vmatmul.f32.gmra.mxu2 %v8943_v15  ;;  %3123 = vmatmul.f32.gmra.mxu3 %v8944_v47  ;;  %v4880_v15 = vld [vmem:[#allocation3 + $0x150] sm:$0xff] }
 0x315   :  { %3785 = vmatpush.msrb.mxu1 %v4879_v44  ;;  %3395 = vmatpush.msrb.mxu2 %v4880_v15  ;;  %v4881_v47 = vld [vmem:[#allocation3 + $0x550] sm:$0xff]  ;;  %v2478_v44 = vld [vmem:[#allocation7 + $0x308] sm:$0xff] }
 0x316   :  { %3430 = vmatpush.msrb.mxu3 %v4881_v47  ;;  %v4890_v35 = vld [vmem:[#allocation3 + $0x10] sm:$0xff]  ;;  %v2470_v15 = vld [vmem:[#allocation7 + $0x2c8] sm:$0xff] }
 0x317   :  { %v2797_v7 = vpop.f32.mrf.mxu2  ;;  %v2832_v29 = vpop.f32.mrf.mxu3  ;;  %3396 = vmatpush.msrb.mxu2 %v4882_v5  ;;  %v4891_v0 = vld [vmem:[#allocation3 + $0x410] sm:$0xff]  ;;  %v2590_v47 = vld [vmem:[#allocation7 + $0x688] sm:$0xff] }
 0x318   :  { %v2833_v63 = vadd.f32 %v2832_v29, %v2797_v7  ;;  %3614 = vmatmul.f32.gmra.mxu0 %v8149_v13  ;;  %3649 = vmatmul.f32.gmra.mxu1 %v8151_v32  ;;  %v2486_v29 = vld [vmem:[#allocation7 + $0x348] sm:$0xff] }
 0x319   :  { %3431 = vmatpush.msrb.mxu3 %v4883_v27  ;;  %3397 = vmatpush.msrb.mxu2 %v4884_v34 }
 0x31a   :  { %3207 = vst [vmem:[#allocation13 + $0xd0] sm:$0xff] %v2833_v63  ;;  %v2606_v63 = vld [vmem:[#allocation7 + $0x708] sm:$0xff] }
 0x31b   :  { %3432 = vmatpush.msrb.mxu3 %v4885_v24  ;;  %3398 = vmatpush.msrb.mxu2 %v4886_v33  ;;  %v2446_v33 = vld [vmem:[#allocation7 + $0x208] sm:$0xff] }
 0x31c   :  { %3261 = vmatmul.f32.vlgmr.msra.gmra.mxu2 %v8141_v30  ;;  %3296 = vmatmul.f32.vlgmr.msra.gmra.mxu3 %v8143_v39 }
 0x31d   :  { %3433 = vmatpush.msrb.mxu3 %v4887_v17  ;;  %3399 = vmatpush.msrb.mxu2 %v4888_v59  ;;  %v2574_v17 = vld [vmem:[#allocation7 + $0x608] sm:$0xff] }
 0x31e   :  { %v2566_v59 = vld [vmem:[#allocation7 + $0x5c8] sm:$0xff] }
 0x31f   :  { %v2800_v23 = vpop.f32.mrf.mxu2  ;;  %v2835_v16 = vpop.f32.mrf.mxu3  ;;  %3434 = vmatpush.msrb.mxu3 %v4889_v45  ;;  %3400 = vmatpush.msrb.mxu2 %v4890_v35  ;;  %v2430_v45 = vld [vmem:[#allocation7 + $0x188] sm:$0xff] }
 0x320   :  { %v2836_v40 = vadd.f32 %v2835_v16, %v2800_v23  ;;  %3617 = vmatmul.f32.gmra.mxu0 %v8163_v51  ;;  %3652 = vmatmul.f32.gmra.mxu1 %v8165_v62  ;;  %v2454_v23 = vld [vmem:[#allocation7 + $0x248] sm:$0xff] }
 0x321   :  { %3435 = vmatpush.msrb.mxu3 %v4891_v0  ;;  %3525 = vmatpush.msra.mxu2 %v8065_v41  ;;  %v2582_v16 = vld [vmem:[#allocation7 + $0x648] sm:$0xff] }
 0x322   :  { %3215 = vst [vmem:[#allocation13 + $0x190] sm:$0xff] %v2836_v40  ;;  %v4892_v40 = vld [vmem:[#allocation3 + $0x160] sm:$0xff]  ;;  %v2558_v35 = vld [vmem:[#allocation7 + $0x588] sm:$0xff] }
 0x323   :  { %3560 = vmatpush.msra.mxu3 %v8067_v9  ;;  %3526 = vmatpush.msra.mxu2 %v8069_v11 }
 0x324   :  { %3264 = vmatmul.f32.gmra.mxu2 %v8149_v13  ;;  %3299 = vmatmul.f32.gmra.mxu3 %v8151_v32 }
 0x325   :  { %3561 = vmatpush.msra.mxu3 %v8073_v20  ;;  %3527 = vmatpush.msra.mxu2 %v8077_v4 }
 0x327   :  { %v2803_v22 = vpop.f32.mrf.mxu2  ;;  %v2838_v49 = vpop.f32.mrf.mxu3  ;;  %3562 = vmatpush.msra.mxu3 %v8079_v55  ;;  %3528 = vmatpush.msra.mxu2 %v8083_v8  ;;  %v2502_v8 = vld [vmem:[#allocation7 + $0x3c8] sm:$0xff] }
 0x328   :  { %v2839_v26 = vadd.f32 %v2838_v49, %v2803_v22  ;;  %3620 = vmatmul.f32.gmra.mxu0 %v8171_v37  ;;  %3655 = vmatmul.f32.gmra.mxu1 %v8173_v56 }
 0x329   :  { %3563 = vmatpush.msra.mxu3 %v8085_v58  ;;  %3529 = vmatpush.msra.mxu2 %v8093_v46  ;;  %v2630_v58 = vld [vmem:[#allocation7 + $0x7c8] sm:$0xff] }
 0x32a   :  { %3223 = vst [vmem:[#allocation13 + $0x250] sm:$0xff] %v2839_v26  ;;  %v2494_v46 = vld [vmem:[#allocation7 + $0x388] sm:$0xff]  ;;  %3923 = vmatpush.msra.mxu0 %v2502_v8  ;;  %3958 = vmatpush.msra.mxu1 %v2630_v58  ;;  %v4894_v26 = vld [vmem:[#allocation3 + $0x120] sm:$0xff] }
 0x32b   :  { %3564 = vmatpush.msra.mxu3 %v8095_v50  ;;  %3530 = vmatpush.msra.mxu2 %v8097_v42  ;;  %v2622_v50 = vld [vmem:[#allocation7 + $0x788] sm:$0xff] }
 0x32c   :  { %3267 = vmatmul.f32.gmra.mxu2 %v8163_v51  ;;  %3302 = vmatmul.f32.gmra.mxu3 %v8165_v62  ;;  %v2414_v8 = vld [vmem:[#allocation7 + $0x108] sm:$0xff] }
 0x32d   :  { %v3332_v41 = vpop.f32.mrf.mxu0  ;;  %v3367_v9 = vpop.f32.mrf.mxu1  ;;  %3565 = vmatpush.msra.mxu3 %v8101_v43  ;;  %3531 = vmatpush.msra.mxu2 %v8105_v54  ;;  %v2542_v58 = vld [vmem:[#allocation7 + $0x508] sm:$0xff] }
 0x32e   :  { %v3368_v11 = vadd.f32 %v3367_v9, %v3332_v41  ;;  %3924 = vmatpush.msra.mxu0 %v2494_v46  ;;  %3959 = vmatpush.msra.mxu1 %v2622_v50  ;;  %v4895_v41 = vld [vmem:[#allocation3 + $0x520] sm:$0xff]  ;;  %v2406_v46 = vld [vmem:[#allocation7 + $0xc8] sm:$0xff] }
 0x32f   :  { %v2806_v20 = vpop.f32.mrf.mxu2  ;;  %v2841_v4 = vpop.f32.mrf.mxu3  ;;  %3566 = vmatpush.msra.mxu3 %v8107_v1  ;;  %3532 = vmatpush.msra.mxu2 %v8111_v52  ;;  %v2598_v52 = vld [vmem:[#allocation7 + $0x6c8] sm:$0xff]  ;;  %v4896_v50 = vld [vmem:[#allocation3 + $0xe0] sm:$0xff] }
 0x330   :  { %3806 = vst [vmem:[#allocation13 + $0x48] sm:$0xff] %v3368_v11  ;;  %v2842_v55 = vadd.f32 %v2841_v4, %v2806_v20  ;;  %3623 = vmatmul.f32.gmra.mxu0 %v8179_v25  ;;  %3658 = vmatmul.f32.gmra.mxu1 %v8181_v19  ;;  %v2422_v4 = vld [vmem:[#allocation7 + $0x148] sm:$0xff] }
 0x331   :  { %3567 = vmatpush.msra.mxu3 %v8113_v18  ;;  %3925 = vmatpush.msra.mxu0 %v2486_v29  ;;  %v2462_v18 = vld [vmem:[#allocation7 + $0x288] sm:$0xff] }
 0x332   :  { %3231 = vst [vmem:[#allocation13 + $0x310] sm:$0xff] %v2842_v55  ;;  %3960 = vmatpush.msra.mxu1 %v2614_v57  ;;  %3533 = vmatpush.msra.mxu2 %v8121_v53  ;;  %v2550_v55 = vld [vmem:[#allocation7 + $0x548] sm:$0xff]  ;;  %v4898_v57 = vld [vmem:[#allocation3 + $0xa0] sm:$0xff] }
 0x333   :  { %3568 = vmatpush.msra.mxu3 %v8123_v21  ;;  %3926 = vmatpush.msra.mxu0 %v2478_v44  ;;  %v4899_v44 = vld [vmem:[#allocation3 + $0x4a0] sm:$0xff] }
 0x334   :  { %3270 = vmatmul.f32.gmra.mxu2 %v8171_v37  ;;  %3305 = vmatmul.f32.gmra.mxu3 %v8173_v56 }
 0x335   :  { %v3335_v42 = vpop.f32.mrf.mxu0  ;;  %v3370_v43 = vpop.f32.mrf.mxu1  ;;  %3961 = vmatpush.msra.mxu1 %v2606_v63  ;;  %3927 = vmatpush.msra.mxu0 %v2470_v15 }
 0x336   :  { %v3371_v36 = vadd.f32 %v3370_v43, %v3335_v42  ;;  %3534 = vmatpush.msra.mxu2 %v8127_v2  ;;  %3569 = vmatpush.msra.mxu3 %v8129_v10  ;;  %v2438_v2 = vld [vmem:[#allocation7 + $0x1c8] sm:$0xff]  ;;  %v4893_v10 = vld [vmem:[#allocation3 + $0x560] sm:$0xff] }
 0x337   :  { %v2809_v54 = vpop.f32.mrf.mxu2  ;;  %v2844_v1 = vpop.f32.mrf.mxu3  ;;  %3962 = vmatpush.msra.mxu1 %v2598_v52  ;;  %3928 = vmatpush.msra.mxu0 %v2462_v18  ;;  %v4897_v42 = vld [vmem:[#allocation3 + $0x4e0] sm:$0xff]  ;;  %v2534_v43 = vld [vmem:[#allocation7 + $0x4c8] sm:$0xff] }
 0x338   :  { %3814 = vst [vmem:[#allocation13 + $0x108] sm:$0xff] %v3371_v36  ;;  %v2845_v7 = vadd.f32 %v2844_v1, %v2809_v54  ;;  %3626 = vmatmul.f32.gmra.mxu0 %v8187_v12  ;;  %3661 = vmatmul.f32.gmra.mxu1 %v8189_v6  ;;  %v2398_v36 = vld [vmem:[#allocation7 + $0x88] sm:$0xff] }
 0x339   :  { %3963 = vmatpush.msra.mxu1 %v2590_v47  ;;  %3929 = vmatpush.msra.mxu0 %v2454_v23  ;;  %v2526_v54 = vld [vmem:[#allocation7 + $0x488] sm:$0xff]  ;;  %v4902_v23 = vld [vmem:[#allocation3 + $0x20] sm:$0xff] }
 0x33a   :  { %3239 = vst [vmem:[#allocation13 + $0x3d0] sm:$0xff] %v2845_v7  ;;  %3535 = vmatpush.msra.mxu2 %v4892_v40  ;;  %3570 = vmatpush.msra.mxu3 %v4893_v10  ;;  %v2390_v18 = vld [vmem:[#allocation7 + $0x48] sm:$0xff] }
 0x33b   :  { %3964 = vmatpush.msra.mxu1 %v2582_v16  ;;  %3930 = vmatpush.msra.mxu0 %v2446_v33  ;;  %v2518_v47 = vld [vmem:[#allocation7 + $0x448] sm:$0xff]  ;;  %v4903_v16 = vld [vmem:[#allocation3 + $0x420] sm:$0xff] }
 0x33c   :  { %3273 = vmatmul.f32.gmra.mxu2 %v8179_v25  ;;  %3308 = vmatmul.f32.gmra.mxu3 %v8181_v19 }
 0x33d   :  { %v3338_v5 = vpop.f32.mrf.mxu0  ;;  %v3373_v27 = vpop.f32.mrf.mxu1  ;;  %3965 = vmatpush.msra.mxu1 %v2574_v17  ;;  %3931 = vmatpush.msra.mxu0 %v2438_v2  ;;  %v4904_v17 = vld [vmem:[#allocation3 + $0x3f0] sm:$0xff] }
 0x33e   :  { %v3374_v34 = vadd.f32 %v3373_v27, %v3338_v5  ;;  %3536 = vmatpush.msra.mxu2 %v4894_v26  ;;  %3571 = vmatpush.msra.mxu3 %v4895_v41  ;;  %v2382_v5 = vld [vmem:[#allocation7 + $0x8] sm:$0xff]  ;;  %v4905_v2 = vld [vmem:[#allocation3 + $0x7f0] sm:$0xff] }
 0x33f   :  { %v2934_v53 = vpop.f32.mrf.mxu2  ;;  %v2969_v21 = vpop.f32.mrf.mxu3  ;;  %3966 = vmatpush.msra.mxu1 %v2566_v59  ;;  %3932 = vmatpush.msra.mxu0 %v2430_v45  ;;  %v2510_v27 = vld [vmem:[#allocation7 + $0x408] sm:$0xff]  ;;  %v4906_v45 = vld [vmem:[#allocation3 + $0x3b0] sm:$0xff] }
 0x340   :  { %3822 = vst [vmem:[#allocation13 + $0x1c8] sm:$0xff] %v3374_v34  ;;  %v2970_v24 = vadd.f32 %v2969_v21, %v2934_v53  ;;  %3751 = vmatmul.f32.vlgmr.msrb.gmra.mxu0 %v8141_v30  ;;  %3786 = vmatmul.f32.vlgmr.msrb.gmra.mxu1 %v8143_v39  ;;  %v4900_v34 = vld [vmem:[#allocation3 + $0x60] sm:$0xff]  ;;  %v4910_v41 = vld [vmem:[#allocation3 + $0x330] sm:$0xff] }
 0x341   :  { %3967 = vmatpush.msra.mxu1 %v2558_v35  ;;  %3933 = vmatpush.msra.mxu0 %v2422_v4  ;;  %v4901_v53 = vld [vmem:[#allocation3 + $0x460] sm:$0xff]  ;;  %v4907_v35 = vld [vmem:[#allocation3 + $0x7b0] sm:$0xff] }
 0x342   :  { %3201 = vst [vmem:[#allocation13 + $0x20] sm:$0xff] %v2970_v24  ;;  %3537 = vmatpush.msra.mxu2 %v4896_v50  ;;  %3572 = vmatpush.msra.mxu3 %v4897_v42  ;;  %v2632_v50 = vld [vmem:[#allocation7 + $0x7d8] sm:$0xff] }
 0x343   :  { %3968 = vmatpush.msra.mxu1 %v2550_v55  ;;  %3934 = vmatpush.msra.mxu0 %v2414_v8  ;;  %v4912_v55 = vld [vmem:[#allocation3 + $0x2f0] sm:$0xff]  ;;  %v2496_v42 = vld [vmem:[#allocation7 + $0x398] sm:$0xff] }
 0x344   :  { %3276 = vmatmul.f32.gmra.mxu2 %v8187_v12  ;;  %3311 = vmatmul.f32.gmra.mxu3 %v8189_v6  ;;  %v4913_v8 = vld [vmem:[#allocation3 + $0x6f0] sm:$0xff] }
 0x345   :  { %v3341_v0 = vpop.f32.mrf.mxu0  ;;  %v3376_v22 = vpop.f32.mrf.mxu1  ;;  %3969 = vmatpush.msra.mxu1 %v2542_v58  ;;  %3935 = vmatpush.msra.mxu0 %v2406_v46  ;;  %v2504_v46 = vld [vmem:[#allocation7 + $0x3d8] sm:$0xff] }
 0x346   :  { %v3377_v49 = vadd.f32 %v3376_v22, %v3341_v0  ;;  %3538 = vmatpush.msra.mxu2 %v4898_v57  ;;  %3573 = vmatpush.msra.mxu3 %v4899_v44  ;;  %v4908_v0 = vld [vmem:[#allocation3 + $0x370] sm:$0xff]  ;;  %v2488_v44 = vld [vmem:[#allocation7 + $0x358] sm:$0xff] }
 0x347   :  { %v2937_v9 = vpop.f32.mrf.mxu2  ;;  %v2972_v11 = vpop.f32.mrf.mxu3  ;;  %3970 = vmatpush.msra.mxu1 %v2534_v43  ;;  %3936 = vmatpush.msra.mxu0 %v2398_v36  ;;  %v4909_v22 = vld [vmem:[#allocation3 + $0x770] sm:$0xff]  ;;  %v2624_v43 = vld [vmem:[#allocation7 + $0x798] sm:$0xff] }
 0x348   :  { %3830 = vst [vmem:[#allocation13 + $0x288] sm:$0xff] %v3377_v49  ;;  %v2973_v20 = vadd.f32 %v2972_v11, %v2937_v9  ;;  %3754 = vmatmul.f32.gmra.mxu0 %v8149_v13  ;;  %3789 = vmatmul.f32.gmra.mxu1 %v8151_v32  ;;  %v4911_v9 = vld [vmem:[#allocation3 + $0x730] sm:$0xff] }
 0x349   :  { %3971 = vmatpush.msra.mxu1 %v2526_v54  ;;  %3937 = vmatpush.msra.mxu0 %v2390_v18  ;;  %v2472_v18 = vld [vmem:[#allocation7 + $0x2d8] sm:$0xff] }
 0x34a   :  { %3209 = vst [vmem:[#allocation13 + $0xe0] sm:$0xff] %v2973_v20  ;;  %3539 = vmatpush.msra.mxu2 %v4900_v34  ;;  %3574 = vmatpush.msra.mxu3 %v4901_v53  ;;  %v2464_v34 = vld [vmem:[#allocation7 + $0x298] sm:$0xff] }
 0x34b   :  { %3972 = vmatpush.msra.mxu1 %v2518_v47  ;;  %3938 = vmatpush.msra.mxu0 %v2382_v5  ;;  %v4916_v47 = vld [vmem:[#allocation3 + $0x230] sm:$0xff]  ;;  %v2592_v53 = vld [vmem:[#allocation7 + $0x698] sm:$0xff] }
 0x34c   :  { %3401 = vmatmul.f32.vlgmr.msrb.gmra.mxu2 %v8141_v30  ;;  %3436 = vmatmul.f32.vlgmr.msrb.gmra.mxu3 %v8143_v39  ;;  %v4917_v5 = vld [vmem:[#allocation3 + $0x630] sm:$0xff] }
 0x34d   :  { %v3344_v1 = vpop.f32.mrf.mxu0  ;;  %v3379_v7 = vpop.f32.mrf.mxu1  ;;  %3973 = vmatpush.msra.mxu1 %v2510_v27  ;;  %3540 = vmatpush.msra.mxu2 %v4902_v23  ;;  %v2600_v27 = vld [vmem:[#allocation7 + $0x6d8] sm:$0xff] }
 0x34e   :  { %v3380_v29 = vadd.f32 %v3379_v7, %v3344_v1  ;;  %3575 = vmatpush.msra.mxu3 %v4903_v16  ;;  %4063 = vmatpush.msrb.mxu0 %v2504_v46  ;;  %v4914_v7 = vld [vmem:[#allocation3 + $0x270] sm:$0xff] }
 0x34f   :  { %v2940_v63 = vpop.f32.mrf.mxu2  ;;  %v2975_v15 = vpop.f32.mrf.mxu3  ;;  %3665 = vmatpush.msrb.mxu2 %v4904_v17  ;;  %4098 = vmatpush.msrb.mxu1 %v2632_v50  ;;  %v4918_v16 = vld [vmem:[#allocation3 + $0x1f0] sm:$0xff] }
 0x350   :  { %3838 = vst [vmem:[#allocation13 + $0x348] sm:$0xff] %v3380_v29  ;;  %v2976_v52 = vadd.f32 %v2975_v15, %v2940_v63  ;;  %3757 = vmatmul.f32.gmra.mxu0 %v8163_v51  ;;  %3792 = vmatmul.f32.gmra.mxu1 %v8165_v62  ;;  %v2616_v63 = vld [vmem:[#allocation7 + $0x758] sm:$0xff] }
 0x351   :  { %3700 = vmatpush.msrb.mxu3 %v4905_v2  ;;  %3666 = vmatpush.msrb.mxu2 %v4906_v45  ;;  %v2480_v15 = vld [vmem:[#allocation7 + $0x318] sm:$0xff] }
 0x352   :  { %3217 = vst [vmem:[#allocation13 + $0x1a0] sm:$0xff] %v2976_v52  ;;  %4064 = vmatpush.msrb.mxu0 %v2496_v42  ;;  %4099 = vmatpush.msrb.mxu1 %v2624_v43  ;;  %v2608_v52 = vld [vmem:[#allocation7 + $0x718] sm:$0xff] }
 0x353   :  { %3701 = vmatpush.msrb.mxu3 %v4907_v35  ;;  %3667 = vmatpush.msrb.mxu2 %v4908_v0  ;;  %v2448_v45 = vld [vmem:[#allocation7 + $0x218] sm:$0xff] }
 0x354   :  { %3404 = vmatmul.f32.gmra.mxu2 %v8149_v13  ;;  %3439 = vmatmul.f32.gmra.mxu3 %v8151_v32  ;;  %v2576_v35 = vld [vmem:[#allocation7 + $0x618] sm:$0xff] }
 0x355   :  { %v3347_v21 = vpop.f32.mrf.mxu0  ;;  %v3382_v24 = vpop.f32.mrf.mxu1  ;;  %3702 = vmatpush.msrb.mxu3 %v4909_v22  ;;  %3668 = vmatpush.msrb.mxu2 %v4910_v41  ;;  %v2440_v0 = vld [vmem:[#allocation7 + $0x1d8] sm:$0xff]  ;;  %v4920_v22 = vld [vmem:[#allocation3 + $0x1b0] sm:$0xff] }
 0x356   :  { %v3383_v33 = vadd.f32 %v3382_v24, %v3347_v21  ;;  %4065 = vmatpush.msrb.mxu0 %v2488_v44  ;;  %4100 = vmatpush.msrb.mxu1 %v2616_v63  ;;  %v2432_v41 = vld [vmem:[#allocation7 + $0x198] sm:$0xff] }
 0x357   :  { %v2943_v40 = vpop.f32.mrf.mxu2  ;;  %v2978_v10 = vpop.f32.mrf.mxu3  ;;  %3703 = vmatpush.msrb.mxu3 %v4911_v9  ;;  %3669 = vmatpush.msrb.mxu2 %v4912_v55  ;;  %v2560_v9 = vld [vmem:[#allocation7 + $0x598] sm:$0xff]  ;;  %v4922_v55 = vld [vmem:[#allocation3 + $0x170] sm:$0xff] }
 0x358   :  { %3846 = vst [vmem:[#allocation13 + $0x408] sm:$0xff] %v3383_v33  ;;  %v2979_v59 = vadd.f32 %v2978_v10, %v2943_v40  ;;  %3760 = vmatmul.f32.gmra.mxu0 %v8171_v37  ;;  %3795 = vmatmul.f32.gmra.mxu1 %v8173_v56  ;;  %v4919_v33 = vld [vmem:[#allocation3 + $0x5f0] sm:$0xff]  ;;  %v2456_v10 = vld [vmem:[#allocation7 + $0x258] sm:$0xff] }
 0x359   :  { %3704 = vmatpush.msrb.mxu3 %v4913_v8  ;;  %3670 = vmatpush.msrb.mxu2 %v8153_v14  ;;  %v4915_v14 = vld [vmem:[#allocation3 + $0x670] sm:$0xff]  ;;  %v2424_v42 = vld [vmem:[#allocation7 + $0x158] sm:$0xff] }
 0x35a   :  { %3225 = vst [vmem:[#allocation13 + $0x260] sm:$0xff] %v2979_v59  ;;  %4066 = vmatpush.msrb.mxu0 %v2480_v15  ;;  %4101 = vmatpush.msrb.mxu1 %v2608_v52  ;;  %v2584_v59 = vld [vmem:[#allocation7 + $0x658] sm:$0xff]  ;;  %v4923_v8 = vld [vmem:[#allocation3 + $0x570] sm:$0xff] }
 0x35b   :  { %3705 = vmatpush.msrb.mxu3 %v8155_v60  ;;  %3671 = vmatpush.msrb.mxu2 %v4914_v7  ;;  %v2552_v43 = vld [vmem:[#allocation7 + $0x558] sm:$0xff]  ;;  %v4924_v7 = vld [vmem:[#allocation3 + $0x130] sm:$0xff] }
 0x35c   :  { %3407 = vmatmul.f32.gmra.mxu2 %v8163_v51  ;;  %3442 = vmatmul.f32.gmra.mxu3 %v8165_v62  ;;  %v4926_v52 = vld [vmem:[#allocation3 + $0xf0] sm:$0xff] }
 0x35d   :  { %v3472_v49 = vpop.f32.mrf.mxu0  ;;  %v3507_v26 = vpop.f32.mrf.mxu1  ;;  %3706 = vmatpush.msrb.mxu3 %v4915_v14  ;;  %3672 = vmatpush.msrb.mxu2 %v4916_v47  ;;  %v4925_v14 = vld [vmem:[#allocation3 + $0x530] sm:$0xff] }
 0x35e   :  { %v3508_v11 = vadd.f32 %v3507_v26, %v3472_v49  ;;  %4067 = vmatpush.msrb.mxu0 %v2472_v18  ;;  %4102 = vmatpush.msrb.mxu1 %v2600_v27  ;;  %v4921_v49 = vld [vmem:[#allocation3 + $0x5b0] sm:$0xff]  ;;  %v2568_v26 = vld [vmem:[#allocation7 + $0x5d8] sm:$0xff] }
 0x35f   :  { %v2946_v20 = vpop.f32.mrf.mxu2  ;;  %v2981_v4 = vpop.f32.mrf.mxu3  ;;  %3707 = vmatpush.msrb.mxu3 %v4917_v5  ;;  %3673 = vmatpush.msrb.mxu2 %v4918_v16  ;;  %v4927_v18 = vld [vmem:[#allocation3 + $0x4f0] sm:$0xff] }
 0x360   :  { %3808 = vst [vmem:[#allocation13 + $0x58] sm:$0xff] %v3508_v11  ;;  %v2982_v58 = vadd.f32 %v2981_v4, %v2946_v20  ;;  %3763 = vmatmul.f32.gmra.mxu0 %v8179_v25  ;;  %3798 = vmatmul.f32.gmra.mxu1 %v8181_v19  ;;  %v4929_v16 = vld [vmem:[#allocation3 + $0x4b0] sm:$0xff] }
 0x361   :  { %3708 = vmatpush.msrb.mxu3 %v4919_v33  ;;  %4068 = vmatpush.msrb.mxu0 %v2464_v34  ;;  %v2392_v34 = vld [vmem:[#allocation7 + $0x58] sm:$0xff] }
 0x362   :  { %3233 = vst [vmem:[#allocation13 + $0x320] sm:$0xff] %v2982_v58  ;;  %4103 = vmatpush.msrb.mxu1 %v2592_v53  ;;  %3674 = vmatpush.msrb.mxu2 %v4920_v22  ;;  %v2520_v53 = vld [vmem:[#allocation7 + $0x458] sm:$0xff] }
 0x363   :  { %4069 = vmatpush.msrb.mxu0 %v2456_v10  ;;  %3709 = vmatpush.msrb.mxu3 %v4921_v49  ;;  %v8955_v49 = vld [vmem:[#allocation69_spill] sm:$0xff] }
 0x364   :  { %3410 = vmatmul.f32.gmra.mxu2 %v8171_v37  ;;  %3445 = vmatmul.f32.gmra.mxu3 %v8173_v56 }
 0x365   :  { %v3475_v36 = vpop.f32.mrf.mxu0  ;;  %v3510_v54 = vpop.f32.mrf.mxu1  ;;  %4104 = vmatpush.msrb.mxu1 %v2584_v59  ;;  %4070 = vmatpush.msrb.mxu0 %v2448_v45 }
 0x366   :  { %v3511_v1 = vadd.f32 %v3510_v54, %v3475_v36  ;;  %3675 = vmatpush.msrb.mxu2 %v4922_v55  ;;  %3710 = vmatpush.msrb.mxu3 %v4923_v8  ;;  %v2416_v36 = vld [vmem:[#allocation7 + $0x118] sm:$0xff]  ;;  %v8957_v8 = vld [vmem:[#allocation73_spill] sm:$0xff] }
 0x367   :  { %v2949_v60 = vpop.f32.mrf.mxu2  ;;  %v2984_v29 = vpop.f32.mrf.mxu3  ;;  %4105 = vmatpush.msrb.mxu1 %v2576_v35  ;;  %4071 = vmatpush.msrb.mxu0 %v2440_v0  ;;  %v2544_v54 = vld [vmem:[#allocation7 + $0x518] sm:$0xff]  ;;  %v4932_v35 = vld [vmem:[#allocation3 + $0x30] sm:$0xff] }
 0x368   :  { %3816 = vst [vmem:[#allocation13 + $0x118] sm:$0xff] %v3511_v1  ;;  %v2985_v57 = vadd.f32 %v2984_v29, %v2949_v60  ;;  %3766 = vmatmul.f32.gmra.mxu0 %v8187_v12  ;;  %3801 = vmatmul.f32.gmra.mxu1 %v8189_v6  ;;  %v2408_v1 = vld [vmem:[#allocation7 + $0xd8] sm:$0xff]  ;;  %v4933_v0 = vld [vmem:[#allocation3 + $0x430] sm:$0xff] }
 0x369   :  { %4106 = vmatpush.msrb.mxu1 %v2568_v26  ;;  %4072 = vmatpush.msrb.mxu0 %v2432_v41  ;;  %v2536_v60 = vld [vmem:[#allocation7 + $0x4d8] sm:$0xff]  ;;  %v8956_v26 = vld [vmem:[#allocation72_spill] sm:$0xff] }
 0x36a   :  { %3241 = vst [vmem:[#allocation13 + $0x3e0] sm:$0xff] %v2985_v57  ;;  %3676 = vmatpush.msrb.mxu2 %v4924_v7  ;;  %3711 = vmatpush.msrb.mxu3 %v4925_v14  ;;  %v2400_v29 = vld [vmem:[#allocation7 + $0x98] sm:$0xff] }
 0x36b   :  { %4107 = vmatpush.msrb.mxu1 %v2560_v9  ;;  %4073 = vmatpush.msrb.mxu0 %v2424_v42  ;;  %v2528_v57 = vld [vmem:[#allocation7 + $0x498] sm:$0xff]  ;;  %v2498_v42 = vld [vmem:[#allocation7 + $0x3a8] sm:$0xff] }
 0x36c   :  { %3413 = vmatmul.f32.gmra.mxu2 %v8179_v25  ;;  %3448 = vmatmul.f32.gmra.mxu3 %v8181_v19 }
 0x36d   :  { %v3478_v21 = vpop.f32.mrf.mxu0  ;;  %v3513_v24 = vpop.f32.mrf.mxu1  ;;  %4108 = vmatpush.msrb.mxu1 %v2552_v43  ;;  %4074 = vmatpush.msrb.mxu0 %v2416_v36  ;;  %v2626_v43 = vld [vmem:[#allocation7 + $0x7a8] sm:$0xff] }
 0x36e   :  { %v3514_v23 = vadd.f32 %v3513_v24, %v3478_v21  ;;  %3677 = vmatpush.msrb.mxu2 %v4926_v52  ;;  %3712 = vmatpush.msrb.mxu3 %v4927_v18  ;;  %v2384_v21 = vld [vmem:[#allocation7 + $0x18] sm:$0xff]  ;;  %v2610_v52 = vld [vmem:[#allocation7 + $0x728] sm:$0xff] }
 0x36f   :  { %v3074_v17 = vpop.f32.mrf.mxu2  ;;  %v3109_v2 = vpop.f32.mrf.mxu3  ;;  %4109 = vmatpush.msrb.mxu1 %v2544_v54  ;;  %4075 = vmatpush.msrb.mxu0 %v2408_v1  ;;  %v2512_v24 = vld [vmem:[#allocation7 + $0x418] sm:$0xff]  ;;  %v2474_v18 = vld [vmem:[#allocation7 + $0x2e8] sm:$0xff] }
 0x370   :  { %3824 = vst [vmem:[#allocation13 + $0x1d8] sm:$0xff] %v3514_v23  ;;  %v3110_v40 = vadd.f32 %v3109_v2, %v3074_v17  ;;  %3939 = vmatmul.f32.vlgmr.msra.gmra.mxu0 %v7864_v48  ;;  %3974 = vmatmul.f32.vlgmr.msra.gmra.mxu1 %v7874_v31  ;;  %v4928_v23 = vld [vmem:[#allocation3 + $0xb0] sm:$0xff] }
 0x371   :  { %4110 = vmatpush.msrb.mxu1 %v2536_v60  ;;  %4076 = vmatpush.msrb.mxu0 %v2400_v29  ;;  %v4930_v2 = vld [vmem:[#allocation3 + $0x70] sm:$0xff]  ;;  %v8959_v29 = vld [vmem:[#allocation46_spill] sm:$0xff] }
 0x372   :  { %3203 = vst [vmem:[#allocation13 + $0x30] sm:$0xff] %v3110_v40  ;;  %3678 = vmatpush.msrb.mxu2 %v4928_v23  ;;  %3713 = vmatpush.msrb.mxu3 %v4929_v16  ;;  %v4931_v40 = vld [vmem:[#allocation3 + $0x470] sm:$0xff] }
 0x373   :  { %4111 = vmatpush.msrb.mxu1 %v2528_v57  ;;  %4077 = vmatpush.msrb.mxu0 %v2392_v34  ;;  %v8960_v57 = vld [vmem:[#allocation74_spill] sm:$0xff] }
 0x374   :  { %3416 = vmatmul.f32.gmra.mxu2 %v8187_v12  ;;  %3451 = vmatmul.f32.gmra.mxu3 %v8189_v6 }
 0x375   :  { %v3481_v11 = vpop.f32.mrf.mxu0  ;;  %v3516_v20 = vpop.f32.mrf.mxu1  ;;  %4112 = vmatpush.msrb.mxu1 %v2520_v53  ;;  %4078 = vmatpush.msrb.mxu0 %v2384_v21 }
 0x376   :  { %v3517_v4 = vadd.f32 %v3516_v20, %v3481_v11  ;;  %3679 = vmatpush.msrb.mxu2 %v4930_v2  ;;  %3714 = vmatpush.msrb.mxu3 %v4931_v40  ;;  %v2458_v2 = vld [vmem:[#allocation7 + $0x268] sm:$0xff] }
 0x377   :  { %v3077_v58 = vpop.f32.mrf.mxu2  ;;  %v3112_v46 = vpop.f32.mrf.mxu3  ;;  %4113 = vmatpush.msrb.mxu1 %v2512_v24  ;;  %v2586_v40 = vld [vmem:[#allocation7 + $0x668] sm:$0xff] }
 0x378   :  { %3832 = vst [vmem:[#allocation13 + $0x298] sm:$0xff] %v3517_v4  ;;  %v3113_v50 = vadd.f32 %v3112_v46, %v3077_v58  ;;  %3942 = vmatmul.f32.gmra.mxu0 %v7925_v3  ;;  %3977 = vmatmul.f32.gmra.mxu1 %v7932_v61  ;;  %v8958_v58 = vld [vmem:[#allocation26_spill] sm:$0xff]  ;;  %v2506_v46 = vld [vmem:[#allocation7 + $0x3e8] sm:$0xff] }
 0x379   :  { %3680 = vmatpush.msrb.mxu2 %v4932_v35  ;;  %3715 = vmatpush.msrb.mxu3 %v4933_v0  ;;  %v2578_v35 = vld [vmem:[#allocation7 + $0x628] sm:$0xff]  ;;  %v2485_v0 = vld [vmem:[#allocation7 + $0x340] sm:$0xff] }
 0x37a   :  { %3211 = vst [vmem:[#allocation13 + $0xf0] sm:$0xff] %v3113_v50  ;;  %v2634_v50 = vld [vmem:[#allocation7 + $0x7e8] sm:$0xff]  ;;  %4203 = vmatpush.msra.mxu0 %v2506_v46  ;;  %v2605_v46 = vld [vmem:[#allocation7 + $0x700] sm:$0xff] }
 0x37b   :  { %4238 = vmatpush.msra.mxu1 %v2634_v50 }
 0x37c   :  { %3541 = vmatmul.f32.vlgmr.msra.gmra.mxu2 %v8141_v30  ;;  %3576 = vmatmul.f32.vlgmr.msra.gmra.mxu3 %v8143_v39 }
 0x37d   :  { %v3484_v44 = vpop.f32.mrf.mxu0  ;;  %v3519_v63 = vpop.f32.mrf.mxu1  ;;  %4204 = vmatpush.msra.mxu0 %v2498_v42  ;;  %4239 = vmatpush.msra.mxu1 %v2626_v43  ;;  %v2434_v43 = vld [vmem:[#allocation7 + $0x1a8] sm:$0xff] }
 0x37e   :  { %v3520_v15 = vadd.f32 %v3519_v63, %v3484_v44  ;;  %v2490_v44 = vld [vmem:[#allocation7 + $0x368] sm:$0xff] }
 0x37f   :  { %v3080_v47 = vpop.f32.mrf.mxu2  ;;  %v3115_v5 = vpop.f32.mrf.mxu3  ;;  %v2618_v63 = vld [vmem:[#allocation7 + $0x768] sm:$0xff]  ;;  %4205 = vmatpush.msra.mxu0 %v2490_v44  ;;  %v2461_v44 = vld [vmem:[#allocation7 + $0x280] sm:$0xff] }
 0x380   :  { %3840 = vst [vmem:[#allocation13 + $0x358] sm:$0xff] %v3520_v15  ;;  %v3116_v27 = vadd.f32 %v3115_v5, %v3080_v47  ;;  %3945 = vmatmul.f32.gmra.mxu0 %v7977_v38  ;;  %3980 = vmatmul.f32.gmra.mxu1 %v7983_v28  ;;  %v2482_v15 = vld [vmem:[#allocation7 + $0x328] sm:$0xff] }
 0x381   :  { %4240 = vmatpush.msra.mxu1 %v2618_v63  ;;  %4206 = vmatpush.msra.mxu0 %v2482_v15  ;;  %v2602_v47 = vld [vmem:[#allocation7 + $0x6e8] sm:$0xff]  ;;  %v2589_v63 = vld [vmem:[#allocation7 + $0x680] sm:$0xff] }
 0x382   :  { %3219 = vst [vmem:[#allocation13 + $0x1b0] sm:$0xff] %v3116_v27  ;;  %v2466_v5 = vld [vmem:[#allocation7 + $0x2a8] sm:$0xff] }
 0x383   :  { %4241 = vmatpush.msra.mxu1 %v2610_v52  ;;  %v2594_v27 = vld [vmem:[#allocation7 + $0x6a8] sm:$0xff]  ;;  %4207 = vmatpush.msra.mxu0 %v2474_v18 }
 0x384   :  { %3544 = vmatmul.f32.gmra.mxu2 %v8149_v13  ;;  %3579 = vmatmul.f32.gmra.mxu3 %v8151_v32  ;;  %v2418_v15 = vld [vmem:[#allocation7 + $0x128] sm:$0xff] }
 0x385   :  { %v3487_v33 = vpop.f32.mrf.mxu0  ;;  %v3522_v17 = vpop.f32.mrf.mxu1  ;;  %4242 = vmatpush.msra.mxu1 %v2602_v47  ;;  %4208 = vmatpush.msra.mxu0 %v2466_v5  ;;  %v2546_v52 = vld [vmem:[#allocation7 + $0x528] sm:$0xff] }
 0x386   :  { %v3523_v10 = vadd.f32 %v3522_v17, %v3487_v33  ;;  %v2501_v33 = vld [vmem:[#allocation7 + $0x3c0] sm:$0xff] }
 0x387   :  { %v3083_v59 = vpop.f32.mrf.mxu2  ;;  %v3118_v45 = vpop.f32.mrf.mxu3  ;;  %4243 = vmatpush.msra.mxu1 %v2594_v27  ;;  %v2629_v17 = vld [vmem:[#allocation7 + $0x7c0] sm:$0xff]  ;;  %3853 = vmatpush.msra.mxu2 %v2501_v33  ;;  %v2402_v33 = vld [vmem:[#allocation7 + $0xa8] sm:$0xff] }
 0x388   :  { %3848 = vst [vmem:[#allocation13 + $0x418] sm:$0xff] %v3523_v10  ;;  %v3119_v22 = vadd.f32 %v3118_v45, %v3083_v59  ;;  %3948 = vmatmul.f32.gmra.mxu0 %v8955_v49  ;;  %3983 = vmatmul.f32.gmra.mxu1 %v8956_v26  ;;  %v2493_v10 = vld [vmem:[#allocation7 + $0x380] sm:$0xff]  ;;  %v2450_v45 = vld [vmem:[#allocation7 + $0x228] sm:$0xff] }
 0x389   :  { %3888 = vmatpush.msra.mxu3 %v2629_v17  ;;  %4209 = vmatpush.msra.mxu0 %v2458_v2  ;;  %v2621_v59 = vld [vmem:[#allocation7 + $0x780] sm:$0xff]  ;;  %v2530_v17 = vld [vmem:[#allocation7 + $0x4a8] sm:$0xff] }
 0x38a   :  { %3227 = vst [vmem:[#allocation13 + $0x270] sm:$0xff] %v3119_v22  ;;  %4244 = vmatpush.msra.mxu1 %v2586_v40  ;;  %3854 = vmatpush.msra.mxu2 %v2493_v10  ;;  %v2613_v22 = vld [vmem:[#allocation7 + $0x740] sm:$0xff]  ;;  %v2394_v10 = vld [vmem:[#allocation7 + $0x68] sm:$0xff] }
 0x38b   :  { %3889 = vmatpush.msra.mxu3 %v2621_v59  ;;  %4210 = vmatpush.msra.mxu0 %v2450_v45  ;;  %v2453_v27 = vld [vmem:[#allocation7 + $0x240] sm:$0xff]  ;;  %v2522_v59 = vld [vmem:[#allocation7 + $0x468] sm:$0xff] }
 0x38c   :  { %3547 = vmatmul.f32.gmra.mxu2 %v8163_v51  ;;  %3582 = vmatmul.f32.gmra.mxu3 %v8165_v62  ;;  %v2437_v2 = vld [vmem:[#allocation7 + $0x1c0] sm:$0xff] }
 0x38d   :  { %v3612_v41 = vpop.f32.mrf.mxu0  ;;  %v3647_v9 = vpop.f32.mrf.mxu1  ;;  %4245 = vmatpush.msra.mxu1 %v2578_v35  ;;  %3855 = vmatpush.msra.mxu2 %v2485_v0  ;;  %v2565_v40 = vld [vmem:[#allocation7 + $0x5c0] sm:$0xff] }
 0x38e   :  { %v3648_v11 = vadd.f32 %v3647_v9, %v3612_v41  ;;  %v2442_v41 = vld [vmem:[#allocation7 + $0x1e8] sm:$0xff]  ;;  %3890 = vmatpush.msra.mxu3 %v2613_v22  ;;  %v2429_v22 = vld [vmem:[#allocation7 + $0x180] sm:$0xff] }
 0x38f   :  { %v3086_v20 = vpop.f32.mrf.mxu2  ;;  %v3121_v4 = vpop.f32.mrf.mxu3  ;;  %v2570_v9 = vld [vmem:[#allocation7 + $0x5e8] sm:$0xff]  ;;  %4211 = vmatpush.msra.mxu0 %v2442_v41  ;;  %v2557_v41 = vld [vmem:[#allocation7 + $0x580] sm:$0xff] }
 0x390   :  { %3810 = vst [vmem:[#allocation13 + $0x68] sm:$0xff] %v3648_v11  ;;  %v3122_v55 = vadd.f32 %v3121_v4, %v3086_v20  ;;  %3951 = vmatmul.f32.gmra.mxu0 %v8957_v8  ;;  %3986 = vmatmul.f32.gmra.mxu1 %v8958_v58 }
 0x391   :  { %4246 = vmatpush.msra.mxu1 %v2570_v9  ;;  %3891 = vmatpush.msra.mxu3 %v2605_v46  ;;  %v2413_v46 = vld [vmem:[#allocation7 + $0x100] sm:$0xff] }
 0x392   :  { %3235 = vst [vmem:[#allocation13 + $0x330] sm:$0xff] %v3122_v55  ;;  %v2477_v55 = vld [vmem:[#allocation7 + $0x300] sm:$0xff]  ;;  %4212 = vmatpush.msra.mxu0 %v2434_v43 }
 0x393   :  { %3856 = vmatpush.msra.mxu2 %v2477_v55  ;;  %v2549_v55 = vld [vmem:[#allocation7 + $0x540] sm:$0xff] }
 0x394   :  { %3550 = vmatmul.f32.gmra.mxu2 %v8171_v37  ;;  %3585 = vmatmul.f32.gmra.mxu3 %v8173_v56  ;;  %v2533_v43 = vld [vmem:[#allocation7 + $0x4c0] sm:$0xff] }
 0x395   :  { %v3615_v36 = vpop.f32.mrf.mxu0  ;;  %v3650_v54 = vpop.f32.mrf.mxu1 }
 0x396   :  { %v3651_v1 = vadd.f32 %v3650_v54, %v3615_v36  ;;  %v2562_v36 = vld [vmem:[#allocation7 + $0x5a8] sm:$0xff] }
 0x397   :  { %v3089_v7 = vpop.f32.mrf.mxu2  ;;  %v3124_v14 = vpop.f32.mrf.mxu3  ;;  %4247 = vmatpush.msra.mxu1 %v2562_v36 }
 0x398   :  { %3818 = vst [vmem:[#allocation13 + $0x128] sm:$0xff] %v3651_v1  ;;  %v3125_v60 = vadd.f32 %v3124_v14, %v3089_v7  ;;  %3954 = vmatmul.f32.gmra.mxu0 %v8959_v29  ;;  %3989 = vmatmul.f32.gmra.mxu1 %v8960_v57  ;;  %v2469_v1 = vld [vmem:[#allocation7 + $0x2c0] sm:$0xff]  ;;  %v2426_v14 = vld [vmem:[#allocation7 + $0x168] sm:$0xff] }
 0x399   :  { %v2597_v7 = vld [vmem:[#allocation7 + $0x6c0] sm:$0xff]  ;;  %3857 = vmatpush.msra.mxu2 %v2469_v1  ;;  %4213 = vmatpush.msra.mxu0 %v2426_v14 }
 0x39a   :  { %3243 = vst [vmem:[#allocation13 + $0x3f0] sm:$0xff] %v3125_v60  ;;  %v2554_v60 = vld [vmem:[#allocation7 + $0x568] sm:$0xff]  ;;  %3892 = vmatpush.msra.mxu3 %v2597_v7  ;;  %v2397_v7 = vld [vmem:[#allocation7 + $0x80] sm:$0xff] }
 0x39b   :  { %4248 = vmatpush.msra.mxu1 %v2554_v60  ;;  %3858 = vmatpush.msra.mxu2 %v2461_v44  ;;  %v2525_v14 = vld [vmem:[#allocation7 + $0x480] sm:$0xff] }
 0x39c   :  { %3553 = vmatmul.f32.gmra.mxu2 %v8179_v25  ;;  %3588 = vmatmul.f32.gmra.mxu3 %v8181_v19 }
 0x39d   :  { %v3618_v34 = vpop.f32.mrf.mxu0  ;;  %v3653_v53 = vpop.f32.mrf.mxu1  ;;  %3893 = vmatpush.msra.mxu3 %v2589_v63  ;;  %4214 = vmatpush.msra.mxu0 %v2418_v15  ;;  %v2381_v15 = vld [vmem:[#allocation7] sm:$0xff] }
 0x39e   :  { %v3654_v21 = vadd.f32 %v3653_v53, %v3618_v34  ;;  %v2581_v34 = vld [vmem:[#allocation7 + $0x640] sm:$0xff]  ;;  %4249 = vmatpush.msra.mxu1 %v2546_v52  ;;  %3859 = vmatpush.msra.mxu2 %v2453_v27 }
 0x39f   :  { %v3262_v24 = vpop.f32.mrf.mxu2  ;;  %v3297_v23 = vpop.f32.mrf.mxu3  ;;  %3894 = vmatpush.msra.mxu3 %v2581_v34  ;;  %v2509_v52 = vld [vmem:[#allocation7 + $0x400] sm:$0xff] }
 0x3a0   :  { %3826 = vst [vmem:[#allocation13 + $0x1e8] sm:$0xff] %v3654_v21  ;;  %v3298_v16 = vadd.f32 %v3297_v23, %v3262_v24  ;;  %4079 = vmatmul.f32.vlgmr.msrb.gmra.mxu0 %v7864_v48  ;;  %4114 = vmatmul.f32.vlgmr.msrb.gmra.mxu1 %v7874_v31  ;;  %v2410_v24 = vld [vmem:[#allocation7 + $0xe8] sm:$0xff] }
 0x3a1   :  { %v2538_v23 = vld [vmem:[#allocation7 + $0x4e8] sm:$0xff]  ;;  %4215 = vmatpush.msra.mxu0 %v2410_v24 }
 0x3a2   :  { %3805 = vst [vmem:[#allocation13 + $0x40] sm:$0xff] %v3298_v16  ;;  %v2573_v16 = vld [vmem:[#allocation7 + $0x600] sm:$0xff]  ;;  %4250 = vmatpush.msra.mxu1 %v2538_v23 }
 0x3a3   :  { %3895 = vmatpush.msra.mxu3 %v2573_v16  ;;  %4216 = vmatpush.msra.mxu0 %v2402_v33  ;;  %v2612_v16 = vld [vmem:[#allocation7 + $0x738] sm:$0xff] }
 0x3a4   :  { %3556 = vmatmul.f32.gmra.mxu2 %v8187_v12  ;;  %3591 = vmatmul.f32.gmra.mxu3 %v8189_v6  ;;  %v2476_v33 = vld [vmem:[#allocation7 + $0x2f8] sm:$0xff] }
 0x3a5   :  { %v3621_v11 = vpop.f32.mrf.mxu0  ;;  %v3656_v20 = vpop.f32.mrf.mxu1  ;;  %4251 = vmatpush.msra.mxu1 %v2530_v17  ;;  %3896 = vmatpush.msra.mxu3 %v2565_v40  ;;  %v2604_v17 = vld [vmem:[#allocation7 + $0x6f8] sm:$0xff] }
 0x3a6   :  { %v3657_v4 = vadd.f32 %v3656_v20, %v3621_v11  ;;  %4217 = vmatpush.msra.mxu0 %v2394_v10  ;;  %v2386_v20 = vld [vmem:[#allocation7 + $0x28] sm:$0xff] }
 0x3a7   :  { %v3265_v50 = vpop.f32.mrf.mxu2  ;;  %v3300_v42 = vpop.f32.mrf.mxu3  ;;  %4252 = vmatpush.msra.mxu1 %v2522_v59  ;;  %3897 = vmatpush.msra.mxu3 %v2557_v41  ;;  %v2468_v59 = vld [vmem:[#allocation7 + $0x2b8] sm:$0xff] }
 0x3a8   :  { %3834 = vst [vmem:[#allocation13 + $0x2a8] sm:$0xff] %v3657_v4  ;;  %v3301_v54 = vadd.f32 %v3300_v42, %v3265_v50  ;;  %4082 = vmatmul.f32.gmra.mxu0 %v7925_v3  ;;  %4117 = vmatmul.f32.gmra.mxu1 %v7932_v61  ;;  %v2514_v4 = vld [vmem:[#allocation7 + $0x428] sm:$0xff]  ;;  %v2541_v50 = vld [vmem:[#allocation7 + $0x500] sm:$0xff]  ;;  %v2460_v41 = vld [vmem:[#allocation7 + $0x278] sm:$0xff] }
 0x3a9   :  { %4218 = vmatpush.msra.mxu0 %v2386_v20  ;;  %4253 = vmatpush.msra.mxu1 %v2514_v4  ;;  %v2405_v42 = vld [vmem:[#allocation7 + $0xc0] sm:$0xff]  ;;  %v2623_v20 = vld [vmem:[#allocation7 + $0x790] sm:$0xff]  ;;  %v2452_v4 = vld [vmem:[#allocation7 + $0x238] sm:$0xff] }
 0x3aa   :  { %3813 = vst [vmem:[#allocation13 + $0x100] sm:$0xff] %v3301_v54  ;;  %3898 = vmatpush.msra.mxu3 %v2549_v55  ;;  %v2615_v55 = vld [vmem:[#allocation7 + $0x750] sm:$0xff] }
 0x3ac   :  { %3681 = vmatmul.f32.vlgmr.msrb.gmra.mxu2 %v8141_v30  ;;  %3716 = vmatmul.f32.vlgmr.msrb.gmra.mxu3 %v8143_v39  ;;  %v2445_v39 = vld [vmem:[#allocation7 + $0x200] sm:$0xff] }
 0x3ad   :  { %v3624_v18 = vpop.f32.mrf.mxu0  ;;  %v3659_v47 = vpop.f32.mrf.mxu1  ;;  %3860 = vmatpush.msra.mxu2 %v2445_v39  ;;  %3899 = vmatpush.msra.mxu3 %v2541_v50  ;;  %v2620_v39 = vld [vmem:[#allocation7 + $0x778] sm:$0xff] }
 0x3ae   :  { %v3660_v5 = vadd.f32 %v3659_v47, %v3624_v18  ;;  %v2508_v18 = vld [vmem:[#allocation7 + $0x3f8] sm:$0xff] }
 0x3af   :  { %v3268_v53 = vpop.f32.mrf.mxu2  ;;  %v3303_v21 = vpop.f32.mrf.mxu3  ;;  %3861 = vmatpush.msra.mxu2 %v2437_v2  ;;  %3900 = vmatpush.msra.mxu3 %v2533_v43  ;;  %v2636_v47 = vld [vmem:[#allocation7 + $0x7f8] sm:$0xff] }
 0x3b0   :  { %3842 = vst [vmem:[#allocation13 + $0x368] sm:$0xff] %v3660_v5  ;;  %v3304_v30 = vadd.f32 %v3303_v21, %v3268_v53  ;;  %4085 = vmatmul.f32.gmra.mxu0 %v7977_v38  ;;  %4120 = vmatmul.f32.gmra.mxu1 %v7983_v28  ;;  %v2500_v53 = vld [vmem:[#allocation7 + $0x3b8] sm:$0xff] }
 0x3b1   :  { %3862 = vmatpush.msra.mxu2 %v2429_v22  ;;  %3901 = vmatpush.msra.mxu3 %v2525_v14  ;;  %v2628_v21 = vld [vmem:[#allocation7 + $0x7b8] sm:$0xff]  ;;  %v2607_v14 = vld [vmem:[#allocation7 + $0x710] sm:$0xff] }
 0x3b2   :  { %3821 = vst [vmem:[#allocation13 + $0x1c0] sm:$0xff] %v3304_v30  ;;  %4343 = vmatpush.msrb.mxu0 %v2508_v18  ;;  %4378 = vmatpush.msrb.mxu1 %v2636_v47  ;;  %v2444_v43 = vld [vmem:[#allocation7 + $0x1f8] sm:$0xff] }
 0x3b4   :  { %3684 = vmatmul.f32.gmra.mxu2 %v8149_v13  ;;  %3719 = vmatmul.f32.gmra.mxu3 %v8151_v32  ;;  %v2421_v32 = vld [vmem:[#allocation7 + $0x140] sm:$0xff] }
 0x3b5   :  { %v3627_v45 = vpop.f32.mrf.mxu0  ;;  %v3662_v35 = vpop.f32.mrf.mxu1  ;;  %3863 = vmatpush.msra.mxu2 %v2421_v32  ;;  %4344 = vmatpush.msrb.mxu0 %v2500_v53  ;;  %v2487_v32 = vld [vmem:[#allocation7 + $0x350] sm:$0xff] }
 0x3b6   :  { %v3663_v0 = vadd.f32 %v3662_v35, %v3627_v45  ;;  %4379 = vmatpush.msrb.mxu1 %v2628_v21  ;;  %v2596_v45 = vld [vmem:[#allocation7 + $0x6b8] sm:$0xff] }
 0x3b7   :  { %v3271_v9 = vpop.f32.mrf.mxu2  ;;  %v3306_v11 = vpop.f32.mrf.mxu3  ;;  %3864 = vmatpush.msra.mxu2 %v2413_v46 }
 0x3b8   :  { %3850 = vst [vmem:[#allocation13 + $0x428] sm:$0xff] %v3663_v0  ;;  %v3307_v13 = vadd.f32 %v3306_v11, %v3271_v9  ;;  %4088 = vmatmul.f32.gmra.mxu0 %v8955_v49  ;;  %4123 = vmatmul.f32.gmra.mxu1 %v8956_v26  ;;  %v2588_v9 = vld [vmem:[#allocation7 + $0x678] sm:$0xff]  ;;  %v2495_v11 = vld [vmem:[#allocation7 + $0x390] sm:$0xff] }
 0x3b9   :  { %3865 = vmatpush.msra.mxu2 %v2405_v42  ;;  %4380 = vmatpush.msrb.mxu1 %v2620_v39  ;;  %v2540_v39 = vld [vmem:[#allocation7 + $0x4f8] sm:$0xff] }
 0x3ba   :  { %3829 = vst [vmem:[#allocation13 + $0x280] sm:$0xff] %v3307_v13  ;;  %v2580_v13 = vld [vmem:[#allocation7 + $0x638] sm:$0xff] }
 0x3bb   :  { %3866 = vmatpush.msra.mxu2 %v2397_v7  ;;  %4381 = vmatpush.msrb.mxu1 %v2612_v16  ;;  %v2479_v7 = vld [vmem:[#allocation7 + $0x310] sm:$0xff] }
 0x3bc   :  { %3687 = vmatmul.f32.gmra.mxu2 %v8163_v51  ;;  %3722 = vmatmul.f32.gmra.mxu3 %v8165_v62  ;;  %v2389_v51 = vld [vmem:[#allocation7 + $0x40] sm:$0xff]  ;;  %v2575_v16 = vld [vmem:[#allocation7 + $0x610] sm:$0xff] }
 0x3bd   :  { %v3752_v36 = vpop.f32.mrf.mxu0  ;;  %v3787_v54 = vpop.f32.mrf.mxu1  ;;  %v2517_v62 = vld [vmem:[#allocation7 + $0x440] sm:$0xff]  ;;  %3867 = vmatpush.msra.mxu2 %v2389_v51  ;;  %4382 = vmatpush.msrb.mxu1 %v2604_v17  ;;  %v2428_v51 = vld [vmem:[#allocation7 + $0x178] sm:$0xff] }
 0x3be   :  { %v3788_v1 = vadd.f32 %v3787_v54, %v3752_v36  ;;  %3902 = vmatpush.msra.mxu3 %v2517_v62  ;;  %v2572_v36 = vld [vmem:[#allocation7 + $0x5f8] sm:$0xff] }
 0x3bf   :  { %v3274_v60 = vpop.f32.mrf.mxu2  ;;  %v3309_v44 = vpop.f32.mrf.mxu3  ;;  %3868 = vmatpush.msra.mxu2 %v2381_v15  ;;  %4383 = vmatpush.msrb.mxu1 %v2596_v45  ;;  %v2556_v62 = vld [vmem:[#allocation7 + $0x578] sm:$0xff]  ;;  %v2463_v15 = vld [vmem:[#allocation7 + $0x290] sm:$0xff] }
 0x3c0   :  { %3812 = vst [vmem:[#allocation13 + $0x78] sm:$0xff] %v3788_v1  ;;  %v3310_v63 = vadd.f32 %v3309_v44, %v3274_v60  ;;  %4091 = vmatmul.f32.gmra.mxu0 %v8957_v8  ;;  %4126 = vmatmul.f32.gmra.mxu1 %v8958_v58  ;;  %v2564_v60 = vld [vmem:[#allocation7 + $0x5b8] sm:$0xff]  ;;  %v2471_v44 = vld [vmem:[#allocation7 + $0x2d0] sm:$0xff] }
 0x3c1   :  { %3903 = vmatpush.msra.mxu3 %v2509_v52  ;;  %4384 = vmatpush.msrb.mxu1 %v2588_v9  ;;  %v2591_v52 = vld [vmem:[#allocation7 + $0x690] sm:$0xff]  ;;  %v2532_v17 = vld [vmem:[#allocation7 + $0x4b8] sm:$0xff] }
 0x3c2   :  { %3837 = vst [vmem:[#allocation13 + $0x340] sm:$0xff] %v3310_v63  ;;  %v2599_v63 = vld [vmem:[#allocation7 + $0x6d0] sm:$0xff] }
 0x3c3   :  { %4385 = vmatpush.msrb.mxu1 %v2580_v13  ;;  %v2551_v13 = vld [vmem:[#allocation7 + $0x550] sm:$0xff] }
 0x3c4   :  { %3690 = vmatmul.f32.gmra.mxu2 %v8171_v37  ;;  %3725 = vmatmul.f32.gmra.mxu3 %v8173_v56  ;;  %v2492_v37 = vld [vmem:[#allocation7 + $0x378] sm:$0xff] }
 0x3c5   :  { %v3755_v5 = vpop.f32.mrf.mxu0  ;;  %v3790_v27 = vpop.f32.mrf.mxu1  ;;  %v2484_v56 = vld [vmem:[#allocation7 + $0x338] sm:$0xff]  ;;  %4345 = vmatpush.msrb.mxu0 %v2492_v37  ;;  %4386 = vmatpush.msrb.mxu1 %v2572_v36  ;;  %v2535_v36 = vld [vmem:[#allocation7 + $0x4d0] sm:$0xff] }
 0x3c6   :  { %v3791_v34 = vadd.f32 %v3790_v27, %v3755_v5  ;;  %v2420_v27 = vld [vmem:[#allocation7 + $0x138] sm:$0xff] }
 0x3c7   :  { %v3277_v24 = vpop.f32.mrf.mxu2  ;;  %v3312_v23 = vpop.f32.mrf.mxu3  ;;  %4346 = vmatpush.msrb.mxu0 %v2484_v56  ;;  %4387 = vmatpush.msrb.mxu1 %v2564_v60  ;;  %v2412_v37 = vld [vmem:[#allocation7 + $0xf8] sm:$0xff]  ;;  %v2447_v56 = vld [vmem:[#allocation7 + $0x210] sm:$0xff] }
 0x3c8   :  { %3820 = vst [vmem:[#allocation13 + $0x138] sm:$0xff] %v3791_v34  ;;  %v3313_v30 = vadd.f32 %v3312_v23, %v3277_v24  ;;  %4094 = vmatmul.f32.gmra.mxu0 %v8959_v29  ;;  %4129 = vmatmul.f32.gmra.mxu1 %v8960_v57  ;;  %v2548_v34 = vld [vmem:[#allocation7 + $0x538] sm:$0xff]  ;;  %v2455_v24 = vld [vmem:[#allocation7 + $0x250] sm:$0xff] }
 0x3c9   :  { %4347 = vmatpush.msrb.mxu0 %v2476_v33  ;;  %4388 = vmatpush.msrb.mxu1 %v2556_v62  ;;  %v2583_v23 = vld [vmem:[#allocation7 + $0x650] sm:$0xff]  ;;  %v2404_v33 = vld [vmem:[#allocation7 + $0xb8] sm:$0xff] }
 0x3ca   :  { %3845 = vst [vmem:[#allocation13 + $0x400] sm:$0xff] %v3313_v30  ;;  %v2519_v60 = vld [vmem:[#allocation7 + $0x450] sm:$0xff] }
 0x3cb   :  { %4348 = vmatpush.msrb.mxu0 %v2468_v59  ;;  %4389 = vmatpush.msrb.mxu1 %v2548_v34 }
 0x3cc   :  { %3693 = vmatmul.f32.gmra.mxu2 %v8179_v25  ;;  %3728 = vmatmul.f32.gmra.mxu3 %v8181_v19  ;;  %v2503_v25 = vld [vmem:[#allocation7 + $0x3d0] sm:$0xff] }
 0x3cd   :  { %v3758_v2 = vpop.f32.mrf.mxu0  ;;  %v3793_v40 = vpop.f32.mrf.mxu1  ;;  %v2631_v19 = vld [vmem:[#allocation7 + $0x7d0] sm:$0xff]  ;;  %3993 = vmatpush.msrb.mxu2 %v2503_v25  ;;  %4349 = vmatpush.msrb.mxu0 %v2460_v41 }
 0x3ce   :  { %v3794_v10 = vadd.f32 %v3793_v40, %v3758_v2  ;;  %4028 = vmatpush.msrb.mxu3 %v2631_v19  ;;  %4390 = vmatpush.msrb.mxu1 %v2540_v39  ;;  %v2439_v2 = vld [vmem:[#allocation7 + $0x1d0] sm:$0xff]  ;;  %v2625_v39 = vld [vmem:[#allocation7 + $0x7a0] sm:$0xff] }
 0x3cf   :  { %v3402_v35 = vpop.f32.mrf.mxu2  ;;  %v3437_v0 = vpop.f32.mrf.mxu3  ;;  %3994 = vmatpush.msrb.mxu2 %v2495_v11  ;;  %4350 = vmatpush.msrb.mxu0 %v2452_v4  ;;  %v2567_v40 = vld [vmem:[#allocation7 + $0x5d0] sm:$0xff]  ;;  %v2388_v11 = vld [vmem:[#allocation7 + $0x38] sm:$0xff] }
 0x3d0   :  { %3828 = vst [vmem:[#allocation13 + $0x1f8] sm:$0xff] %v3794_v10  ;;  %v3438_v22 = vadd.f32 %v3437_v0, %v3402_v35  ;;  %4219 = vmatmul.f32.vlgmr.msra.gmra.mxu0 %v7864_v48  ;;  %4254 = vmatmul.f32.vlgmr.msra.gmra.mxu1 %v7874_v31  ;;  %v2396_v35 = vld [vmem:[#allocation7 + $0x78] sm:$0xff]  ;;  %v2431_v19 = vld [vmem:[#allocation7 + $0x190] sm:$0xff] }
 0x3d1   :  { %4029 = vmatpush.msrb.mxu3 %v2623_v20  ;;  %3995 = vmatpush.msrb.mxu2 %v2487_v32  ;;  %v2524_v0 = vld [vmem:[#allocation7 + $0x478] sm:$0xff]  ;;  %v2559_v41 = vld [vmem:[#allocation7 + $0x590] sm:$0xff] }
 0x3d2   :  { %3807 = vst [vmem:[#allocation13 + $0x50] sm:$0xff] %v3438_v22  ;;  %4351 = vmatpush.msrb.mxu0 %v2444_v43  ;;  %4391 = vmatpush.msrb.mxu1 %v2532_v17  ;;  %v2516_v20 = vld [vmem:[#allocation7 + $0x438] sm:$0xff]  ;;  %v2423_v4 = vld [vmem:[#allocation7 + $0x150] sm:$0xff]  ;;  %v2609_v17 = vld [vmem:[#allocation7 + $0x720] sm:$0xff] }
 0x3d3   :  { %4030 = vmatpush.msrb.mxu3 %v2615_v55  ;;  %3996 = vmatpush.msrb.mxu2 %v2479_v7  ;;  %v2415_v32 = vld [vmem:[#allocation7 + $0x110] sm:$0xff] }
 0x3d4   :  { %3696 = vmatmul.f32.gmra.mxu2 %v8187_v12  ;;  %3731 = vmatmul.f32.gmra.mxu3 %v8189_v6  ;;  %v2436_v6 = vld [vmem:[#allocation7 + $0x1b8] sm:$0xff]  ;;  %v2543_v55 = vld [vmem:[#allocation7 + $0x510] sm:$0xff] }
 0x3d5   :  { %v3761_v46 = vpop.f32.mrf.mxu0  ;;  %v3796_v50 = vpop.f32.mrf.mxu1  ;;  %4031 = vmatpush.msrb.mxu3 %v2607_v14  ;;  %4352 = vmatpush.msrb.mxu0 %v2436_v6  ;;  %v2407_v43 = vld [vmem:[#allocation7 + $0xd0] sm:$0xff] }
 0x3d6   :  { %v3797_v42 = vadd.f32 %v3796_v50, %v3761_v46  ;;  %3997 = vmatpush.msrb.mxu2 %v2471_v44  ;;  %4392 = vmatpush.msrb.mxu1 %v2524_v0  ;;  %v2399_v14 = vld [vmem:[#allocation7 + $0x90] sm:$0xff]  ;;  %v2473_v0 = vld [vmem:[#allocation7 + $0x2e0] sm:$0xff] }
 0x3d7   :  { %v3405_v54 = vpop.f32.mrf.mxu2  ;;  %v3440_v1 = vpop.f32.mrf.mxu3  ;;  %4032 = vmatpush.msrb.mxu3 %v2599_v63  ;;  %4353 = vmatpush.msrb.mxu0 %v2428_v51  ;;  %v2391_v6 = vld [vmem:[#allocation7 + $0x50] sm:$0xff] }
 0x3d8   :  { %3836 = vst [vmem:[#allocation13 + $0x2b8] sm:$0xff] %v3797_v42  ;;  %v3441_v12 = vadd.f32 %v3440_v1, %v3405_v54  ;;  %4222 = vmatmul.f32.gmra.mxu0 %v7925_v3  ;;  %4257 = vmatmul.f32.gmra.mxu1 %v7932_v61  ;;  %v2383_v44 = vld [vmem:[#allocation7 + $0x10] sm:$0xff] }
 0x3d9   :  { %3998 = vmatpush.msrb.mxu2 %v2463_v15  ;;  %4033 = vmatpush.msrb.mxu3 %v2591_v52  ;;  %v2511_v63 = vld [vmem:[#allocation7 + $0x410] sm:$0xff] }
 0x3da   :  { %3815 = vst [vmem:[#allocation13 + $0x110] sm:$0xff] %v3441_v12  ;;  %4354 = vmatpush.msrb.mxu0 %v2420_v27  ;;  %4393 = vmatpush.msrb.mxu1 %v2516_v20  ;;  %v2527_v12 = vld [vmem:[#allocation7 + $0x490] sm:$0xff]  ;;  %v2577_v20 = vld [vmem:[#allocation7 + $0x620] sm:$0xff] }
 0x3db   :  { %3999 = vmatpush.msrb.mxu2 %v2455_v24  ;;  %4034 = vmatpush.msrb.mxu3 %v2583_v23  ;;  %v2505_v23 = vld [vmem:[#allocation7 + $0x3e0] sm:$0xff] }
 0x3dc   :  { %3869 = vmatmul.f32.vlgmr.msra.gmra.mxu2 %v7864_v48  ;;  %3904 = vmatmul.f32.vlgmr.msra.gmra.mxu3 %v7874_v31 }
 0x3dd   :  { %v3764_v18 = vpop.f32.mrf.mxu0  ;;  %v3799_v47 = vpop.f32.mrf.mxu1  ;;  %4355 = vmatpush.msrb.mxu0 %v2412_v37  ;;  %4000 = vmatpush.msrb.mxu2 %v2447_v56  ;;  %v2497_v37 = vld [vmem:[#allocation7 + $0x3a0] sm:$0xff] }
 0x3de   :  { %v3800_v5 = vadd.f32 %v3799_v47, %v3764_v18  ;;  %4035 = vmatpush.msrb.mxu3 %v2575_v16  ;;  %v2489_v56 = vld [vmem:[#allocation7 + $0x360] sm:$0xff] }
 0x3df   :  { %v3408_v53 = vpop.f32.mrf.mxu2  ;;  %v3443_v21 = vpop.f32.mrf.mxu3  ;;  %4356 = vmatpush.msrb.mxu0 %v2404_v33  ;;  %4001 = vmatpush.msrb.mxu2 %v2439_v2  ;;  %v2617_v16 = vld [vmem:[#allocation7 + $0x760] sm:$0xff] }
 0x3e0   :  { %3844 = vst [vmem:[#allocation13 + $0x378] sm:$0xff] %v3800_v5  ;;  %v3444_v30 = vadd.f32 %v3443_v21, %v3408_v53  ;;  %4225 = vmatmul.f32.gmra.mxu0 %v7977_v38  ;;  %4260 = vmatmul.f32.gmra.mxu1 %v7983_v28  ;;  %v2481_v33 = vld [vmem:[#allocation7 + $0x320] sm:$0xff] }
 0x3e1   :  { %4036 = vmatpush.msrb.mxu3 %v2567_v40  ;;  %4357 = vmatpush.msrb.mxu0 %v2396_v35 }
 0x3e2   :  { %3823 = vst [vmem:[#allocation13 + $0x1d0] sm:$0xff] %v3444_v30  ;;  %4002 = vmatpush.msrb.mxu2 %v2431_v19  ;;  %v2633_v30 = vld [vmem:[#allocation7 + $0x7e0] sm:$0xff] }
 0x3e3   :  { %4037 = vmatpush.msrb.mxu3 %v2559_v41  ;;  %4358 = vmatpush.msrb.mxu0 %v2388_v11  ;;  %v2593_v19 = vld [vmem:[#allocation7 + $0x6a0] sm:$0xff] }
 0x3e4   :  { %3872 = vmatmul.f32.gmra.mxu2 %v7925_v3  ;;  %3907 = vmatmul.f32.gmra.mxu3 %v7932_v61  ;;  %v2457_v41 = vld [vmem:[#allocation7 + $0x260] sm:$0xff] }
 0x3e5   :  { %v3767_v10 = vpop.f32.mrf.mxu0  ;;  %v3802_v59 = vpop.f32.mrf.mxu1  ;;  %4003 = vmatpush.msrb.mxu2 %v2423_v4  ;;  %4038 = vmatpush.msrb.mxu3 %v2551_v13  ;;  %v2449_v11 = vld [vmem:[#allocation7 + $0x220] sm:$0xff] }
 0x3e6   :  { %v3803_v45 = vadd.f32 %v3802_v59, %v3767_v10 }
 0x3e7   :  { %v3411_v22 = vpop.f32.mrf.mxu2  ;;  %v3446_v25 = vpop.f32.mrf.mxu3  ;;  %4004 = vmatpush.msrb.mxu2 %v2415_v32  ;;  %4039 = vmatpush.msrb.mxu3 %v2543_v55 }
 0x3e8   :  { %3852 = vst [vmem:[#allocation13 + $0x438] sm:$0xff] %v3803_v45  ;;  %v3447_v9 = vadd.f32 %v3446_v25, %v3411_v22  ;;  %4228 = vmatmul.f32.gmra.mxu0 %v8955_v49  ;;  %4263 = vmatmul.f32.gmra.mxu1 %v8956_v26  ;;  %v2601_v22 = vld [vmem:[#allocation7 + $0x6e0] sm:$0xff] }
 0x3e9   :  { %4005 = vmatpush.msrb.mxu2 %v2407_v43  ;;  %4040 = vmatpush.msrb.mxu3 %v2535_v36  ;;  %v2465_v25 = vld [vmem:[#allocation7 + $0x2a0] sm:$0xff] }
 0x3ea   :  { %3831 = vst [vmem:[#allocation13 + $0x290] sm:$0xff] %v3447_v9  ;;  %v2585_v9 = vld [vmem:[#allocation7 + $0x660] sm:$0xff] }
 0x3eb   :  { %4006 = vmatpush.msrb.mxu2 %v2399_v14  ;;  %4041 = vmatpush.msrb.mxu3 %v2527_v12  ;;  %v2569_v43 = vld [vmem:[#allocation7 + $0x5e0] sm:$0xff] }
 0x3ec   :  { %3875 = vmatmul.f32.gmra.mxu2 %v7977_v38  ;;  %3910 = vmatmul.f32.gmra.mxu3 %v7983_v28  ;;  %v2433_v36 = vld [vmem:[#allocation7 + $0x1a0] sm:$0xff] }
 0x3ed   :  { %v3940_v46 = vpop.f32.mrf.mxu0  ;;  %v3975_v50 = vpop.f32.mrf.mxu1  ;;  %4007 = vmatpush.msrb.mxu2 %v2391_v6  ;;  %4042 = vmatpush.msrb.mxu3 %v2519_v60  ;;  %v2417_v14 = vld [vmem:[#allocation7 + $0x120] sm:$0xff] }
 0x3ee   :  { %v3976_v42 = vadd.f32 %v3975_v50, %v3940_v46  ;;  %v2545_v12 = vld [vmem:[#allocation7 + $0x520] sm:$0xff] }
 0x3ef   :  { %v3414_v54 = vpop.f32.mrf.mxu2  ;;  %v3449_v1 = vpop.f32.mrf.mxu3  ;;  %4008 = vmatpush.msrb.mxu2 %v2383_v44  ;;  %4043 = vmatpush.msrb.mxu3 %v2511_v63 }
 0x3f0   :  { %4414 = vst [vmem:[#allocation13 + $0x88] sm:$0xff] %v3976_v42  ;;  %v3450_v7 = vadd.f32 %v3449_v1, %v3414_v54  ;;  %4231 = vmatmul.f32.gmra.mxu0 %v8957_v8  ;;  %4266 = vmatmul.f32.gmra.mxu1 %v8958_v58  ;;  %v2441_v42 = vld [vmem:[#allocation7 + $0x1e0] sm:$0xff] }
 0x3f1   :  { %4133 = vmatpush.msra.mxu2 %v2505_v23  ;;  %4168 = vmatpush.msra.mxu3 %v2633_v30  ;;  %v2561_v54 = vld [vmem:[#allocation7 + $0x5a0] sm:$0xff] }
 0x3f2   :  { %3839 = vst [vmem:[#allocation13 + $0x350] sm:$0xff] %v3450_v7  ;;  %v2425_v1 = vld [vmem:[#allocation7 + $0x160] sm:$0xff] }
 0x3f3   :  { %4134 = vmatpush.msra.mxu2 %v2497_v37  ;;  %4169 = vmatpush.msra.mxu3 %v2625_v39  ;;  %v2553_v7 = vld [vmem:[#allocation7 + $0x560] sm:$0xff] }
 0x3f4   :  { %3878 = vmatmul.f32.gmra.mxu2 %v8955_v49  ;;  %3913 = vmatmul.f32.gmra.mxu3 %v8956_v26 }
 0x3f5   :  { %v3943_v51 = vpop.f32.mrf.mxu0  ;;  %v3978_v62 = vpop.f32.mrf.mxu1  ;;  %4135 = vmatpush.msra.mxu2 %v2489_v56  ;;  %4170 = vmatpush.msra.mxu3 %v2617_v16 }
 0x3f6   :  { %v3979_v15 = vadd.f32 %v3978_v62, %v3943_v51 }
 0x3f7   :  { %v3417_v52 = vpop.f32.mrf.mxu2  ;;  %v3452_v18 = vpop.f32.mrf.mxu3  ;;  %4136 = vmatpush.msra.mxu2 %v2481_v33  ;;  %4171 = vmatpush.msra.mxu3 %v2609_v17 }
 0x3f8   :  { %4422 = vst [vmem:[#allocation13 + $0x148] sm:$0xff] %v3979_v15  ;;  %v3453_v47 = vadd.f32 %v3452_v18, %v3417_v52  ;;  %4234 = vmatmul.f32.gmra.mxu0 %v8959_v29  ;;  %4269 = vmatmul.f32.gmra.mxu1 %v8960_v57  ;;  %v2409_v15 = vld [vmem:[#allocation7 + $0xe0] sm:$0xff] }
 0x3f9   :  { %4137 = vmatpush.msra.mxu2 %v2473_v0  ;;  %4172 = vmatpush.msra.mxu3 %v2601_v22  ;;  %v2537_v52 = vld [vmem:[#allocation7 + $0x4e0] sm:$0xff] }
 0x3fa   :  { %3847 = vst [vmem:[#allocation13 + $0x410] sm:$0xff] %v3453_v47  ;;  %v2401_v18 = vld [vmem:[#allocation7 + $0xa0] sm:$0xff] }
 0x3fb   :  { %4138 = vmatpush.msra.mxu2 %v2465_v25  ;;  %4173 = vmatpush.msra.mxu3 %v2593_v19  ;;  %v2529_v47 = vld [vmem:[#allocation7 + $0x4a0] sm:$0xff]  ;;  %v2507_v25 = vld [vmem:[#allocation7 + $0x3f0] sm:$0xff] }
 0x3fc   :  { %3881 = vmatmul.f32.gmra.mxu2 %v8957_v8  ;;  %3916 = vmatmul.f32.gmra.mxu3 %v8958_v58  ;;  %v2635_v19 = vld [vmem:[#allocation7 + $0x7f0] sm:$0xff] }
 0x3fd   :  { %v3946_v5 = vpop.f32.mrf.mxu0  ;;  %v3981_v27 = vpop.f32.mrf.mxu1  ;;  %4139 = vmatpush.msra.mxu2 %v2457_v41  ;;  %4174 = vmatpush.msra.mxu3 %v2585_v9  ;;  %v2499_v41 = vld [vmem:[#allocation7 + $0x3b0] sm:$0xff] }
 0x3fe   :  { %v3982_v34 = vadd.f32 %v3981_v27, %v3946_v5  ;;  %v2393_v5 = vld [vmem:[#allocation7 + $0x60] sm:$0xff]  ;;  %v2627_v9 = vld [vmem:[#allocation7 + $0x7b0] sm:$0xff] }
 0x3ff   :  { %v3542_v53 = vpop.f32.mrf.mxu2  ;;  %v3577_v21 = vpop.f32.mrf.mxu3  ;;  %4140 = vmatpush.msra.mxu2 %v2449_v11  ;;  %4175 = vmatpush.msra.mxu3 %v2577_v20  ;;  %v2521_v27 = vld [vmem:[#allocation7 + $0x460] sm:$0xff]  ;;  %v2491_v11 = vld [vmem:[#allocation7 + $0x370] sm:$0xff] }
 0x400   :  { %4430 = vst [vmem:[#allocation13 + $0x208] sm:$0xff] %v3982_v34  ;;  %v3578_v24 = vadd.f32 %v3577_v21, %v3542_v53  ;;  %4359 = vmatmul.f32.vlgmr.msrb.gmra.mxu0 %v7864_v48  ;;  %4394 = vmatmul.f32.vlgmr.msrb.gmra.mxu1 %v7874_v31  ;;  %v2385_v34 = vld [vmem:[#allocation7 + $0x20] sm:$0xff]  ;;  %v2619_v20 = vld [vmem:[#allocation7 + $0x770] sm:$0xff] }
 0x401   :  { %4141 = vmatpush.msra.mxu2 %v2441_v42  ;;  %4176 = vmatpush.msra.mxu3 %v2569_v43  ;;  %v2513_v53 = vld [vmem:[#allocation7 + $0x420] sm:$0xff] }
 0x402   :  { %3809 = vst [vmem:[#allocation13 + $0x60] sm:$0xff] %v3578_v24 }
 0x403   :  { %4142 = vmatpush.msra.mxu2 %v2433_v36  ;;  %4177 = vmatpush.msra.mxu3 %v2561_v54  ;;  %v2475_v36 = vld [vmem:[#allocation7 + $0x2f0] sm:$0xff] }
 0x404   :  { %3884 = vmatmul.f32.gmra.mxu2 %v8959_v29  ;;  %3919 = vmatmul.f32.gmra.mxu3 %v8960_v57  ;;  %v2603_v54 = vld [vmem:[#allocation7 + $0x6f0] sm:$0xff] }
 0x405   :  { %v3949_v2 = vpop.f32.mrf.mxu0  ;;  %v3984_v40 = vpop.f32.mrf.mxu1  ;;  %4143 = vmatpush.msra.mxu2 %v2425_v1  ;;  %4178 = vmatpush.msra.mxu3 %v2553_v7  ;;  %v2467_v1 = vld [vmem:[#allocation7 + $0x2b0] sm:$0xff] }
 0x406   :  { %v3985_v10 = vadd.f32 %v3984_v40, %v3949_v2  ;;  %v2595_v7 = vld [vmem:[#allocation7 + $0x6b0] sm:$0xff] }
 0x407   :  { %v3545_v59 = vpop.f32.mrf.mxu2  ;;  %v3580_v45 = vpop.f32.mrf.mxu3  ;;  %4144 = vmatpush.msra.mxu2 %v2417_v14  ;;  %4179 = vmatpush.msra.mxu3 %v2545_v12  ;;  %v2459_v14 = vld [vmem:[#allocation7 + $0x270] sm:$0xff] }
 0x408   :  { %4438 = vst [vmem:[#allocation13 + $0x2c8] sm:$0xff] %v3985_v10  ;;  %v3581_v35 = vadd.f32 %v3580_v45, %v3545_v59  ;;  %4362 = vmatmul.f32.gmra.mxu0 %v7925_v3  ;;  %4397 = vmatmul.f32.gmra.mxu1 %v7932_v61  ;;  %v2587_v12 = vld [vmem:[#allocation7 + $0x670] sm:$0xff] }
 0x409   :  { %4145 = vmatpush.msra.mxu2 %v2409_v15  ;;  %4180 = vmatpush.msra.mxu3 %v2537_v52 }
 0x40a   :  { %3817 = vst [vmem:[#allocation13 + $0x120] sm:$0xff] %v3581_v35 }
 0x40b   :  { %4146 = vmatpush.msra.mxu2 %v2401_v18  ;;  %4181 = vmatpush.msra.mxu3 %v2529_v47  ;;  %v2443_v18 = vld [vmem:[#allocation7 + $0x1f0] sm:$0xff] }
 0x40c   :  { %4009 = vmatmul.f32.vlgmr.msrb.gmra.mxu2 %v7864_v48  ;;  %4044 = vmatmul.f32.vlgmr.msrb.gmra.mxu3 %v7874_v31  ;;  %v2571_v47 = vld [vmem:[#allocation7 + $0x5f0] sm:$0xff] }
 0x40d   :  { %v3952_v4 = vpop.f32.mrf.mxu0  ;;  %v3987_v13 = vpop.f32.mrf.mxu1  ;;  %4147 = vmatpush.msra.mxu2 %v2393_v5  ;;  %4182 = vmatpush.msra.mxu3 %v2521_v27  ;;  %v2435_v5 = vld [vmem:[#allocation7 + $0x1b0] sm:$0xff] }
 0x40e   :  { %v3988_v32 = vadd.f32 %v3987_v13, %v3952_v4  ;;  %v2483_v4 = vld [vmem:[#allocation7 + $0x330] sm:$0xff] }
 0x40f   :  { %v3548_v55 = vpop.f32.mrf.mxu2  ;;  %v3583_v46 = vpop.f32.mrf.mxu3  ;;  %4148 = vmatpush.msra.mxu2 %v2385_v34  ;;  %4183 = vmatpush.msra.mxu3 %v2513_v53  ;;  %v2611_v13 = vld [vmem:[#allocation7 + $0x730] sm:$0xff] }
 0x410   :  { %4446 = vst [vmem:[#allocation13 + $0x388] sm:$0xff] %v3988_v32  ;;  %v3584_v50 = vadd.f32 %v3583_v46, %v3548_v55  ;;  %4365 = vmatmul.f32.gmra.mxu0 %v7977_v38  ;;  %4400 = vmatmul.f32.gmra.mxu1 %v7983_v28  ;;  %v2563_v27 = vld [vmem:[#allocation7 + $0x5b0] sm:$0xff] }
 0x411   :  { %4273 = vmatpush.msrb.mxu2 %v2507_v25  ;;  %4308 = vmatpush.msrb.mxu3 %v2635_v19  ;;  %v2427_v34 = vld [vmem:[#allocation7 + $0x170] sm:$0xff] }
 0x412   :  { %3825 = vst [vmem:[#allocation13 + $0x1e0] sm:$0xff] %v3584_v50  ;;  %v2555_v53 = vld [vmem:[#allocation7 + $0x570] sm:$0xff] }
 0x413   :  { %4274 = vmatpush.msrb.mxu2 %v2499_v41  ;;  %4309 = vmatpush.msrb.mxu3 %v2627_v9 }
 0x414   :  { %4012 = vmatmul.f32.gmra.mxu2 %v7925_v3  ;;  %4047 = vmatmul.f32.gmra.mxu3 %v7932_v61 }
 0x415   :  { %v3955_v6 = vpop.f32.mrf.mxu0  ;;  %v3990_v60 = vpop.f32.mrf.mxu1  ;;  %4275 = vmatpush.msrb.mxu2 %v2491_v11  ;;  %4310 = vmatpush.msrb.mxu3 %v2619_v20 }
 0x416   :  { %v3991_v44 = vadd.f32 %v3990_v60, %v3955_v6  ;;  %v2451_v6 = vld [vmem:[#allocation7 + $0x230] sm:$0xff] }
 0x417   :  { %v3551_v63 = vpop.f32.mrf.mxu2  ;;  %v3586_v51 = vpop.f32.mrf.mxu3  ;;  %4276 = vmatpush.msrb.mxu2 %v2483_v4  ;;  %4311 = vmatpush.msrb.mxu3 %v2611_v13  ;;  %v2579_v60 = vld [vmem:[#allocation7 + $0x630] sm:$0xff] }
 0x418   :  { %4454 = vst [vmem:[#allocation13 + $0x448] sm:$0xff] %v3991_v44  ;;  %v3587_v62 = vadd.f32 %v3586_v51, %v3551_v63  ;;  %4368 = vmatmul.f32.gmra.mxu0 %v8955_v49  ;;  %4403 = vmatmul.f32.gmra.mxu1 %v8956_v26 }
 0x419   :  { %4277 = vmatpush.msrb.mxu2 %v2475_v36  ;;  %4312 = vmatpush.msrb.mxu3 %v2603_v54 }
 0x41a   :  { %3833 = vst [vmem:[#allocation13 + $0x2a0] sm:$0xff] %v3587_v62 }
 0x41b   :  { %4278 = vmatpush.msrb.mxu2 %v2467_v1  ;;  %4313 = vmatpush.msrb.mxu3 %v2595_v7 }
 0x41c   :  { %4015 = vmatmul.f32.gmra.mxu2 %v7977_v38  ;;  %4050 = vmatmul.f32.gmra.mxu3 %v7983_v28 }
 0x41d   :  { %v4080_v21 = vpop.f32.mrf.mxu0  ;;  %v4115_v24 = vpop.f32.mrf.mxu1  ;;  %4279 = vmatpush.msrb.mxu2 %v2459_v14  ;;  %4314 = vmatpush.msrb.mxu3 %v2587_v12 }
 0x41e   :  { %v4116_v23 = vadd.f32 %v4115_v24, %v4080_v21  ;;  %v2419_v21 = vld [vmem:[#allocation7 + $0x130] sm:$0xff] }
 0x41f   :  { %v3554_v30 = vpop.f32.mrf.mxu2  ;;  %v3589_v37 = vpop.f32.mrf.mxu3  ;;  %4280 = vmatpush.msrb.mxu2 %v2451_v6  ;;  %4315 = vmatpush.msrb.mxu3 %v2579_v60  ;;  %v2547_v24 = vld [vmem:[#allocation7 + $0x530] sm:$0xff] }
 0x420   :  { %4416 = vst [vmem:[#allocation13 + $0x98] sm:$0xff] %v4116_v23  ;;  %v3590_v39 = vadd.f32 %v3589_v37, %v3554_v30  ;;  %4371 = vmatmul.f32.gmra.mxu0 %v8957_v8  ;;  %4406 = vmatmul.f32.gmra.mxu1 %v8958_v58 }
 0x421   :  { %4281 = vmatpush.msrb.mxu2 %v2443_v18  ;;  %4316 = vmatpush.msrb.mxu3 %v2571_v47 }
 0x422   :  { %3841 = vst [vmem:[#allocation13 + $0x360] sm:$0xff] %v3590_v39 }
 0x423   :  { %4282 = vmatpush.msrb.mxu2 %v2435_v5  ;;  %4317 = vmatpush.msrb.mxu3 %v2563_v27 }
 0x424   :  { %4018 = vmatmul.f32.gmra.mxu2 %v8955_v49  ;;  %4053 = vmatmul.f32.gmra.mxu3 %v8956_v26 }
 0x425   :  { %v4083_v56 = vpop.f32.mrf.mxu0  ;;  %v4118_v16 = vpop.f32.mrf.mxu1  ;;  %4283 = vmatpush.msrb.mxu2 %v2427_v34  ;;  %4318 = vmatpush.msrb.mxu3 %v2555_v53 }
 0x426   :  { %v4119_v33 = vadd.f32 %v4118_v16, %v4083_v56 }
 0x427   :  { %v3557_v17 = vpop.f32.mrf.mxu2  ;;  %v3592_v2 = vpop.f32.mrf.mxu3  ;;  %4284 = vmatpush.msrb.mxu2 %v2419_v21  ;;  %4319 = vmatpush.msrb.mxu3 %v2547_v24 }
 0x428   :  { %4424 = vst [vmem:[#allocation13 + $0x158] sm:$0xff] %v4119_v33  ;;  %v3593_v40 = vadd.f32 %v3592_v2, %v3557_v17  ;;  %4374 = vmatmul.f32.gmra.mxu0 %v8959_v29  ;;  %4409 = vmatmul.f32.gmra.mxu1 %v8960_v57  ;;  %v2411_v33 = vld [vmem:[#allocation7 + $0xf0] sm:$0xff] }
 0x429   :  { %v2539_v17 = vld [vmem:[#allocation7 + $0x4f0] sm:$0xff]  ;;  %4285 = vmatpush.msrb.mxu2 %v2411_v33 }
 0x42a   :  { %3849 = vst [vmem:[#allocation13 + $0x420] sm:$0xff] %v3593_v40  ;;  %4320 = vmatpush.msrb.mxu3 %v2539_v17  ;;  %v2403_v2 = vld [vmem:[#allocation7 + $0xb0] sm:$0xff] }
 0x42b   :  { %v2531_v40 = vld [vmem:[#allocation7 + $0x4b0] sm:$0xff]  ;;  %4286 = vmatpush.msrb.mxu2 %v2403_v2 }
 0x42c   :  { %4021 = vmatmul.f32.gmra.mxu2 %v8957_v8  ;;  %4056 = vmatmul.f32.gmra.mxu3 %v8958_v58 }
 0x42d   :  { %v4086_v10 = vpop.f32.mrf.mxu0  ;;  %v4121_v59 = vpop.f32.mrf.mxu1  ;;  %4321 = vmatpush.msrb.mxu3 %v2531_v40 }
 0x42e   :  { %v4122_v45 = vadd.f32 %v4121_v59, %v4086_v10  ;;  %v2395_v10 = vld [vmem:[#allocation7 + $0x70] sm:$0xff] }
 0x42f   :  { %v3682_v35 = vpop.f32.mrf.mxu2  ;;  %v3717_v0 = vpop.f32.mrf.mxu3  ;;  %v2523_v59 = vld [vmem:[#allocation7 + $0x470] sm:$0xff]  ;;  %4287 = vmatpush.msrb.mxu2 %v2395_v10 }
 0x430   :  { %4432 = vst [vmem:[#allocation13 + $0x218] sm:$0xff] %v4122_v45  ;;  %v3718_v22 = vadd.f32 %v3717_v0, %v3682_v35  ;;  %v2387_v45 = vld [vmem:[#allocation7 + $0x30] sm:$0xff]  ;;  %4322 = vmatpush.msrb.mxu3 %v2523_v59 }
 0x431   :  { %v2515_v35 = vld [vmem:[#allocation7 + $0x430] sm:$0xff]  ;;  %4288 = vmatpush.msrb.mxu2 %v2387_v45 }
 0x432   :  { %3811 = vst [vmem:[#allocation13 + $0x70] sm:$0xff] %v3718_v22  ;;  %4323 = vmatpush.msrb.mxu3 %v2515_v35 }
 0x434   :  { %4024 = vmatmul.f32.gmra.mxu2 %v8959_v29  ;;  %4059 = vmatmul.f32.gmra.mxu3 %v8960_v57 }
 0x435   :  { %v4089_v32 = vpop.f32.mrf.mxu0  ;;  %v4124_v55 = vpop.f32.mrf.mxu1 }
 0x436   :  { %v4125_v46 = vadd.f32 %v4124_v55, %v4089_v32 }
 0x437   :  { %v3685_v50 = vpop.f32.mrf.mxu2  ;;  %v3720_v42 = vpop.f32.mrf.mxu3 }
 0x438   :  { %4440 = vst [vmem:[#allocation13 + $0x2d8] sm:$0xff] %v4125_v46  ;;  %v3721_v43 = vadd.f32 %v3720_v42, %v3685_v50 }
 0x43a   :  { %3819 = vst [vmem:[#allocation13 + $0x130] sm:$0xff] %v3721_v43 }
 0x43c   :  { %4149 = vmatmul.f32.vlgmr.msra.gmra.mxu2 %v7864_v48  ;;  %4184 = vmatmul.f32.vlgmr.msra.gmra.mxu3 %v7874_v31 }
 0x43d   :  { %v4092_v44 = vpop.f32.mrf.mxu0  ;;  %v4127_v63 = vpop.f32.mrf.mxu1 }
 0x43e   :  { %v4128_v51 = vadd.f32 %v4127_v63, %v4092_v44 }
 0x43f   :  { %v3688_v62 = vpop.f32.mrf.mxu2  ;;  %v3723_v15 = vpop.f32.mrf.mxu3 }
 0x440   :  { %4448 = vst [vmem:[#allocation13 + $0x398] sm:$0xff] %v4128_v51  ;;  %v3724_v52 = vadd.f32 %v3723_v15, %v3688_v62 }
 0x442   :  { %3827 = vst [vmem:[#allocation13 + $0x1f0] sm:$0xff] %v3724_v52 }
 0x444   :  { %4152 = vmatmul.f32.gmra.mxu2 %v7925_v3  ;;  %4187 = vmatmul.f32.gmra.mxu3 %v7932_v61 }
 0x445   :  { %v4095_v23 = vpop.f32.mrf.mxu0  ;;  %v4130_v30 = vpop.f32.mrf.mxu1 }
 0x446   :  { %v4131_v37 = vadd.f32 %v4130_v30, %v4095_v23 }
 0x447   :  { %v3691_v39 = vpop.f32.mrf.mxu2  ;;  %v3726_v56 = vpop.f32.mrf.mxu3 }
 0x448   :  { %4456 = vst [vmem:[#allocation13 + $0x458] sm:$0xff] %v4131_v37  ;;  %v3727_v16 = vadd.f32 %v3726_v56, %v3691_v39 }
 0x44a   :  { %3835 = vst [vmem:[#allocation13 + $0x2b0] sm:$0xff] %v3727_v16 }
 0x44c   :  { %4155 = vmatmul.f32.gmra.mxu2 %v7977_v38  ;;  %4190 = vmatmul.f32.gmra.mxu3 %v7983_v28 }
 0x44d   :  { %v4220_v0 = vpop.f32.mrf.mxu0  ;;  %v4255_v22 = vpop.f32.mrf.mxu1 }
 0x44e   :  { %v4256_v25 = vadd.f32 %v4255_v22, %v4220_v0 }
 0x44f   :  { %v3694_v19 = vpop.f32.mrf.mxu2  ;;  %v3729_v41 = vpop.f32.mrf.mxu3 }
 0x450   :  { %4418 = vst [vmem:[#allocation13 + $0xa8] sm:$0xff] %v4256_v25  ;;  %v3730_v9 = vadd.f32 %v3729_v41, %v3694_v19 }
 0x452   :  { %3843 = vst [vmem:[#allocation13 + $0x370] sm:$0xff] %v3730_v9 }
 0x454   :  { %4158 = vmatmul.f32.gmra.mxu2 %v8955_v49  ;;  %4193 = vmatmul.f32.gmra.mxu3 %v8956_v26 }
 0x455   :  { %v4223_v11 = vpop.f32.mrf.mxu0  ;;  %v4258_v20 = vpop.f32.mrf.mxu1 }
 0x456   :  { %v4259_v4 = vadd.f32 %v4258_v20, %v4223_v11 }
 0x457   :  { %v3697_v13 = vpop.f32.mrf.mxu2  ;;  %v3732_v32 = vpop.f32.mrf.mxu3 }
 0x458   :  { %4426 = vst [vmem:[#allocation13 + $0x168] sm:$0xff] %v4259_v4  ;;  %v3733_v55 = vadd.f32 %v3732_v32, %v3697_v13 }
 0x45a   :  { %3851 = vst [vmem:[#allocation13 + $0x430] sm:$0xff] %v3733_v55 }
 0x45c   :  { %4161 = vmatmul.f32.gmra.mxu2 %v8957_v8  ;;  %4196 = vmatmul.f32.gmra.mxu3 %v8958_v58 }
 0x45d   :  { %v4226_v46 = vpop.f32.mrf.mxu0  ;;  %v4261_v50 = vpop.f32.mrf.mxu1 }
 0x45e   :  { %v4262_v42 = vadd.f32 %v4261_v50, %v4226_v46 }
 0x45f   :  { %v3870_v43 = vpop.f32.mrf.mxu2  ;;  %v3905_v36 = vpop.f32.mrf.mxu3 }
 0x460   :  { %4434 = vst [vmem:[#allocation13 + $0x228] sm:$0xff] %v4262_v42  ;;  %v3906_v54 = vadd.f32 %v3905_v36, %v3870_v43 }
 0x462   :  { %4413 = vst [vmem:[#allocation13 + $0x80] sm:$0xff] %v3906_v54 }
 0x464   :  { %4164 = vmatmul.f32.gmra.mxu2 %v8959_v29  ;;  %4199 = vmatmul.f32.gmra.mxu3 %v8960_v57 }
 0x465   :  { %v4229_v1 = vpop.f32.mrf.mxu0  ;;  %v4264_v7 = vpop.f32.mrf.mxu1 }
 0x466   :  { %v4265_v14 = vadd.f32 %v4264_v7, %v4229_v1 }
 0x467   :  { %v3873_v12 = vpop.f32.mrf.mxu2  ;;  %v3908_v6 = vpop.f32.mrf.mxu3 }
 0x468   :  { %4442 = vst [vmem:[#allocation13 + $0x2e8] sm:$0xff] %v4265_v14  ;;  %v3909_v60 = vadd.f32 %v3908_v6, %v3873_v12 }
 0x46a   :  { %4421 = vst [vmem:[#allocation13 + $0x140] sm:$0xff] %v3909_v60 }
 0x46c   :  { %4289 = vmatmul.f32.vlgmr.msrb.gmra.mxu2 %v7864_v48  ;;  %4324 = vmatmul.f32.vlgmr.msrb.gmra.mxu3 %v7874_v31 }
 0x46d   :  { %v4232_v44 = vpop.f32.mrf.mxu0  ;;  %v4267_v63 = vpop.f32.mrf.mxu1 }
 0x46e   :  { %v4268_v51 = vadd.f32 %v4267_v63, %v4232_v44 }
 0x46f   :  { %v3876_v62 = vpop.f32.mrf.mxu2  ;;  %v3911_v15 = vpop.f32.mrf.mxu3 }
 0x470   :  { %4450 = vst [vmem:[#allocation13 + $0x3a8] sm:$0xff] %v4268_v51  ;;  %v3912_v52 = vadd.f32 %v3911_v15, %v3876_v62 }
 0x472   :  { %4429 = vst [vmem:[#allocation13 + $0x200] sm:$0xff] %v3912_v52 }
 0x474   :  { %4292 = vmatmul.f32.gmra.mxu2 %v7925_v3  ;;  %4327 = vmatmul.f32.gmra.mxu3 %v7932_v61 }
 0x475   :  { %v4235_v18 = vpop.f32.mrf.mxu0  ;;  %v4270_v47 = vpop.f32.mrf.mxu1 }
 0x476   :  { %v4271_v5 = vadd.f32 %v4270_v47, %v4235_v18 }
 0x477   :  { %v3879_v27 = vpop.f32.mrf.mxu2  ;;  %v3914_v34 = vpop.f32.mrf.mxu3 }
 0x478   :  { %4458 = vst [vmem:[#allocation13 + $0x468] sm:$0xff] %v4271_v5  ;;  %v3915_v48 = vadd.f32 %v3914_v34, %v3879_v27 }
 0x47a   :  { %4437 = vst [vmem:[#allocation13 + $0x2c0] sm:$0xff] %v3915_v48 }
 0x47c   :  { %4295 = vmatmul.f32.gmra.mxu2 %v7977_v38  ;;  %4330 = vmatmul.f32.gmra.mxu3 %v7983_v28 }
 0x47d   :  { %v4360_v31 = vpop.f32.mrf.mxu0  ;;  %v4395_v53 = vpop.f32.mrf.mxu1 }
 0x47e   :  { %v4396_v21 = vadd.f32 %v4395_v53, %v4360_v31 }
 0x47f   :  { %v3882_v24 = vpop.f32.mrf.mxu2  ;;  %v3917_v23 = vpop.f32.mrf.mxu3 }
 0x480   :  { %4420 = vst [vmem:[#allocation13 + $0xb8] sm:$0xff] %v4396_v21  ;;  %v3918_v3 = vadd.f32 %v3917_v23, %v3882_v24 }
 0x482   :  { %4445 = vst [vmem:[#allocation13 + $0x380] sm:$0xff] %v3918_v3 }
 0x484   :  { %4298 = vmatmul.f32.gmra.mxu2 %v8955_v49  ;;  %4333 = vmatmul.f32.gmra.mxu3 %v8956_v26 }
 0x485   :  { %v4363_v61 = vpop.f32.mrf.mxu0  ;;  %v4398_v30 = vpop.f32.mrf.mxu1 }
 0x486   :  { %v4399_v37 = vadd.f32 %v4398_v30, %v4363_v61 }
 0x487   :  { %v3885_v39 = vpop.f32.mrf.mxu2  ;;  %v3920_v56 = vpop.f32.mrf.mxu3 }
 0x488   :  { %4428 = vst [vmem:[#allocation13 + $0x178] sm:$0xff] %v4399_v37  ;;  %v3921_v38 = vadd.f32 %v3920_v56, %v3885_v39 }
 0x48a   :  { %4453 = vst [vmem:[#allocation13 + $0x440] sm:$0xff] %v3921_v38 }
 0x48c   :  { %4301 = vmatmul.f32.gmra.mxu2 %v8957_v8  ;;  %4336 = vmatmul.f32.gmra.mxu3 %v8958_v58 }
 0x48d   :  { %v4366_v28 = vpop.f32.mrf.mxu0  ;;  %v4401_v16 = vpop.f32.mrf.mxu1 }
 0x48e   :  { %v4402_v33 = vadd.f32 %v4401_v16, %v4366_v28 }
 0x48f   :  { %v4010_v17 = vpop.f32.mrf.mxu2  ;;  %v4045_v2 = vpop.f32.mrf.mxu3 }
 0x490   :  { %4436 = vst [vmem:[#allocation13 + $0x238] sm:$0xff] %v4402_v33  ;;  %v4046_v49 = vadd.f32 %v4045_v2, %v4010_v17 }
 0x492   :  { %4415 = vst [vmem:[#allocation13 + $0x90] sm:$0xff] %v4046_v49 }
 0x494   :  { %4304 = vmatmul.f32.gmra.mxu2 %v8959_v29  ;;  %4339 = vmatmul.f32.gmra.mxu3 %v8960_v57 }
 0x495   :  { %v4369_v26 = vpop.f32.mrf.mxu0  ;;  %v4404_v40 = vpop.f32.mrf.mxu1 }
 0x496   :  { %v4405_v10 = vadd.f32 %v4404_v40, %v4369_v26 }
 0x497   :  { %v4013_v59 = vpop.f32.mrf.mxu2  ;;  %v4048_v45 = vpop.f32.mrf.mxu3 }
 0x498   :  { %4444 = vst [vmem:[#allocation13 + $0x2f8] sm:$0xff] %v4405_v10  ;;  %v4049_v8 = vadd.f32 %v4048_v45, %v4013_v59 }
 0x49a   :  { %4423 = vst [vmem:[#allocation13 + $0x150] sm:$0xff] %v4049_v8 }
 0x49d   :  { %v4372_v58 = vpop.f32.mrf.mxu0  ;;  %v4407_v35 = vpop.f32.mrf.mxu1 }
 0x49e   :  { %v4408_v0 = vadd.f32 %v4407_v35, %v4372_v58 }
 0x49f   :  { %v4016_v22 = vpop.f32.mrf.mxu2  ;;  %v4051_v25 = vpop.f32.mrf.mxu3 }
 0x4a0   :  { %4452 = vst [vmem:[#allocation13 + $0x3b8] sm:$0xff] %v4408_v0  ;;  %v4052_v19 = vadd.f32 %v4051_v25, %v4016_v22 }
 0x4a2   :  { %4431 = vst [vmem:[#allocation13 + $0x210] sm:$0xff] %v4052_v19 }
 0x4a5   :  { %v4375_v41 = vpop.f32.mrf.mxu0  ;;  %v4410_v29 = vpop.f32.mrf.mxu1 }
 0x4a6   :  { %v4411_v9 = vadd.f32 %v4410_v29, %v4375_v41 }
 0x4a7   :  { %v4019_v57 = vpop.f32.mrf.mxu2  ;;  %v4054_v11 = vpop.f32.mrf.mxu3 }
 0x4a8   :  { %4460 = vst [vmem:[#allocation13 + $0x478] sm:$0xff] %v4411_v9  ;;  %v4055_v20 = vadd.f32 %v4054_v11, %v4019_v57 }
 0x4aa   :  { %4439 = vst [vmem:[#allocation13 + $0x2d0] sm:$0xff] %v4055_v20 }
 0x4af   :  { %v4022_v4 = vpop.f32.mrf.mxu2  ;;  %v4057_v13 = vpop.f32.mrf.mxu3 }
 0x4b0   :  { %v4058_v32 = vadd.f32 %v4057_v13, %v4022_v4 }
 0x4b2   :  { %4447 = vst [vmem:[#allocation13 + $0x390] sm:$0xff] %v4058_v32 }
 0x4b7   :  { %v4025_v55 = vpop.f32.mrf.mxu2  ;;  %v4060_v46 = vpop.f32.mrf.mxu3 }
 0x4b8   :  { %v4061_v50 = vadd.f32 %v4060_v46, %v4025_v55 }
 0x4ba   :  { %4455 = vst [vmem:[#allocation13 + $0x450] sm:$0xff] %v4061_v50 }
 0x4bf   :  { %v4150_v42 = vpop.f32.mrf.mxu2  ;;  %v4185_v43 = vpop.f32.mrf.mxu3 }
 0x4c0   :  { %v4186_v36 = vadd.f32 %v4185_v43, %v4150_v42 }
 0x4c2   :  { %4417 = vst [vmem:[#allocation13 + $0xa0] sm:$0xff] %v4186_v36 }
 0x4c7   :  { %v4153_v54 = vpop.f32.mrf.mxu2  ;;  %v4188_v1 = vpop.f32.mrf.mxu3 }
 0x4c8   :  { %v4189_v7 = vadd.f32 %v4188_v1, %v4153_v54 }
 0x4ca   :  { %4425 = vst [vmem:[#allocation13 + $0x160] sm:$0xff] %v4189_v7 }
 0x4cf   :  { %v4156_v14 = vpop.f32.mrf.mxu2  ;;  %v4191_v12 = vpop.f32.mrf.mxu3 }
 0x4d0   :  { %v4192_v6 = vadd.f32 %v4191_v12, %v4156_v14 }
 0x4d2   :  { %4433 = vst [vmem:[#allocation13 + $0x220] sm:$0xff] %v4192_v6 }
 0x4d7   :  { %v4159_v60 = vpop.f32.mrf.mxu2  ;;  %v4194_v44 = vpop.f32.mrf.mxu3 }
 0x4d8   :  { %v4195_v63 = vadd.f32 %v4194_v44, %v4159_v60 }
 0x4da   :  { %4441 = vst [vmem:[#allocation13 + $0x2e0] sm:$0xff] %v4195_v63 }
 0x4df   :  { %v4162_v51 = vpop.f32.mrf.mxu2  ;;  %v4197_v62 = vpop.f32.mrf.mxu3 }
 0x4e0   :  { %v4198_v15 = vadd.f32 %v4197_v62, %v4162_v51 }
 0x4e2   :  { %4449 = vst [vmem:[#allocation13 + $0x3a0] sm:$0xff] %v4198_v15 }
 0x4e7   :  { %v4165_v52 = vpop.f32.mrf.mxu2  ;;  %v4200_v18 = vpop.f32.mrf.mxu3 }
 0x4e8   :  { %v4201_v47 = vadd.f32 %v4200_v18, %v4165_v52 }
 0x4ea   :  { %4457 = vst [vmem:[#allocation13 + $0x460] sm:$0xff] %v4201_v47 }
 0x4ef   :  { %v4290_v5 = vpop.f32.mrf.mxu2  ;;  %v4325_v27 = vpop.f32.mrf.mxu3 }
 0x4f0   :  { %v4326_v34 = vadd.f32 %v4325_v27, %v4290_v5 }
 0x4f2   :  { %4419 = vst [vmem:[#allocation13 + $0xb0] sm:$0xff] %v4326_v34 }
 0x4f7   :  { %v4293_v48 = vpop.f32.mrf.mxu2  ;;  %v4328_v31 = vpop.f32.mrf.mxu3 }
 0x4f8   :  { %v4329_v53 = vadd.f32 %v4328_v31, %v4293_v48 }
 0x4fa   :  { %4427 = vst [vmem:[#allocation13 + $0x170] sm:$0xff] %v4329_v53 }
 0x4ff   :  { %v4296_v21 = vpop.f32.mrf.mxu2  ;;  %v4331_v24 = vpop.f32.mrf.mxu3 }
 0x500   :  { %v4332_v23 = vadd.f32 %v4331_v24, %v4296_v21 }
 0x502   :  { %4435 = vst [vmem:[#allocation13 + $0x230] sm:$0xff] %v4332_v23 }
 0x507   :  { %v4299_v3 = vpop.f32.mrf.mxu2  ;;  %v4334_v61 = vpop.f32.mrf.mxu3 }
 0x508   :  { %v4335_v30 = vadd.f32 %v4334_v61, %v4299_v3 }
 0x50a   :  { %4443 = vst [vmem:[#allocation13 + $0x2f0] sm:$0xff] %v4335_v30 }
 0x50f   :  { %v4302_v37 = vpop.f32.mrf.mxu2  ;;  %v4337_v39 = vpop.f32.mrf.mxu3 }
 0x510   :  { %v4338_v56 = vadd.f32 %v4337_v39, %v4302_v37 }
 0x512   :  { %4451 = vst [vmem:[#allocation13 + $0x3b0] sm:$0xff] %v4338_v56 }
 0x517   :  { %v4305_v38 = vpop.f32.mrf.mxu2  ;;  %v4340_v28 = vpop.f32.mrf.mxu3 }
 0x518   :  { %v4341_v16 = vadd.f32 %v4340_v28, %v4305_v38 }
 0x51a   :  { %4459 = vst [vmem:[#allocation13 + $0x470] sm:$0xff] %v4341_v16 }
 0x51b   :  { %4473 = dma.vmem_to_hbm [thread:$0]  %s4466_s25, 18432, %s4468_s27, [#allocation5], %s5062_s28, %s5062_s28, %s5063_s29  }
 0x51c   :  { %5050 = dma.done.wait [#allocation5], 18432  }
 0x51d   :  { %5051 = vsyncadd [#allocation5], 4294948864 }
 0x51e   :  { %4478 = vsyncpa [#allocation4], 1 }
 0x51f   :  { %4479 = vsyncpa [#allocation8], 1 }
 0x520   :  { %4480 = vsyncpa [#allocation5], 1 }
 0x521   :  { %4481 = vsyncpa [#allocation6], 1 }
 0x522   :  { %4482 = vsyncpa [#allocation11], 1 }

</bundles_post_ra>
